<compile_context>
chip_gen: v7x
topology: tpu7x:2x2x1
jax: 0.10.0
libtpu: 0.0.40
codegen_flags: <defaults>
</compile_context>

<pallas_src>
import functools

import jax
import jax.numpy as jnp
from jax import lax
from jax.experimental import pallas as pl
from jax.experimental.pallas import tpu as pltpu

BN_EPS = 1e-5


# ----------------------------------------------------------------------------
# Fused ResnetBlock kernel (one batch block per grid step).
# ----------------------------------------------------------------------------
def _resnet_block_kernel(x_ref, w1_ref, s1_ref, b1_ref, w2_ref, s2_ref, b2_ref,
                         o_ref, xp_ref, acc_ref, *, NB, H, W, C):
    # x_ref : (NB, H, W, C) f32        w*_ref : (9*C, C) bf16 (raw conv weights)
    # s*_ref/b*_ref : (1, C) f32        o_ref : (NB, H, W, C) f32
    # xp_ref: (NB, H+2, W+2, C) bf16 padded scratch (reused for both convs)
    # acc_ref: (NB*H*W, C) f32 matmul accumulator
    M = NB * H * W

    def fill_padded(img_bf16):
        # Reflect-pad W at value level (single shift/concat), store the full
        # (W+2, C)-wide slab aligned on the minor dims, then reflect H with
        # two cheap row copies inside the scratch (corners come out right
        # because the copied rows already contain the reflected columns).
        xw = jnp.concatenate(
            [img_bf16[:, :, 1:2, :], img_bf16, img_bf16[:, :, W - 2:W - 1, :]],
            axis=2)                                         # (NB, H, W+2, C)
        xp_ref[:, 1:H + 1, :, :] = xw
        xp_ref[:, 0:1, :, :] = xp_ref[:, 2:3, :, :]              # top row
        xp_ref[:, H + 1:H + 2, :, :] = xp_ref[:, H - 1:H, :, :]  # bottom row

    def conv3x3(w_ref):
        # 3 accumulating dots grouped by kernel row dy; K = 3*C per dot.
        for dy in range(3):
            rows = xp_ref[:, dy:dy + H, :, :]               # (NB, H, W+2, C)
            patch = jnp.concatenate(
                [rows[:, :, dx:dx + W, :].reshape(M, C) for dx in range(3)],
                axis=-1)                                    # (M, 3C) bf16
            part = jnp.dot(patch, w_ref[dy * 3 * C:(dy + 1) * 3 * C, :],
                           preferred_element_type=jnp.float32)
            if dy == 0:
                acc_ref[...] = part
            else:
                acc_ref[...] += part

    # --- conv1 -> BN1 (f32 epilogue) -> ReLU --------------------------------
    fill_padded(x_ref[...].astype(jnp.bfloat16))
    conv3x3(w1_ref)
    h = jnp.maximum(acc_ref[...] * s1_ref[...] + b1_ref[...], 0.0)   # (M, C) f32

    # --- conv2 -> BN2 -> residual add ----------------------------------------
    fill_padded(h.astype(jnp.bfloat16).reshape(NB, H, W, C))
    conv3x3(w2_ref)
    a2 = acc_ref[...] * s2_ref[...] + b2_ref[...]
    o_ref[...] = (x_ref[...] + a2.reshape(NB, H, W, C)).astype(o_ref.dtype)


# ----------------------------------------------------------------------------
# Wrapper (NHWC native).
# ----------------------------------------------------------------------------
def _bn_scale_bias(bn):
    scale = bn["gamma"] * lax.rsqrt(bn["var"] + BN_EPS)
    bias = bn["beta"] - bn["mean"] * scale
    return (scale.reshape(1, -1).astype(jnp.float32),
            bias.reshape(1, -1).astype(jnp.float32))


def _pick_batch_block(n):
    for nb in (8, 4, 2):                 # keep >=4 grid steps if possible
        if n % nb == 0 and n // nb >= 4:
            return nb
    for nb in (4, 2):                    # else keep >=2 steps (megacore)
        if n % nb == 0 and n // nb >= 2:
            return nb
    return 1


def _pick_vmem_limit():
    try:
        cap = int(pltpu.get_tpu_info().vmem_capacity_bytes)
    except Exception:
        cap = 64 * 1024 * 1024
    # 3/4 of physical: 48 MiB on v7x (64 MiB/TC), capped at 96 MiB on v5e/v6e.
    return min(cap * 3 // 4, 96 * 1024 * 1024)


def resnet_block_forward(x, params):
    """x: (N, H, W, C) f32, NHWC layout."""
    N, H, W, C = x.shape
    nb = _pick_batch_block(N)

    w1 = params["conv1_w"].reshape(9 * C, C).astype(jnp.bfloat16)
    w2 = params["conv2_w"].reshape(9 * C, C).astype(jnp.bfloat16)
    s1, b1 = _bn_scale_bias(params["bn1"])
    s2, b2 = _bn_scale_bias(params["bn2"])

    kernel = functools.partial(_resnet_block_kernel, NB=nb, H=H, W=W, C=C)
    cost = pl.CostEstimate(
        flops=int(4 * N * H * W * 9 * C * C),
        transcendentals=0,
        bytes_accessed=int(2 * N * H * W * C * 4 + 2 * 9 * C * C * 2 + 4 * C * 4),
    )

    const_map = lambda n: (0, 0)
    out = pl.pallas_call(
        kernel,
        out_shape=jax.ShapeDtypeStruct((N, H, W, C), x.dtype),
        grid_spec=pltpu.PrefetchScalarGridSpec(
            num_scalar_prefetch=0,
            grid=(N // nb,),
            in_specs=[
                pl.BlockSpec((nb, H, W, C), lambda n: (n, 0, 0, 0)),
                pl.BlockSpec((9 * C, C), const_map),
                pl.BlockSpec((1, C), const_map),
                pl.BlockSpec((1, C), const_map),
                pl.BlockSpec((9 * C, C), const_map),
                pl.BlockSpec((1, C), const_map),
                pl.BlockSpec((1, C), const_map),
            ],
            out_specs=pl.BlockSpec((nb, H, W, C), lambda n: (n, 0, 0, 0)),
            scratch_shapes=[
                pltpu.VMEM((nb, H + 2, W + 2, C), jnp.bfloat16),
                pltpu.VMEM((nb * H * W, C), jnp.float32),
            ],
        ),
        compiler_params=pltpu.CompilerParams(
            dimension_semantics=("parallel",),
            vmem_limit_bytes=_pick_vmem_limit(),
        ),
        cost_estimate=cost,
    )(x, w1, s1, b1, w2, s2, b2)
    return out


def resnet_block_forward_nchw(x_nchw, params):
    """Compatibility adapter for PyTorch NCHW callers (adds 2 transposes)."""
    x = jnp.transpose(x_nchw, (0, 2, 3, 1))
    return jnp.transpose(resnet_block_forward(x, params), (0, 3, 1, 2))


# ----------------------------------------------------------------------------
# Deterministic synthetic parameters + pure-JAX f32 reference (NHWC).
# ----------------------------------------------------------------------------
def init_resnet_block(key, dim):
    ks = jax.random.split(key, 10)
    std = (2.0 / (9 * dim)) ** 0.5

    def bn(k1, k2, k3, k4):
        return {
            "gamma": 1.0 + 0.1 * jax.random.normal(k1, (dim,), jnp.float32),
            "beta": 0.1 * jax.random.normal(k2, (dim,), jnp.float32),
            "mean": 0.1 * jax.random.normal(k3, (dim,), jnp.float32),
            "var": 1.0 + 0.5 * jax.random.uniform(k4, (dim,), jnp.float32),
        }

    return {
        "conv1_w": std * jax.random.normal(ks[0], (3, 3, dim, dim), jnp.float32),
        "bn1": bn(ks[1], ks[2], ks[3], ks[4]),
        "conv2_w": std * jax.random.normal(ks[5], (3, 3, dim, dim), jnp.float32),
        "bn2": bn(ks[6], ks[7], ks[8], ks[9]),
    }


def resnet_block_reference(x, params):
    """Plain-JAX f32 reference (reflect-pad conv + inference BN + ReLU + skip)."""
    def conv_bn(h, w, bn, relu):
        hp = jnp.pad(h, ((0, 0), (1, 1), (1, 1), (0, 0)), mode="reflect")
        y = lax.conv_general_dilated(
            hp, w, window_strides=(1, 1), padding="VALID",
            dimension_numbers=("NHWC", "HWIO", "NHWC"))
        y = (y - bn["mean"]) * lax.rsqrt(bn["var"] + BN_EPS) * bn["gamma"] + bn["beta"]
        return jnp.maximum(y, 0.0) if relu else y

    y = conv_bn(x, params["conv1_w"], params["bn1"], relu=True)
    y = conv_bn(y, params["conv2_w"], params["bn2"], relu=False)
    return x + y


# ----------------------------------------------------------------------------
if __name__ == "__main__":
    # ResnetBlock(dim) at small scale: dim=128 (lane-dense), N=2, 16x16, NHWC.
    DIM, N, H, W = 128, 2, 16, 16

    key = jax.random.PRNGKey(0)
    k_x, k_p = jax.random.split(key)
    x = jax.random.normal(k_x, (N, H, W, DIM), jnp.float32)
    params = init_resnet_block(k_p, DIM)

    fwd = jax.jit(resnet_block_forward)
    out = jax.block_until_ready(fwd(x, params))
    assert out.shape == (N, H, W, DIM), out.shape
    assert out.dtype == jnp.float32

    # Loose check vs f32 reference (kernel runs the convs in bf16 on the MXU).
    ref = resnet_block_reference(x, params)
    max_err = float(jnp.max(jnp.abs(out - ref)))
    assert max_err < 0.25, f"max abs error {max_err}"

    print("KERNEL_OK")
</pallas_src>

<mosaic_0001>
module attributes {stable_mosaic.version = 11 : i64} {
  func.func @_resnet_block_kernel(%arg0: i32, %arg1: memref<1x16x16x128xf32, #tpu.memory_space<vmem>>, %arg2: memref<1152x128xbf16, #tpu.memory_space<vmem>>, %arg3: memref<1x128xf32, #tpu.memory_space<vmem>>, %arg4: memref<1x128xf32, #tpu.memory_space<vmem>>, %arg5: memref<1152x128xbf16, #tpu.memory_space<vmem>>, %arg6: memref<1x128xf32, #tpu.memory_space<vmem>>, %arg7: memref<1x128xf32, #tpu.memory_space<vmem>>, %arg8: memref<1x16x16x128xf32, #tpu.memory_space<vmem>>, %arg9: memref<1x18x18x128xbf16, #tpu.memory_space<vmem>>, %arg10: memref<256x128xf32, #tpu.memory_space<vmem>>) attributes {dimension_semantics = [#tpu.dimension_semantics<parallel>], iteration_bounds = array<i64: 2>, scalar_prefetch = 0 : i64, scratch_operands = 2 : i64, tpu.core_type = #tpu.core_type<tc>, window_params = [{transform_indices = @transform_0, window_bounds = array<i64: 1, 16, 16, 128>}, {pipeline_mode = #tpu.pipeline_mode<synchronous>, transform_indices = @transform_1, window_bounds = array<i64: 1152, 128>}, {pipeline_mode = #tpu.pipeline_mode<synchronous>, transform_indices = @transform_2, window_bounds = array<i64: 1, 128>}, {pipeline_mode = #tpu.pipeline_mode<synchronous>, transform_indices = @transform_3, window_bounds = array<i64: 1, 128>}, {pipeline_mode = #tpu.pipeline_mode<synchronous>, transform_indices = @transform_4, window_bounds = array<i64: 1152, 128>}, {pipeline_mode = #tpu.pipeline_mode<synchronous>, transform_indices = @transform_5, window_bounds = array<i64: 1, 128>}, {pipeline_mode = #tpu.pipeline_mode<synchronous>, transform_indices = @transform_6, window_bounds = array<i64: 1, 128>}, {transform_indices = @transform_7, window_bounds = array<i64: 1, 16, 16, 128>}]} {
    %c0 = arith.constant 0 : index
    %c0_0 = arith.constant 0 : index
    %c0_1 = arith.constant 0 : index
    %c0_2 = arith.constant 0 : index
    %0 = vector.load %arg1[%c0, %c0_0, %c0_1, %c0_2] : memref<1x16x16x128xf32, #tpu.memory_space<vmem>>, vector<1x16x16x128xf32>
    %1 = arith.truncf %0 : vector<1x16x16x128xf32> to vector<1x16x16x128xbf16>
    %2 = vector.extract_strided_slice %1 {offsets = [0, 0, 1, 0], sizes = [1, 16, 1, 128], strides = [1, 1, 1, 1]} : vector<1x16x16x128xbf16> to vector<1x16x1x128xbf16>
    %3 = vector.extract_strided_slice %1 {offsets = [0, 0, 14, 0], sizes = [1, 16, 1, 128], strides = [1, 1, 1, 1]} : vector<1x16x16x128xbf16> to vector<1x16x1x128xbf16>
    %4 = tpu.concatenate %2, %1, %3 in 2 : vector<1x16x1x128xbf16>, vector<1x16x16x128xbf16>, vector<1x16x1x128xbf16> -> vector<1x16x18x128xbf16>
    %c0_3 = arith.constant 0 : index
    %c1 = arith.constant 1 : index
    %c0_4 = arith.constant 0 : index
    %c0_5 = arith.constant 0 : index
    %5 = vector.load %arg9[%c0_3, %c1, %c0_4, %c0_5] : memref<1x18x18x128xbf16, #tpu.memory_space<vmem>>, vector<1x16x18x128xbf16>
    tpu.vector_store %arg9[%c0_3, %c1, %c0_4, %c0_5], %4 {strides = array<i32>} : memref<1x18x18x128xbf16, #tpu.memory_space<vmem>>, vector<1x16x18x128xbf16>,
    %c0_6 = arith.constant 0 : index
    %c2 = arith.constant 2 : index
    %c0_7 = arith.constant 0 : index
    %c0_8 = arith.constant 0 : index
    %6 = vector.load %arg9[%c0_6, %c2, %c0_7, %c0_8] : memref<1x18x18x128xbf16, #tpu.memory_space<vmem>>, vector<1x1x18x128xbf16>
    %c0_9 = arith.constant 0 : index
    %c0_10 = arith.constant 0 : index
    %c0_11 = arith.constant 0 : index
    %c0_12 = arith.constant 0 : index
    %7 = vector.load %arg9[%c0_9, %c0_10, %c0_11, %c0_12] : memref<1x18x18x128xbf16, #tpu.memory_space<vmem>>, vector<1x1x18x128xbf16>
    tpu.vector_store %arg9[%c0_9, %c0_10, %c0_11, %c0_12], %6 {strides = array<i32>} : memref<1x18x18x128xbf16, #tpu.memory_space<vmem>>, vector<1x1x18x128xbf16>,
    %c0_13 = arith.constant 0 : index
    %c15 = arith.constant 15 : index
    %c0_14 = arith.constant 0 : index
    %c0_15 = arith.constant 0 : index
    %8 = vector.load %arg9[%c0_13, %c15, %c0_14, %c0_15] : memref<1x18x18x128xbf16, #tpu.memory_space<vmem>>, vector<1x1x18x128xbf16>
    %c0_16 = arith.constant 0 : index
    %c17 = arith.constant 17 : index
    %c0_17 = arith.constant 0 : index
    %c0_18 = arith.constant 0 : index
    %9 = vector.load %arg9[%c0_16, %c17, %c0_17, %c0_18] : memref<1x18x18x128xbf16, #tpu.memory_space<vmem>>, vector<1x1x18x128xbf16>
    tpu.vector_store %arg9[%c0_16, %c17, %c0_17, %c0_18], %8 {strides = array<i32>} : memref<1x18x18x128xbf16, #tpu.memory_space<vmem>>, vector<1x1x18x128xbf16>,
    %c0_19 = arith.constant 0 : index
    %c0_20 = arith.constant 0 : index
    %c0_21 = arith.constant 0 : index
    %c0_22 = arith.constant 0 : index
    %10 = vector.load %arg9[%c0_19, %c0_20, %c0_21, %c0_22] : memref<1x18x18x128xbf16, #tpu.memory_space<vmem>>, vector<1x16x18x128xbf16>
    %11 = vector.extract_strided_slice %10 {offsets = [0, 0, 0, 0], sizes = [1, 16, 16, 128], strides = [1, 1, 1, 1]} : vector<1x16x18x128xbf16> to vector<1x16x16x128xbf16>
    %12 = vector.shape_cast %11 : vector<1x16x16x128xbf16> to vector<256x128xbf16>
    %13 = vector.extract_strided_slice %10 {offsets = [0, 0, 1, 0], sizes = [1, 16, 16, 128], strides = [1, 1, 1, 1]} : vector<1x16x18x128xbf16> to vector<1x16x16x128xbf16>
    %14 = vector.shape_cast %13 : vector<1x16x16x128xbf16> to vector<256x128xbf16>
    %15 = vector.extract_strided_slice %10 {offsets = [0, 0, 2, 0], sizes = [1, 16, 16, 128], strides = [1, 1, 1, 1]} : vector<1x16x18x128xbf16> to vector<1x16x16x128xbf16>
    %16 = vector.shape_cast %15 : vector<1x16x16x128xbf16> to vector<256x128xbf16>
    %17 = tpu.concatenate %12, %14, %16 in 1 : vector<256x128xbf16>, vector<256x128xbf16>, vector<256x128xbf16> -> vector<256x384xbf16>
    %c0_23 = arith.constant 0 : index
    %c0_24 = arith.constant 0 : index
    %18 = vector.load %arg2[%c0_23, %c0_24] : memref<1152x128xbf16, #tpu.memory_space<vmem>>, vector<384x128xbf16>
    %cst = arith.constant dense<0.000000e+00> : vector<256x128xf32>
    %19 = tpu.matmul %17, %18, %cst {dimension_numbers = #tpu.dot_dimension_numbers<[1], [0], [0], [1], [0, 0, 1, 1], [], []>} : vector<256x384xbf16>, vector<384x128xbf16>, vector<256x128xf32> -> vector<256x128xf32>
    %c0_25 = arith.constant 0 : index
    %c0_26 = arith.constant 0 : index
    %20 = vector.load %arg10[%c0_25, %c0_26] : memref<256x128xf32, #tpu.memory_space<vmem>>, vector<256x128xf32>
    tpu.vector_store %arg10[%c0_25, %c0_26], %19 {strides = array<i32>} : memref<256x128xf32, #tpu.memory_space<vmem>>, vector<256x128xf32>,
    %c0_27 = arith.constant 0 : index
    %c1_28 = arith.constant 1 : index
    %c0_29 = arith.constant 0 : index
    %c0_30 = arith.constant 0 : index
    %21 = vector.load %arg9[%c0_27, %c1_28, %c0_29, %c0_30] : memref<1x18x18x128xbf16, #tpu.memory_space<vmem>>, vector<1x16x18x128xbf16>
    %22 = vector.extract_strided_slice %21 {offsets = [0, 0, 0, 0], sizes = [1, 16, 16, 128], strides = [1, 1, 1, 1]} : vector<1x16x18x128xbf16> to vector<1x16x16x128xbf16>
    %23 = vector.shape_cast %22 : vector<1x16x16x128xbf16> to vector<256x128xbf16>
    %24 = vector.extract_strided_slice %21 {offsets = [0, 0, 1, 0], sizes = [1, 16, 16, 128], strides = [1, 1, 1, 1]} : vector<1x16x18x128xbf16> to vector<1x16x16x128xbf16>
    %25 = vector.shape_cast %24 : vector<1x16x16x128xbf16> to vector<256x128xbf16>
    %26 = vector.extract_strided_slice %21 {offsets = [0, 0, 2, 0], sizes = [1, 16, 16, 128], strides = [1, 1, 1, 1]} : vector<1x16x18x128xbf16> to vector<1x16x16x128xbf16>
    %27 = vector.shape_cast %26 : vector<1x16x16x128xbf16> to vector<256x128xbf16>
    %28 = tpu.concatenate %23, %25, %27 in 1 : vector<256x128xbf16>, vector<256x128xbf16>, vector<256x128xbf16> -> vector<256x384xbf16>
    %c384 = arith.constant 384 : index
    %c0_31 = arith.constant 0 : index
    %29 = vector.load %arg2[%c384, %c0_31] : memref<1152x128xbf16, #tpu.memory_space<vmem>>, vector<384x128xbf16>
    %cst_32 = arith.constant dense<0.000000e+00> : vector<256x128xf32>
    %30 = tpu.matmul %28, %29, %cst_32 {dimension_numbers = #tpu.dot_dimension_numbers<[1], [0], [0], [1], [0, 0, 1, 1], [], []>} : vector<256x384xbf16>, vector<384x128xbf16>, vector<256x128xf32> -> vector<256x128xf32>
    %c0_33 = arith.constant 0 : index
    %c0_34 = arith.constant 0 : index
    %31 = vector.load %arg10[%c0_33, %c0_34] : memref<256x128xf32, #tpu.memory_space<vmem>>, vector<256x128xf32>
    %32 = arith.addf %31, %30 : vector<256x128xf32>
    %c0_35 = arith.constant 0 : index
    %c0_36 = arith.constant 0 : index
    %33 = vector.load %arg10[%c0_35, %c0_36] : memref<256x128xf32, #tpu.memory_space<vmem>>, vector<256x128xf32>
    tpu.vector_store %arg10[%c0_35, %c0_36], %32 {strides = array<i32>} : memref<256x128xf32, #tpu.memory_space<vmem>>, vector<256x128xf32>,
    %c0_37 = arith.constant 0 : index
    %c2_38 = arith.constant 2 : index
    %c0_39 = arith.constant 0 : index
    %c0_40 = arith.constant 0 : index
    %34 = vector.load %arg9[%c0_37, %c2_38, %c0_39, %c0_40] : memref<1x18x18x128xbf16, #tpu.memory_space<vmem>>, vector<1x16x18x128xbf16>
    %35 = vector.extract_strided_slice %34 {offsets = [0, 0, 0, 0], sizes = [1, 16, 16, 128], strides = [1, 1, 1, 1]} : vector<1x16x18x128xbf16> to vector<1x16x16x128xbf16>
    %36 = vector.shape_cast %35 : vector<1x16x16x128xbf16> to vector<256x128xbf16>
    %37 = vector.extract_strided_slice %34 {offsets = [0, 0, 1, 0], sizes = [1, 16, 16, 128], strides = [1, 1, 1, 1]} : vector<1x16x18x128xbf16> to vector<1x16x16x128xbf16>
    %38 = vector.shape_cast %37 : vector<1x16x16x128xbf16> to vector<256x128xbf16>
    %39 = vector.extract_strided_slice %34 {offsets = [0, 0, 2, 0], sizes = [1, 16, 16, 128], strides = [1, 1, 1, 1]} : vector<1x16x18x128xbf16> to vector<1x16x16x128xbf16>
    %40 = vector.shape_cast %39 : vector<1x16x16x128xbf16> to vector<256x128xbf16>
    %41 = tpu.concatenate %36, %38, %40 in 1 : vector<256x128xbf16>, vector<256x128xbf16>, vector<256x128xbf16> -> vector<256x384xbf16>
    %c768 = arith.constant 768 : index
    %c0_41 = arith.constant 0 : index
    %42 = vector.load %arg2[%c768, %c0_41] : memref<1152x128xbf16, #tpu.memory_space<vmem>>, vector<384x128xbf16>
    %cst_42 = arith.constant dense<0.000000e+00> : vector<256x128xf32>
    %43 = tpu.matmul %41, %42, %cst_42 {dimension_numbers = #tpu.dot_dimension_numbers<[1], [0], [0], [1], [0, 0, 1, 1], [], []>} : vector<256x384xbf16>, vector<384x128xbf16>, vector<256x128xf32> -> vector<256x128xf32>
    %c0_43 = arith.constant 0 : index
    %c0_44 = arith.constant 0 : index
    %44 = vector.load %arg10[%c0_43, %c0_44] : memref<256x128xf32, #tpu.memory_space<vmem>>, vector<256x128xf32>
    %45 = arith.addf %44, %43 : vector<256x128xf32>
    %c0_45 = arith.constant 0 : index
    %c0_46 = arith.constant 0 : index
    %46 = vector.load %arg10[%c0_45, %c0_46] : memref<256x128xf32, #tpu.memory_space<vmem>>, vector<256x128xf32>
    tpu.vector_store %arg10[%c0_45, %c0_46], %45 {strides = array<i32>} : memref<256x128xf32, #tpu.memory_space<vmem>>, vector<256x128xf32>,
    %c0_47 = arith.constant 0 : index
    %c0_48 = arith.constant 0 : index
    %47 = vector.load %arg10[%c0_47, %c0_48] : memref<256x128xf32, #tpu.memory_space<vmem>>, vector<256x128xf32>
    %c0_49 = arith.constant 0 : index
    %c0_50 = arith.constant 0 : index
    %48 = vector.load %arg3[%c0_49, %c0_50] : memref<1x128xf32, #tpu.memory_space<vmem>>, vector<1x128xf32>
    %49 = vector.broadcast %48 : vector<1x128xf32> to vector<256x128xf32>
    %50 = arith.mulf %47, %49 : vector<256x128xf32>
    %c0_51 = arith.constant 0 : index
    %c0_52 = arith.constant 0 : index
    %51 = vector.load %arg4[%c0_51, %c0_52] : memref<1x128xf32, #tpu.memory_space<vmem>>, vector<1x128xf32>
    %52 = vector.broadcast %51 : vector<1x128xf32> to vector<256x128xf32>
    %53 = arith.addf %50, %52 : vector<256x128xf32>
    %cst_53 = arith.constant 0.000000e+00 : f32
    %54 = vector.broadcast %cst_53 : f32 to vector<256x128xf32>
    %55 = arith.maximumf %53, %54 : vector<256x128xf32>
    %56 = arith.truncf %55 : vector<256x128xf32> to vector<256x128xbf16>
    %57 = vector.shape_cast %56 : vector<256x128xbf16> to vector<1x16x16x128xbf16>
    %58 = vector.extract_strided_slice %57 {offsets = [0, 0, 1, 0], sizes = [1, 16, 1, 128], strides = [1, 1, 1, 1]} : vector<1x16x16x128xbf16> to vector<1x16x1x128xbf16>
    %59 = vector.extract_strided_slice %57 {offsets = [0, 0, 14, 0], sizes = [1, 16, 1, 128], strides = [1, 1, 1, 1]} : vector<1x16x16x128xbf16> to vector<1x16x1x128xbf16>
    %60 = tpu.concatenate %58, %57, %59 in 2 : vector<1x16x1x128xbf16>, vector<1x16x16x128xbf16>, vector<1x16x1x128xbf16> -> vector<1x16x18x128xbf16>
    %c0_54 = arith.constant 0 : index
    %c1_55 = arith.constant 1 : index
    %c0_56 = arith.constant 0 : index
    %c0_57 = arith.constant 0 : index
    %61 = vector.load %arg9[%c0_54, %c1_55, %c0_56, %c0_57] : memref<1x18x18x128xbf16, #tpu.memory_space<vmem>>, vector<1x16x18x128xbf16>
    tpu.vector_store %arg9[%c0_54, %c1_55, %c0_56, %c0_57], %60 {strides = array<i32>} : memref<1x18x18x128xbf16, #tpu.memory_space<vmem>>, vector<1x16x18x128xbf16>,
    %c0_58 = arith.constant 0 : index
    %c2_59 = arith.constant 2 : index
    %c0_60 = arith.constant 0 : index
    %c0_61 = arith.constant 0 : index
    %62 = vector.load %arg9[%c0_58, %c2_59, %c0_60, %c0_61] : memref<1x18x18x128xbf16, #tpu.memory_space<vmem>>, vector<1x1x18x128xbf16>
    %c0_62 = arith.constant 0 : index
    %c0_63 = arith.constant 0 : index
    %c0_64 = arith.constant 0 : index
    %c0_65 = arith.constant 0 : index
    %63 = vector.load %arg9[%c0_62, %c0_63, %c0_64, %c0_65] : memref<1x18x18x128xbf16, #tpu.memory_space<vmem>>, vector<1x1x18x128xbf16>
    tpu.vector_store %arg9[%c0_62, %c0_63, %c0_64, %c0_65], %62 {strides = array<i32>} : memref<1x18x18x128xbf16, #tpu.memory_space<vmem>>, vector<1x1x18x128xbf16>,
    %c0_66 = arith.constant 0 : index
    %c15_67 = arith.constant 15 : index
    %c0_68 = arith.constant 0 : index
    %c0_69 = arith.constant 0 : index
    %64 = vector.load %arg9[%c0_66, %c15_67, %c0_68, %c0_69] : memref<1x18x18x128xbf16, #tpu.memory_space<vmem>>, vector<1x1x18x128xbf16>
    %c0_70 = arith.constant 0 : index
    %c17_71 = arith.constant 17 : index
    %c0_72 = arith.constant 0 : index
    %c0_73 = arith.constant 0 : index
    %65 = vector.load %arg9[%c0_70, %c17_71, %c0_72, %c0_73] : memref<1x18x18x128xbf16, #tpu.memory_space<vmem>>, vector<1x1x18x128xbf16>
    tpu.vector_store %arg9[%c0_70, %c17_71, %c0_72, %c0_73], %64 {strides = array<i32>} : memref<1x18x18x128xbf16, #tpu.memory_space<vmem>>, vector<1x1x18x128xbf16>,
    %c0_74 = arith.constant 0 : index
    %c0_75 = arith.constant 0 : index
    %c0_76 = arith.constant 0 : index
    %c0_77 = arith.constant 0 : index
    %66 = vector.load %arg9[%c0_74, %c0_75, %c0_76, %c0_77] : memref<1x18x18x128xbf16, #tpu.memory_space<vmem>>, vector<1x16x18x128xbf16>
    %67 = vector.extract_strided_slice %66 {offsets = [0, 0, 0, 0], sizes = [1, 16, 16, 128], strides = [1, 1, 1, 1]} : vector<1x16x18x128xbf16> to vector<1x16x16x128xbf16>
    %68 = vector.shape_cast %67 : vector<1x16x16x128xbf16> to vector<256x128xbf16>
    %69 = vector.extract_strided_slice %66 {offsets = [0, 0, 1, 0], sizes = [1, 16, 16, 128], strides = [1, 1, 1, 1]} : vector<1x16x18x128xbf16> to vector<1x16x16x128xbf16>
    %70 = vector.shape_cast %69 : vector<1x16x16x128xbf16> to vector<256x128xbf16>
    %71 = vector.extract_strided_slice %66 {offsets = [0, 0, 2, 0], sizes = [1, 16, 16, 128], strides = [1, 1, 1, 1]} : vector<1x16x18x128xbf16> to vector<1x16x16x128xbf16>
    %72 = vector.shape_cast %71 : vector<1x16x16x128xbf16> to vector<256x128xbf16>
    %73 = tpu.concatenate %68, %70, %72 in 1 : vector<256x128xbf16>, vector<256x128xbf16>, vector<256x128xbf16> -> vector<256x384xbf16>
    %c0_78 = arith.constant 0 : index
    %c0_79 = arith.constant 0 : index
    %74 = vector.load %arg5[%c0_78, %c0_79] : memref<1152x128xbf16, #tpu.memory_space<vmem>>, vector<384x128xbf16>
    %cst_80 = arith.constant dense<0.000000e+00> : vector<256x128xf32>
    %75 = tpu.matmul %73, %74, %cst_80 {dimension_numbers = #tpu.dot_dimension_numbers<[1], [0], [0], [1], [0, 0, 1, 1], [], []>} : vector<256x384xbf16>, vector<384x128xbf16>, vector<256x128xf32> -> vector<256x128xf32>
    %c0_81 = arith.constant 0 : index
    %c0_82 = arith.constant 0 : index
    %76 = vector.load %arg10[%c0_81, %c0_82] : memref<256x128xf32, #tpu.memory_space<vmem>>, vector<256x128xf32>
    tpu.vector_store %arg10[%c0_81, %c0_82], %75 {strides = array<i32>} : memref<256x128xf32, #tpu.memory_space<vmem>>, vector<256x128xf32>,
    %c0_83 = arith.constant 0 : index
    %c1_84 = arith.constant 1 : index
    %c0_85 = arith.constant 0 : index
    %c0_86 = arith.constant 0 : index
    %77 = vector.load %arg9[%c0_83, %c1_84, %c0_85, %c0_86] : memref<1x18x18x128xbf16, #tpu.memory_space<vmem>>, vector<1x16x18x128xbf16>
    %78 = vector.extract_strided_slice %77 {offsets = [0, 0, 0, 0], sizes = [1, 16, 16, 128], strides = [1, 1, 1, 1]} : vector<1x16x18x128xbf16> to vector<1x16x16x128xbf16>
    %79 = vector.shape_cast %78 : vector<1x16x16x128xbf16> to vector<256x128xbf16>
    %80 = vector.extract_strided_slice %77 {offsets = [0, 0, 1, 0], sizes = [1, 16, 16, 128], strides = [1, 1, 1, 1]} : vector<1x16x18x128xbf16> to vector<1x16x16x128xbf16>
    %81 = vector.shape_cast %80 : vector<1x16x16x128xbf16> to vector<256x128xbf16>
    %82 = vector.extract_strided_slice %77 {offsets = [0, 0, 2, 0], sizes = [1, 16, 16, 128], strides = [1, 1, 1, 1]} : vector<1x16x18x128xbf16> to vector<1x16x16x128xbf16>
    %83 = vector.shape_cast %82 : vector<1x16x16x128xbf16> to vector<256x128xbf16>
    %84 = tpu.concatenate %79, %81, %83 in 1 : vector<256x128xbf16>, vector<256x128xbf16>, vector<256x128xbf16> -> vector<256x384xbf16>
    %c384_87 = arith.constant 384 : index
    %c0_88 = arith.constant 0 : index
    %85 = vector.load %arg5[%c384_87, %c0_88] : memref<1152x128xbf16, #tpu.memory_space<vmem>>, vector<384x128xbf16>
    %cst_89 = arith.constant dense<0.000000e+00> : vector<256x128xf32>
    %86 = tpu.matmul %84, %85, %cst_89 {dimension_numbers = #tpu.dot_dimension_numbers<[1], [0], [0], [1], [0, 0, 1, 1], [], []>} : vector<256x384xbf16>, vector<384x128xbf16>, vector<256x128xf32> -> vector<256x128xf32>
    %c0_90 = arith.constant 0 : index
    %c0_91 = arith.constant 0 : index
    %87 = vector.load %arg10[%c0_90, %c0_91] : memref<256x128xf32, #tpu.memory_space<vmem>>, vector<256x128xf32>
    %88 = arith.addf %87, %86 : vector<256x128xf32>
    %c0_92 = arith.constant 0 : index
    %c0_93 = arith.constant 0 : index
    %89 = vector.load %arg10[%c0_92, %c0_93] : memref<256x128xf32, #tpu.memory_space<vmem>>, vector<256x128xf32>
    tpu.vector_store %arg10[%c0_92, %c0_93], %88 {strides = array<i32>} : memref<256x128xf32, #tpu.memory_space<vmem>>, vector<256x128xf32>,
    %c0_94 = arith.constant 0 : index
    %c2_95 = arith.constant 2 : index
    %c0_96 = arith.constant 0 : index
    %c0_97 = arith.constant 0 : index
    %90 = vector.load %arg9[%c0_94, %c2_95, %c0_96, %c0_97] : memref<1x18x18x128xbf16, #tpu.memory_space<vmem>>, vector<1x16x18x128xbf16>
    %91 = vector.extract_strided_slice %90 {offsets = [0, 0, 0, 0], sizes = [1, 16, 16, 128], strides = [1, 1, 1, 1]} : vector<1x16x18x128xbf16> to vector<1x16x16x128xbf16>
    %92 = vector.shape_cast %91 : vector<1x16x16x128xbf16> to vector<256x128xbf16>
    %93 = vector.extract_strided_slice %90 {offsets = [0, 0, 1, 0], sizes = [1, 16, 16, 128], strides = [1, 1, 1, 1]} : vector<1x16x18x128xbf16> to vector<1x16x16x128xbf16>
    %94 = vector.shape_cast %93 : vector<1x16x16x128xbf16> to vector<256x128xbf16>
    %95 = vector.extract_strided_slice %90 {offsets = [0, 0, 2, 0], sizes = [1, 16, 16, 128], strides = [1, 1, 1, 1]} : vector<1x16x18x128xbf16> to vector<1x16x16x128xbf16>
    %96 = vector.shape_cast %95 : vector<1x16x16x128xbf16> to vector<256x128xbf16>
    %97 = tpu.concatenate %92, %94, %96 in 1 : vector<256x128xbf16>, vector<256x128xbf16>, vector<256x128xbf16> -> vector<256x384xbf16>
    %c768_98 = arith.constant 768 : index
    %c0_99 = arith.constant 0 : index
    %98 = vector.load %arg5[%c768_98, %c0_99] : memref<1152x128xbf16, #tpu.memory_space<vmem>>, vector<384x128xbf16>
    %cst_100 = arith.constant dense<0.000000e+00> : vector<256x128xf32>
    %99 = tpu.matmul %97, %98, %cst_100 {dimension_numbers = #tpu.dot_dimension_numbers<[1], [0], [0], [1], [0, 0, 1, 1], [], []>} : vector<256x384xbf16>, vector<384x128xbf16>, vector<256x128xf32> -> vector<256x128xf32>
    %c0_101 = arith.constant 0 : index
    %c0_102 = arith.constant 0 : index
    %100 = vector.load %arg10[%c0_101, %c0_102] : memref<256x128xf32, #tpu.memory_space<vmem>>, vector<256x128xf32>
    %101 = arith.addf %100, %99 : vector<256x128xf32>
    %c0_103 = arith.constant 0 : index
    %c0_104 = arith.constant 0 : index
    %102 = vector.load %arg10[%c0_103, %c0_104] : memref<256x128xf32, #tpu.memory_space<vmem>>, vector<256x128xf32>
    tpu.vector_store %arg10[%c0_103, %c0_104], %101 {strides = array<i32>} : memref<256x128xf32, #tpu.memory_space<vmem>>, vector<256x128xf32>,
    %c0_105 = arith.constant 0 : index
    %c0_106 = arith.constant 0 : index
    %103 = vector.load %arg10[%c0_105, %c0_106] : memref<256x128xf32, #tpu.memory_space<vmem>>, vector<256x128xf32>
    %c0_107 = arith.constant 0 : index
    %c0_108 = arith.constant 0 : index
    %104 = vector.load %arg6[%c0_107, %c0_108] : memref<1x128xf32, #tpu.memory_space<vmem>>, vector<1x128xf32>
    %105 = vector.broadcast %104 : vector<1x128xf32> to vector<256x128xf32>
    %106 = arith.mulf %103, %105 : vector<256x128xf32>
    %c0_109 = arith.constant 0 : index
    %c0_110 = arith.constant 0 : index
    %107 = vector.load %arg7[%c0_109, %c0_110] : memref<1x128xf32, #tpu.memory_space<vmem>>, vector<1x128xf32>
    %108 = vector.broadcast %107 : vector<1x128xf32> to vector<256x128xf32>
    %109 = arith.addf %106, %108 : vector<256x128xf32>
    %c0_111 = arith.constant 0 : index
    %c0_112 = arith.constant 0 : index
    %c0_113 = arith.constant 0 : index
    %c0_114 = arith.constant 0 : index
    %110 = vector.load %arg1[%c0_111, %c0_112, %c0_113, %c0_114] : memref<1x16x16x128xf32, #tpu.memory_space<vmem>>, vector<1x16x16x128xf32>
    %111 = vector.shape_cast %109 : vector<256x128xf32> to vector<1x16x16x128xf32>
    %112 = arith.addf %110, %111 : vector<1x16x16x128xf32>
    %c0_115 = arith.constant 0 : index
    %c0_116 = arith.constant 0 : index
    %c0_117 = arith.constant 0 : index
    %c0_118 = arith.constant 0 : index
    %113 = vector.load %arg8[%c0_115, %c0_116, %c0_117, %c0_118] : memref<1x16x16x128xf32, #tpu.memory_space<vmem>>, vector<1x16x16x128xf32>
    tpu.vector_store %arg8[%c0_115, %c0_116, %c0_117, %c0_118], %112 {strides = array<i32>} : memref<1x16x16x128xf32, #tpu.memory_space<vmem>>, vector<1x16x16x128xf32>,
    return
  }
  func.func @transform_0(%arg0: i32) -> (i32, i32, i32, i32) {
    %c0_i32 = arith.constant 0 : i32
    %c0_i32_0 = arith.constant 0 : i32
    %c0_i32_1 = arith.constant 0 : i32
    %c0_i32_2 = arith.constant 0 : i32
    return %arg0, %c0_i32, %c0_i32_0, %c0_i32_1 : i32, i32, i32, i32
  }
  func.func @transform_1(%arg0: i32) -> (i32, i32) {
    %c0_i32 = arith.constant 0 : i32
    %c0_i32_0 = arith.constant 0 : i32
    %c0_i32_1 = arith.constant 0 : i32
    return %c0_i32, %c0_i32_0 : i32, i32
  }
  func.func @transform_2(%arg0: i32) -> (i32, i32) {
    %c0_i32 = arith.constant 0 : i32
    %c0_i32_0 = arith.constant 0 : i32
    %c0_i32_1 = arith.constant 0 : i32
    return %c0_i32, %c0_i32_0 : i32, i32
  }
  func.func @transform_3(%arg0: i32) -> (i32, i32) {
    %c0_i32 = arith.constant 0 : i32
    %c0_i32_0 = arith.constant 0 : i32
    %c0_i32_1 = arith.constant 0 : i32
    return %c0_i32, %c0_i32_0 : i32, i32
  }
  func.func @transform_4(%arg0: i32) -> (i32, i32) {
    %c0_i32 = arith.constant 0 : i32
    %c0_i32_0 = arith.constant 0 : i32
    %c0_i32_1 = arith.constant 0 : i32
    return %c0_i32, %c0_i32_0 : i32, i32
  }
  func.func @transform_5(%arg0: i32) -> (i32, i32) {
    %c0_i32 = arith.constant 0 : i32
    %c0_i32_0 = arith.constant 0 : i32
    %c0_i32_1 = arith.constant 0 : i32
    return %c0_i32, %c0_i32_0 : i32, i32
  }
  func.func @transform_6(%arg0: i32) -> (i32, i32) {
    %c0_i32 = arith.constant 0 : i32
    %c0_i32_0 = arith.constant 0 : i32
    %c0_i32_1 = arith.constant 0 : i32
    return %c0_i32, %c0_i32_0 : i32, i32
  }
  func.func @transform_7(%arg0: i32) -> (i32, i32, i32, i32) {
    %c0_i32 = arith.constant 0 : i32
    %c0_i32_0 = arith.constant 0 : i32
    %c0_i32_1 = arith.constant 0 : i32
    %c0_i32_2 = arith.constant 0 : i32
    return %arg0, %c0_i32, %c0_i32_0, %c0_i32_1 : i32, i32, i32, i32
  }
}

</mosaic_0001>

<bundles_post_ra>
// kernel: resnet_block_forward.1
= control target key start
LH: loop header
LB: loop body
LE: loop exit
PB: predicated region body
PF: predicated region fallthrough
CT: control target
= control target key end

     0   :  { %12 = vsyncpa [#allocation5], 0  ;;  %s17120_s0 = inlined_call_operand.vmem [shape: f32[2,16,16,128], index: 0, kind: input, shape index: {}]   ;;  %s17121_s1 = inlined_call_operand.vmem [shape: bf16[1152,128], index: 1, kind: input, shape index: {}]   ;;  %s17122_s2 = inlined_call_operand.vmem [shape: f32[1,128], index: 2, kind: input, shape index: {}]   ;;  %s17123_s3 = inlined_call_operand.vmem [shape: f32[1,128], index: 3, kind: input, shape index: {}]   ;;  %s17124_s4 = inlined_call_operand.vmem [shape: bf16[1152,128], index: 4, kind: input, shape index: {}]   ;;  %s17125_s5 = inlined_call_operand.vmem [shape: f32[1,128], index: 5, kind: input, shape index: {}]   ;;  %s17126_s6 = inlined_call_operand.vmem [shape: f32[1,128], index: 6, kind: input, shape index: {}]   ;;  %s17127_s7 = inlined_call_operand.hbm [shape: f32[2,16,16,128], index: 7, kind: output, shape index: {}]  }
   0x1   :  { %14 = vsyncpa [#allocation5 + $0x1], 0  ;;  %s12500_s24 = smov 0   ;;  %s12502_s25 = smov 0  }
   0x2   :  { %s12504_s26 = smov 0   ;;  %s12506_s27 = smov 0  }
   0x3 LB: > { %s12521_s28 = sadd.s32 4294967295, %s12455_s27   ;;  %s9935_s29 = sadd.s32 4294967294, %s12455_s27   ;;  %s12455_s27 = sphi %s12506_s27, %s17382_s27   ;;  %s12451_s26 = sphi %s12504_s26, %s17381_s26   ;;  %s12447_s25 = sphi %s12502_s25, %s17380_s25   ;;  %s12443_s24 = sphi %s12500_s24, %s17379_s24  }
   0x4   : > { %s12525_s30 = sadd.s32 1, %s12455_s27   ;;  %s179_s8 = sadd.s32 1, %s12451_s26 }
   0x5   : > { %s176_s9 = ssub.s32 %s12455_s27, %s12525_s30  ;;  %p189_p0 = scmp.ne.s32.totalorder %s12451_s26, %s12447_s25 }
   0x6   : > { %p177_p1 = scmp.eq.s32.totalorder %s176_s9, 0  ;;  %p190_p2 = scmp.eq.s32.totalorder %s12521_s28, 1 }
   0x7   : > { %p195_p3 = scmp.ne.s32.totalorder %s12447_s25, %s12443_s24  ;;  %p196_p4 = scmp.eq.s32.totalorder %s9935_s29, 1 }
   0x8   : > { %s12536_s10 = scalar_select %p177_p1, %s12451_s26, %s179_s8  }
   0x9   : > { %p12538_p5 = por %p190_p2, %p189_p0  ;;  %p12542_p6 = por %p196_p4, %p195_p3 }
   0xa   : > { %p9938_p7 = scmp.ge.s32.totalorder %s12455_s27, 1  ;;  %p240_p8 = scmp.lt.s32.totalorder %s12455_s27, 3 }
   0xc   : > { %p241_p9 = pnand %p9938_p7, %p240_p8 }
   0xe   : > { %244 = sbr.rel (%p241_p9) target bundleno = 1234 (0x4d2), region = 48 }
  0x15   : > { %v12042_v0 = vld [vmem:[%s17121_s1 + $0x100] sm:$0xff]   ;;  %v12044_v2 = vld [vmem:[%s17121_s1 + $0x108] sm:$0xff]   ;;  %v12048_v6 = vld [vmem:[%s17121_s1 + $0x110] sm:$0xff]   ;;  %p272_p10 = scmp.lt.s32.totalorder %s12521_s28, 1  ;;  %vm518_vm0 = vcmask 1040384   ;;  %v17150_v32 = vmov 0 }
  0x16   : > { %v12043_v1 = vld [vmem:[%s17121_s1 + $0xc0] sm:$0xff]   ;;  %10713 = vmatprep.subr.bf16.mxu1 %v12042_v0  ;;  %v12045_v3 = vld [vmem:[%s17121_s1 + $0xc8] sm:$0xff]   ;;  %v12049_v7 = vld [vmem:[%s17121_s1 + $0xd0] sm:$0xff]   ;;  %vm519_vm1 = vsmask.f32 256  ;;  %vm1276_vm6 = vcmask 1042432  }
  0x17   : > { %10714 = vmatpush3.bf16.msra.mxu1 %v12043_v1  ;;  %v12046_v4 = vld [vmem:[%s17121_s1 + $0x40] sm:$0xff]   ;;  %v12050_v8 = vld [vmem:[%s17121_s1 + $0x48] sm:$0xff]   ;;  %v12052_v10 = vld [vmem:[%s17121_s1 + $0x118] sm:$0xff]   ;;  %s273_s8 = scalar_select %p272_p10, %s12521_s28, 1  ;;  %vm841_vm3 = vsmask.f32 3328 }
  0x18   : > { %10715 = vmatprep.subr.bf16.mxu1 %v12044_v2  ;;  %v12047_v5 = vld [vmem:[%s17121_s1] sm:$0xff]   ;;  %10577 = vmatprep.subr.bf16.mxu0 %v12046_v4  ;;  %v12051_v9 = vld [vmem:[%s17121_s1 + $0x8] sm:$0xff]   ;;  %v12053_v11 = vld [vmem:[%s17121_s1 + $0xd8] sm:$0xff]   ;;  %vm842_vm4 = vsmask.f32 7440  ;;  %vm1277_vm7 = vcmask 1046532  }
  0x19   : > { %10578 = vmatpush3.bf16.msra.mxu0 %v12047_v5  ;;  %v12054_v12 = vld [vmem:[%s17121_s1 + $0x50] sm:$0xff]   ;;  %v12056_v14 = vld [vmem:[%s17121_s1 + $0x120] sm:$0xff]   ;;  %v12058_v16 = vld [vmem:[%s17121_s1 + $0x58] sm:$0xff]   ;;  %s10575_s20 = sshll.u32 %s273_s8, 8  ;;  %s269_s13 = sand.u32 1, %s12447_s25  }
  0x1a   : > { %10579 = vmatprep.subr.bf16.mxu0 %v12050_v8  ;;  %v12055_v13 = vld [vmem:[%s17121_s1 + $0x10] sm:$0xff]   ;;  %v12057_v15 = vld [vmem:[%s17121_s1 + $0xe0] sm:$0xff]   ;;  %v12059_v17 = vld [vmem:[%s17121_s1 + $0x18] sm:$0xff]   ;;  %s12634_s16 = scalar_lea.vmem %s17120_s0, %s10575_s20  ;;  %s9939_s18 = sshll.u32 %s269_s13, 8 }
  0x1b   : > { %10716 = vmatpush3.bf16.msra.mxu1 %v12045_v3  ;;  %v12060_v18 = vld [vmem:[%s17121_s1 + $0x128] sm:$0xff]   ;;  %v12062_v20 = vld [vmem:[%s17121_s1 + $0x60] sm:$0xff]   ;;  %v12064_v22 = vld [vmem:[%s17121_s1 + $0x130] sm:$0xff]   ;;  %s16922_s19 = scalar_lea.vmem [#allocation4], %s9939_s18  ;;  %s10576_s20 = sshll.u32 %s12521_s28, 12 }
  0x1c   : > { %10717 = vmatprep.subr.bf16.mxu1 %v12048_v6  ;;  %v12061_v19 = vld [vmem:[%s17121_s1 + $0xe8] sm:$0xff]   ;;  %v12063_v21 = vld [vmem:[%s17121_s1 + $0x20] sm:$0xff]   ;;  %v12065_v23 = vld [vmem:[%s17121_s1 + $0xf0] sm:$0xff]   ;;  %s9873_s21 = sshll.u32 %s16922_s19, 4  ;;  %s17070_s29 = scalar_lea.hbm %s17127_s7, %s10576_s20  ;;  %s17072_s21 = int_to_ptr.vmem [resolvable:$true] %s9873_s21 }
  0x1d   : > { %10580 = vmatpush3.bf16.msra.mxu0 %v12051_v9  ;;  %v12066_v24 = vld [vmem:[%s17121_s1 + $0x68] sm:$0xff]   ;;  %v12068_v26 = vld [vmem:[%s17121_s1 + $0x138] sm:$0xff]   ;;  %v12070_v28 = vld [vmem:[%s17121_s1 + $0x70] sm:$0xff]   ;;  %s17079_s28 = scalar_lea.sflag [#allocation5], %s269_s13  ;;  %s12457_s9 = smov [#allocation4]  }
  0x1e   : > { %10581 = vmatprep.subr.bf16.mxu0 %v12054_v12  ;;  %v12067_v25 = vld [vmem:[%s17121_s1 + $0x28] sm:$0xff]   ;;  %v12069_v27 = vld [vmem:[%s17121_s1 + $0xf8] sm:$0xff]   ;;  %v278_v29 = vld [vmem:[%s12634_s16] sm:$0xff]  ;;  %s12397_s14 = sshll.u32 %s12457_s9, 4  ;;  %s12398_s14 = int_to_ptr.vmem [resolvable:$false] %s12397_s14 }
  0x1f   : > { %10718 = vmatpush3.bf16.msra.mxu1 %v12049_v7  ;;  %v279_v30 = vld [vmem:[%s12634_s16 + $0x8] sm:$0xff]  ;;  %vm12644_vm2 = vmand %vm518_vm0, %vm519_vm1  ;;  %v12071_v33 = vld [vmem:[%s17121_s1 + $0x30] sm:$0xff]   ;;  %s12399_s15 = scalar_lea.vmem %s12398_s14, 8192  ;;  %p12400_p0 = scmp.lt.s32.totalorder %s17072_s21, %s12398_s14 }
  0x20   : > { %10719 = vmatprep.subr.bf16.mxu1 %v12052_v10  ;;  %v310_v31 = vpack.c.bf16 %v279_v30, %v278_v29  ;;  %v17151_v32 = vsel %vm12644_vm2, 4294967295, %v17150_v32  ;;  %v12073_v36 = vld [vmem:[%s17121_s1 + $0x78] sm:$0xff]   ;;  %v280_v38 = vld [vmem:[%s12634_s16 + $0x10] sm:$0xff]  ;;  %v12662_v42 = vld [vmem:[%s17121_s1 + $0x80] sm:$0xff]  }
  0x21   : > { %10582 = vmatpush3.bf16.msra.mxu0 %v12055_v13  ;;  %17152 = vst [vmem:[#allocation7_spill] sm:$0xff] %v17151_v32  ;;  %v12074_v37 = vld [vmem:[%s17121_s1 + $0x38] sm:$0xff]   ;;  %v282_v44 = vld [vmem:[%s12634_s16 + $0x20] sm:$0xff]  ;;  %v283_v45 = vld [vmem:[%s12634_s16 + $0x28] sm:$0xff] }
  0x22   : > { %10583 = vmatprep.subr.bf16.mxu0 %v12058_v16  ;;  %v327_v34 = vshrl.u32 %v310_v31, 16  ;;  %v391_v35 = vshll.u32 %v310_v31, 16  ;;  %v281_v41 = vld [vmem:[%s12634_s16 + $0x18] sm:$0xff]  ;;  %v312_v48 = vpack.c.bf16 %v283_v45, %v282_v44  ;;  %v284_v52 = vld [vmem:[%s12634_s16 + $0x30] sm:$0xff]  ;;  %v286_v58 = vld [vmem:[%s12634_s16 + $0x40] sm:$0xff] }
  0x23   : > { %10720 = vmatpush3.bf16.msra.mxu1 %v12053_v11  ;;  %v311_v43 = vpack.c.bf16 %v281_v41, %v280_v38  ;;  %v285_v53 = vld [vmem:[%s12634_s16 + $0x38] sm:$0xff]  ;;  %v287_v59 = vld [vmem:[%s12634_s16 + $0x48] sm:$0xff]  ;;  %v288_v0 = vld [vmem:[%s12634_s16 + $0x50] sm:$0xff] }
  0x24   : > { %10721 = vmatprep.subr.bf16.mxu1 %v12056_v14  ;;  %v390_v39 = vrot.slane %v327_v34, 7  ;;  %v486_v40 = vrot.slane %v391_v35, 7  ;;  %v333_v55 = vshrl.u32 %v312_v48, 16  ;;  %v399_v56 = vshll.u32 %v312_v48, 16  ;;  %v289_v1 = vld [vmem:[%s12634_s16 + $0x58] sm:$0xff]  ;;  %vm12744_vm5 = vmor %vm841_vm3, %vm842_vm4 }
  0x25   : > { %10584 = vmatpush3.bf16.msra.mxu0 %v12059_v17  ;;  %v330_v50 = vshrl.u32 %v311_v43, 16  ;;  %v395_v51 = vshll.u32 %v311_v43, 16  ;;  %v313_v57 = vpack.c.bf16 %v285_v53, %v284_v52  ;;  %v12679_v8 = vpack.c.bf16 %v287_v59, %v286_v58  ;;  %vm13413_vm8 = vmor %vm1276_vm6, %vm1277_vm7 }
  0x26   : > { %10585 = vmatprep.subr.bf16.mxu0 %v12062_v20  ;;  %v393_v46 = vor.u32 %v391_v35, %v390_v39  ;;  %v537_v47 = vsel %vm12644_vm2, %v390_v39, %v486_v40  ;;  %v398_v2 = vrot.slane %v333_v55, 7  ;;  %v488_v3 = vrot.slane %v399_v56, 7  ;;  %v292_v35 = vld [vmem:[%s12634_s16 + $0x70] sm:$0xff]  ;;  %v293_v40 = vld [vmem:[%s12634_s16 + $0x78] sm:$0xff] }
  0x27   : > { %10722 = vmatpush3.bf16.msra.mxu1 %v12057_v15  ;;  %v9944_v49 = vcombine.low %v537_v47, %v537_v47  ;;  %v394_v62 = vrot.slane %v330_v50, 7  ;;  %v487_v63 = vrot.slane %v395_v51, 7  ;;  %v336_v4 = vshrl.u32 %v313_v57, 16 }
  0x28   : > { %10723 = vmatprep.subr.bf16.mxu1 %v12060_v18  ;;  %v521_v54 = vsel %vm12644_vm2, %v327_v34, %v393_v46  ;;  %v403_v5 = vshll.u32 %v313_v57, 16  ;;  %v12681_v9 = vpack.c.bf16 %v289_v1, %v288_v0  ;;  %v401_v11 = vor.u32 %v399_v56, %v398_v2  ;;  %v12691_v18 = vld [vmem:[%s17121_s1 + $0x140] sm:$0xff]  }
  0x29   : > { %10586 = vmatpush3.bf16.msra.mxu0 %v12063_v21  ;;  %v9942_v60 = vcombine.low %v521_v54, %v521_v54  ;;  %v9943_v61 = vcombine.high %v521_v54, %v521_v54  ;;  %732 = vst [vmem:[#allocation2 + $0x14] sm:$0x1] %v9944_v49  ;;  %v397_v6 = vor.u32 %v395_v51, %v394_v62  ;;  %v402_v13 = vrot.slane %v336_v4, 7 }
  0x2a   : > { %10587 = vmatprep.subr.bf16.mxu0 %v12066_v24  ;;  %v538_v7 = vsel %vm12644_vm2, %v394_v62, %v487_v63  ;;  %v539_v12 = vsel %vm12644_vm2, %v398_v2, %v488_v3  ;;  %v489_v16 = vrot.slane %v403_v5, 7  ;;  %v339_v17 = vshrl.u32 %v12679_v8, 16 }
  0x2b   : > { %10724 = vmatpush3.bf16.msra.mxu1 %v12061_v19  ;;  %730 = vst [vmem:[#allocation2 + $0xc] sm:$0xf] %v9942_v60  ;;  %731 = vst [vmem:[#allocation2 + $0x10] sm:$0xf] %v9943_v61  ;;  %v9947_v10 = vcombine.low %v538_v7, %v538_v7  ;;  %v522_v14 = vsel %vm12644_vm2, %v330_v50, %v397_v6  ;;  %v9950_v15 = vcombine.low %v539_v12, %v539_v12 }
  0x2c   : > { %10725 = vmatprep.subr.bf16.mxu1 %v12064_v22  ;;  %v9945_v19 = vcombine.low %v522_v14, %v522_v14  ;;  %v9946_v20 = vcombine.high %v522_v14, %v522_v14  ;;  %v523_v21 = vsel %vm12644_vm2, %v333_v55, %v401_v11  ;;  %v405_v22 = vor.u32 %v403_v5, %v402_v13 }
  0x2d   : > { %10588 = vmatpush3.bf16.msra.mxu0 %v12067_v25  ;;  %735 = vst [vmem:[#allocation2 + $0x20] sm:$0x1] %v9947_v10  ;;  %v9949_v24 = vcombine.high %v523_v21, %v523_v21  ;;  %738 = vst [vmem:[#allocation2 + $0x2c] sm:$0x1] %v9950_v15  ;;  %v540_v25 = vsel %vm12644_vm2, %v402_v13, %v489_v16  ;;  %v407_v34 = vshll.u32 %v12679_v8, 16  ;;  %v342_v39 = vshrl.u32 %v12681_v9, 16 }
  0x2e   : > { %10589 = vmatprep.subr.bf16.mxu0 %v12070_v28  ;;  %v291_v28 = vld [vmem:[%s12634_s16 + $0x68] sm:$0xff]  ;;  %733 = vst [vmem:[#allocation2 + $0x18] sm:$0xf] %v9945_v19  ;;  %734 = vst [vmem:[#allocation2 + $0x1c] sm:$0xf] %v9946_v20  ;;  %v524_v31 = vsel %vm12644_vm2, %v336_v4, %v405_v22  ;;  %v12732_v56 = vpack.c.bf16 %v293_v40, %v292_v35 }
  0x2f   : > { %10726 = vmatpush3.bf16.msra.mxu1 %v12065_v23  ;;  %v9948_v23 = vcombine.low %v523_v21, %v523_v21  ;;  %737 = vst [vmem:[#allocation2 + $0x28] sm:$0xf] %v9949_v24  ;;  %v9951_v38 = vcombine.low %v524_v31, %v524_v31  ;;  %v9952_v45 = vcombine.high %v524_v31, %v524_v31 }
  0x30   : > { %10727 = vmatprep.subr.bf16.mxu1 %v12068_v26  ;;  %v12699_v26 = vrot.slane %v339_v17, 7  ;;  %v2131_v29 = vld [vmem:[#allocation2 + $0x14] sm:$0x1] }
  0x31   : > { %10590 = vmatpush3.bf16.msra.mxu0 %v12071_v33  ;;  %v12704_v30 = vld [vmem:[#allocation2 + $0x14] sm:$0x1]  ;;  %v9953_v33 = vcombine.low %v540_v25, %v540_v25  ;;  %736 = vst [vmem:[#allocation2 + $0x24] sm:$0xf] %v9948_v23  ;;  %739 = vst [vmem:[#allocation2 + $0x30] sm:$0xf] %v9951_v38 }
  0x32   : > { %10591 = vmatprep.subr.bf16.mxu0 %v12073_v36  ;;  %v2197_v36 = vshll.u32 %v2131_v29, 16  ;;  %v12713_v41 = vld [vmem:[#allocation2 + $0xc] sm:$0xf]  ;;  %v12715_v43 = vld [vmem:[#allocation2 + $0x10] sm:$0xf]  ;;  %v409_v46 = vor.u32 %v407_v34, %v12699_v26 }
  0x33   : > { %10728 = vmatpush3.bf16.msra.mxu1 %v12069_v27  ;;  %v290_v27 = vld [vmem:[%s12634_s16 + $0x60] sm:$0xff]  ;;  %v12717_v44 = vld [vmem:[#allocation2 + $0xc] sm:$0xf]  ;;  %741 = vst [vmem:[#allocation2 + $0x38] sm:$0x1] %v9953_v33  ;;  %v2178_v48 = vshrl.u32 %v12713_v41, 16  ;;  %v10094_v5 = vcombine.low %v12713_v41, %v12715_v43 }
  0x34   : > { %11441 = vmatprep.subr.bf16.mxu1 %v12691_v18  ;;  %v12722_v47 = vpack.c.bf16 %v291_v28, %v290_v27  ;;  %v2181_v49 = vshll.u32 %v12713_v41, 16  ;;  %v2187_v50 = vshll.u32 %v12715_v43, 16  ;;  %v2191_v51 = vshrl.u32 %v12715_v43, 16  ;;  %v12728_v52 = vld [vmem:[#allocation2 + $0x10] sm:$0xf] }
  0x35   : > { %10592 = vmatpush3.bf16.msra.mxu0 %v12074_v37  ;;  %v888_v37 = vshll.u32 %v12704_v30, 16  ;;  %v2199_v53 = vrot.slane %v2197_v36, 5  ;;  %v869_v54 = vshrl.u32 %v12717_v44, 16  ;;  %v872_v55 = vshll.u32 %v12717_v44, 16  ;;  %740 = vst [vmem:[#allocation2 + $0x34] sm:$0xf] %v9952_v45 }
  0x36   : > { %11393 = vmatprep.subr.bf16.mxu0 %v12662_v42  ;;  %v2180_v57 = vrot.slane %v2178_v48, 4  ;;  %v2183_v58 = vrot.slane %v2181_v49, 5  ;;  %v2189_v59 = vrot.slane %v2187_v50, 5  ;;  %v2193_v60 = vrot.slane %v2191_v51, 4  ;;  %v781_v61 = vld [vmem:[#allocation2 + $0x20] sm:$0x1] }
  0x37   : > { %784 = vst [vmem:[#allocation2 + $0x8] sm:$0x1] %v781_v61  ;;  %v2134_v62 = vld [vmem:[#allocation2 + $0x20] sm:$0x1]  ;;  %v871_v63 = vrot.slane %v869_v54, 4  ;;  %v874_v0 = vrot.slane %v872_v55, 5  ;;  %v10007_v11 = vcombine.low %v12717_v44, %v12728_v52  ;;  %v12756_v19 = vsel %vm12644_vm2, %v339_v17, %v409_v46 }
  0x38   : > { %v878_v1 = vshll.u32 %v12728_v52, 16  ;;  %v882_v2 = vshrl.u32 %v12728_v52, 16  ;;  %v2184_v3 = vor.u32 %v2183_v58, %v2180_v57  ;;  %v2194_v4 = vor.u32 %v2193_v60, %v2189_v59  ;;  %v779_v6 = vld [vmem:[#allocation2 + $0x18] sm:$0xf]  ;;  %v780_v7 = vld [vmem:[#allocation2 + $0x1c] sm:$0xf] }
  0x39   : > { %v12738_v10 = vld [vmem:[#allocation2 + $0x18] sm:$0xf]  ;;  %782 = vst [vmem:[#allocation2] sm:$0xf] %v779_v6  ;;  %783 = vst [vmem:[#allocation2 + $0x4] sm:$0xf] %v780_v7  ;;  %v875_v40 = vor.u32 %v874_v0, %v871_v63 }
  0x3a   : > { %v12748_v13 = vld [vmem:[#allocation2 + $0x1c] sm:$0xf]  ;;  %v2202_v14 = vshrl.u32 %v12738_v10, 16  ;;  %v2205_v15 = vshll.u32 %v12738_v10, 16  ;;  %v2221_v16 = vshll.u32 %v2134_v62, 16  ;;  %v2185_v20 = vrot.slane %v2184_v3, 4 }
  0x3b   : > { %v2195_v21 = vrot.slane %v2194_v4, 4  ;;  %v2211_v22 = vshll.u32 %v12748_v13, 16  ;;  %v2215_v23 = vshrl.u32 %v12748_v13, 16  ;;  %v10095_v28 = vcombine.low %v12738_v10, %v12748_v13  ;;  %v12762_v29 = vld [vmem:[#allocation2 + $0x24] sm:$0xf]  ;;  %v12099_v50 = vld [vmem:[%s17121_s1 + $0x148] sm:$0xff]  }
  0x3c   : > { %v2204_v24 = vrot.slane %v2202_v14, 4  ;;  %v2207_v25 = vrot.slane %v2205_v15, 5  ;;  %v2223_v27 = vrot.slane %v2221_v16, 5  ;;  %v2190_v31 = vsel %vm12744_vm5, %v2185_v20, %v2189_v59  ;;  %v12774_v55 = vld [vmem:[#allocation2 + $0x28] sm:$0xf] }
  0x3d   : > { %v2200_v17 = vsel %vm12744_vm5, %v2195_v21, %v2199_v53  ;;  %v2213_v33 = vrot.slane %v2211_v22, 5  ;;  %v2217_v35 = vrot.slane %v2215_v23, 4  ;;  %v880_v41 = vrot.slane %v878_v1, 5  ;;  %v2137_v6 = vld [vmem:[#allocation2 + $0x2c] sm:$0x1] }
  0x3e   : > { %v10110_v36 = vcombine.low %v2190_v31, %v2200_v17  ;;  %v2208_v38 = vor.u32 %v2207_v25, %v2204_v24  ;;  %v795_v43 = vld [vmem:[#allocation2 + $0x8] sm:$0x1]  ;;  %v884_v46 = vrot.slane %v882_v2, 4  ;;  %v890_v48 = vrot.slane %v888_v37, 5  ;;  %v12794_v20 = vld [vmem:[#allocation2 + $0x18] sm:$0xf] }
  0x3f   : > { %v2218_v45 = vor.u32 %v2217_v35, %v2213_v33  ;;  %v2226_v49 = vshrl.u32 %v12762_v29, 16  ;;  %v864_v51 = vshll.u32 %v795_v43, 16  ;;  %v876_v54 = vrot.slane %v875_v40, 4  ;;  %v12800_v17 = vld [vmem:[#allocation2 + $0x1c] sm:$0xf] }
  0x40   : > { %3137 = vmatprep.mubr.bf16.mxu1 %v10110_v36  ;;  %v2209_v53 = vrot.slane %v2208_v38, 4  ;;  %v2229_v57 = vshll.u32 %v12762_v29, 16  ;;  %v12777_v58 = vld [vmem:[#allocation2] sm:$0xf]  ;;  %v12779_v59 = vld [vmem:[#allocation2 + $0x4] sm:$0xf]  ;;  %v885_v37 = vor.u32 %v884_v46, %v880_v41  ;;  %v10096_v61 = vcombine.low %v12762_v29, %v12774_v55 }
  0x41   : > { %3138 = vmatmul.mubr.bf16.vlgmr.msra.gmra.mrb[0].mxu1 %v10094_v5  ;;  %v2219_v30 = vrot.slane %v2218_v45, 4  ;;  %v2228_v60 = vrot.slane %v2226_v49, 4  ;;  %v845_v62 = vshrl.u32 %v12777_v58, 16  ;;  %v848_v63 = vshll.u32 %v12777_v58, 16  ;;  %v801_v38 = vld [vmem:[#allocation2 + $0x20] sm:$0x1] }
  0x42   : > { %v854_v0 = vshll.u32 %v12779_v59, 16  ;;  %v858_v1 = vshrl.u32 %v12779_v59, 16  ;;  %11442 = vmatpush3.bf16.msra.mxu1 %v12691_v18  ;;  %v866_v2 = vrot.slane %v864_v51, 5  ;;  %v2214_v3 = vsel %vm12744_vm5, %v2209_v53, %v2213_v33  ;;  %v12105_v51 = vld [vmem:[%s17121_s1 + $0x150] sm:$0xff]   ;;  %v12090_v29 = vld [vmem:[%s17121_s1 + $0x98] sm:$0xff]  }
  0x43   : > { %v2224_v4 = vsel %vm12744_vm5, %v2219_v30, %v2223_v27  ;;  %v10006_v5 = vcombine.low %v12777_v58, %v12779_v59  ;;  %11443 = vmatprep.subr.bf16.mxu1 %v12099_v50  ;;  %v847_v7 = vrot.slane %v845_v62, 4  ;;  %v850_v14 = vrot.slane %v848_v63, 5  ;;  %v12080_v62 = vld [vmem:[%s17121_s1 + $0x88] sm:$0xff]  }
  0x44   : > { %v856_v15 = vrot.slane %v854_v0, 5  ;;  %v860_v16 = vrot.slane %v858_v1, 4  ;;  %v10111_v21 = vcombine.low %v2214_v3, %v2224_v4  ;;  %v881_v18 = vsel %vm12744_vm5, %v876_v54, %v880_v41  ;;  %v12805_v41 = vld [vmem:[#allocation2 + $0x30] sm:$0xf] }
  0x45   : > { %v886_v22 = vrot.slane %v885_v37, 4  ;;  %v2231_v23 = vrot.slane %v2229_v57, 5  ;;  %v851_v24 = vor.u32 %v850_v14, %v847_v7  ;;  %v2235_v27 = vshll.u32 %v12774_v55, 16  ;;  %v12819_v37 = vld [vmem:[#allocation2 + $0x34] sm:$0xf] }
  0x46   : > { %v861_v25 = vor.u32 %v860_v16, %v856_v15  ;;  %v2239_v31 = vshrl.u32 %v12774_v55, 16  ;;  %11444 = vmatpush3.bf16.msra.mxu1 %v12099_v50  ;;  %3145 = vmatprep.mubr.bf16.mxu1 %v10111_v21  ;;  %v2245_v36 = vshll.u32 %v2137_v6, 16  ;;  %v893_v40 = vshrl.u32 %v12794_v20, 16 }
  0x47   : > { %v891_v33 = vsel %vm12744_vm5, %v886_v22, %v890_v48  ;;  %v2232_v35 = vor.u32 %v2231_v23, %v2228_v60  ;;  %v852_v43 = vrot.slane %v851_v24, 4  ;;  %v2237_v49 = vrot.slane %v2235_v27, 5  ;;  %11445 = vmatprep.subr.bf16.mxu1 %v12105_v51  ;;  %v12833_v23 = vld [vmem:[#allocation2 + $0x28] sm:$0xf] }
  0x48   : > { %v862_v45 = vrot.slane %v861_v25, 4  ;;  %v10023_v46 = vcombine.low %v881_v18, %v891_v33  ;;  %v2241_v50 = vrot.slane %v2239_v31, 4  ;;  %v2247_v53 = vrot.slane %v2245_v36, 5 }
  0x49   : > { %3146 = vmatmul.mubr.bf16.gmra.mrb[4].mxu1 %v10095_v28  ;;  %v2233_v48 = vrot.slane %v2232_v35, 4  ;;  %v895_v54 = vrot.slane %v893_v40, 4  ;;  %v857_v57 = vsel %vm12744_vm5, %v852_v43, %v856_v15  ;;  %v896_v59 = vshll.u32 %v12794_v20, 16  ;;  %v12830_v15 = vld [vmem:[#allocation2 + $0x24] sm:$0xf]  ;;  %v12085_v40 = vld [vmem:[%s17121_s1 + $0x90] sm:$0xff]  }
  0x4a   : > { %v867_v58 = vsel %vm12744_vm5, %v862_v45, %v866_v2  ;;  %v902_v30 = vshll.u32 %v12800_v17, 16  ;;  %v2242_v13 = vor.u32 %v2241_v50, %v2237_v49  ;;  %v906_v28 = vshrl.u32 %v12800_v17, 16  ;;  %11446 = vmatpush3.bf16.msra.mxu1 %v12105_v51  ;;  %v2140_v2 = vld [vmem:[#allocation2 + $0x38] sm:$0x1] }
  0x4b   : > { %v10022_v60 = vcombine.low %v857_v57, %v867_v58  ;;  %v2238_v10 = vsel %vm12744_vm5, %v2233_v48, %v2237_v49  ;;  %v898_v63 = vrot.slane %v896_v59, 5  ;;  %v912_v1 = vshll.u32 %v801_v38, 16  ;;  %v804_v38 = vld [vmem:[#allocation2 + $0x2c] sm:$0x1]  ;;  %v12855_v58 = vld [vmem:[#allocation2 + $0x30] sm:$0xf] }
  0x4c   : > { %v904_v0 = vrot.slane %v902_v30, 5  ;;  %v2250_v3 = vshrl.u32 %v12805_v41, 16  ;;  %v2243_v4 = vrot.slane %v2242_v13, 4  ;;  %v908_v6 = vrot.slane %v906_v28, 4 }
  0x4d   : > { %1807 = vmatprep.mubr.bf16.mxu0 %v10022_v60  ;;  %v2253_v7 = vshll.u32 %v12805_v41, 16  ;;  %v2259_v14 = vshll.u32 %v12819_v37, 16  ;;  %v899_v16 = vor.u32 %v898_v63, %v895_v54  ;;  %v914_v21 = vrot.slane %v912_v1, 5 }
  0x4e   : > { %1808 = vmatmul.mubr.bf16.vlgmr.msra.gmra.mrb[0].mxu0 %v10006_v5  ;;  %v2252_v18 = vrot.slane %v2250_v3, 4  ;;  %v2263_v22 = vshrl.u32 %v12819_v37, 16  ;;  %v2248_v24 = vsel %vm12744_vm5, %v2243_v4, %v2247_v53  ;;  %v909_v25 = vor.u32 %v908_v6, %v904_v0  ;;  %v12111_v3 = vld [vmem:[%s17121_s1 + $0x158] sm:$0xff]  }
  0x4f   : > { %11394 = vmatpush3.bf16.msra.mxu0 %v12662_v42  ;;  %1815 = vmatprep.mubr.bf16.mxu0 %v10023_v46  ;;  %v2255_v27 = vrot.slane %v2253_v7, 5  ;;  %v2261_v31 = vrot.slane %v2259_v14, 5  ;;  %v10112_v33 = vcombine.low %v2238_v10, %v2248_v24  ;;  %v900_v35 = vrot.slane %v899_v16, 4  ;;  %v12858_v10 = vld [vmem:[#allocation2 + $0x34] sm:$0xf] }
  0x50   : > { %11395 = vmatprep.subr.bf16.mxu0 %v12080_v62  ;;  %v2265_v5 = vrot.slane %v2263_v22, 4  ;;  %v2269_v36 = vshll.u32 %v2140_v2, 16  ;;  %v910_v43 = vrot.slane %v909_v25, 4  ;;  %v10008_v42 = vcombine.low %v12794_v20, %v12800_v17  ;;  %v12096_v2 = vld [vmem:[%s17121_s1 + $0xa0] sm:$0xff]   ;;  %v807_v4 = vld [vmem:[#allocation2 + $0x38] sm:$0x1]  ;;  %11447 = vmatprep.subr.bf16.mxu1 %v12111_v3 }
  0x51   : > { %v2256_v45 = vor.u32 %v2255_v27, %v2252_v18  ;;  %v10097_v46 = vcombine.low %v12805_v41, %v12819_v37  ;;  %3153 = vmatprep.mubr.bf16.mxu1 %v10112_v33  ;;  %v905_v49 = vsel %vm12744_vm5, %v900_v35, %v904_v0  ;;  %v917_v50 = vshrl.u32 %v12830_v15, 16  ;;  %11448 = vmatpush3.bf16.msra.mxu1 %v12111_v3  ;;  %v294_v35 = vld [vmem:[%s12634_s16 + $0x80] sm:$0xff] }
  0x52   : > { %v2266_v51 = vor.u32 %v2265_v5, %v2261_v31  ;;  %v2271_v48 = vrot.slane %v2269_v36, 5  ;;  %3154 = vmatmul.mubr.bf16.gmra.mrb[8].mxu1 %v10096_v61  ;;  %v915_v53 = vsel %vm12744_vm5, %v910_v43, %v914_v21  ;;  %v920_v57 = vshll.u32 %v12830_v15, 16  ;;  %v295_v43 = vld [vmem:[%s12634_s16 + $0x88] sm:$0xff] }
  0x53   : > { %v2257_v54 = vrot.slane %v2256_v45, 4  ;;  %11396 = vmatpush3.bf16.msra.mxu0 %v12080_v62  ;;  %v926_v41 = vshll.u32 %v12833_v23, 16  ;;  %v10024_v59 = vcombine.low %v905_v49, %v915_v53  ;;  %v919_v37 = vrot.slane %v917_v50, 4  ;;  %v12102_v45 = vld [vmem:[%s17121_s1 + $0xa8] sm:$0xff]  }
  0x54   : > { %v2267_v30 = vrot.slane %v2266_v51, 4  ;;  %v930_v60 = vshrl.u32 %v12833_v23, 16  ;;  %11397 = vmatprep.subr.bf16.mxu0 %v12085_v40  ;;  %v922_v61 = vrot.slane %v920_v57, 5  ;;  %v936_v28 = vshll.u32 %v804_v38, 16 }
  0x55   : > { %v2262_v55 = vsel %vm12744_vm5, %v2257_v54, %v2261_v31  ;;  %v928_v13 = vrot.slane %v926_v41, 5  ;;  %v490_v0 = vrot.slane %v407_v34, 7  ;;  %v9954_v1 = vcombine.low %v12756_v19, %v12756_v19 }
  0x56   : > { %1816 = vmatmul.mubr.bf16.gmra.mrb[4].mxu0 %v10007_v11  ;;  %v2272_v62 = vsel %vm12744_vm5, %v2267_v30, %v2271_v48  ;;  %v932_v63 = vrot.slane %v930_v60, 4  ;;  %v923_v52 = vor.u32 %v922_v61, %v919_v37  ;;  %v9955_v11 = vcombine.high %v12756_v19, %v12756_v19 }
  0x57   : > { %1823 = vmatprep.mubr.bf16.mxu0 %v10024_v59  ;;  %v10113_v44 = vcombine.low %v2262_v55, %v2272_v62  ;;  %11398 = vmatpush3.bf16.msra.mxu0 %v12085_v40  ;;  %v938_v34 = vrot.slane %v936_v28, 5  ;;  %v541_v6 = vsel %vm12644_vm2, %v12699_v26, %v490_v0  ;;  %742 = vst [vmem:[#allocation2 + $0x3c] sm:$0xf] %v9954_v1  ;;  %v941_v7 = vshrl.u32 %v12855_v58, 16  ;;  %v12108_v55 = vld [vmem:[%s17121_s1 + $0xb0] sm:$0xff]  }
  0x58   : > { %v933_v8 = vor.u32 %v932_v63, %v928_v13  ;;  %11399 = vmatprep.subr.bf16.mxu0 %v12090_v29  ;;  %v924_v14 = vrot.slane %v923_v52, 4  ;;  %v9956_v16 = vcombine.low %v541_v6, %v541_v6  ;;  %743 = vst [vmem:[#allocation2 + $0x40] sm:$0xf] %v9955_v11  ;;  %v944_v19 = vshll.u32 %v12855_v58, 16 }
  0x59   : > { %3161 = vmatprep.mubr.bf16.mxu1 %v10113_v44  ;;  %v950_v21 = vshll.u32 %v12858_v10, 16  ;;  %v943_v22 = vrot.slane %v941_v7, 4  ;;  %v954_v26 = vshrl.u32 %v12858_v10, 16  ;;  %v960_v24 = vshll.u32 %v807_v4, 16 }
  0x5a   : > { %v934_v18 = vrot.slane %v933_v8, 4  ;;  %3162 = vmatmul.mubr.bf16.gmra.mrb[12].mxu1 %v10097_v46  ;;  %v929_v25 = vsel %vm12744_vm5, %v924_v14, %v928_v13  ;;  %744 = vst [vmem:[#allocation2 + $0x44] sm:$0x1] %v9956_v16  ;;  %v946_v27 = vrot.slane %v944_v19, 5  ;;  %v410_v33 = vrot.slane %v342_v39, 7  ;;  %v12114_v14 = vld [vmem:[%s17121_s1 + $0x160] sm:$0xff]  }
  0x5b   : > { %v952_v31 = vrot.slane %v950_v21, 5  ;;  %11400 = vmatpush3.bf16.msra.mxu0 %v12090_v29  ;;  %v10009_v36 = vcombine.low %v12830_v15, %v12833_v23  ;;  %v956_v38 = vrot.slane %v954_v26, 4  ;;  %v411_v40 = vshll.u32 %v12681_v9, 16  ;;  %11449 = vmatprep.subr.bf16.mxu1 %v12114_v14 }
  0x5c   : > { %v939_v5 = vsel %vm12744_vm5, %v934_v18, %v938_v34  ;;  %11401 = vmatprep.subr.bf16.mxu0 %v12096_v2  ;;  %v947_v49 = vor.u32 %v946_v27, %v943_v22  ;;  %v962_v51 = vrot.slane %v960_v24, 5  ;;  %v345_v48 = vshrl.u32 %v12722_v47, 16  ;;  %v12115_v27 = vld [vmem:[%s17121_s1 + $0x168] sm:$0xff]   ;;  %11450 = vmatpush3.bf16.msra.mxu1 %v12114_v14 }
  0x5d   : > { %v10025_v46 = vcombine.low %v929_v25, %v939_v5  ;;  %v957_v50 = vor.u32 %v956_v38, %v952_v31  ;;  %v413_v15 = vor.u32 %v411_v40, %v410_v33  ;;  %v491_v23 = vrot.slane %v411_v40, 7  ;;  %11451 = vmatprep.subr.bf16.mxu1 %v12115_v27 }
  0x5e   : > { %1824 = vmatmul.mubr.bf16.gmra.mrb[8].mxu0 %v10008_v42  ;;  %v10010_v53 = vcombine.low %v12855_v58, %v12858_v10  ;;  %v12909_v54 = vld [vmem:[#allocation2 + $0x3c] sm:$0xf]  ;;  %v948_v57 = vrot.slane %v947_v49, 4  ;;  %v12913_v41 = vrot.slane %v345_v48, 7  ;;  %v415_v59 = vshll.u32 %v12722_v47, 16 }
  0x5f   : > { %1831 = vmatprep.mubr.bf16.mxu0 %v10025_v46  ;;  %v12916_v30 = vpack.c.bf16 %v295_v43, %v294_v35  ;;  %11402 = vmatpush3.bf16.msra.mxu0 %v12096_v2  ;;  %v12918_v20 = vld [vmem:[#allocation2 + $0x40] sm:$0xf]  ;;  %v2274_v17 = vshrl.u32 %v12909_v54, 16  ;;  %v2277_v42 = vshll.u32 %v12909_v54, 16  ;;  %v958_v37 = vrot.slane %v957_v50, 4  ;;  %v296_v46 = vld [vmem:[%s12634_s16 + $0x90] sm:$0xff] }
  0x60   : > { %v526_v60 = vsel %vm12644_vm2, %v342_v39, %v413_v15  ;;  %v12926_v29 = vld [vmem:[#allocation2 + $0x3c] sm:$0xf]  ;;  %11403 = vmatprep.subr.bf16.mxu0 %v12102_v45  ;;  %v2283_v61 = vshll.u32 %v12918_v20, 16  ;;  %v2287_v13 = vshrl.u32 %v12918_v20, 16  ;;  %v10098_v28 = vcombine.low %v12909_v54, %v12918_v20  ;;  %v12937_v62 = vld [vmem:[#allocation2 + $0x40] sm:$0xf]  ;;  %11452 = vmatpush3.bf16.msra.mxu1 %v12115_v27 }
  0x61   : > { %v953_v9 = vsel %vm12744_vm5, %v948_v57, %v952_v31  ;;  %v2143_v39 = vld [vmem:[#allocation2 + $0x44] sm:$0x1]  ;;  %v2276_v63 = vrot.slane %v2274_v17, 4  ;;  %v2279_v0 = vrot.slane %v2277_v42, 5  ;;  %v963_v1 = vsel %vm12744_vm5, %v958_v37, %v962_v51  ;;  %v12116_v31 = vld [vmem:[%s17121_s1 + $0xb8] sm:$0xff]   ;;  %v299_v17 = vld [vmem:[%s12634_s16 + $0xa8] sm:$0xff] }
  0x62   : > { %v542_v2 = vsel %vm12644_vm2, %v410_v33, %v491_v23  ;;  %v810_v3 = vld [vmem:[#allocation2 + $0x44] sm:$0x1]  ;;  %v2285_v44 = vrot.slane %v2283_v61, 5  ;;  %v2289_v52 = vrot.slane %v2287_v13, 4  ;;  %v2293_v11 = vshll.u32 %v2143_v39, 16  ;;  %v297_v49 = vld [vmem:[%s12634_s16 + $0x98] sm:$0xff] }
  0x63   : > { %v10026_v4 = vcombine.low %v953_v9, %v963_v1  ;;  %11404 = vmatpush3.bf16.msra.mxu0 %v12102_v45  ;;  %v2280_v8 = vor.u32 %v2279_v0, %v2276_v63  ;;  %v9957_v34 = vcombine.low %v526_v60, %v526_v60  ;;  %v9958_v6 = vcombine.high %v526_v60, %v526_v60  ;;  %v298_v51 = vld [vmem:[%s12634_s16 + $0xa0] sm:$0xff]  ;;  %v300_v61 = vld [vmem:[%s12634_s16 + $0xb0] sm:$0xff]  ;;  %v301_v13 = vld [vmem:[%s12634_s16 + $0xb8] sm:$0xff] }
  0x64   : > { %v9959_v7 = vcombine.low %v542_v2, %v542_v2  ;;  %11405 = vmatprep.subr.bf16.mxu0 %v12108_v55  ;;  %v2290_v16 = vor.u32 %v2289_v52, %v2285_v44  ;;  %v2295_v19 = vrot.slane %v2293_v11, 5  ;;  %v965_v21 = vshrl.u32 %v12926_v29, 16  ;;  %v12119_v1 = vld [vmem:[%s17121_s1 + $0x170] sm:$0xff]   ;;  %v12120_v10 = vld [vmem:[%s17121_s1 + $0x178] sm:$0xff]  }
  0x65   : > { %v968_v18 = vshll.u32 %v12926_v29, 16  ;;  %v2281_v22 = vrot.slane %v2280_v8, 4  ;;  %745 = vst [vmem:[#allocation2 + $0x48] sm:$0xf] %v9957_v34  ;;  %746 = vst [vmem:[#allocation2 + $0x4c] sm:$0xf] %v9958_v6  ;;  %v10011_v52 = vcombine.low %v12926_v29, %v12937_v62  ;;  %v12999_v11 = vpack.c.bf16 %v297_v49, %v296_v46  ;;  %11453 = vmatprep.subr.bf16.mxu1 %v12119_v1 }
  0x66   : > { %1832 = vmatmul.mubr.bf16.gmra.mrb[12].mxu0 %v10009_v36  ;;  %747 = vst [vmem:[#allocation2 + $0x50] sm:$0x1] %v9959_v7  ;;  %v974_v26 = vshll.u32 %v12937_v62, 16  ;;  %v978_v24 = vshrl.u32 %v12937_v62, 16  ;;  %v984_v25 = vshll.u32 %v810_v3, 16  ;;  %v2291_v33 = vrot.slane %v2290_v16, 4  ;;  %11454 = vmatpush3.bf16.msra.mxu1 %v12119_v1 }
  0x67   : > { %1839 = vmatprep.mubr.bf16.mxu0 %v10026_v4  ;;  %v967_v35 = vrot.slane %v965_v21, 4  ;;  %v970_v5 = vrot.slane %v968_v18, 5  ;;  %v417_v36 = vor.u32 %v415_v59, %v12913_v41  ;;  %11406 = vmatpush3.bf16.msra.mxu0 %v12108_v55  ;;  %v2286_v38 = vsel %vm12744_vm5, %v2281_v22, %v2285_v44  ;;  %v12122_v1 = vld [vmem:[%s17121_s1 + $0x1c0] sm:$0xff]  }
  0x68   : > { %v12961_v40 = vrot.slane %v974_v26, 5  ;;  %v980_v43 = vrot.slane %v978_v24, 4  ;;  %v986_v45 = vrot.slane %v984_v25, 5  ;;  %11407 = vmatprep.subr.bf16.mxu0 %v12116_v31  ;;  %v2296_v50 = vsel %vm12744_vm5, %v2291_v33, %v2295_v19  ;;  %11455 = vmatprep.subr.bf16.mxu1 %v12120_v10 }
  0x69   : > { %v971_v15 = vor.u32 %v970_v5, %v967_v35  ;;  %v492_v23 = vrot.slane %v415_v59, 7  ;;  %v527_v57 = vsel %vm12644_vm2, %v345_v48, %v417_v36  ;;  %v10114_v42 = vcombine.low %v2286_v38, %v2296_v50 }
  0x6a   : > { %v981_v37 = vor.u32 %v980_v43, %v12961_v40  ;;  %v9960_v60 = vcombine.low %v527_v57, %v527_v57  ;;  %v9961_v55 = vcombine.high %v527_v57, %v527_v57  ;;  %v348_v59 = vshrl.u32 %v12732_v56, 16  ;;  %11456 = vmatpush3.bf16.msra.mxu1 %v12120_v10  ;;  %v302_v10 = vld [vmem:[%s12634_s16 + $0xc0] sm:$0xff] }
  0x6b   : > { %v972_v9 = vrot.slane %v971_v15, 4  ;;  %v543_v39 = vsel %vm12644_vm2, %v12913_v41, %v492_v23  ;;  %11408 = vmatpush3.bf16.msra.mxu0 %v12116_v31  ;;  %3169 = vmatprep.mubr.bf16.mxu1 %v10114_v42  ;;  %v419_v63 = vshll.u32 %v12732_v56, 16  ;;  %v351_v0 = vshrl.u32 %v12916_v30, 16 }
  0x6c   : > { %v982_v47 = vrot.slane %v981_v37, 4  ;;  %v9962_v48 = vcombine.low %v543_v39, %v543_v39  ;;  %748 = vst [vmem:[#allocation2 + $0x54] sm:$0xf] %v9960_v60  ;;  %749 = vst [vmem:[#allocation2 + $0x58] sm:$0xf] %v9961_v55  ;;  %3170 = vmatmul.mubr.bf16.gmra.mrb[16].mxu1 %v10098_v28  ;;  %v13001_v4 = vpack.c.bf16 %v299_v17, %v298_v51  ;;  %10849 = vmatprep.subr.bf16.mxu0 %v12122_v1 }
  0x6d   : > { %v12990_v41 = vld [vmem:[#allocation2 + $0x48] sm:$0xf]  ;;  %v12992_v2 = vld [vmem:[#allocation2 + $0x4c] sm:$0xf]  ;;  %v2146_v3 = vld [vmem:[#allocation2 + $0x50] sm:$0x1]  ;;  %v977_v44 = vsel %vm12744_vm5, %v972_v9, %v12961_v40  ;;  %v13017_v16 = vpack.c.bf16 %v301_v13, %v300_v61 }
  0x6e   : > { %v2298_v8 = vshrl.u32 %v12990_v41, 16  ;;  %v2301_v54 = vshll.u32 %v12990_v41, 16  ;;  %v2307_v20 = vshll.u32 %v12992_v2, 16  ;;  %v2311_v28 = vshrl.u32 %v12992_v2, 16  ;;  %1840 = vmatmul.mubr.bf16.gmra.mrb[16].mxu0 %v10010_v53  ;;  %750 = vst [vmem:[#allocation2 + $0x5c] sm:$0x1] %v9962_v48 }
  0x6f   : > { %v13010_v34 = vld [vmem:[#allocation2 + $0x48] sm:$0xf]  ;;  %v2317_v29 = vshll.u32 %v2146_v3, 16  ;;  %v987_v62 = vsel %vm12744_vm5, %v982_v47, %v986_v45  ;;  %v13014_v6 = vld [vmem:[#allocation2 + $0x4c] sm:$0xf]  ;;  %v10099_v35 = vcombine.low %v12990_v41, %v12992_v2 }
  0x70   : > { %v813_v7 = vld [vmem:[#allocation2 + $0x50] sm:$0x1]  ;;  %v989_v14 = vshrl.u32 %v13010_v34, 16  ;;  %v2300_v19 = vrot.slane %v2298_v8, 4  ;;  %v2303_v21 = vrot.slane %v2301_v54, 5  ;;  %v2309_v18 = vrot.slane %v2307_v20, 5 }
  0x71   : > { %v2313_v58 = vrot.slane %v2311_v28, 4  ;;  %v2319_v53 = vrot.slane %v2317_v29, 5  ;;  %v10027_v22 = vcombine.low %v977_v44, %v987_v62  ;;  %v992_v24 = vshll.u32 %v13010_v34, 16 }
  0x72   : > { %v991_v26 = vrot.slane %v989_v14, 4  ;;  %v2304_v25 = vor.u32 %v2303_v21, %v2300_v19  ;;  %v998_v31 = vshll.u32 %v13014_v6, 16  ;;  %v1002_v33 = vshrl.u32 %v13014_v6, 16 }
  0x73   : > { %v2314_v27 = vor.u32 %v2313_v58, %v2309_v18  ;;  %1847 = vmatprep.mubr.bf16.mxu0 %v10027_v22  ;;  %v13027_v5 = vld [vmem:[#allocation2 + $0x54] sm:$0xf]  ;;  %v13029_v36 = vld [vmem:[#allocation2 + $0x58] sm:$0xf]  ;;  %v994_v38 = vrot.slane %v992_v24, 5  ;;  %v1008_v40 = vshll.u32 %v813_v7, 16  ;;  %v10012_v43 = vcombine.low %v13010_v34, %v13014_v6 }
  0x74   : > { %v2305_v45 = vrot.slane %v2304_v25, 4  ;;  %v2322_v49 = vshrl.u32 %v13027_v5, 16  ;;  %v2325_v51 = vshll.u32 %v13027_v5, 16  ;;  %v2331_v15 = vshll.u32 %v13029_v36, 16  ;;  %v13043_v61 = vld [vmem:[#allocation2 + $0x54] sm:$0xf] }
  0x75   : > { %v2315_v46 = vrot.slane %v2314_v27, 4  ;;  %v2149_v50 = vld [vmem:[#allocation2 + $0x5c] sm:$0x1]  ;;  %v2335_v23 = vshrl.u32 %v13029_v36, 16  ;;  %v10100_v57 = vcombine.low %v13027_v5, %v13029_v36  ;;  %v995_v17 = vor.u32 %v994_v38, %v991_v26  ;;  %v13045_v48 = vld [vmem:[#allocation2 + $0x58] sm:$0xf] }
  0x76   : > { %v2310_v42 = vsel %vm12744_vm5, %v2305_v45, %v2309_v18  ;;  %v2324_v60 = vrot.slane %v2322_v49, 4  ;;  %v2327_v55 = vrot.slane %v2325_v51, 5  ;;  %1848 = vmatmul.mubr.bf16.gmra.mrb[20].mxu0 %v10011_v52  ;;  %v2333_v9 = vrot.slane %v2331_v15, 5  ;;  %v816_v21 = vld [vmem:[#allocation2 + $0x5c] sm:$0x1] }
  0x77   : > { %v2320_v37 = vsel %vm12744_vm5, %v2315_v46, %v2319_v53  ;;  %v2337_v39 = vrot.slane %v2335_v23, 4  ;;  %v2341_v47 = vshll.u32 %v2149_v50, 16  ;;  %v996_v2 = vrot.slane %v995_v17, 4 }
  0x78   : > { %v10115_v13 = vcombine.low %v2310_v42, %v2320_v37  ;;  %v2328_v41 = vor.u32 %v2327_v55, %v2324_v60  ;;  %v1000_v3 = vrot.slane %v998_v31, 5  ;;  %v1004_v44 = vrot.slane %v1002_v33, 4  ;;  %v303_v33 = vld [vmem:[%s12634_s16 + $0xc8] sm:$0xff] }
  0x79   : > { %v2338_v8 = vor.u32 %v2337_v39, %v2333_v9  ;;  %v2343_v52 = vrot.slane %v2341_v47, 5  ;;  %v1010_v54 = vrot.slane %v1008_v40, 5  ;;  %v418_v20 = vrot.slane %v348_v59, 7 }
  0x7a   : > { %3177 = vmatprep.mubr.bf16.mxu1 %v10115_v13  ;;  %v2329_v28 = vrot.slane %v2328_v41, 4  ;;  %v1001_v29 = vsel %vm12744_vm5, %v996_v2, %v1000_v3  ;;  %v1005_v62 = vor.u32 %v1004_v44, %v1000_v3  ;;  %v493_v7 = vrot.slane %v419_v63, 7 }
  0x7b   : > { %3178 = vmatmul.mubr.bf16.gmra.mrb[20].mxu1 %v10099_v35  ;;  %v2339_v14 = vrot.slane %v2338_v8, 4  ;;  %v421_v19 = vor.u32 %v419_v63, %v418_v20  ;;  %v1013_v18 = vshrl.u32 %v13043_v61, 16  ;;  %v1016_v58 = vshll.u32 %v13043_v61, 16 }
  0x7c   : > { %v2334_v53 = vsel %vm12744_vm5, %v2329_v28, %v2333_v9  ;;  %v1006_v22 = vrot.slane %v1005_v62, 4  ;;  %v544_v26 = vsel %vm12644_vm2, %v418_v20, %v493_v7  ;;  %v1022_v24 = vshll.u32 %v13045_v48, 16 }
  0x7d   : > { %v2344_v25 = vsel %vm12744_vm5, %v2339_v14, %v2343_v52  ;;  %v528_v63 = vsel %vm12644_vm2, %v348_v59, %v421_v19  ;;  %v9965_v27 = vcombine.low %v544_v26, %v544_v26  ;;  %v1015_v31 = vrot.slane %v1013_v18, 4 }
  0x7e   : > { %v10116_v35 = vcombine.low %v2334_v53, %v2344_v25  ;;  %v1011_v38 = vsel %vm12744_vm5, %v1006_v22, %v1010_v54  ;;  %v9963_v40 = vcombine.low %v528_v63, %v528_v63  ;;  %v9964_v45 = vcombine.high %v528_v63, %v528_v63 }
  0x7f   : > { %v10028_v46 = vcombine.low %v1001_v29, %v1011_v38  ;;  %753 = vst [vmem:[#allocation2 + $0x68] sm:$0x1] %v9965_v27  ;;  %v1018_v49 = vrot.slane %v1016_v58, 5  ;;  %v1024_v51 = vrot.slane %v1022_v24, 5  ;;  %v1026_v50 = vshrl.u32 %v13045_v48, 16 }
  0x80   : > { %3185 = vmatprep.mubr.bf16.mxu1 %v10116_v35  ;;  %751 = vst [vmem:[#allocation2 + $0x60] sm:$0xf] %v9963_v40  ;;  %752 = vst [vmem:[#allocation2 + $0x64] sm:$0xf] %v9964_v45  ;;  %v1032_v56 = vshll.u32 %v816_v21, 16  ;;  %v422_v59 = vrot.slane %v351_v0, 7  ;;  %v13079_v23 = vpack.c.bf16 %v303_v33, %v302_v10  ;;  %v10013_v34 = vcombine.low %v13043_v61, %v13045_v48 }
  0x81   : > { %v423_v15 = vshll.u32 %v12916_v30, 16  ;;  %1855 = vmatprep.mubr.bf16.mxu0 %v10028_v46  ;;  %v1019_v17 = vor.u32 %v1018_v49, %v1015_v31  ;;  %v1028_v42 = vrot.slane %v1026_v50, 4  ;;  %v354_v37 = vshrl.u32 %v12999_v11, 16 }
  0x82   : > { %v427_v60 = vshll.u32 %v12999_v11, 16  ;;  %1856 = vmatmul.mubr.bf16.gmra.mrb[24].mxu0 %v10012_v43  ;;  %v1034_v55 = vrot.slane %v1032_v56, 5  ;;  %v357_v39 = vshrl.u32 %v13001_v4, 16  ;;  %v431_v3 = vshll.u32 %v13001_v4, 16 }
  0x83   : > { %3186 = vmatmul.mubr.bf16.gmra.mrb[24].mxu1 %v10100_v57  ;;  %v425_v13 = vor.u32 %v423_v15, %v422_v59  ;;  %v494_v9 = vrot.slane %v423_v15, 7  ;;  %v1020_v47 = vrot.slane %v1019_v17, 4  ;;  %v1029_v1 = vor.u32 %v1028_v42, %v1024_v51 }
  0x84   : > { %v426_v41 = vrot.slane %v354_v37, 7  ;;  %v495_v2 = vrot.slane %v427_v60, 7  ;;  %v13100_v6 = vrot.slane %v357_v39, 7 }
  0x85   : > { %v529_v11 = vsel %vm12644_vm2, %v351_v0, %v425_v13  ;;  %v545_v5 = vsel %vm12644_vm2, %v422_v59, %v494_v9  ;;  %v1030_v36 = vrot.slane %v1029_v1, 4  ;;  %v1025_v30 = vsel %vm12744_vm5, %v1020_v47, %v1024_v51 }
  0x86   : > { %v9966_v43 = vcombine.low %v529_v11, %v529_v11  ;;  %v9967_v57 = vcombine.high %v529_v11, %v529_v11  ;;  %v2152_v44 = vld [vmem:[#allocation2 + $0x68] sm:$0x1]  ;;  %v9968_v0 = vcombine.low %v545_v5, %v545_v5  ;;  %v429_v52 = vor.u32 %v427_v60, %v426_v41 }
  0x87   : > { %v819_v8 = vld [vmem:[#allocation2 + $0x68] sm:$0x1]  ;;  %v546_v54 = vsel %vm12644_vm2, %v426_v41, %v495_v2  ;;  %v13107_v61 = vld [vmem:[#allocation2 + $0x60] sm:$0xf]  ;;  %v13109_v48 = vld [vmem:[#allocation2 + $0x64] sm:$0xf]  ;;  %v1035_v28 = vsel %vm12744_vm5, %v1030_v36, %v1034_v55  ;;  %v13125_v26 = vor.u32 %v431_v3, %v13100_v6 }
  0x88   : > { %v2365_v20 = vshll.u32 %v2152_v44, 16  ;;  %754 = vst [vmem:[#allocation2 + $0x6c] sm:$0xf] %v9966_v43  ;;  %755 = vst [vmem:[#allocation2 + $0x70] sm:$0xf] %v9967_v57  ;;  %v1056_v29 = vshll.u32 %v819_v8, 16  ;;  %v9971_v62 = vcombine.low %v546_v54, %v546_v54  ;;  %v10029_v10 = vcombine.low %v1025_v30, %v1035_v28 }
  0x89   : > { %v2346_v7 = vshrl.u32 %v13107_v61, 16  ;;  %v2349_v14 = vshll.u32 %v13107_v61, 16  ;;  %v2355_v19 = vshll.u32 %v13109_v48, 16  ;;  %v2359_v21 = vshrl.u32 %v13109_v48, 16  ;;  %756 = vst [vmem:[#allocation2 + $0x74] sm:$0x1] %v9968_v0 }
  0x8a   : > { %v13117_v18 = vld [vmem:[#allocation2 + $0x60] sm:$0xf]  ;;  %v2367_v58 = vrot.slane %v2365_v20, 5  ;;  %v13119_v53 = vld [vmem:[#allocation2 + $0x64] sm:$0xf]  ;;  %1863 = vmatprep.mubr.bf16.mxu0 %v10029_v10  ;;  %v1058_v46 = vrot.slane %v1056_v29, 5  ;;  %v530_v49 = vsel %vm12644_vm2, %v354_v37, %v429_v52  ;;  %v10101_v42 = vcombine.low %v13107_v61, %v13109_v48 }
  0x8b   : > { %v1037_v22 = vshrl.u32 %v13117_v18, 16  ;;  %759 = vst [vmem:[#allocation2 + $0x80] sm:$0x1] %v9971_v62  ;;  %v2348_v24 = vrot.slane %v2346_v7, 4  ;;  %v2351_v25 = vrot.slane %v2349_v14, 5  ;;  %v2357_v63 = vrot.slane %v2355_v19, 5  ;;  %1864 = vmatmul.mubr.bf16.gmra.mrb[28].mxu0 %v10013_v34 }
  0x8c   : > { %v2361_v27 = vrot.slane %v2359_v21, 4  ;;  %v1040_v33 = vshll.u32 %v13117_v18, 16  ;;  %v1046_v35 = vshll.u32 %v13119_v53, 16  ;;  %v1050_v38 = vshrl.u32 %v13119_v53, 16 }
  0x8d   : > { %v1039_v31 = vrot.slane %v1037_v22, 4  ;;  %v2352_v40 = vor.u32 %v2351_v25, %v2348_v24  ;;  %v9969_v59 = vcombine.low %v530_v49, %v530_v49  ;;  %v9970_v13 = vcombine.high %v530_v49, %v530_v49 }
  0x8e   : > { %v2362_v45 = vor.u32 %v2361_v27, %v2357_v63  ;;  %v1042_v51 = vrot.slane %v1040_v33, 5  ;;  %v1048_v50 = vrot.slane %v1046_v35, 5  ;;  %v1052_v56 = vrot.slane %v1050_v38, 4 }
  0x8f   : > { %v2353_v15 = vrot.slane %v2352_v40, 4  ;;  %v13134_v60 = vld [vmem:[#allocation2 + $0x6c] sm:$0xf]  ;;  %v13136_v55 = vld [vmem:[#allocation2 + $0x70] sm:$0xf]  ;;  %v10014_v36 = vcombine.low %v13117_v18, %v13119_v53  ;;  %v12130_v18 = vld [vmem:[%s17121_s1 + $0x200] sm:$0xff]  }
  0x90   : > { %v2363_v17 = vrot.slane %v2362_v45, 4  ;;  %v2155_v9 = vld [vmem:[#allocation2 + $0x74] sm:$0x1]  ;;  %v2370_v47 = vshrl.u32 %v13134_v60, 16  ;;  %v2373_v1 = vshll.u32 %v13134_v60, 16  ;;  %v2379_v37 = vshll.u32 %v13136_v55, 16  ;;  %11489 = vmatprep.subr.bf16.mxu1 %v12130_v18 }
  0x91   : > { %v2383_v41 = vshrl.u32 %v13136_v55, 16  ;;  %757 = vst [vmem:[#allocation2 + $0x78] sm:$0xf] %v9969_v59  ;;  %v2358_v2 = vsel %vm12744_vm5, %v2353_v15, %v2357_v63  ;;  %v2389_v5 = vshll.u32 %v2155_v9, 16  ;;  %758 = vst [vmem:[#allocation2 + $0x7c] sm:$0xf] %v9970_v13  ;;  %v1043_v61 = vor.u32 %v1042_v51, %v1039_v31 }
  0x92   : > { %v2368_v11 = vsel %vm12744_vm5, %v2363_v17, %v2367_v58  ;;  %v2158_v34 = vld [vmem:[#allocation2 + $0x80] sm:$0x1]  ;;  %v13148_v43 = vld [vmem:[#allocation2 + $0x6c] sm:$0xf]  ;;  %v2372_v44 = vrot.slane %v2370_v47, 4  ;;  %v2375_v30 = vrot.slane %v2373_v1, 5  ;;  %v1053_v48 = vor.u32 %v1052_v56, %v1048_v50 }
  0x93   : > { %v10117_v57 = vcombine.low %v2358_v2, %v2368_v11  ;;  %v2381_v0 = vrot.slane %v2379_v37, 5  ;;  %v13150_v8 = vld [vmem:[#allocation2 + $0x70] sm:$0xf]  ;;  %v2385_v52 = vrot.slane %v2383_v41, 4  ;;  %v2391_v54 = vrot.slane %v2389_v5, 5 }
  0x94   : > { %v2376_v20 = vor.u32 %v2375_v30, %v2372_v44  ;;  %v2413_v28 = vshll.u32 %v2158_v34, 16  ;;  %v1061_v29 = vshrl.u32 %v13148_v43, 16  ;;  %v1064_v62 = vshll.u32 %v13148_v43, 16  ;;  %v822_v49 = vld [vmem:[#allocation2 + $0x74] sm:$0x1] }
  0x95   : > { %3193 = vmatprep.mubr.bf16.mxu1 %v10117_v57  ;;  %v2386_v7 = vor.u32 %v2385_v52, %v2381_v0  ;;  %v1044_v14 = vrot.slane %v1043_v61, 4  ;;  %v1054_v19 = vrot.slane %v1053_v48, 4  ;;  %v1070_v21 = vshll.u32 %v13150_v8, 16  ;;  %v825_v11 = vld [vmem:[#allocation2 + $0x80] sm:$0x1] }
  0x96   : > { %3194 = vmatmul.mubr.bf16.gmra.mrb[28].mxu1 %v10101_v42  ;;  %v2377_v58 = vrot.slane %v2376_v20, 4  ;;  %v10102_v10 = vcombine.low %v13134_v60, %v13136_v55  ;;  %v1063_v53 = vrot.slane %v1061_v29, 4  ;;  %v1066_v22 = vrot.slane %v1064_v62, 5 }
  0x97   : > { %v2387_v24 = vrot.slane %v2386_v7, 4  ;;  %v1049_v25 = vsel %vm12744_vm5, %v1044_v14, %v1048_v50  ;;  %v1059_v63 = vsel %vm12744_vm5, %v1054_v19, %v1058_v46  ;;  %v2415_v31 = vrot.slane %v2413_v28, 5  ;;  %v305_v19 = vld [vmem:[%s12634_s16 + $0xd8] sm:$0xff] }
  0x98   : > { %v13164_v27 = vld [vmem:[#allocation2 + $0x78] sm:$0xf]  ;;  %v2382_v33 = vsel %vm12744_vm5, %v2377_v58, %v2381_v0  ;;  %v10030_v35 = vcombine.low %v1049_v25, %v1059_v63  ;;  %v13168_v38 = vld [vmem:[#allocation2 + $0x7c] sm:$0xf]  ;;  %v1072_v56 = vrot.slane %v1070_v21, 5  ;;  %v1067_v42 = vor.u32 %v1066_v22, %v1063_v53 }
  0x99   : > { %v2394_v40 = vshrl.u32 %v13164_v27, 16  ;;  %v2397_v45 = vshll.u32 %v13164_v27, 16  ;;  %v2392_v51 = vsel %vm12744_vm5, %v2387_v24, %v2391_v54  ;;  %v2403_v46 = vshll.u32 %v13168_v38, 16  ;;  %v13177_v47 = vld [vmem:[#allocation2 + $0x78] sm:$0xf] }
  0x9a   : > { %v2407_v50 = vshrl.u32 %v13168_v38, 16  ;;  %v10118_v59 = vcombine.low %v2382_v33, %v2392_v51  ;;  %1871 = vmatprep.mubr.bf16.mxu0 %v10030_v35  ;;  %v1074_v13 = vshrl.u32 %v13150_v8, 16  ;;  %v1080_v9 = vshll.u32 %v822_v49, 16  ;;  %v13188_v44 = vld [vmem:[#allocation2 + $0x7c] sm:$0xf]  ;;  %v306_v49 = vld [vmem:[%s12634_s16 + $0xe0] sm:$0xff] }
  0x9b   : > { %v2396_v15 = vrot.slane %v2394_v40, 4  ;;  %v2399_v17 = vrot.slane %v2397_v45, 5  ;;  %v2405_v60 = vrot.slane %v2403_v46, 5  ;;  %1872 = vmatmul.mubr.bf16.gmra.mrb[32].mxu0 %v10014_v36  ;;  %v1068_v37 = vrot.slane %v1067_v42, 4  ;;  %v307_v51 = vld [vmem:[%s12634_s16 + $0xe8] sm:$0xff] }
  0x9c   : > { %v2409_v55 = vrot.slane %v2407_v50, 4  ;;  %3201 = vmatprep.mubr.bf16.mxu1 %v10118_v59  ;;  %v496_v41 = vrot.slane %v431_v3, 7  ;;  %v531_v2 = vsel %vm12644_vm2, %v357_v39, %v13125_v26  ;;  %v10103_v34 = vcombine.low %v13164_v27, %v13168_v38 }
  0x9d   : > { %v2400_v1 = vor.u32 %v2399_v17, %v2396_v15  ;;  %v1076_v36 = vrot.slane %v1074_v13, 4  ;;  %v9972_v57 = vcombine.low %v531_v2, %v531_v2  ;;  %v1082_v0 = vrot.slane %v1080_v9, 5 }
  0x9e   : > { %3202 = vmatmul.mubr.bf16.gmra.mrb[32].mxu1 %v10102_v10  ;;  %v2410_v5 = vor.u32 %v2409_v55, %v2405_v60  ;;  %v547_v4 = vsel %vm12644_vm2, %v13100_v6, %v496_v41  ;;  %v9973_v3 = vcombine.high %v531_v2, %v531_v2  ;;  %v1073_v39 = vsel %vm12744_vm5, %v1068_v37, %v1072_v56  ;;  %v304_v6 = vld [vmem:[%s12634_s16 + $0xd0] sm:$0xff] }
  0x9f   : > { %v2401_v30 = vrot.slane %v2400_v1, 4  ;;  %v1077_v26 = vor.u32 %v1076_v36, %v1072_v56  ;;  %v9974_v54 = vcombine.low %v547_v4, %v547_v4  ;;  %760 = vst [vmem:[#allocation2 + $0x84] sm:$0xf] %v9972_v57  ;;  %v1085_v48 = vshrl.u32 %v13177_v47, 16 }
  0xa0   : > { %v2411_v52 = vrot.slane %v2410_v5, 4  ;;  %761 = vst [vmem:[#allocation2 + $0x88] sm:$0xf] %v9973_v3  ;;  %v1088_v20 = vshll.u32 %v13177_v47, 16  ;;  %v1094_v28 = vshll.u32 %v13188_v44, 16  ;;  %v1098_v7 = vshrl.u32 %v13188_v44, 16 }
  0xa1   : > { %v2406_v61 = vsel %vm12744_vm5, %v2401_v30, %v2405_v60  ;;  %v1078_v62 = vrot.slane %v1077_v26, 4  ;;  %762 = vst [vmem:[#allocation2 + $0x8c] sm:$0x1] %v9974_v54  ;;  %v1104_v14 = vshll.u32 %v825_v11, 16  ;;  %v1087_v18 = vrot.slane %v1085_v48, 4 }
  0xa2   : > { %v2416_v29 = vsel %vm12744_vm5, %v2411_v52, %v2415_v31  ;;  %v1090_v58 = vrot.slane %v1088_v20, 5  ;;  %v1096_v10 = vrot.slane %v1094_v28, 5  ;;  %v10015_v22 = vcombine.low %v13148_v43, %v13150_v8 }
  0xa3   : > { %v10119_v21 = vcombine.low %v2406_v61, %v2416_v29  ;;  %v1083_v53 = vsel %vm12744_vm5, %v1078_v62, %v1082_v0  ;;  %v1100_v24 = vrot.slane %v1098_v7, 4  ;;  %v360_v25 = vshrl.u32 %v13017_v16, 16 }
  0xa4   : > { %v10031_v63 = vcombine.low %v1073_v39, %v1083_v53  ;;  %v1091_v27 = vor.u32 %v1090_v58, %v1087_v18  ;;  %v435_v31 = vshll.u32 %v13017_v16, 16  ;;  %v13211_v33 = vpack.c.bf16 %v305_v19, %v304_v6  ;;  %v308_v58 = vld [vmem:[%s12634_s16 + $0xf0] sm:$0xff] }
  0xa5   : > { %3209 = vmatprep.mubr.bf16.mxu1 %v10119_v21  ;;  %v1101_v35 = vor.u32 %v1100_v24, %v1096_v10  ;;  %v1106_v38 = vrot.slane %v1104_v14, 5  ;;  %v434_v40 = vrot.slane %v360_v25, 7  ;;  %v10016_v45 = vcombine.low %v13177_v47, %v13188_v44 }
  0xa6   : > { %3210 = vmatmul.mubr.bf16.gmra.mrb[36].mxu1 %v10103_v34  ;;  %1879 = vmatprep.mubr.bf16.mxu0 %v10031_v63  ;;  %v13217_v43 = vld [vmem:[#allocation2 + $0x84] sm:$0xf]  ;;  %v1092_v8 = vrot.slane %v1091_v27, 4  ;;  %v497_v46 = vrot.slane %v435_v31, 7  ;;  %v363_v50 = vshrl.u32 %v13079_v23, 16  ;;  %v439_v16 = vshll.u32 %v13079_v23, 16 }
  0xa7   : > { %v13221_v56 = vld [vmem:[#allocation2 + $0x88] sm:$0xf]  ;;  %v2418_v59 = vshrl.u32 %v13217_v43, 16  ;;  %v2421_v15 = vshll.u32 %v13217_v43, 16  ;;  %1880 = vmatmul.mubr.bf16.gmra.mrb[36].mxu0 %v10015_v22  ;;  %v1102_v17 = vrot.slane %v1101_v35, 4  ;;  %v437_v42 = vor.u32 %v435_v31, %v434_v40 }
  0xa8   : > { %v2161_v60 = vld [vmem:[#allocation2 + $0x8c] sm:$0x1]  ;;  %v2427_v55 = vshll.u32 %v13221_v56, 16  ;;  %v2431_v13 = vshrl.u32 %v13221_v56, 16  ;;  %v1097_v9 = vsel %vm12744_vm5, %v1092_v8, %v1096_v10  ;;  %v13229_v47 = vld [vmem:[#allocation2 + $0x84] sm:$0xf]  ;;  %v13231_v23 = vpack.c.bf16 %v307_v51, %v306_v49 }
  0xa9   : > { %v2420_v1 = vrot.slane %v2418_v59, 4  ;;  %v2423_v37 = vrot.slane %v2421_v15, 5  ;;  %v2437_v41 = vshll.u32 %v2161_v60, 16  ;;  %v1107_v2 = vsel %vm12744_vm5, %v1102_v17, %v1106_v38  ;;  %v13235_v11 = vld [vmem:[#allocation2 + $0x88] sm:$0xf]  ;;  %v309_v10 = vld [vmem:[%s12634_s16 + $0xf8] sm:$0xff] }
  0xaa   : > { %v2429_v5 = vrot.slane %v2427_v55, 5  ;;  %v2433_v34 = vrot.slane %v2431_v13, 4  ;;  %v10032_v36 = vcombine.low %v1097_v9, %v1107_v2  ;;  %v532_v57 = vsel %vm12644_vm2, %v360_v25, %v437_v42  ;;  %v828_v44 = vld [vmem:[#allocation2 + $0x8c] sm:$0x1] }
  0xab   : > { %v2424_v30 = vor.u32 %v2423_v37, %v2420_v1  ;;  %v2439_v0 = vrot.slane %v2437_v41, 5  ;;  %v548_v4 = vsel %vm12644_vm2, %v434_v40, %v497_v46  ;;  %v9975_v3 = vcombine.low %v532_v57, %v532_v57 }
  0xac   : > { %v2434_v52 = vor.u32 %v2433_v34, %v2429_v5  ;;  %1887 = vmatprep.mubr.bf16.mxu0 %v10032_v36  ;;  %v9976_v39 = vcombine.high %v532_v57, %v532_v57  ;;  %v9977_v26 = vcombine.low %v548_v4, %v548_v4  ;;  %v1109_v54 = vshrl.u32 %v13229_v47, 16 }
  0xad   : > { %v2425_v61 = vrot.slane %v2424_v30, 4  ;;  %763 = vst [vmem:[#allocation2 + $0x90] sm:$0xf] %v9975_v3  ;;  %v1112_v48 = vshll.u32 %v13229_v47, 16  ;;  %v1118_v20 = vshll.u32 %v13235_v11, 16  ;;  %v1122_v28 = vshrl.u32 %v13235_v11, 16 }
  0xae   : > { %v2435_v6 = vrot.slane %v2434_v52, 4  ;;  %764 = vst [vmem:[#allocation2 + $0x94] sm:$0xf] %v9976_v39  ;;  %765 = vst [vmem:[#allocation2 + $0x98] sm:$0x1] %v9977_v26  ;;  %v1111_v29 = vrot.slane %v1109_v54, 4  ;;  %v10104_v22 = vcombine.low %v13217_v43, %v13221_v56  ;;  %v13258_v49 = vpack.c.bf16 %v309_v10, %v308_v58 }
  0xaf   : > { %v1128_v62 = vshll.u32 %v828_v44, 16  ;;  %v438_v7 = vrot.slane %v363_v50, 7  ;;  %v2430_v14 = vsel %vm12744_vm5, %v2425_v61, %v2429_v5  ;;  %1888 = vmatmul.mubr.bf16.gmra.mrb[40].mxu0 %v10016_v45  ;;  %v1114_v19 = vrot.slane %v1112_v48, 5 }
  0xb0   : > { %v1120_v21 = vrot.slane %v1118_v20, 5  ;;  %v1124_v18 = vrot.slane %v1122_v28, 4  ;;  %v2440_v53 = vsel %vm12744_vm5, %v2435_v6, %v2439_v0  ;;  %v498_v25 = vrot.slane %v439_v16, 7 }
  0xb1   : > { %v441_v24 = vor.u32 %v439_v16, %v438_v7  ;;  %v10120_v63 = vcombine.low %v2430_v14, %v2440_v53  ;;  %v1115_v27 = vor.u32 %v1114_v19, %v1111_v29  ;;  %v1130_v35 = vrot.slane %v1128_v62, 5 }
  0xb2   : > { %v1125_v31 = vor.u32 %v1124_v18, %v1120_v21  ;;  %v549_v40 = vsel %vm12644_vm2, %v438_v7, %v498_v25  ;;  %v366_v45 = vshrl.u32 %v13211_v33, 16  ;;  %v10017_v59 = vcombine.low %v13229_v47, %v13235_v11 }
  0xb3   : > { %v533_v38 = vsel %vm12644_vm2, %v363_v50, %v441_v24  ;;  %3217 = vmatprep.mubr.bf16.mxu1 %v10120_v63  ;;  %v1116_v51 = vrot.slane %v1115_v27, 4  ;;  %v9980_v56 = vcombine.low %v549_v40, %v549_v40  ;;  %v443_v17 = vshll.u32 %v13211_v33, 16 }
  0xb4   : > { %v1126_v8 = vrot.slane %v1125_v31, 4  ;;  %v9978_v43 = vcombine.low %v533_v38, %v533_v38  ;;  %v9979_v46 = vcombine.high %v533_v38, %v533_v38  ;;  %3218 = vmatmul.mubr.bf16.gmra.mrb[40].mxu1 %v10104_v22  ;;  %v13260_v16 = vld [vmem:[#allocation2 + $0x90] sm:$0xf]  ;;  %v442_v15 = vrot.slane %v366_v45, 7 }
  0xb5   : > { %v13264_v50 = vld [vmem:[#allocation2 + $0x90] sm:$0xf]  ;;  %v13269_v42 = vld [vmem:[#allocation2 + $0x94] sm:$0xf]  ;;  %v2164_v60 = vld [vmem:[#allocation2 + $0x98] sm:$0x1]  ;;  %v1121_v9 = vsel %vm12744_vm5, %v1116_v51, %v1120_v21 }
  0xb6   : > { %v2442_v55 = vshrl.u32 %v13260_v16, 16  ;;  %v2445_v13 = vshll.u32 %v13260_v16, 16  ;;  %v1131_v47 = vsel %vm12744_vm5, %v1126_v8, %v1130_v35  ;;  %766 = vst [vmem:[#allocation2 + $0x9c] sm:$0xf] %v9978_v43  ;;  %767 = vst [vmem:[#allocation2 + $0xa0] sm:$0xf] %v9979_v46  ;;  %v445_v28 = vor.u32 %v443_v17, %v442_v15 }
  0xb7   : > { %v2451_v1 = vshll.u32 %v13269_v42, 16  ;;  %v2455_v37 = vshrl.u32 %v13269_v42, 16  ;;  %v2461_v41 = vshll.u32 %v2164_v60, 16  ;;  %768 = vst [vmem:[#allocation2 + $0xa4] sm:$0x1] %v9980_v56  ;;  %v499_v11 = vrot.slane %v443_v17, 7 }
  0xb8   : > { %v13279_v2 = vld [vmem:[#allocation2 + $0x94] sm:$0xf]  ;;  %v2444_v5 = vrot.slane %v2442_v55, 4  ;;  %v2447_v34 = vrot.slane %v2445_v13, 5  ;;  %v10033_v36 = vcombine.low %v1121_v9, %v1131_v47  ;;  %v831_v57 = vld [vmem:[#allocation2 + $0x98] sm:$0x1]  ;;  %v10105_v29 = vcombine.low %v13260_v16, %v13269_v42 }
  0xb9   : > { %v1133_v44 = vshrl.u32 %v13264_v50, 16  ;;  %v2453_v30 = vrot.slane %v2451_v1, 5  ;;  %v2457_v0 = vrot.slane %v2455_v37, 4  ;;  %v2463_v4 = vrot.slane %v2461_v41, 5 }
  0xba   : > { %v1136_v3 = vshll.u32 %v13264_v50, 16  ;;  %v2448_v52 = vor.u32 %v2447_v34, %v2444_v5  ;;  %1895 = vmatprep.mubr.bf16.mxu0 %v10033_v36  ;;  %v1142_v26 = vshll.u32 %v13279_v2, 16  ;;  %v1146_v54 = vshrl.u32 %v13279_v2, 16 }
  0xbb   : > { %v1135_v39 = vrot.slane %v1133_v44, 4  ;;  %v2458_v61 = vor.u32 %v2457_v0, %v2453_v30  ;;  %1896 = vmatmul.mubr.bf16.gmra.mrb[44].mxu0 %v10017_v59  ;;  %v1152_v20 = vshll.u32 %v831_v57, 16  ;;  %v550_v10 = vsel %vm12644_vm2, %v442_v15, %v499_v11 }
  0xbc   : > { %v1138_v48 = vrot.slane %v1136_v3, 5  ;;  %v2449_v6 = vrot.slane %v2448_v52, 4  ;;  %v1144_v62 = vrot.slane %v1142_v26, 5  ;;  %v1148_v7 = vrot.slane %v1146_v54, 4 }
  0xbd   : > { %v2459_v14 = vrot.slane %v2458_v61, 4  ;;  %v13287_v19 = vld [vmem:[#allocation2 + $0x9c] sm:$0xf]  ;;  %v13289_v21 = vld [vmem:[#allocation2 + $0xa0] sm:$0xf]  ;;  %v1154_v58 = vrot.slane %v1152_v20, 5  ;;  %v534_v38 = vsel %vm12644_vm2, %v366_v45, %v445_v28  ;;  %v9983_v33 = vcombine.low %v550_v10, %v550_v10 }
  0xbe   : > { %v1139_v18 = vor.u32 %v1138_v48, %v1135_v39  ;;  %v2454_v53 = vsel %vm12744_vm5, %v2449_v6, %v2453_v30  ;;  %v2167_v22 = vld [vmem:[#allocation2 + $0xa4] sm:$0x1]  ;;  %v2466_v24 = vshrl.u32 %v13287_v19, 16  ;;  %v2469_v25 = vshll.u32 %v13287_v19, 16  ;;  %v13305_v46 = vld [vmem:[#allocation2 + $0x9c] sm:$0xf] }
  0xbf   : > { %v2475_v63 = vshll.u32 %v13289_v21, 16  ;;  %v2464_v27 = vsel %vm12744_vm5, %v2459_v14, %v2463_v4  ;;  %v2479_v31 = vshrl.u32 %v13289_v21, 16  ;;  %v2485_v35 = vshll.u32 %v2167_v22, 16  ;;  %v13307_v17 = vld [vmem:[#allocation2 + $0xa0] sm:$0xf] }
  0xc0   : > { %v10121_v40 = vcombine.low %v2454_v53, %v2464_v27  ;;  %v2468_v51 = vrot.slane %v2466_v24, 4  ;;  %v2471_v8 = vrot.slane %v2469_v25, 5  ;;  %v1140_v59 = vrot.slane %v1139_v18, 4  ;;  %v834_v13 = vld [vmem:[#allocation2 + $0xa4] sm:$0x1] }
  0xc1   : > { %v2477_v43 = vrot.slane %v2475_v63, 5  ;;  %v2481_v16 = vrot.slane %v2479_v31, 4  ;;  %v2487_v56 = vrot.slane %v2485_v35, 5  ;;  %v1149_v15 = vor.u32 %v1148_v7, %v1144_v62  ;;  %771 = vst [vmem:[#allocation2 + $0xb0] sm:$0x1] %v9983_v33 }
  0xc2   : > { %3225 = vmatprep.mubr.bf16.mxu1 %v10121_v40  ;;  %v2472_v42 = vor.u32 %v2471_v8, %v2468_v51  ;;  %v9981_v60 = vcombine.low %v534_v38, %v534_v38  ;;  %v9982_v55 = vcombine.high %v534_v38, %v534_v38  ;;  %v1145_v9 = vsel %vm12744_vm5, %v1140_v59, %v1144_v62 }
  0xc3   : > { %3226 = vmatmul.mubr.bf16.gmra.mrb[44].mxu1 %v10105_v29  ;;  %v2482_v45 = vor.u32 %v2481_v16, %v2477_v43  ;;  %v1150_v47 = vrot.slane %v1149_v15, 4  ;;  %v10018_v1 = vcombine.low %v13264_v50, %v13279_v2  ;;  %v1157_v41 = vshrl.u32 %v13305_v46, 16 }
  0xc4   : > { %v2473_v37 = vrot.slane %v2472_v42, 4  ;;  %769 = vst [vmem:[#allocation2 + $0xa8] sm:$0xf] %v9981_v60  ;;  %770 = vst [vmem:[#allocation2 + $0xac] sm:$0xf] %v9982_v55  ;;  %v1160_v11 = vshll.u32 %v13305_v46, 16  ;;  %v10106_v3 = vcombine.low %v13287_v19, %v13289_v21 }
  0xc5   : > { %v1166_v5 = vshll.u32 %v13307_v17, 16  ;;  %v2483_v34 = vrot.slane %v2482_v45, 4  ;;  %v1155_v36 = vsel %vm12744_vm5, %v1150_v47, %v1154_v58  ;;  %v1170_v57 = vshrl.u32 %v13307_v17, 16 }
  0xc6   : > { %v1176_v44 = vshll.u32 %v834_v13, 16  ;;  %v2478_v50 = vsel %vm12744_vm5, %v2473_v37, %v2477_v43  ;;  %v10034_v2 = vcombine.low %v1145_v9, %v1155_v36  ;;  %v1159_v30 = vrot.slane %v1157_v41, 4 }
  0xc7   : > { %v1162_v0 = vrot.slane %v1160_v11, 5  ;;  %v2488_v4 = vsel %vm12744_vm5, %v2483_v34, %v2487_v56  ;;  %v1168_v52 = vrot.slane %v1166_v5, 5  ;;  %v1172_v39 = vrot.slane %v1170_v57, 4 }
  0xc8   : > { %v10122_v26 = vcombine.low %v2478_v50, %v2488_v4  ;;  %1903 = vmatprep.mubr.bf16.mxu0 %v10034_v2  ;;  %v369_v61 = vshrl.u32 %v13231_v23, 16  ;;  %v447_v48 = vshll.u32 %v13231_v23, 16  ;;  %v1178_v28 = vrot.slane %v1176_v44, 5  ;;  %v13333_v18 = vld [vmem:[#allocation2 + $0xb0] sm:$0x1] }
  0xc9   : > { %v1163_v54 = vor.u32 %v1162_v0, %v1159_v30  ;;  %1904 = vmatmul.mubr.bf16.gmra.mrb[48].mxu0 %v10018_v1  ;;  %v1173_v20 = vor.u32 %v1172_v39, %v1168_v52  ;;  %v372_v6 = vshrl.u32 %v13258_v49, 16  ;;  %v451_v14 = vshll.u32 %v13258_v49, 16  ;;  %v13356_v55 = vld [vmem:[#allocation2 + $0xb0] sm:$0x1] }
  0xca   : > { %3233 = vmatprep.mubr.bf16.mxu1 %v10122_v26  ;;  %v446_v62 = vrot.slane %v369_v61, 7  ;;  %v500_v7 = vrot.slane %v447_v48, 7  ;;  %v10019_v23 = vcombine.low %v13305_v46, %v13307_v17  ;;  %v2509_v24 = vshll.u32 %v13333_v18, 16 }
  0xcb   : > { %v1164_v29 = vrot.slane %v1163_v54, 4  ;;  %3234 = vmatmul.mubr.bf16.gmra.mrb[48].mxu1 %v10106_v3  ;;  %v13329_v19 = vld [vmem:[#allocation2 + $0xa8] sm:$0xf]  ;;  %v13331_v21 = vld [vmem:[#allocation2 + $0xac] sm:$0xf]  ;;  %v1174_v27 = vrot.slane %v1173_v20, 4 }
  0xcc   : > { %v2490_v58 = vshrl.u32 %v13329_v19, 16  ;;  %v2493_v10 = vshll.u32 %v13329_v19, 16  ;;  %v2499_v53 = vshll.u32 %v13331_v21, 16  ;;  %v2503_v22 = vshrl.u32 %v13331_v21, 16  ;;  %v13346_v31 = vld [vmem:[#allocation2 + $0xa8] sm:$0xf] }
  0xcd   : > { %v10107_v25 = vcombine.low %v13329_v19, %v13331_v21  ;;  %v1169_v63 = vsel %vm12744_vm5, %v1164_v29, %v1168_v52  ;;  %v13348_v35 = vld [vmem:[#allocation2 + $0xac] sm:$0xf]  ;;  %v2511_v43 = vrot.slane %v2509_v24, 5  ;;  %v1179_v46 = vsel %vm12744_vm5, %v1174_v27, %v1178_v28  ;;  %v13369_v3 = vld [vmem:[#allocation2 + $0x14] sm:$0x1] }
  0xce   : > { %v2492_v38 = vrot.slane %v2490_v58, 4  ;;  %v2495_v40 = vrot.slane %v2493_v10, 5  ;;  %v2501_v51 = vrot.slane %v2499_v53, 5  ;;  %v2505_v8 = vrot.slane %v2503_v22, 4  ;;  %v13374_v20 = vld [vmem:[#allocation2 + $0x20] sm:$0x1] }
  0xcf   : > { %v449_v16 = vor.u32 %v447_v48, %v446_v62  ;;  %v551_v56 = vsel %vm12644_vm2, %v446_v62, %v500_v7  ;;  %v10035_v17 = vcombine.low %v1169_v63, %v1179_v46  ;;  %v1181_v33 = vshrl.u32 %v13346_v31, 16  ;;  %v13381_v7 = vld [vmem:[#allocation2 + $0x1c] sm:$0xf]  ;;  %v12284_v53 = vld [vmem:[#allocation2 + $0x10] sm:$0xf] }
  0xd0   : > { %v2496_v59 = vor.u32 %v2495_v40, %v2492_v38  ;;  %v2506_v15 = vor.u32 %v2505_v8, %v2501_v51  ;;  %v9986_v42 = vcombine.low %v551_v56, %v551_v56  ;;  %v1184_v13 = vshll.u32 %v13346_v31, 16  ;;  %v13385_v24 = vld [vmem:[#allocation2 + $0x18] sm:$0xf]  ;;  %v12285_v63 = vld [vmem:[#allocation2 + $0xc] sm:$0xf] }
  0xd1   : > { %v535_v60 = vsel %vm12644_vm2, %v369_v61, %v449_v16  ;;  %v1190_v45 = vshll.u32 %v13348_v35, 16  ;;  %1911 = vmatprep.mubr.bf16.mxu0 %v10035_v17  ;;  %v1183_v41 = vrot.slane %v1181_v33, 4  ;;  %v1194_v34 = vshrl.u32 %v13348_v35, 16  ;;  %v12286_v33 = vld [vmem:[#allocation2 + $0x14] sm:$0x1] }
  0xd2   : > { %v2497_v9 = vrot.slane %v2496_v59, 4  ;;  %v2507_v47 = vrot.slane %v2506_v15, 4  ;;  %v9984_v1 = vcombine.low %v535_v60, %v535_v60  ;;  %v9985_v37 = vcombine.high %v535_v60, %v535_v60  ;;  %774 = vst [vmem:[#allocation2 + $0xbc] sm:$0x1] %v9986_v42  ;;  %1912 = vmatmul.mubr.bf16.gmra.mrb[52].mxu0 %v10019_v23 }
  0xd3   : > { %v1186_v11 = vrot.slane %v1184_v13, 5  ;;  %v1192_v5 = vrot.slane %v1190_v45, 5  ;;  %v1200_v44 = vshll.u32 %v13356_v55, 16  ;;  %v450_v50 = vrot.slane %v372_v6, 7 }
  0xd4   : > { %v2502_v36 = vsel %vm12744_vm5, %v2497_v9, %v2501_v51  ;;  %v2512_v57 = vsel %vm12744_vm5, %v2507_v47, %v2511_v43  ;;  %772 = vst [vmem:[#allocation2 + $0xb4] sm:$0xf] %v9984_v1  ;;  %773 = vst [vmem:[#allocation2 + $0xb8] sm:$0xf] %v9985_v37  ;;  %v1196_v0 = vrot.slane %v1194_v34, 4  ;;  %v501_v4 = vrot.slane %v451_v14, 7 }
  0xd5   : > { %v10123_v2 = vcombine.low %v2502_v36, %v2512_v57  ;;  %v1187_v30 = vor.u32 %v1186_v11, %v1183_v41  ;;  %v1291_v52 = vrot.slane %v13369_v3, 5  ;;  %v453_v39 = vor.u32 %v451_v14, %v450_v50  ;;  %v13502_v3 = vld [vmem:[#allocation2 + $0x34] sm:$0xf] }
  0xd6   : > { %v1197_v54 = vor.u32 %v1196_v0, %v1192_v5  ;;  %v1202_v61 = vrot.slane %v1200_v44, 5  ;;  %v552_v48 = vsel %vm12644_vm2, %v450_v50, %v501_v4  ;;  %v2621_v28 = vrot.slane %v13374_v20, 5 }
  0xd7   : > { %3241 = vmatprep.mubr.bf16.mxu1 %v10123_v2  ;;  %v1188_v26 = vrot.slane %v1187_v30, 4  ;;  %v536_v29 = vsel %vm12644_vm2, %v372_v6, %v453_v39  ;;  %v9989_v62 = vcombine.low %v552_v48, %v552_v48  ;;  %v2611_v22 = vrot.slane %v12284_v53, 5 }
  0xd8   : > { %3242 = vmatmul.mubr.bf16.gmra.mrb[52].mxu1 %v10107_v25  ;;  %v1198_v23 = vrot.slane %v1197_v54, 4  ;;  %v9987_v58 = vcombine.low %v536_v29, %v536_v29  ;;  %v9988_v10 = vcombine.high %v536_v29, %v536_v29  ;;  %v10078_v27 = vrot.slane %v12285_v63, 9 }
  0xd9   : > { %v13383_v14 = vld [vmem:[#allocation2 + $0xbc] sm:$0x1]  ;;  %v1193_v49 = vsel %vm12744_vm5, %v1188_v26, %v1192_v5  ;;  %777 = vst [vmem:[#allocation2 + $0xc8] sm:$0x1] %v9989_v62  ;;  %v10020_v8 = vcombine.low %v13346_v31, %v13348_v35  ;;  %v17155_v31 = vmov 0  ;;  %v2613_v35 = vrot.slane %v2611_v22, 4 }
  0xda   : > { %v2533_v25 = vshll.u32 %v13383_v14, 16  ;;  %v13390_v6 = vld [vmem:[#allocation2 + $0xbc] sm:$0x1]  ;;  %v1203_v51 = vsel %vm12744_vm5, %v1198_v23, %v1202_v61  ;;  %775 = vst [vmem:[#allocation2 + $0xc0] sm:$0xf] %v9987_v58  ;;  %v17156_v31 = vsel %vm13413_vm8, 4294967295, %v17155_v31  ;;  %v13423_v44 = vsel %vm13413_vm8, %v10078_v27, %v2611_v22 }
  0xdb   : > { %v13392_v38 = vld [vmem:[#allocation2 + $0xb4] sm:$0xf]  ;;  %v13394_v40 = vld [vmem:[#allocation2 + $0xb8] sm:$0xf]  ;;  %776 = vst [vmem:[#allocation2 + $0xc4] sm:$0xf] %v9988_v10  ;;  %v10036_v42 = vcombine.low %v1193_v49, %v1203_v51 }
  0xdc   : > { %v13400_v43 = vld [vmem:[#allocation2 + $0xb4] sm:$0xf]  ;;  %v2514_v16 = vshrl.u32 %v13392_v38, 16  ;;  %v2517_v56 = vshll.u32 %v13392_v38, 16  ;;  %v2523_v59 = vshll.u32 %v13394_v40, 16  ;;  %v2527_v15 = vshrl.u32 %v13394_v40, 16 }
  0xdd   : > { %v13408_v17 = vld [vmem:[#allocation2 + $0xb8] sm:$0xf]  ;;  %v1205_v60 = vshrl.u32 %v13400_v43, 16  ;;  %17157 = vst [vmem:[#allocation8_spill] sm:$0xff] %v17156_v31  ;;  %v2614_v13 = vrot.slane %v12286_v33, 5  ;;  %1919 = vmatprep.mubr.bf16.mxu0 %v10036_v42  ;;  %v1208_v37 = vshll.u32 %v13400_v43, 16  ;;  %v10108_v54 = vcombine.low %v13392_v38, %v13394_v40 }
  0xde   : > { %v2516_v45 = vrot.slane %v2514_v16, 4  ;;  %v2519_v9 = vrot.slane %v2517_v56, 5  ;;  %v2525_v47 = vrot.slane %v2523_v59, 5  ;;  %v2529_v1 = vrot.slane %v2527_v15, 4  ;;  %1920 = vmatmul.mubr.bf16.gmra.mrb[56].mxu0 %v10020_v8  ;;  %v786_v16 = vld [vmem:[#allocation2 + $0xb4] sm:$0xf] }
  0xdf   : > { %v1214_v41 = vshll.u32 %v13408_v17, 16  ;;  %v1218_v11 = vshrl.u32 %v13408_v17, 16  ;;  %v1224_v5 = vshll.u32 %v13390_v6, 16  ;;  %v2535_v57 = vrot.slane %v2533_v25, 5  ;;  %790 = vst [vmem:[#allocation2 + $0xcc] sm:$0xf] %v786_v16 }
  0xe0   : > { %v2520_v34 = vor.u32 %v2519_v9, %v2516_v45  ;;  %v2530_v36 = vor.u32 %v2529_v1, %v2525_v47  ;;  %v13425_v50 = vld [vmem:[#allocation2 + $0xc8] sm:$0x1]  ;;  %v1207_v2 = vrot.slane %v1205_v60, 4  ;;  %v1210_v30 = vrot.slane %v1208_v37, 5  ;;  %v787_v60 = vld [vmem:[#allocation2 + $0xb8] sm:$0xf] }
  0xe1   : > { %v1216_v0 = vrot.slane %v1214_v41, 5  ;;  %v1220_v4 = vrot.slane %v1218_v11, 4  ;;  %v13429_v61 = vld [vmem:[#allocation2 + $0xc0] sm:$0xf]  ;;  %v13435_v29 = vsel %vm13413_vm8, %v2613_v35, %v2614_v13  ;;  %v2557_v25 = vshll.u32 %v13425_v50, 16 }
  0xe2   : > { %v2521_v39 = vrot.slane %v2520_v34, 4  ;;  %v2531_v26 = vrot.slane %v2530_v36, 4  ;;  %v13431_v48 = vld [vmem:[#allocation2 + $0xc4] sm:$0xf]  ;;  %v2538_v62 = vshrl.u32 %v13429_v61, 16  ;;  %v2541_v23 = vshll.u32 %v13429_v61, 16 }
  0xe3   : > { %v2547_v58 = vshll.u32 %v13431_v48, 16  ;;  %v2551_v10 = vshrl.u32 %v13431_v48, 16  ;;  %v1226_v49 = vrot.slane %v1224_v5, 5  ;;  %v1211_v59 = vor.u32 %v1210_v30, %v1207_v2  ;;  %v788_v35 = vld [vmem:[#allocation2 + $0xbc] sm:$0x1] }
  0xe4   : > { %v2526_v53 = vsel %vm12744_vm5, %v2521_v39, %v2525_v47  ;;  %v2536_v22 = vsel %vm12744_vm5, %v2531_v26, %v2535_v57  ;;  %v2540_v27 = vrot.slane %v2538_v62, 4  ;;  %v2543_v51 = vrot.slane %v2541_v23, 5  ;;  %v12287_v45 = vld [vmem:[#allocation2 + $0x1c] sm:$0xf]  ;;  %v12288_v47 = vld [vmem:[#allocation2] sm:$0xf] }
  0xe5   : > { %v10124_v63 = vcombine.low %v2526_v53, %v2536_v22  ;;  %v2549_v8 = vrot.slane %v2547_v58, 5  ;;  %v2553_v56 = vrot.slane %v2551_v10, 4  ;;  %v1221_v15 = vor.u32 %v1220_v4, %v1216_v0  ;;  %791 = vst [vmem:[#allocation2 + $0xd0] sm:$0xf] %v787_v60  ;;  %792 = vst [vmem:[#allocation2 + $0xd4] sm:$0x1] %v788_v35 }
  0xe6   : > { %v10126_v42 = vcombine.low %v13423_v44, %v13435_v29  ;;  %v2544_v33 = vor.u32 %v2543_v51, %v2540_v27  ;;  %v2559_v13 = vrot.slane %v2557_v25, 5  ;;  %v2618_v9 = vrot.slane %v12287_v45, 5  ;;  %v12289_v5 = vld [vmem:[#allocation2 + $0x4] sm:$0xf]  ;;  %v12290_v2 = vld [vmem:[#allocation2 + $0x18] sm:$0xf] }
  0xe7   : > { %3249 = vmatprep.mubr.bf16.mxu1 %v10124_v63  ;;  %v9990_v1 = vrot.slane %v12288_v47, 9  ;;  %v2554_v37 = vor.u32 %v2553_v56, %v2549_v8  ;;  %v1212_v41 = vrot.slane %v1211_v59, 4  ;;  %v1222_v11 = vrot.slane %v1221_v15, 4  ;;  %v12291_v4 = vld [vmem:[#allocation2 + $0x8] sm:$0x1] }
  0xe8   : > { %3250 = vmatmul.mubr.bf16.gmra.mrb[56].mxu1 %v10108_v54  ;;  %v1281_v34 = vrot.slane %v12289_v5, 5  ;;  %v2545_v36 = vrot.slane %v2544_v33, 4  ;;  %v10021_v57 = vcombine.low %v13400_v43, %v13408_v17  ;;  %v10079_v30 = vrot.slane %v12290_v2, 9  ;;  %v12292_v27 = vld [vmem:[#allocation2 + $0x24] sm:$0xf] }
  0xe9   : > { %v1284_v39 = vrot.slane %v12291_v4, 5  ;;  %v2555_v26 = vrot.slane %v2554_v37, 4  ;;  %v1217_v62 = vsel %vm12744_vm5, %v1212_v41, %v1216_v0  ;;  %v1227_v54 = vsel %vm12744_vm5, %v1222_v11, %v1226_v49  ;;  %v12293_v51 = vld [vmem:[#allocation2 + $0x28] sm:$0xf]  ;;  %v12294_v56 = vld [vmem:[#allocation2 + $0x2c] sm:$0x1] }
  0xea   : > { %v2620_v23 = vrot.slane %v2618_v9, 4  ;;  %v2550_v58 = vsel %vm12744_vm5, %v2545_v36, %v2549_v8  ;;  %v10037_v10 = vcombine.low %v1217_v62, %v1227_v54  ;;  %v1282_v53 = vsel %vm13413_vm8, %v9990_v1, %v1281_v34  ;;  %v12295_v15 = vld [vmem:[#allocation2 + $0xc] sm:$0xf]  ;;  %v12296_v45 = vld [vmem:[#allocation2 + $0x10] sm:$0xf] }
  0xeb   : > { %v1283_v22 = vrot.slane %v1281_v34, 4  ;;  %v2560_v25 = vsel %vm12744_vm5, %v2555_v26, %v2559_v13  ;;  %v10109_v63 = vcombine.low %v13429_v61, %v13431_v48  ;;  %v10080_v0 = vrot.slane %v12292_v27, 9  ;;  %v12297_v1 = vld [vmem:[#allocation2 + $0x30] sm:$0xf]  ;;  %v12298_v41 = vld [vmem:[#allocation2 + $0x34] sm:$0xf] }
  0xec   : > { %v2625_v16 = vrot.slane %v12293_v51, 5  ;;  %v10125_v49 = vcombine.low %v2550_v58, %v2560_v25  ;;  %1927 = vmatprep.mubr.bf16.mxu0 %v10037_v10  ;;  %v2628_v59 = vrot.slane %v12294_v56, 5  ;;  %v9991_v60 = vrot.slane %v12295_v15, 9  ;;  %v13468_v5 = vld [vmem:[#allocation2 + $0x38] sm:$0x1]  ;;  %v12124_v25 = vld [vmem:[%s17121_s1 + $0x1c8] sm:$0xff]  }
  0xed   : > { %v1285_v8 = vsel %vm13413_vm8, %v1283_v22, %v1284_v39  ;;  %1928 = vmatmul.mubr.bf16.gmra.mrb[60].mxu0 %v10021_v57  ;;  %v13466_v35 = vsel %vm13413_vm8, %v10079_v30, %v2618_v9  ;;  %v1288_v47 = vrot.slane %v12296_v45, 5  ;;  %v10081_v37 = vrot.slane %v12297_v1, 9  ;;  %v12300_v36 = vld [vmem:[#allocation2 + $0x18] sm:$0xf]  ;;  %v12301_v4 = vld [vmem:[#allocation2 + $0x1c] sm:$0xf] }
  0xee   : > { %v10038_v33 = vcombine.low %v1282_v53, %v1285_v8  ;;  %v2627_v13 = vrot.slane %v2625_v16, 4  ;;  %3257 = vmatprep.mubr.bf16.mxu1 %v10125_v49  ;;  %v2632_v11 = vrot.slane %v12298_v41, 5  ;;  %v2635_v34 = vrot.slane %v13468_v5, 5  ;;  %v13477_v26 = vld [vmem:[#allocation2 + $0x24] sm:$0xf] }
  0xef   : > { %v9992_v2 = vrot.slane %v12300_v36, 9  ;;  %v2622_v9 = vsel %vm13413_vm8, %v2620_v23, %v2621_v28  ;;  %v1289_v57 = vsel %vm13413_vm8, %v9991_v60, %v1288_v47  ;;  %v1290_v30 = vrot.slane %v1288_v47, 4  ;;  %v13479_v62 = vld [vmem:[#allocation2 + $0x28] sm:$0xf]  ;;  %v12123_v23 = vld [vmem:[%s17121_s1 + $0x180] sm:$0xff]  }
  0xf0   : > { %3258 = vmatmul.mubr.bf16.gmra.mrb[60].mxu1 %v10109_v63  ;;  %11409 = vmatprep.mubr.bf16.mxu0 %v10038_v33  ;;  %v1295_v39 = vrot.slane %v12301_v4, 5  ;;  %v2626_v20 = vsel %vm13413_vm8, %v10080_v0, %v2625_v16  ;;  %v2629_v28 = vsel %vm13413_vm8, %v2627_v13, %v2628_v59  ;;  %v2634_v54 = vrot.slane %v2632_v11, 4  ;;  %v12302_v58 = vld [vmem:[#allocation2 + $0x20] sm:$0x1]  ;;  %v12305_v51 = vld [vmem:[#allocation2 + $0x44] sm:$0x1] }
  0xf1   : > { %11457 = vmatprep.mubr.bf16.mxu1 %v10126_v42  ;;  %v1298_v10 = vrot.slane %v12302_v58, 5  ;;  %v1292_v53 = vsel %vm13413_vm8, %v1290_v30, %v1291_v52  ;;  %v12303_v42 = vld [vmem:[#allocation2 + $0x3c] sm:$0xf]  ;;  %v12304_v27 = vld [vmem:[#allocation2 + $0x40] sm:$0xf]  ;;  %v2642_v16 = vrot.slane %v12305_v51, 5  ;;  %v10127_v59 = vcombine.low %v13466_v35, %v2622_v9 }
  0xf2   : > { %v1296_v44 = vsel %vm13413_vm8, %v9992_v2, %v1295_v39  ;;  %v1297_v29 = vrot.slane %v1295_v39, 4  ;;  %v10082_v22 = vrot.slane %v12303_v42, 9  ;;  %v10039_v63 = vcombine.low %v1289_v57, %v1292_v53  ;;  %v13500_v49 = vld [vmem:[#allocation2 + $0x30] sm:$0xf]  ;;  %v13504_v52 = vld [vmem:[#allocation2 + $0x3c] sm:$0xf] }
  0xf3   : > { %v2639_v0 = vrot.slane %v12304_v27, 5  ;;  %v13506_v8 = vld [vmem:[#allocation2 + $0x40] sm:$0xf]  ;;  %v12306_v60 = vld [vmem:[#allocation2 + $0x24] sm:$0xf]  ;;  %v10128_v47 = vcombine.low %v2626_v20, %v2629_v28  ;;  %v12131_v35 = vld [vmem:[%s17121_s1 + $0x208] sm:$0xff]   ;;  %v13525_v20 = vsel %vm13413_vm8, %v10081_v37, %v2632_v11  ;;  %v13536_v37 = vsel %vm13413_vm8, %v2634_v54, %v2635_v34 }
  0xf4   : > { %v1299_v15 = vsel %vm13413_vm8, %v1297_v29, %v1298_v10  ;;  %v9993_v33 = vrot.slane %v12306_v60, 9  ;;  %v12307_v13 = vld [vmem:[#allocation2 + $0x28] sm:$0xf]  ;;  %v12308_v36 = vld [vmem:[#allocation2 + $0x2c] sm:$0x1]  ;;  %v12126_v27 = vld [vmem:[%s17121_s1 + $0x1d0] sm:$0xff]  }
  0xf5   : > { %v1302_v45 = vrot.slane %v12307_v13, 5  ;;  %v10040_v1 = vcombine.low %v1296_v44, %v1299_v15  ;;  %v2641_v41 = vrot.slane %v2639_v0, 4  ;;  %v1305_v2 = vrot.slane %v12308_v36, 5  ;;  %11410 = vmatmul.mubr.bf16.vlgmr.msra.gmra.mrb[64].mxu0 %v10039_v63  ;;  %v13513_v30 = vld [vmem:[#allocation2 + $0x4c] sm:$0xf]  ;;  %v12314_v51 = vld [vmem:[%s17121_s1 + $0x200] sm:$0xff]  }
  0xf6   : > { %v2646_v4 = vrot.slane %v13513_v30, 5  ;;  %10850 = vmatpush3.bf16.msra.mxu0 %v12123_v23  ;;  %v12125_v58 = vld [vmem:[%s17121_s1 + $0x188] sm:$0xff]   ;;  %v12310_v10 = vld [vmem:[#allocation2 + $0x30] sm:$0xf]  ;;  %v12311_v44 = vld [vmem:[#allocation2 + $0x34] sm:$0xf]  ;;  %v13540_v11 = vsel %vm13413_vm8, %v10082_v22, %v2639_v0 }
  0xf7   : > { %v1304_v57 = vrot.slane %v1302_v45, 4  ;;  %11413 = vmatprep.mubr.bf16.mxu0 %v10040_v1  ;;  %v1303_v28 = vsel %vm13413_vm8, %v9993_v33, %v1302_v45  ;;  %v9994_v53 = vrot.slane %v12310_v10, 9  ;;  %v1309_v29 = vrot.slane %v12311_v44, 5  ;;  %10851 = vmatprep.subr.bf16.mxu0 %v12124_v25  ;;  %v12312_v42 = vld [vmem:[#allocation2 + $0x48] sm:$0xf]  ;;  %v12127_v0 = vld [vmem:[%s17121_s1 + $0x190] sm:$0xff]  }
  0xf8   : > { %11458 = vmatmul.mubr.bf16.vlgmr.msra.gmra.mrb[64].mxu1 %v10127_v59  ;;  %v10083_v63 = vrot.slane %v12312_v42, 9  ;;  %v13549_v5 = vsel %vm13413_vm8, %v2641_v41, %v2642_v16  ;;  %v12313_v22 = vld [vmem:[#allocation2 + $0x38] sm:$0x1]  ;;  %v2648_v16 = vrot.slane %v2646_v4, 4  ;;  %v12315_v15 = vld [vmem:[#allocation2 + $0x50] sm:$0x1]  ;;  %v10129_v1 = vcombine.low %v13525_v20, %v13536_v37 }
  0xf9   : > { %v1306_v23 = vsel %vm13413_vm8, %v1304_v57, %v1305_v2  ;;  %11461 = vmatprep.mubr.bf16.mxu1 %v10128_v47  ;;  %v1310_v34 = vsel %vm13413_vm8, %v9994_v53, %v1309_v29  ;;  %v1311_v54 = vrot.slane %v1309_v29, 4  ;;  %v1312_v25 = vrot.slane %v12313_v22, 5  ;;  %11490 = vmatpush3.bf16.msra.mxu1 %v12314_v51  ;;  %v12316_v33 = vld [vmem:[#allocation2 + $0x58] sm:$0xf]  ;;  %v12134_v47 = vld [vmem:[%s17121_s1 + $0x210] sm:$0xff]  }
  0xfa   : > { %v10041_v59 = vcombine.low %v1303_v28, %v1306_v23  ;;  %v2649_v60 = vrot.slane %v12315_v15, 5  ;;  %v2653_v13 = vrot.slane %v12316_v33, 5  ;;  %v12128_v45 = vld [vmem:[%s17121_s1 + $0x1d8] sm:$0xff]   ;;  %11491 = vmatprep.subr.bf16.mxu1 %v12131_v35  ;;  %10852 = vmatpush3.bf16.msra.mxu0 %v12125_v58  ;;  %v12318_v57 = vld [vmem:[#allocation2 + $0x40] sm:$0xf]  ;;  %v10130_v44 = vcombine.low %v13540_v11, %v13549_v5 }
  0xfb   : > { %v1313_v41 = vsel %vm13413_vm8, %v1311_v54, %v1312_v25  ;;  %v12317_v36 = vld [vmem:[#allocation2 + $0x3c] sm:$0xf]  ;;  %v1316_v28 = vrot.slane %v12318_v57, 5  ;;  %v13571_v10 = vld [vmem:[#allocation2 + $0x48] sm:$0xf]  ;;  %10853 = vmatprep.subr.bf16.mxu0 %v12126_v27  ;;  %v13584_v11 = vsel %vm13413_vm8, %v10083_v63, %v2646_v4 }
  0xfc   : > { %v9995_v2 = vrot.slane %v12317_v36, 9  ;;  %v13573_v53 = vld [vmem:[#allocation2 + $0x4c] sm:$0xf]  ;;  %v10042_v29 = vcombine.low %v1310_v34, %v1313_v41  ;;  %v12319_v23 = vld [vmem:[#allocation2 + $0x54] sm:$0xf]  ;;  %v2655_v37 = vrot.slane %v2653_v13, 4  ;;  %v13596_v4 = vsel %vm13413_vm8, %v2648_v16, %v2649_v60 }
  0xfd   : > { %v10084_v42 = vrot.slane %v12319_v23, 9  ;;  %v12320_v20 = vld [vmem:[#allocation2 + $0x44] sm:$0x1]  ;;  %v12321_v22 = vld [vmem:[#allocation2 + $0x5c] sm:$0x1]  ;;  %v1318_v25 = vrot.slane %v1316_v28, 4  ;;  %11492 = vmatpush3.bf16.msra.mxu1 %v12131_v35  ;;  %11414 = vmatmul.mubr.bf16.gmra.mrb[68].mxu0 %v10041_v59 }
  0xfe   : > { %v1319_v58 = vrot.slane %v12320_v20, 5  ;;  %v2656_v54 = vrot.slane %v12321_v22, 5  ;;  %v13577_v51 = vld [vmem:[#allocation2 + $0x64] sm:$0xf]  ;;  %v12323_v5 = vld [vmem:[#allocation2 + $0x48] sm:$0xf]  ;;  %11493 = vmatprep.subr.bf16.mxu1 %v12134_v47  ;;  %11417 = vmatprep.mubr.bf16.mxu0 %v10042_v29  ;;  %v1317_v63 = vsel %vm13413_vm8, %v9995_v2, %v1316_v28 }
  0xff   : > { %v2660_v15 = vrot.slane %v13577_v51, 5  ;;  %v9996_v27 = vrot.slane %v12323_v5, 9  ;;  %v12324_v34 = vld [vmem:[#allocation2 + $0x4c] sm:$0xf]  ;;  %v12129_v41 = vld [vmem:[%s17121_s1 + $0x198] sm:$0xff]   ;;  %10854 = vmatpush3.bf16.msra.mxu0 %v12127_v0  ;;  %v12132_v23 = vld [vmem:[%s17121_s1 + $0x1e0] sm:$0xff]   ;;  %v13607_v20 = vsel %vm13413_vm8, %v10084_v42, %v2653_v13 }
 0x100   : > { %v1323_v33 = vrot.slane %v12324_v34, 5  ;;  %v12135_v35 = vld [vmem:[%s17121_s1 + $0x218] sm:$0xff]   ;;  %v1320_v59 = vsel %vm13413_vm8, %v1318_v25, %v1319_v58  ;;  %v12325_v36 = vld [vmem:[#allocation2 + $0x60] sm:$0xf]  ;;  %11462 = vmatmul.mubr.bf16.gmra.mrb[68].mxu1 %v10129_v1  ;;  %v12326_v2 = vld [vmem:[#allocation2 + $0x50] sm:$0x1]  ;;  %10855 = vmatprep.subr.bf16.mxu0 %v12128_v45  ;;  %v13613_v0 = vsel %vm13413_vm8, %v2655_v37, %v2656_v54 }
 0x101   : > { %v10085_v57 = vrot.slane %v12325_v36, 9  ;;  %v1326_v28 = vrot.slane %v12326_v2, 5  ;;  %11465 = vmatprep.mubr.bf16.mxu1 %v10130_v44  ;;  %v2662_v29 = vrot.slane %v2660_v15, 4  ;;  %v12327_v1 = vld [vmem:[#allocation2 + $0x68] sm:$0x1]  ;;  %v12133_v42 = vld [vmem:[%s17121_s1 + $0x1a0] sm:$0xff]   ;;  %11494 = vmatpush3.bf16.msra.mxu1 %v12134_v47  ;;  %v10043_v44 = vcombine.low %v1317_v63, %v1320_v59 }
 0x102   : > { %v1324_v16 = vsel %vm13413_vm8, %v9996_v27, %v1323_v33  ;;  %v1325_v60 = vrot.slane %v1323_v33, 4  ;;  %v2663_v58 = vrot.slane %v12327_v1, 5  ;;  %v12328_v22 = vld [vmem:[#allocation2 + $0x70] sm:$0xf]  ;;  %v12138_v45 = vld [vmem:[%s17121_s1 + $0x220] sm:$0xff]   ;;  %11495 = vmatprep.subr.bf16.mxu1 %v12135_v35  ;;  %v12136_v34 = vld [vmem:[%s17121_s1 + $0x1e8] sm:$0xff]   ;;  %v10131_v47 = vcombine.low %v13584_v11, %v13596_v4 }
 0x103   : > { %v2667_v13 = vrot.slane %v12328_v22, 5  ;;  %v12329_v54 = vld [vmem:[#allocation2 + $0x6c] sm:$0xf]  ;;  %v12330_v5 = vld [vmem:[#allocation2 + $0x58] sm:$0xf]  ;;  %10856 = vmatpush3.bf16.msra.mxu0 %v12129_v41  ;;  %v10132_v30 = vcombine.low %v13607_v20, %v13613_v0 }
 0x104   : > { %v1327_v37 = vsel %vm13413_vm8, %v1325_v60, %v1326_v28  ;;  %v10086_v25 = vrot.slane %v12329_v54, 9  ;;  %v1330_v27 = vrot.slane %v12330_v5, 5  ;;  %v12331_v36 = vld [vmem:[#allocation2 + $0x54] sm:$0xf]  ;;  %v12332_v1 = vld [vmem:[#allocation2 + $0x5c] sm:$0x1]  ;;  %10857 = vmatprep.subr.bf16.mxu0 %v12132_v23  ;;  %v13642_v23 = vsel %vm13413_vm8, %v10085_v57, %v2660_v15 }
 0x105   : > { %v10044_v33 = vcombine.low %v1324_v16, %v1327_v37  ;;  %v9997_v2 = vrot.slane %v12331_v36, 9  ;;  %v1333_v63 = vrot.slane %v12332_v1, 5  ;;  %v2669_v59 = vrot.slane %v2667_v13, 4  ;;  %v12333_v60 = vld [vmem:[#allocation2 + $0x74] sm:$0x1]  ;;  %11496 = vmatpush3.bf16.msra.mxu1 %v12135_v35  ;;  %v12137_v41 = vld [vmem:[%s17121_s1 + $0x1a8] sm:$0xff]   ;;  %11418 = vmatmul.mubr.bf16.gmra.mrb[72].mxu0 %v10043_v44 }
 0x106   : > { %v2670_v28 = vrot.slane %v12333_v60, 5  ;;  %v1332_v22 = vrot.slane %v1330_v27, 4  ;;  %v12334_v54 = vld [vmem:[#allocation2 + $0x7c] sm:$0xf]  ;;  %v12335_v39 = vld [vmem:[#allocation2 + $0x78] sm:$0xf]  ;;  %11497 = vmatprep.subr.bf16.mxu1 %v12138_v45  ;;  %v13654_v15 = vsel %vm13413_vm8, %v10086_v25, %v2667_v13 }
 0x107   : > { %v2674_v5 = vrot.slane %v12334_v54, 5  ;;  %v10087_v9 = vrot.slane %v12335_v39, 9  ;;  %v12336_v56 = vld [vmem:[#allocation2 + $0x60] sm:$0xf]  ;;  %v12337_v4 = vld [vmem:[#allocation2 + $0x64] sm:$0xf]  ;;  %11421 = vmatprep.mubr.bf16.mxu0 %v10044_v33  ;;  %v1331_v0 = vsel %vm13413_vm8, %v9997_v2, %v1330_v27  ;;  %10858 = vmatpush3.bf16.msra.mxu0 %v12133_v42 }
 0x108   : > { %v9998_v11 = vrot.slane %v12336_v56, 9  ;;  %v1337_v16 = vrot.slane %v12337_v4, 5  ;;  %v12139_v37 = vld [vmem:[%s17121_s1 + $0x228] sm:$0xff]   ;;  %v13646_v56 = vsel %vm13413_vm8, %v2662_v29, %v2663_v58  ;;  %v12338_v35 = vld [vmem:[#allocation2 + $0x80] sm:$0x1]  ;;  %v1334_v44 = vsel %vm13413_vm8, %v1332_v22, %v1333_v63  ;;  %11466 = vmatmul.mubr.bf16.gmra.mrb[72].mxu1 %v10131_v47  ;;  %10859 = vmatprep.subr.bf16.mxu0 %v12136_v34  ;;  %v12140_v33 = vld [vmem:[%s17121_s1 + $0x1f0] sm:$0xff]  }
 0x109   : > { %v2676_v39 = vrot.slane %v2674_v5, 4  ;;  %v2677_v20 = vrot.slane %v12338_v35, 5  ;;  %v12339_v36 = vld [vmem:[#allocation2 + $0x68] sm:$0x1]  ;;  %v13658_v57 = vsel %vm13413_vm8, %v2669_v59, %v2670_v28  ;;  %v12340_v58 = vld [vmem:[#allocation2 + $0x84] sm:$0xf]  ;;  %11469 = vmatprep.mubr.bf16.mxu1 %v10132_v30  ;;  %v13672_v13 = vsel %vm13413_vm8, %v10087_v9, %v2674_v5  ;;  %11498 = vmatpush3.bf16.msra.mxu1 %v12138_v45 }
 0x10a   : > { %v1339_v51 = vrot.slane %v1337_v16, 4  ;;  %v1340_v1 = vrot.slane %v12339_v36, 5  ;;  %v1338_v29 = vsel %vm13413_vm8, %v9998_v11, %v1337_v16  ;;  %v10088_v27 = vrot.slane %v12340_v58, 9  ;;  %v13668_v42 = vld [vmem:[%s17121_s1 + $0x230] sm:$0xff]   ;;  %v12341_v47 = vld [vmem:[#allocation2 + $0x88] sm:$0xf]  ;;  %11499 = vmatprep.subr.bf16.mxu1 %v12139_v37 }
 0x10b   : > { %v2681_v2 = vrot.slane %v12341_v47, 5  ;;  %v12342_v34 = vld [vmem:[#allocation2 + $0x70] sm:$0xf]  ;;  %v10045_v59 = vcombine.low %v1331_v0, %v1334_v44  ;;  %v13678_v60 = vsel %vm13413_vm8, %v2676_v39, %v2677_v20  ;;  %v12343_v28 = vld [vmem:[#allocation2 + $0x6c] sm:$0xf]  ;;  %v10133_v9 = vcombine.low %v13642_v23, %v13646_v56  ;;  %10860 = vmatpush3.bf16.msra.mxu0 %v12137_v41  ;;  %v12143_v56 = vld [vmem:[%s17121_s1 + $0x238] sm:$0xff]  }
 0x10c   : > { %v1341_v25 = vsel %vm13413_vm8, %v1339_v51, %v1340_v1  ;;  %v1344_v63 = vrot.slane %v12342_v34, 5  ;;  %v9999_v22 = vrot.slane %v12343_v28, 9  ;;  %v12344_v30 = vld [vmem:[#allocation2 + $0x74] sm:$0x1]  ;;  %v10134_v39 = vcombine.low %v13654_v15, %v13658_v57  ;;  %v12346_v35 = vld [vmem:[#allocation2 + $0x8c] sm:$0x1]  ;;  %10861 = vmatprep.subr.bf16.mxu0 %v12140_v33 }
 0x10d   : > { %v1347_v54 = vrot.slane %v12344_v30, 5  ;;  %v10046_v5 = vcombine.low %v1338_v29, %v1341_v25  ;;  %v13682_v4 = vld [vmem:[#allocation2 + $0x94] sm:$0xf]  ;;  %v2684_v20 = vrot.slane %v12346_v35, 5  ;;  %v12347_v0 = vld [vmem:[#allocation2 + $0x78] sm:$0xf]  ;;  %v10135_v36 = vcombine.low %v13672_v13, %v13678_v60  ;;  %11500 = vmatpush3.bf16.msra.mxu1 %v12139_v37  ;;  %11422 = vmatmul.mubr.bf16.gmra.mrb[76].mxu0 %v10045_v59 }
 0x10e   : > { %v1346_v11 = vrot.slane %v1344_v63, 4  ;;  %v2688_v16 = vrot.slane %v13682_v4, 5  ;;  %v12141_v45 = vld [vmem:[%s17121_s1 + $0x1b0] sm:$0xff]   ;;  %v10000_v44 = vrot.slane %v12347_v0, 9  ;;  %v12348_v51 = vld [vmem:[#allocation2 + $0x7c] sm:$0xf]  ;;  %v13700_v1 = vsel %vm13413_vm8, %v10088_v27, %v2681_v2  ;;  %11501 = vmatprep.subr.bf16.mxu1 %v13668_v42 }
 0x10f   : > { %v1351_v23 = vrot.slane %v12348_v51, 5  ;;  %v12144_v41 = vld [vmem:[%s17121_s1 + $0x1f8] sm:$0xff]   ;;  %v2683_v15 = vrot.slane %v2681_v2, 4  ;;  %v12349_v57 = vld [vmem:[#allocation2 + $0x90] sm:$0xf]  ;;  %v1345_v33 = vsel %vm13413_vm8, %v9999_v22, %v1344_v63  ;;  %11425 = vmatprep.mubr.bf16.mxu0 %v10046_v5  ;;  %10862 = vmatpush3.bf16.msra.mxu0 %v12141_v45  ;;  %v2716_v13 = vrot.slane %v13431_v48, 5 }
 0x110   : > { %v10089_v29 = vrot.slane %v12349_v57, 9  ;;  %v12145_v58 = vld [vmem:[%s17121_s1 + $0x1b8] sm:$0xff]   ;;  %v1348_v25 = vsel %vm13413_vm8, %v1346_v11, %v1347_v54  ;;  %v12350_v34 = vld [vmem:[#allocation2 + $0x80] sm:$0x1]  ;;  %v2690_v37 = vrot.slane %v2688_v16, 4  ;;  %11470 = vmatmul.mubr.bf16.gmra.mrb[76].mxu1 %v10133_v9  ;;  %10863 = vmatprep.subr.bf16.mxu0 %v12144_v41 }
 0x111   : > { %v1353_v47 = vrot.slane %v1351_v23, 4  ;;  %v1354_v28 = vrot.slane %v12350_v34, 5  ;;  %v12351_v27 = vld [vmem:[#allocation2 + $0x98] sm:$0x1]  ;;  %v12352_v30 = vld [vmem:[#allocation2 + $0x9c] sm:$0xf]  ;;  %v1352_v63 = vsel %vm13413_vm8, %v10000_v44, %v1351_v23  ;;  %11473 = vmatprep.mubr.bf16.mxu1 %v10134_v39  ;;  %v2685_v57 = vsel %vm13413_vm8, %v2683_v15, %v2684_v20  ;;  %11502 = vmatpush3.bf16.msra.mxu1 %v13668_v42 }
 0x112   : > { %v2691_v2 = vrot.slane %v12351_v27, 5  ;;  %v10090_v35 = vrot.slane %v12352_v30, 9  ;;  %v12353_v59 = vld [vmem:[#allocation2 + $0xa0] sm:$0xf]  ;;  %v12354_v54 = vld [vmem:[#allocation2 + $0xa4] sm:$0x1]  ;;  %v10047_v34 = vcombine.low %v1345_v33, %v1348_v25  ;;  %11503 = vmatprep.subr.bf16.mxu1 %v12143_v56  ;;  %v10136_v33 = vcombine.low %v13700_v1, %v2685_v57 }
 0x113   : > { %v2695_v0 = vrot.slane %v12353_v59, 5  ;;  %v1355_v22 = vsel %vm13413_vm8, %v1353_v47, %v1354_v28  ;;  %v2698_v11 = vrot.slane %v12354_v54, 5  ;;  %v12355_v5 = vld [vmem:[#allocation2 + $0x88] sm:$0xf]  ;;  %v12356_v30 = vld [vmem:[#allocation2 + $0x84] sm:$0xf]  ;;  %10864 = vmatpush3.bf16.msra.mxu0 %v12145_v58  ;;  %v13727_v42 = vsel %vm13413_vm8, %v10089_v29, %v2688_v16 }
 0x114   : > { %v1358_v51 = vrot.slane %v12355_v5, 5  ;;  %v10001_v45 = vrot.slane %v12356_v30, 9  ;;  %v12357_v44 = vld [vmem:[#allocation2 + $0x8c] sm:$0x1]  ;;  %v10091_v47 = vrot.slane %v13329_v19, 9  ;;  %v2702_v28 = vrot.slane %v13331_v21, 5 }
 0x115   : > { %v2697_v27 = vrot.slane %v2695_v0, 4  ;;  %v1361_v23 = vrot.slane %v12357_v44, 5  ;;  %v10048_v59 = vcombine.low %v1352_v63, %v1355_v22  ;;  %v2705_v39 = vrot.slane %v13333_v18, 5  ;;  %v12358_v41 = vld [vmem:[#allocation2 + $0x90] sm:$0xf]  ;;  %11504 = vmatpush3.bf16.msra.mxu1 %v12143_v56  ;;  %11426 = vmatmul.mubr.bf16.gmra.mrb[80].mxu0 %v10047_v34 }
 0x116   : > { %v1360_v9 = vrot.slane %v1358_v51, 4  ;;  %v10002_v54 = vrot.slane %v12358_v41, 9  ;;  %v12359_v20 = vld [vmem:[#allocation2 + $0x94] sm:$0xf]  ;;  %v13731_v19 = vsel %vm13413_vm8, %v2690_v37, %v2691_v2  ;;  %v2704_v21 = vrot.slane %v2702_v28, 4  ;;  %v13750_v2 = vpop.f32.mrb[0].mxu1 }
 0x117   : > { %v1365_v15 = vrot.slane %v12359_v20, 5  ;;  %v13735_v18 = vsel %vm13413_vm8, %v10090_v35, %v2695_v0  ;;  %v1359_v58 = vsel %vm13413_vm8, %v10001_v45, %v1358_v51  ;;  %v12360_v1 = vld [vmem:[#allocation2 + $0x98] sm:$0x1]  ;;  %v13741_v4 = vsel %vm13413_vm8, %v2697_v27, %v2698_v11  ;;  %11429 = vmatprep.mubr.bf16.mxu0 %v10048_v59  ;;  %v12361_v22 = vld [vmem:[#allocation2 + $0xa0] sm:$0xf]  ;;  %v13759_v5 = vpop.f32.mrb[1].mxu1 }
 0x118   : > { %v1368_v63 = vrot.slane %v12360_v1, 5  ;;  %v1362_v16 = vsel %vm13413_vm8, %v1360_v9, %v1361_v23  ;;  %v13747_v29 = vsel %vm13413_vm8, %v10091_v47, %v2702_v28  ;;  %v2709_v37 = vrot.slane %v13394_v40, 5  ;;  %11474 = vmatmul.mubr.bf16.gmra.mrb[80].mxu1 %v10135_v36  ;;  %v12362_v34 = vld [vmem:[#allocation2 + $0x9c] sm:$0xf]  ;;  %v13767_v30 = vpop.f32.mrb[2].mxu1 }
 0x119   : > { %v1367_v25 = vrot.slane %v1365_v15, 4  ;;  %v13754_v56 = vsel %vm13413_vm8, %v2704_v21, %v2705_v39  ;;  %v1366_v35 = vsel %vm13413_vm8, %v10002_v54, %v1365_v15  ;;  %v10092_v0 = vrot.slane %v13392_v38, 9  ;;  %11477 = vmatprep.mubr.bf16.mxu1 %v10136_v33  ;;  %v12363_v9 = vld [vmem:[#allocation2 + $0xa4] sm:$0x1]  ;;  %v13772_v60 = vpop.f32.mrb[3].mxu1 }
 0x11a   : > { %v1372_v11 = vrot.slane %v12361_v22, 5  ;;  %v2711_v51 = vrot.slane %v2709_v37, 4  ;;  %v2712_v57 = vrot.slane %v13383_v14, 5  ;;  %v10003_v27 = vrot.slane %v12362_v34, 9  ;;  %v12364_v47 = vld [vmem:[#allocation2 + $0xa8] sm:$0xf] }
 0x11b   : > { %v1369_v40 = vsel %vm13413_vm8, %v1367_v25, %v1368_v63  ;;  %v10137_v38 = vcombine.low %v13727_v42, %v13731_v19  ;;  %v1375_v44 = vrot.slane %v12363_v9, 5  ;;  %v10049_v36 = vcombine.low %v1359_v58, %v1362_v16  ;;  %v12365_v28 = vld [vmem:[#allocation2 + $0xac] sm:$0xf]  ;;  %v13783_v48 = vld [vmem:[#allocation2 + $0x20] sm:$0x1] }
 0x11c   : > { %v1374_v45 = vrot.slane %v1372_v11, 4  ;;  %v10093_v23 = vrot.slane %v13429_v61, 9  ;;  %v10004_v14 = vrot.slane %v12364_v47, 9  ;;  %v1379_v59 = vrot.slane %v12365_v28, 5  ;;  %v13796_v25 = vld [vmem:[#allocation2 + $0x2c] sm:$0x1] }
 0x11d   : > { %v10138_v39 = vcombine.low %v13735_v18, %v13741_v4  ;;  %v10139_v41 = vcombine.low %v13747_v29, %v13754_v56  ;;  %v10050_v54 = vcombine.low %v1366_v35, %v1369_v40  ;;  %v13781_v20 = vsel %vm13413_vm8, %v10092_v0, %v2709_v37  ;;  %11430 = vmatmul.mubr.bf16.gmra.mrb[84].mxu0 %v10049_v36  ;;  %v13806_v16 = vpop.f32.mrb[4].mxu1 }
 0x11e   : > { %v13787_v61 = vsel %vm13413_vm8, %v2711_v51, %v2712_v57  ;;  %v1373_v15 = vsel %vm13413_vm8, %v10003_v27, %v1372_v11  ;;  %v1381_v33 = vrot.slane %v1379_v59, 4  ;;  %v1382_v42 = vrot.slane %v13356_v55, 5  ;;  %v13812_v22 = vpop.f32.mrb[5].mxu1 }
 0x11f   : > { %v1376_v19 = vsel %vm13413_vm8, %v1374_v45, %v1375_v44  ;;  %v2718_v21 = vrot.slane %v2716_v13, 4  ;;  %v2719_v18 = vrot.slane %v13425_v50, 5  ;;  %v4005_v58 = vrot.slane %v13381_v7, 5  ;;  %11433 = vmatprep.mubr.bf16.mxu0 %v10050_v54  ;;  %v13816_v57 = vpop.f32.mrb[6].mxu1  ;;  %v12366_v54 = vld [vmem:[#allocation2 + $0x1c] sm:$0xf] }
 0x120   : > { %v13800_v1 = vsel %vm13413_vm8, %v10093_v23, %v2716_v13  ;;  %v1380_v63 = vsel %vm13413_vm8, %v10004_v14, %v1379_v59  ;;  %v10166_v55 = vrot.slane %v13385_v24, 9  ;;  %v1386_v4 = vrot.slane %v13408_v17, 5  ;;  %11478 = vmatmul.mubr.bf16.gmra.mrb[84].mxu1 %v10137_v38  ;;  %v13825_v38 = vpop.f32.mrb[7].mxu1 }
 0x121   : > { %v1383_v50 = vsel %vm13413_vm8, %v1381_v33, %v1382_v42  ;;  %v4007_v37 = vrot.slane %v4005_v58, 4  ;;  %v4008_v35 = vrot.slane %v13783_v48, 5  ;;  %v10005_v0 = vrot.slane %v13400_v43, 9  ;;  %11481 = vmatprep.mubr.bf16.mxu1 %v10138_v39  ;;  %17158 = vst [vmem:[#allocation9_spill] sm:$0xff] %v13825_v38  ;;  %v13837_v28 = vpop.f32.mrb[0].mxu0 }
 0x122   : > { %v10051_v11 = vcombine.low %v1373_v15, %v1376_v19  ;;  %v1388_v40 = vrot.slane %v1386_v4, 4  ;;  %v1389_v51 = vrot.slane %v13390_v6, 5  ;;  %v4012_v17 = vrot.slane %v13479_v62, 5  ;;  %17159 = vst [vmem:[#allocation10_spill] sm:$0xff] %v13837_v28  ;;  %v13844_v42 = vpop.f32.mrb[1].mxu0 }
 0x123   : > { %v13820_v34 = vsel %vm13413_vm8, %v2718_v21, %v2719_v18  ;;  %v10167_v27 = vrot.slane %v13477_v26, 9  ;;  %v3572_v43 = vshrl.u32 %v13385_v24, 16  ;;  %v3575_v45 = vshll.u32 %v13385_v24, 16  ;;  %17160 = vst [vmem:[#allocation11_spill] sm:$0xff] %v13844_v42 }
 0x124   : > { %v10052_v9 = vcombine.low %v1380_v63, %v1383_v50  ;;  %v13829_v6 = vsel %vm13413_vm8, %v10166_v55, %v4005_v58  ;;  %v4014_v44 = vrot.slane %v4012_v17, 4  ;;  %v4015_v13 = vrot.slane %v13796_v25, 5  ;;  %v13849_v63 = vpop.f32.mrb[2].mxu0  ;;  %v13859_v50 = vld [vmem:[#allocation2 + $0x38] sm:$0x1] }
 0x125   : > { %v13834_v36 = vsel %vm13413_vm8, %v4007_v37, %v4008_v35  ;;  %v3574_v23 = vrot.slane %v3572_v43, 4  ;;  %v3577_v47 = vrot.slane %v3575_v45, 5  ;;  %v3581_v14 = vshll.u32 %v13381_v7, 16  ;;  %17161 = vst [vmem:[#allocation12_spill] sm:$0xff] %v13849_v63  ;;  %11434 = vmatmul.mubr.bf16.gmra.mrb[88].mxu0 %v10051_v11  ;;  %v13868_v43 = vld [vmem:[#allocation2 + $0x44] sm:$0x1] }
 0x126   : > { %v10140_v59 = vcombine.low %v13781_v20, %v13787_v61  ;;  %v3585_v15 = vshrl.u32 %v12366_v54, 16  ;;  %v3591_v33 = vshll.u32 %v13783_v48, 16  ;;  %v1387_v19 = vsel %vm13413_vm8, %v10005_v0, %v1386_v4  ;;  %v13861_v4 = vpop.f32.mrb[3].mxu0  ;;  %11437 = vmatprep.mubr.bf16.mxu0 %v10052_v9  ;;  %v13876_v45 = vpop.f32.mrb[8].mxu1  ;;  %v13904_v20 = vld [vmem:[#allocation2 + $0x50] sm:$0x1] }
 0x127   : > { %v3578_v21 = vor.u32 %v3577_v47, %v3574_v23  ;;  %v3583_v18 = vrot.slane %v3581_v14, 5  ;;  %v4019_v58 = vrot.slane %v13502_v3, 5  ;;  %v1390_v61 = vsel %vm13413_vm8, %v1388_v40, %v1389_v51  ;;  %17162 = vst [vmem:[#allocation13_spill] sm:$0xff] %v13861_v4  ;;  %17163 = vst [vmem:[#allocation14_spill] sm:$0xff] %v13876_v45  ;;  %v13880_v47 = vpop.f32.mrb[9].mxu1 }
 0x128   : > { %v13857_v48 = vsel %vm13413_vm8, %v10167_v27, %v4012_v17  ;;  %v3587_v55 = vrot.slane %v3585_v15, 4  ;;  %v13865_v37 = vsel %vm13413_vm8, %v4014_v44, %v4015_v13  ;;  %v3593_v0 = vrot.slane %v3591_v33, 5  ;;  %11482 = vmatmul.mubr.bf16.gmra.mrb[88].mxu1 %v10139_v41  ;;  %17164 = vst [vmem:[#allocation15_spill] sm:$0xff] %v13880_v47  ;;  %v13884_v54 = vpop.f32.mrb[10].mxu1  ;;  %v14090_v47 = vld [vmem:[#allocation2 + $0x9c] sm:$0xf] }
 0x129   : > { %v3579_v35 = vrot.slane %v3578_v21, 4  ;;  %v10168_v11 = vrot.slane %v13500_v49, 9  ;;  %v4026_v51 = vrot.slane %v13506_v8, 5  ;;  %v3596_v17 = vshrl.u32 %v13477_v26, 16  ;;  %11485 = vmatprep.mubr.bf16.mxu1 %v10140_v59  ;;  %17165 = vst [vmem:[#allocation16_spill] sm:$0xff] %v13884_v54  ;;  %v13891_v21 = vpop.f32.mrb[4].mxu0 }
 0x12a   : > { %v3588_v40 = vor.u32 %v3587_v55, %v3583_v18  ;;  %v3599_v27 = vshll.u32 %v13477_v26, 16  ;;  %v10053_v9 = vcombine.low %v1387_v19, %v1390_v61  ;;  %v4021_v44 = vrot.slane %v4019_v58, 4  ;;  %17166 = vst [vmem:[#allocation17_spill] sm:$0xff] %v13891_v21  ;;  %v13893_v61 = vpop.f32.mrb[11].mxu1  ;;  %17192 = vst [vmem:[#allocation37_spill] sm:$0xff] %v14090_v47 }
 0x12b   : > { %v4022_v13 = vrot.slane %v13859_v50, 5  ;;  %v10169_v23 = vrot.slane %v13504_v52, 9  ;;  %v3584_v29 = vsel %vm12744_vm5, %v3579_v35, %v3583_v18  ;;  %v3598_v41 = vrot.slane %v3596_v17, 4  ;;  %17167 = vst [vmem:[#allocation18_spill] sm:$0xff] %v13893_v61  ;;  %v13898_v17 = vpop.f32.mrb[5].mxu0 }
 0x12c   : > { %v3589_v56 = vrot.slane %v3588_v40, 4  ;;  %v3601_v14 = vrot.slane %v3599_v27, 5  ;;  %v3605_v59 = vshll.u32 %v13479_v62, 16  ;;  %v3609_v33 = vshrl.u32 %v13479_v62, 16  ;;  %17168 = vst [vmem:[#allocation19_spill] sm:$0xff] %v13898_v17  ;;  %v13906_v39 = vpop.f32.mrb[6].mxu0 }
 0x12d   : > { %v3615_v19 = vshll.u32 %v13796_v25, 16  ;;  %v4028_v55 = vrot.slane %v4026_v51, 4  ;;  %v4029_v35 = vrot.slane %v13868_v43, 5  ;;  %v13902_v15 = vsel %vm13413_vm8, %v10168_v11, %v4019_v58  ;;  %17169 = vst [vmem:[#allocation20_spill] sm:$0xff] %v13906_v39  ;;  %11438 = vmatmul.mubr.bf16.gmra.mrb[92].mxu0 %v10053_v9  ;;  %v13917_v58 = vld [vmem:[#allocation2 + $0x54] sm:$0xf] }
 0x12e   : > { %v3594_v18 = vsel %vm12744_vm5, %v3589_v56, %v3593_v0  ;;  %v3602_v40 = vor.u32 %v3601_v14, %v3598_v41  ;;  %v3607_v46 = vrot.slane %v3605_v59, 5  ;;  %v3611_v25 = vrot.slane %v3609_v33, 4  ;;  %v13919_v11 = vpop.f32.mrb[7].mxu0  ;;  %v13922_v33 = vld [vmem:[#allocation2 + $0x58] sm:$0xf] }
 0x12f   : > { %v10198_v27 = vcombine.low %v3584_v29, %v3594_v18  ;;  %v13910_v0 = vsel %vm13413_vm8, %v4021_v44, %v4022_v13  ;;  %v13914_v56 = vsel %vm13413_vm8, %v10169_v23, %v4026_v51  ;;  %v4033_v41 = vrot.slane %v13573_v53, 5  ;;  %17170 = vst [vmem:[#allocation21_spill] sm:$0xff] %v13919_v11 }
 0x130   : > { %v3603_v29 = vrot.slane %v3602_v40, 4  ;;  %v3612_v14 = vor.u32 %v3611_v25, %v3607_v46  ;;  %v3617_v59 = vrot.slane %v3615_v19, 5  ;;  %v10170_v9 = vrot.slane %v13571_v10, 9  ;;  %v13933_v40 = vld [vmem:[#allocation2 + $0x5c] sm:$0x1] }
 0x131   : > { %4531 = vmatprep.mubr.bf16.mxu0 %v10198_v27  ;;  %v3620_v44 = vshrl.u32 %v13500_v49, 16  ;;  %v17171_v51 = vcombine.low %v13800_v1, %v13820_v34  ;;  %v13930_v13 = vsel %vm13413_vm8, %v4028_v55, %v4029_v35  ;;  %v4035_v23 = vrot.slane %v4033_v41, 4  ;;  %v13936_v27 = vpop.f32.mrb[12].mxu1 }
 0x132   : > { %v4036_v18 = vrot.slane %v13904_v20, 5  ;;  %v3623_v19 = vshll.u32 %v13500_v49, 16  ;;  %17172 = vst [vmem:[#allocation22_spill] sm:$0xff] %v13936_v27  ;;  %v17173_v25 = vcombine.low %v13829_v6, %v13834_v36  ;;  %v3608_v1 = vsel %vm12744_vm5, %v3603_v29, %v3607_v46  ;;  %v13946_v32 = vpop.f32.mrb[13].mxu1 }
 0x133   : > { %11486 = vmatmul.mubr.bf16.gmra.mrb[92].mxu1 %v17171_v51  ;;  %v3613_v34 = vrot.slane %v3612_v14, 4  ;;  %v10171_v55 = vrot.slane %v13917_v58, 9  ;;  %v3622_v35 = vrot.slane %v3620_v44, 4  ;;  %v13944_v51 = vld [vmem:[#allocation2 + $0x64] sm:$0xf]  ;;  %17174 = vst [vmem:[#allocation23_spill] sm:$0xff] %v13946_v32  ;;  %v10216_v46 = vcombine.low %v13902_v15, %v13910_v0 }
 0x134   : > { %11505 = vmatprep.mubr.bf16.mxu1 %v17173_v25  ;;  %v4040_v4 = vrot.slane %v13922_v33, 5  ;;  %v3625_v63 = vrot.slane %v3623_v19, 5  ;;  %v3629_v11 = vshll.u32 %v13502_v3, 16  ;;  %v3633_v39 = vshrl.u32 %v13502_v3, 16  ;;  %v13951_v6 = vpop.f32.mrb[14].mxu1  ;;  %v13964_v19 = vpop.f32.mrb[8].mxu0 }
 0x135   : > { %17175 = vst [vmem:[#allocation24_spill] sm:$0xff] %v13951_v6  ;;  %v3618_v36 = vsel %vm12744_vm5, %v3613_v34, %v3617_v59  ;;  %v13959_v29 = vsel %vm13413_vm8, %v10170_v9, %v4033_v41  ;;  %v3639_v14 = vshll.u32 %v13859_v50, 16  ;;  %v13962_v44 = vld [vmem:[#allocation2 + $0x60] sm:$0xf]  ;;  %17176 = vst [vmem:[#allocation25_spill] sm:$0xff] %v13964_v19  ;;  %v13966_v25 = vpop.f32.mrb[15].mxu1  ;;  %v13970_v28 = vsel %vm13413_vm8, %v4035_v23, %v4036_v18 }
 0x136   : > { %17177 = vst [vmem:[#allocation26_spill] sm:$0xff] %v13966_v25  ;;  %v10199_v42 = vcombine.low %v3608_v1, %v3618_v36  ;;  %v3626_v15 = vor.u32 %v3625_v63, %v3622_v35  ;;  %v3631_v0 = vrot.slane %v3629_v11, 5  ;;  %v13972_v59 = vld [vmem:[#allocation2 + $0x68] sm:$0x1]  ;;  %v13974_v34 = vld [vmem:[#allocation2 + $0x6c] sm:$0xf]  ;;  %v17180_v63 = vcombine.low %v13385_v24, %v13381_v7 }
 0x137   : > { %v13976_v41 = vpop.f32.mrb[9].mxu0  ;;  %v4043_v9 = vrot.slane %v13933_v40, 5  ;;  %v3635_v19 = vrot.slane %v3633_v39, 4  ;;  %v4047_v1 = vrot.slane %v13944_v51, 5  ;;  %v13982_v36 = vld [vmem:[#allocation2 + $0x70] sm:$0xf]  ;;  %v13991_v11 = vsel %vm13413_vm8, %v10171_v55, %v4040_v4 }
 0x138   : > { %17178 = vst [vmem:[#allocation27_spill] sm:$0xff] %v13976_v41  ;;  %v13984_v23 = vpop.f32.mrb[10].mxu0  ;;  %4532 = vmatmul.mubr.bf16.vlgmr.msra.gmra.mrb[96].mxu0 %v17180_v63  ;;  %v4042_v18 = vrot.slane %v4040_v4, 4  ;;  %v3627_v35 = vrot.slane %v3626_v15, 4  ;;  %v10172_v50 = vrot.slane %v13962_v44, 9  ;;  %v10218_v39 = vcombine.low %v13959_v29, %v13970_v28 }
 0x139   : > { %17179 = vst [vmem:[#allocation28_spill] sm:$0xff] %v13984_v23  ;;  %v13994_v41 = vpop.f32.mrb[11].mxu0  ;;  %4539 = vmatprep.mubr.bf16.mxu0 %v10199_v42  ;;  %v3636_v17 = vor.u32 %v3635_v19, %v3631_v0  ;;  %v3641_v23 = vrot.slane %v3639_v14, 5  ;;  %v4050_v21 = vrot.slane %v13972_v59, 5  ;;  %v17182_v7 = vcombine.low %v13857_v48, %v13865_v37  ;;  %v14002_v55 = vld [vmem:[#allocation2 + $0x74] sm:$0x1] }
 0x13a   : > { %17181 = vst [vmem:[#allocation29_spill] sm:$0xff] %v13994_v41  ;;  %v4049_v24 = vrot.slane %v4047_v1, 4  ;;  %v10173_v4 = vrot.slane %v13974_v34, 9  ;;  %v4054_v15 = vrot.slane %v13982_v36, 5  ;;  %v3644_v42 = vshrl.u32 %v13504_v52, 16 }
 0x13b   : > { %11506 = vmatmul.mubr.bf16.vlgmr.msra.gmra.mrb[64].mxu1 %v17182_v7  ;;  %v3632_v28 = vsel %vm12744_vm5, %v3627_v35, %v3631_v0  ;;  %v3637_v29 = vrot.slane %v3636_v17, 4  ;;  %v3647_v14 = vshll.u32 %v13504_v52, 16  ;;  %v3653_v19 = vshll.u32 %v13506_v8, 16  ;;  %v14022_v41 = vld [vmem:[#allocation2 + $0x7c] sm:$0xf] }
 0x13c   : > { %11509 = vmatprep.mubr.bf16.mxu1 %v10216_v46  ;;  %v14013_v48 = vsel %vm13413_vm8, %v4042_v18, %v4043_v9  ;;  %v14017_v37 = vsel %vm13413_vm8, %v10172_v50, %v4047_v1  ;;  %v3646_v63 = vrot.slane %v3644_v42, 4  ;;  %v3657_v7 = vshrl.u32 %v13506_v8, 16  ;;  %v14020_v46 = vld [vmem:[#allocation2 + $0x78] sm:$0xf]  ;;  %v14027_v9 = vld [vmem:[#allocation2 + $0x88] sm:$0xf] }
 0x13d   : > { %v3642_v17 = vsel %vm12744_vm5, %v3637_v29, %v3641_v23  ;;  %v4057_v0 = vrot.slane %v14002_v55, 5  ;;  %v3649_v35 = vrot.slane %v3647_v14, 5  ;;  %v3655_v25 = vrot.slane %v3653_v19, 5  ;;  %v14029_v18 = vpop.f32.mrb[12].mxu0  ;;  %v14032_v32 = vld [vmem:[#allocation2 + $0x80] sm:$0x1] }
 0x13e   : > { %17183 = vst [vmem:[#allocation30_spill] sm:$0xff] %v14029_v18  ;;  %v10200_v50 = vcombine.low %v3632_v28, %v3642_v17  ;;  %v4056_v1 = vrot.slane %v4054_v15, 4  ;;  %v3659_v42 = vrot.slane %v3657_v7, 4  ;;  %v3663_v6 = vshll.u32 %v13868_v43, 16  ;;  %v14034_v27 = vpop.f32.mrb[13].mxu0 }
 0x13f   : > { %17184 = vst [vmem:[#allocation31_spill] sm:$0xff] %v14034_v27  ;;  %v14038_v23 = vsel %vm13413_vm8, %v4049_v24, %v4050_v21  ;;  %v14042_v29 = vsel %vm13413_vm8, %v10173_v4, %v4054_v15  ;;  %v3650_v14 = vor.u32 %v3649_v35, %v3646_v63  ;;  %v4061_v19 = vrot.slane %v14022_v41, 5  ;;  %v14045_v28 = vld [vmem:[#allocation2 + $0x84] sm:$0xf]  ;;  %v14047_v7 = vpop.f32.mrb[14].mxu0 }
 0x140   : > { %17185 = vst [vmem:[#allocation32_spill] sm:$0xff] %v14047_v7  ;;  %v17186_v43 = vcombine.low %v13477_v26, %v13479_v62  ;;  %v3660_v17 = vor.u32 %v3659_v42, %v3655_v25  ;;  %v3665_v27 = vrot.slane %v3663_v6, 5  ;;  %v10174_v21 = vrot.slane %v14020_v46, 9  ;;  %v14053_v24 = vld [vmem:[#allocation2 + $0x8c] sm:$0x1]  ;;  %v14056_v15 = vpop.f32.mrb[15].mxu0 }
 0x141   : > { %v4068_v4 = vrot.slane %v14027_v9, 5  ;;  %17187 = vst [vmem:[#allocation33_spill] sm:$0xff] %v14056_v15  ;;  %v3651_v63 = vrot.slane %v3650_v14, 4  ;;  %v4063_v35 = vrot.slane %v4061_v19, 4  ;;  %v4064_v18 = vrot.slane %v14032_v32, 5 }
 0x142   : > { %4540 = vmatmul.mubr.bf16.gmra.mrb[100].mxu0 %v17186_v43  ;;  %v3668_v7 = vshrl.u32 %v13571_v10, 16  ;;  %v17188_v26 = vcombine.low %v13914_v56, %v13930_v13  ;;  %v14065_v62 = vsel %vm13413_vm8, %v4056_v1, %v4057_v0  ;;  %v3661_v6 = vrot.slane %v3660_v17, 4  ;;  %v14073_v56 = vld [vmem:[#allocation2 + $0x90] sm:$0xf] }
 0x143   : > { %4547 = vmatprep.mubr.bf16.mxu0 %v10200_v50  ;;  %v10175_v42 = vrot.slane %v14045_v28, 9  ;;  %v3671_v43 = vshll.u32 %v13571_v10, 16  ;;  %v3656_v50 = vsel %vm12744_vm5, %v3651_v63, %v3655_v25  ;;  %v4071_v14 = vrot.slane %v14053_v24, 5  ;;  %17189 = vst [vmem:[#allocation34_spill] sm:$0xff] %v14073_v56 }
 0x144   : > { %11510 = vmatmul.mubr.bf16.gmra.mrb[68].mxu1 %v17188_v26  ;;  %v3670_v15 = vrot.slane %v3668_v7, 4  ;;  %v3677_v61 = vshll.u32 %v13573_v53, 16  ;;  %v3666_v13 = vsel %vm12744_vm5, %v3661_v6, %v3665_v27  ;;  %v14079_v0 = vsel %vm13413_vm8, %v10174_v21, %v4061_v19  ;;  %v14083_v26 = vpop.f32.mrb[16].mxu1  ;;  %v14092_v27 = vpop.f32.mrb[16].mxu0 }
 0x145   : > { %11513 = vmatprep.mubr.bf16.mxu1 %v10218_v39  ;;  %v4070_v1 = vrot.slane %v4068_v4, 4  ;;  %v3673_v17 = vrot.slane %v3671_v43, 5  ;;  %v14081_v39 = vld [vmem:[#allocation2 + $0x94] sm:$0xf]  ;;  %17191 = vst [vmem:[#allocation36_spill] sm:$0xff] %v14083_v26  ;;  %v10201_v25 = vcombine.low %v3656_v50, %v3666_v13  ;;  %v14087_v7 = vsel %vm13413_vm8, %v4063_v35, %v4064_v18  ;;  %17193 = vst [vmem:[#allocation38_spill] sm:$0xff] %v14092_v27 }
 0x146   : > { %17190 = vst [vmem:[#allocation35_spill] sm:$0xff] %v14081_v39  ;;  %v3679_v63 = vrot.slane %v3677_v61, 5  ;;  %v3681_v54 = vshrl.u32 %v13573_v53, 16  ;;  %v14094_v19 = vpop.f32.mrb[17].mxu1  ;;  %v10219_v21 = vcombine.low %v13991_v11, %v14013_v48  ;;  %v3687_v43 = vshll.u32 %v13904_v20, 16  ;;  %v14102_v18 = vpop.f32.mrb[17].mxu0 }
 0x147   : > { %17194 = vst [vmem:[#allocation39_spill] sm:$0xff] %v14094_v19  ;;  %v3674_v6 = vor.u32 %v3673_v17, %v3670_v15  ;;  %v10176_v50 = vrot.slane %v14073_v56, 9  ;;  %v14100_v13 = vld [vmem:[#allocation2 + $0xa0] sm:$0xf]  ;;  %17196 = vst [vmem:[#allocation41_spill] sm:$0xff] %v14102_v18  ;;  %v14104_v61 = vpop.f32.mrb[18].mxu1  ;;  %v10220_v35 = vcombine.low %v14017_v37, %v14038_v23  ;;  %v17201_v15 = vcombine.low %v13500_v49, %v13502_v3 }
 0x148   : > { %17195 = vst [vmem:[#allocation40_spill] sm:$0xff] %v14100_v13  ;;  %17197 = vst [vmem:[#allocation42_spill] sm:$0xff] %v14104_v61  ;;  %v3683_v19 = vrot.slane %v3681_v54, 4  ;;  %v14110_v26 = vld [vmem:[#allocation2 + $0x98] sm:$0x1]  ;;  %v4075_v11 = vrot.slane %v14081_v39, 5  ;;  %v14124_v37 = vsel %vm13413_vm8, %v10175_v42, %v4068_v4 }
 0x149   : > { %17198 = vst [vmem:[#allocation43_spill] sm:$0xff] %v14110_v26  ;;  %v14113_v20 = vpop.f32.mrb[18].mxu0  ;;  %v14115_v48 = vpop.f32.mrb[19].mxu1  ;;  %v3675_v54 = vrot.slane %v3674_v6, 4  ;;  %v10177_v23 = vrot.slane %v14090_v47, 9  ;;  %v3689_v49 = vrot.slane %v3687_v43, 5 }
 0x14a   : > { %17199 = vst [vmem:[#allocation44_spill] sm:$0xff] %v14113_v20  ;;  %17200 = vst [vmem:[#allocation45_spill] sm:$0xff] %v14115_v48  ;;  %4548 = vmatmul.mubr.bf16.gmra.mrb[104].mxu0 %v17201_v15  ;;  %v14127_v27 = vpop.f32.mrb[19].mxu0  ;;  %v14131_v20 = vsel %vm13413_vm8, %v4070_v1, %v4071_v14  ;;  %v3684_v18 = vor.u32 %v3683_v19, %v3679_v63  ;;  %v4082_v3 = vrot.slane %v14100_v13, 5  ;;  %v14134_v15 = vld [vmem:[#allocation2 + $0xac] sm:$0xf] }
 0x14b   : > { %17202 = vst [vmem:[#allocation46_spill] sm:$0xff] %v14127_v27  ;;  %4555 = vmatprep.mubr.bf16.mxu0 %v10201_v25  ;;  %v14138_v4 = vsel %vm13413_vm8, %v10176_v50, %v4075_v11  ;;  %v4078_v42 = vrot.slane %v14110_v26, 5  ;;  %v14141_v6 = vld [vmem:[#allocation2 + $0xa4] sm:$0x1]  ;;  %v3692_v25 = vshrl.u32 %v13917_v58, 16  ;;  %v3695_v14 = vshll.u32 %v13917_v58, 16 }
 0x14c   : > { %11514 = vmatmul.mubr.bf16.gmra.mrb[72].mxu1 %v10219_v21  ;;  %v14145_v1 = vld [vmem:[#allocation2 + $0xa8] sm:$0xf]  ;;  %v3680_v19 = vsel %vm12744_vm5, %v3675_v54, %v3679_v63  ;;  %v3685_v43 = vrot.slane %v3684_v18, 4  ;;  %v4077_v21 = vrot.slane %v4075_v11, 4  ;;  %v3701_v17 = vshll.u32 %v13922_v33, 16  ;;  %v14164_v26 = vpop.f32.mrb[20].mxu0 }
 0x14d   : > { %11517 = vmatprep.mubr.bf16.mxu1 %v10220_v35  ;;  %v14150_v50 = vld [vmem:[#allocation2 + $0xb0] sm:$0x1]  ;;  %v14154_v27 = vsel %vm13413_vm8, %v10177_v23, %v4082_v3  ;;  %v3694_v48 = vrot.slane %v3692_v25, 4  ;;  %v3697_v61 = vrot.slane %v3695_v14, 5  ;;  %v3705_v13 = vshrl.u32 %v13922_v33, 16  ;;  %17204 = vst [vmem:[#allocation48_spill] sm:$0xff] %v14164_v26 }
 0x14e   : > { %v14157_v47 = vld [vmem:[#allocation2 + $0xb8] sm:$0xf]  ;;  %v3690_v35 = vsel %vm12744_vm5, %v3685_v43, %v3689_v49  ;;  %v4084_v63 = vrot.slane %v4082_v3, 4  ;;  %v3703_v18 = vrot.slane %v3701_v17, 5  ;;  %v3711_v11 = vshll.u32 %v13933_v40, 16  ;;  %v14169_v56 = vpop.f32.mrb[21].mxu0 }
 0x14f   : > { %17203 = vst [vmem:[#allocation47_spill] sm:$0xff] %v14157_v47  ;;  %v14162_v54 = vld [vmem:[#allocation2 + $0xb4] sm:$0xf]  ;;  %v10202_v45 = vcombine.low %v3680_v19, %v3690_v35  ;;  %v3698_v23 = vor.u32 %v3697_v61, %v3694_v48  ;;  %v3707_v39 = vrot.slane %v3705_v13, 4  ;;  %v4089_v25 = vrot.slane %v14134_v15, 5  ;;  %17205 = vst [vmem:[#allocation49_spill] sm:$0xff] %v14169_v56 }
 0x150   : > { %v14167_v14 = vld [vmem:[#allocation2 + $0xbc] sm:$0x1]  ;;  %v4085_v38 = vrot.slane %v14141_v6, 5  ;;  %v3713_v49 = vrot.slane %v3711_v11, 5  ;;  %v10178_v17 = vrot.slane %v14145_v1, 9  ;;  %v4096_v40 = vrot.slane %v14157_v47, 5 }
 0x151   : > { %v14174_v3 = vpop.f32.mrb[22].mxu0  ;;  %v17207_v19 = vcombine.low %v13504_v52, %v13506_v8  ;;  %v3699_v13 = vrot.slane %v3698_v23, 4  ;;  %v3708_v61 = vor.u32 %v3707_v39, %v3703_v18  ;;  %v4091_v48 = vrot.slane %v4089_v25, 4  ;;  %v14186_v47 = vpop.f32.mrb[20].mxu1 }
 0x152   : > { %17206 = vst [vmem:[#allocation50_spill] sm:$0xff] %v14174_v3  ;;  %v4092_v43 = vrot.slane %v14150_v50, 5  ;;  %v14180_v35 = vpop.f32.mrb[23].mxu0  ;;  %v4079_v11 = vsel %vm13413_vm8, %v4077_v21, %v4078_v42  ;;  %v10179_v56 = vrot.slane %v14162_v54, 9  ;;  %v4098_v26 = vrot.slane %v4096_v40, 4  ;;  %v14195_v42 = vpop.f32.mrb[21].mxu1 }
 0x153   : > { %4556 = vmatmul.mubr.bf16.gmra.mrb[108].mxu0 %v17207_v19  ;;  %17208 = vst [vmem:[#allocation51_spill] sm:$0xff] %v14180_v35  ;;  %v3716_v3 = vshrl.u32 %v13962_v44, 16  ;;  %v17209_v52 = vcombine.low %v14042_v29, %v14065_v62  ;;  %v3704_v8 = vsel %vm12744_vm5, %v3699_v13, %v3703_v18  ;;  %v3709_v39 = vrot.slane %v3708_v61, 4  ;;  %v14209_v13 = vpop.f32.mrb[22].mxu1  ;;  %v14235_v35 = vld [vmem:[#allocation2 + $0xc8] sm:$0x1] }
 0x154   : > { %4563 = vmatprep.mubr.bf16.mxu0 %v10202_v45  ;;  %v4099_v45 = vrot.slane %v14167_v14, 5  ;;  %v3719_v23 = vshll.u32 %v13962_v44, 16  ;;  %v17210_v21 = vcombine.low %v14079_v0, %v14087_v7  ;;  %v14202_v19 = vsel %vm13413_vm8, %v4084_v63, %v4085_v38  ;;  %v14218_v63 = vpop.f32.mrb[23].mxu1  ;;  %17213 = vst [vmem:[#allocation54_spill] sm:$0xff] %v14235_v35 }
 0x155   : > { %11518 = vmatmul.mubr.bf16.gmra.mrb[76].mxu1 %v17209_v52  ;;  %v14206_v29 = vsel %vm13413_vm8, %v10178_v17, %v4089_v25  ;;  %v3718_v62 = vrot.slane %v3716_v3, 4  ;;  %v3725_v18 = vshll.u32 %v13944_v51, 16  ;;  %v3714_v61 = vsel %vm12744_vm5, %v3709_v39, %v3713_v49 }
 0x156   : > { %11521 = vmatprep.mubr.bf16.mxu1 %v17210_v21  ;;  %v14215_v0 = vsel %vm13413_vm8, %v4091_v48, %v4092_v43  ;;  %v3721_v7 = vrot.slane %v3719_v23, 5  ;;  %v3729_v38 = vshrl.u32 %v13944_v51, 16  ;;  %v10223_v25 = vcombine.low %v14124_v37, %v14131_v20  ;;  %v14223_v21 = vld [vmem:[#allocation2 + $0xc0] sm:$0xf]  ;;  %v14233_v23 = vld [vmem:[#allocation2 + $0xc4] sm:$0xf] }
 0x157   : > { %v10203_v17 = vcombine.low %v3704_v8, %v3714_v61  ;;  %v3727_v3 = vrot.slane %v3725_v18, 5  ;;  %v3735_v52 = vshll.u32 %v13972_v59, 16  ;;  %17211 = vst [vmem:[#allocation52_spill] sm:$0xff] %v14223_v21  ;;  %v14227_v49 = vsel %vm13413_vm8, %v10179_v56, %v4096_v40  ;;  %17212 = vst [vmem:[#allocation53_spill] sm:$0xff] %v14233_v23  ;;  %v14244_v40 = vld [vmem:[#allocation2 + $0xcc] sm:$0xf] }
 0x158   : > { %v14231_v48 = vsel %vm13413_vm8, %v4098_v26, %v4099_v45  ;;  %v3722_v43 = vor.u32 %v3721_v7, %v3718_v62  ;;  %v3731_v39 = vrot.slane %v3729_v38, 4  ;;  %v10224_v20 = vcombine.low %v14138_v4, %v4079_v11  ;;  %v14250_v11 = vld [vmem:[#allocation2 + $0xd0] sm:$0xf]  ;;  %v14257_v18 = vpop.f32.mrb[24].mxu0 }
 0x159   : > { %v10225_v59 = vcombine.low %v14154_v27, %v14202_v19  ;;  %v10187_v56 = vcombine.low %v13917_v58, %v13922_v33  ;;  %v17214_v26 = vcombine.low %v13571_v10, %v13573_v53  ;;  %v3737_v62 = vrot.slane %v3735_v52, 5  ;;  %17215 = vst [vmem:[#allocation55_spill] sm:$0xff] %v14257_v18  ;;  %v14259_v10 = vpop.f32.mrb[24].mxu1 }
 0x15a   : > { %v3723_v8 = vrot.slane %v3722_v43, 4  ;;  %v3732_v45 = vor.u32 %v3731_v39, %v3727_v3  ;;  %v10180_v4 = vrot.slane %v14223_v21, 9  ;;  %v4103_v19 = vrot.slane %v14233_v23, 5  ;;  %v14268_v52 = vpop.f32.mrb[25].mxu1 }
 0x15b   : > { %4564 = vmatmul.mubr.bf16.gmra.mrb[112].mxu0 %v17214_v26  ;;  %v4106_v58 = vrot.slane %v14235_v35, 5  ;;  %v3740_v33 = vshrl.u32 %v13974_v34, 16  ;;  %v3743_v38 = vshll.u32 %v13974_v34, 16  ;;  %v3873_v31 = vshrl.u32 %v14134_v15, 16 }
 0x15c   : > { %4571 = vmatprep.mubr.bf16.mxu0 %v10203_v17  ;;  %v3728_v53 = vsel %vm12744_vm5, %v3723_v8, %v3727_v3  ;;  %v3733_v61 = vrot.slane %v3732_v45, 4  ;;  %v14266_v17 = vpop.f32.mrb[25].mxu0  ;;  %v14275_v3 = vpop.f32.mrb[26].mxu1  ;;  %v14281_v45 = vsel %vm13413_vm8, %v10180_v4, %v4103_v19  ;;  %v4105_v39 = vrot.slane %v4103_v19, 4 }
 0x15d   : > { %11522 = vmatmul.mubr.bf16.gmra.mrb[80].mxu1 %v10223_v25  ;;  %17216 = vst [vmem:[#allocation56_spill] sm:$0xff] %v14266_v17  ;;  %v3742_v26 = vrot.slane %v3740_v33, 4  ;;  %v3749_v25 = vshll.u32 %v13982_v36, 16  ;;  %v14273_v27 = vpop.f32.mrb[26].mxu0  ;;  %17218 = vst [vmem:[#allocation58_spill] sm:$0xff] %v14275_v3  ;;  %v3745_v7 = vrot.slane %v3743_v38, 5 }
 0x15e   : > { %11525 = vmatprep.mubr.bf16.mxu1 %v10224_v20  ;;  %17217 = vst [vmem:[#allocation57_spill] sm:$0xff] %v14273_v27  ;;  %v3738_v8 = vsel %vm12744_vm5, %v3733_v61, %v3737_v62  ;;  %v3753_v20 = vshrl.u32 %v13982_v36, 16  ;;  %v14284_v43 = vpop.f32.mrb[27].mxu0  ;;  %v14286_v37 = vpop.f32.mrb[27].mxu1  ;;  %v3759_v27 = vshll.u32 %v14002_v55, 16  ;;  %v3764_v61 = vshrl.u32 %v14020_v46, 16 }
 0x15f   : > { %17219 = vst [vmem:[#allocation59_spill] sm:$0xff] %v14284_v43  ;;  %17220 = vst [vmem:[#allocation60_spill] sm:$0xff] %v14286_v37  ;;  %v10204_v33 = vcombine.low %v3728_v53, %v3738_v8  ;;  %v3751_v35 = vrot.slane %v3749_v25, 5  ;;  %v14289_v17 = vld [vmem:[#allocation2 + $0xd4] sm:$0x1]  ;;  %v3746_v18 = vor.u32 %v3745_v7, %v3742_v26  ;;  %v3767_v4 = vshll.u32 %v14020_v46, 16 }
 0x160   : > { %v3755_v62 = vrot.slane %v3753_v20, 4  ;;  %v17221_v38 = vrot.slane %v14250_v11, 5  ;;  %v3761_v21 = vrot.slane %v3759_v27, 5  ;;  %v3773_v43 = vshll.u32 %v14022_v41, 16 }
 0x161   : > { %v3777_v53 = vshrl.u32 %v14022_v41, 16  ;;  %v3747_v19 = vrot.slane %v3746_v18, 4  ;;  %v3766_v55 = vrot.slane %v3764_v61, 4  ;;  %v3769_v8 = vrot.slane %v3767_v4, 5 }
 0x162   : > { %v4112_v23 = vrot.slane %v17221_v38, 4  ;;  %v3756_v25 = vor.u32 %v3755_v62, %v3751_v35  ;;  %v4113_v7 = vrot.slane %v14289_v17, 5  ;;  %v3775_v26 = vrot.slane %v3773_v43, 5 }
 0x163   : > { %4572 = vmatmul.mubr.bf16.gmra.mrb[116].mxu0 %v10187_v56  ;;  %v3779_v20 = vrot.slane %v3777_v53, 4  ;;  %v3783_v37 = vshll.u32 %v14032_v32, 16  ;;  %v3752_v27 = vsel %vm12744_vm5, %v3747_v19, %v3751_v35  ;;  %v3770_v3 = vor.u32 %v3769_v8, %v3766_v55  ;;  %v14314_v35 = vpop.f32.mrb[28].mxu0 }
 0x164   : > { %4579 = vmatprep.mubr.bf16.mxu0 %v10204_v33  ;;  %v3757_v38 = vrot.slane %v3756_v25, 4  ;;  %v14303_v56 = vadd.f32 %v13759_v5, %v13750_v2  ;;  %v17223_v18 = vcombine.low %v14206_v29, %v14215_v0  ;;  %v14310_v43 = vadd.f32 %v13772_v60, %v13767_v30  ;;  %v14322_v0 = vpop.f32.mrb[29].mxu0 }
 0x165   : > { %11526 = vmatmul.mubr.bf16.gmra.mrb[84].mxu1 %v10225_v59  ;;  %v3780_v33 = vor.u32 %v3779_v20, %v3775_v26  ;;  %v3788_v32 = vshrl.u32 %v14045_v28, 16  ;;  %v3791_v59 = vshll.u32 %v14045_v28, 16  ;;  %v4107_v62 = vsel %vm13413_vm8, %v4105_v39, %v4106_v58  ;;  %v14324_v53 = vpop.f32.mrb[30].mxu0 }
 0x166   : > { %17222 = vst [vmem:[#allocation61_spill] sm:$0xff] %v14303_v56  ;;  %11529 = vmatprep.mubr.bf16.mxu1 %v17223_v18  ;;  %17224 = vst [vmem:[#allocation62_spill] sm:$0xff] %v14310_v43  ;;  %v3762_v2 = vsel %vm12744_vm5, %v3757_v38, %v3761_v21  ;;  %v3797_v5 = vshll.u32 %v14027_v9, 16  ;;  %v3801_v29 = vshrl.u32 %v14027_v9, 16  ;;  %v3785_v60 = vrot.slane %v3783_v37, 5  ;;  %v14326_v58 = vpop.f32.mrb[31].mxu0 }
 0x167   : > { %v10205_v30 = vcombine.low %v3752_v27, %v3762_v2  ;;  %v3790_v61 = vrot.slane %v3788_v32, 4  ;;  %v3793_v4 = vrot.slane %v3791_v59, 5  ;;  %v3771_v19 = vrot.slane %v3770_v3, 4  ;;  %v17226_v3 = vld [vmem:[#allocation9_spill] sm:$0xff]  ;;  %v17229_v59 = vld [vmem:[#allocation35_spill] sm:$0xff] }
 0x168   : > { %v3781_v25 = vrot.slane %v3780_v33, 4  ;;  %v3799_v55 = vrot.slane %v3797_v5, 5  ;;  %v3803_v8 = vrot.slane %v3801_v29, 4  ;;  %v10228_v21 = vcombine.low %v14281_v45, %v4107_v62  ;;  %v17228_v33 = vld [vmem:[#allocation34_spill] sm:$0xff] }
 0x169   : > { %v3794_v39 = vor.u32 %v3793_v4, %v3790_v61  ;;  %v3807_v20 = vshll.u32 %v14053_v24, 16  ;;  %v14332_v38 = vadd.f32 %v13812_v22, %v13806_v16  ;;  %v17225_v37 = vcombine.low %v13962_v44, %v13944_v51 }
 0x16a   : > { %v3804_v27 = vor.u32 %v3803_v8, %v3799_v55  ;;  %v14339_v18 = vadd.f32 %v17226_v3, %v13816_v57  ;;  %v3812_v32 = vshrl.u32 %v17228_v33, 16  ;;  %v3815_v45 = vshll.u32 %v17228_v33, 16  ;;  %v17237_v3 = vld [vmem:[#allocation18_spill] sm:$0xff] }
 0x16b   : > { %4580 = vmatmul.mubr.bf16.gmra.mrb[120].mxu0 %v17225_v37  ;;  %v3821_v24 = vshll.u32 %v17229_v59, 16  ;;  %v17230_v16 = vcombine.low %v14227_v49, %v14231_v48  ;;  %v17231_v22 = vrot.slane %v14250_v11, 5  ;;  %v17232_v51 = vrot.slane %v14244_v40, 9 }
 0x16c   : > { %17227 = vst [vmem:[#allocation9_spill] sm:$0xff] %v14339_v18  ;;  %4587 = vmatprep.mubr.bf16.mxu0 %v10205_v30  ;;  %v3776_v57 = vsel %vm12744_vm5, %v3771_v19, %v3775_v26  ;;  %v3786_v62 = vsel %vm12744_vm5, %v3781_v25, %v3785_v60  ;;  %v3825_v2 = vshrl.u32 %v17229_v59, 16  ;;  %v4114_v49 = vsel %vm13413_vm8, %v4112_v23, %v4113_v7  ;;  %v14362_v30 = vpop.f32.mrb[28].mxu1  ;;  %v17233_v26 = vld [vmem:[#allocation14_spill] sm:$0xff]  ;;  %v17234_v19 = vld [vmem:[#allocation15_spill] sm:$0xff]  ;;  %v17236_v7 = vld [vmem:[#allocation16_spill] sm:$0xff] }
 0x16d   : > { %11530 = vmatmul.mubr.bf16.gmra.mrb[88].mxu1 %v17230_v16  ;;  %v4111_v44 = vsel %vm13413_vm8, %v17232_v51, %v17231_v22  ;;  %v10189_v48 = vcombine.low %v13974_v34, %v13982_v36  ;;  %v3795_v5 = vrot.slane %v3794_v39, 4  ;;  %v3809_v29 = vrot.slane %v3807_v20, 5  ;;  %v14368_v60 = vpop.f32.mrb[29].mxu1  ;;  %v17240_v22 = vld [vmem:[#allocation37_spill] sm:$0xff] }
 0x16e   : > { %11533 = vmatprep.mubr.bf16.mxu1 %v10228_v21  ;;  %v3805_v61 = vrot.slane %v3804_v27, 4  ;;  %v3814_v4 = vrot.slane %v3812_v32, 4  ;;  %v3817_v8 = vrot.slane %v3815_v45, 5  ;;  %v14366_v37 = vadd.f32 %v17234_v19, %v17233_v26  ;;  %v14376_v36 = vpop.f32.mrb[30].mxu1  ;;  %v17239_v27 = vld [vmem:[#allocation43_spill] sm:$0xff]  ;;  %v17245_v19 = vld [vmem:[#allocation26_spill] sm:$0xff] }
 0x16f   : > { %v10206_v25 = vcombine.low %v3776_v57, %v3786_v62  ;;  %v14370_v21 = vrot.slane %v3821_v24, 5  ;;  %v3827_v23 = vrot.slane %v3825_v2, 4  ;;  %v14374_v34 = vadd.f32 %v17237_v3, %v17236_v7  ;;  %v14378_v20 = vpop.f32.mrb[31].mxu1  ;;  %v10641_v62 = vpop.f32.mrb[32].mxu0  ;;  %v17241_v2 = vld [vmem:[#allocation22_spill] sm:$0xff] }
 0x170   : > { %17235 = vst [vmem:[#allocation34_spill] sm:$0xff] %v14366_v37  ;;  %v10229_v39 = vcombine.low %v4111_v44, %v4114_v49  ;;  %v3831_v32 = vshll.u32 %v17239_v27, 16  ;;  %v3800_v45 = vsel %vm12744_vm5, %v3795_v5, %v3799_v55  ;;  %v3810_v24 = vsel %vm12744_vm5, %v3805_v61, %v3809_v29  ;;  %v17242_v49 = vld [vmem:[#allocation23_spill] sm:$0xff]  ;;  %v10642_v55 = vpop.f32.mrb[33].mxu0  ;;  %v17247_v5 = vld [vmem:[#allocation40_spill] sm:$0xff] }
 0x171   : > { %17238 = vst [vmem:[#allocation35_spill] sm:$0xff] %v14374_v34  ;;  %v3818_v16 = vor.u32 %v3817_v8, %v3814_v4  ;;  %v3836_v51 = vshrl.u32 %v17240_v22, 16  ;;  %v3828_v57 = vor.u32 %v3827_v23, %v14370_v21  ;;  %v3839_v44 = vshll.u32 %v17240_v22, 16  ;;  %v10644_v23 = vpop.f32.mrb[34].mxu0 }
 0x172   : > { %v14390_v26 = vadd.f32 %v17242_v49, %v17241_v2  ;;  %v3845_v29 = vshll.u32 %v17247_v5, 16  ;;  %v3849_v61 = vshrl.u32 %v17247_v5, 16  ;;  %v3860_v4 = vshrl.u32 %v14145_v1, 16  ;;  %v14405_v2 = vpop.f32.mrb[32].mxu1 }
 0x173   : > { %4588 = vmatmul.mubr.bf16.gmra.mrb[124].mxu0 %v10189_v48  ;;  %v17244_v48 = vld [vmem:[#allocation24_spill] sm:$0xff]  ;;  %v10190_v8 = vcombine.low %v14020_v46, %v14022_v41  ;;  %v3863_v3 = vshll.u32 %v14145_v1, 16  ;;  %v3869_v27 = vshll.u32 %v14134_v15, 16  ;;  %v3819_v49 = vrot.slane %v3818_v16, 4  ;;  %v14408_v34 = vpop.f32.mrb[33].mxu1  ;;  %v17251_v16 = vld [vmem:[#allocation39_spill] sm:$0xff] }
 0x174   : > { %4595 = vmatprep.mubr.bf16.mxu0 %v10206_v25  ;;  %17243 = vst [vmem:[#allocation14_spill] sm:$0xff] %v14390_v26  ;;  %v14394_v7 = vadd.f32 %v17245_v19, %v17244_v48  ;;  %v14401_v25 = vadd.f32 %v10642_v55, %v10641_v62  ;;  %v3833_v48 = vrot.slane %v3831_v32, 5  ;;  %v10645_v19 = vpop.f32.mrb[35].mxu0  ;;  %v3838_v41 = vrot.slane %v3836_v51, 4  ;;  %v14412_v62 = vpop.f32.mrb[34].mxu1 }
 0x175   : > { %11534 = vmatmul.mubr.bf16.gmra.mrb[92].mxu1 %v10229_v39  ;;  %v10207_v39 = vcombine.low %v3800_v45, %v3810_v24  ;;  %v14410_v37 = vadd.f32 %v10645_v19, %v10644_v23  ;;  %v3841_v46 = vrot.slane %v3839_v44, 5  ;;  %v3847_v55 = vrot.slane %v3845_v29, 5  ;;  %v14414_v18 = vpop.f32.mrb[35].mxu1  ;;  %v17250_v24 = vld [vmem:[#allocation36_spill] sm:$0xff]  ;;  %v17253_v23 = vld [vmem:[#allocation45_spill] sm:$0xff] }
 0x176   : > { %17246 = vst [vmem:[#allocation15_spill] sm:$0xff] %v14394_v7  ;;  %17248 = vst [vmem:[#allocation16_spill] sm:$0xff] %v14401_v25  ;;  %v3829_v7 = vrot.slane %v3828_v57, 4  ;;  %v3851_v25 = vrot.slane %v3849_v61, 4  ;;  %v3862_v26 = vrot.slane %v3860_v4, 4  ;;  %v3865_v43 = vrot.slane %v3863_v3, 5 }
 0x177   : > { %17249 = vst [vmem:[#allocation18_spill] sm:$0xff] %v14410_v37  ;;  %v3871_v45 = vrot.slane %v3869_v27, 5  ;;  %v3875_v32 = vrot.slane %v3873_v31, 4  ;;  %v14418_v56 = vadd.f32 %v17251_v16, %v17250_v24  ;;  %v17252_v57 = vld [vmem:[#allocation42_spill] sm:$0xff]  ;;  %v3824_v51 = vsel %vm12744_vm5, %v3819_v49, %v14370_v21 }
 0x178   : > { %v14422_v19 = vadd.f32 %v17253_v23, %v17252_v57  ;;  %v3834_v44 = vsel %vm12744_vm5, %v3829_v7, %v3833_v48  ;;  %v3855_v29 = vshll.u32 %v14141_v6, 16  ;;  %v3842_v31 = vor.u32 %v3841_v46, %v3838_v41 }
 0x179   : > { %v3852_v61 = vor.u32 %v3851_v25, %v3847_v55  ;;  %v3866_v4 = vor.u32 %v3865_v43, %v3862_v26  ;;  %v3879_v3 = vshll.u32 %v14150_v50, 16  ;;  %v3884_v27 = vshrl.u32 %v14162_v54, 16  ;;  %v17255_v25 = vld [vmem:[#allocation47_spill] sm:$0xff] }
 0x17a   : > { %17254 = vst [vmem:[#allocation43_spill] sm:$0xff] %v14422_v19  ;;  %v3887_v24 = vshll.u32 %v14162_v54, 16  ;;  %v10191_v16 = vcombine.low %v14045_v28, %v14027_v9  ;;  %v14437_v21 = vadd.f32 %v14195_v42, %v14186_v47  ;;  %v14441_v6 = vadd.f32 %v14218_v63, %v14209_v13  ;;  %v10647_v7 = vpop.f32.mrb[36].mxu0 }
 0x17b   : > { %4596 = vmatmul.mubr.bf16.gmra.mrb[128].mxu0 %v10190_v8  ;;  %v3876_v8 = vor.u32 %v3875_v32, %v3871_v45  ;;  %v10208_v26 = vcombine.low %v3824_v51, %v3834_v44  ;;  %v3857_v50 = vrot.slane %v3855_v29, 5  ;;  %v3893_v49 = vshll.u32 %v17255_v25, 16  ;;  %v10648_v9 = vpop.f32.mrb[37].mxu0 }
 0x17c   : > { %4603 = vmatprep.mubr.bf16.mxu0 %v10207_v39  ;;  %v10783_v39 = vpop.f32.mrb[36].mxu1  ;;  %v3897_v48 = vshrl.u32 %v17255_v25, 16  ;;  %v3843_v46 = vrot.slane %v3842_v31, 4  ;;  %v3853_v32 = vrot.slane %v3852_v61, 4  ;;  %v3867_v28 = vrot.slane %v3866_v4, 4  ;;  %v10650_v23 = vpop.f32.mrb[38].mxu0 }
 0x17d   : > { %v10784_v43 = vpop.f32.mrb[37].mxu1  ;;  %v3881_v57 = vrot.slane %v3879_v3, 5  ;;  %v14445_v42 = vadd.f32 %v10648_v9, %v10647_v7  ;;  %v3877_v13 = vrot.slane %v3876_v8, 4  ;;  %v3886_v63 = vrot.slane %v3884_v27, 4  ;;  %v10651_v51 = vpop.f32.mrb[39].mxu0  ;;  %v17256_v8 = vld [vmem:[#allocation58_spill] sm:$0xff] }
 0x17e   : > { %v10786_v41 = vpop.f32.mrb[38].mxu1  ;;  %v3889_v37 = vrot.slane %v3887_v24, 5  ;;  %v14447_v44 = vadd.f32 %v10651_v51, %v10650_v23  ;;  %v14449_v29 = vrot.slane %v3893_v49, 5  ;;  %v3899_v19 = vrot.slane %v3897_v48, 4  ;;  %v17257_v27 = vld [vmem:[#allocation60_spill] sm:$0xff] }
 0x17f   : > { %v10787_v47 = vpop.f32.mrb[39].mxu1  ;;  %v3903_v31 = vshll.u32 %v14167_v14, 16  ;;  %v3848_v61 = vsel %vm12744_vm5, %v3843_v46, %v3847_v55  ;;  %v3858_v4 = vsel %vm12744_vm5, %v3853_v32, %v3857_v50  ;;  %v14458_v3 = vadd.f32 %v14268_v52, %v14259_v10  ;;  %v17258_v32 = vld [vmem:[#allocation52_spill] sm:$0xff] }
 0x180   : > { %v14462_v24 = vadd.f32 %v17257_v27, %v17256_v8  ;;  %v3882_v14 = vsel %vm12744_vm5, %v3877_v13, %v3881_v57  ;;  %v10192_v55 = vcombine.low %v17228_v33, %v17229_v59  ;;  %v10209_v7 = vcombine.low %v3848_v61, %v3858_v4  ;;  %v17266_v8 = vld [vmem:[#allocation10_spill] sm:$0xff] }
 0x181   : > { %v10193_v50 = vcombine.low %v17240_v22, %v17247_v5  ;;  %v3900_v52 = vor.u32 %v3899_v19, %v14449_v29  ;;  %v14473_v49 = vrot.slane %v3903_v31, 5  ;;  %v3911_v9 = vshll.u32 %v17258_v32, 16  ;;  %v17260_v22 = vld [vmem:[#allocation53_spill] sm:$0xff]  ;;  %v17265_v31 = vld [vmem:[#allocation19_spill] sm:$0xff] }
 0x182   : > { %v10653_v10 = vpop.f32.mrb[40].mxu0  ;;  %v3917_v5 = vshll.u32 %v17260_v22, 16  ;;  %v14486_v19 = vadd.f32 %v14378_v20, %v14376_v36  ;;  %v3921_v23 = vshrl.u32 %v17260_v22, 16  ;;  %v14491_v13 = vadd.f32 %v14408_v34, %v14405_v2  ;;  %v17264_v20 = vld [vmem:[#allocation17_spill] sm:$0xff]  ;;  %v17267_v34 = vld [vmem:[#allocation11_spill] sm:$0xff] }
 0x183   : > { %4604 = vmatmul.mubr.bf16.gmra.mrb[132].mxu0 %v10191_v16  ;;  %v3872_v16 = vsel %vm12744_vm5, %v3867_v28, %v3871_v45  ;;  %v10654_v46 = vpop.f32.mrb[41].mxu0  ;;  %v3908_v45 = vshrl.u32 %v17258_v32, 16  ;;  %v3901_v51 = vrot.slane %v3900_v52, 4  ;;  %v14501_v36 = vadd.f32 %v10787_v47, %v10786_v41  ;;  %v17275_v52 = vld [vmem:[#allocation27_spill] sm:$0xff] }
 0x184   : > { %4611 = vmatprep.mubr.bf16.mxu0 %v10208_v26  ;;  %v3890_v26 = vor.u32 %v3889_v37, %v3886_v63  ;;  %v10210_v48 = vcombine.low %v3872_v16, %v3882_v14  ;;  %v14479_v37 = vadd.f32 %v14368_v60, %v14362_v30  ;;  %v14481_v33 = vadd.f32 %v10654_v46, %v10653_v10  ;;  %v10656_v59 = vpop.f32.mrb[42].mxu0  ;;  %v17271_v16 = vld [vmem:[#allocation13_spill] sm:$0xff] }
 0x185   : > { %v10657_v57 = vpop.f32.mrb[43].mxu0  ;;  %v14495_v30 = vadd.f32 %v14414_v18, %v14412_v62  ;;  %v14497_v60 = vadd.f32 %v10784_v43, %v10783_v39  ;;  %17263 = vst [vmem:[#allocation24_spill] sm:$0xff] %v14501_v36  ;;  %v14505_v61 = vadd.f32 %v17265_v31, %v17264_v20  ;;  %v3910_v4 = vrot.slane %v3908_v45, 4  ;;  %v17268_v18 = vld [vmem:[#allocation20_spill] sm:$0xff]  ;;  %v17269_v62 = vld [vmem:[#allocation21_spill] sm:$0xff] }
 0x186   : > { %17259 = vst [vmem:[#allocation37_spill] sm:$0xff] %v14481_v33  ;;  %v3891_v28 = vrot.slane %v3890_v26, 4  ;;  %v14499_v63 = vadd.f32 %v10657_v57, %v10656_v59  ;;  %v14509_v2 = vadd.f32 %v17267_v34, %v17266_v8  ;;  %v14513_v39 = vadd.f32 %v17269_v62, %v17268_v18  ;;  %v17270_v43 = vld [vmem:[#allocation12_spill] sm:$0xff]  ;;  %v17272_v26 = vld [vmem:[#allocation30_spill] sm:$0xff]  ;;  %v17274_v10 = vld [vmem:[#allocation25_spill] sm:$0xff] }
 0x187   : > { %17261 = vst [vmem:[#allocation22_spill] sm:$0xff] %v14495_v30  ;;  %v10789_v27 = vpop.f32.mrb[40].mxu1  ;;  %v14517_v14 = vadd.f32 %v17271_v16, %v17270_v43  ;;  %v3913_v41 = vrot.slane %v3911_v9, 5  ;;  %v14525_v46 = vadd.f32 %v17275_v52, %v17274_v10  ;;  %v17276_v45 = vld [vmem:[#allocation32_spill] sm:$0xff]  ;;  %v17277_v59 = vld [vmem:[#allocation33_spill] sm:$0xff]  ;;  %v3919_v20 = vrot.slane %v3917_v5, 5 }
 0x188   : > { %17262 = vst [vmem:[#allocation23_spill] sm:$0xff] %v14499_v63  ;;  %v10790_v47 = vpop.f32.mrb[41].mxu1  ;;  %v14529_v57 = vadd.f32 %v17277_v59, %v17276_v45  ;;  %v17279_v34 = vld [vmem:[#allocation28_spill] sm:$0xff]  ;;  %v17280_v18 = vld [vmem:[#allocation29_spill] sm:$0xff]  ;;  %v17283_v10 = vld [vmem:[#allocation38_spill] sm:$0xff]  ;;  %v3951_v30 = vshll.u32 %v14289_v17, 16 }
 0x189   : > { %v14531_v31 = vadd.f32 %v10790_v47, %v10789_v27  ;;  %v10792_v8 = vpop.f32.mrb[42].mxu1  ;;  %v14535_v9 = vadd.f32 %v17280_v18, %v17279_v34  ;;  %v17281_v62 = vld [vmem:[#allocation48_spill] sm:$0xff]  ;;  %v17282_v43 = vld [vmem:[#allocation49_spill] sm:$0xff]  ;;  %v17285_v45 = vld [vmem:[#allocation50_spill] sm:$0xff]  ;;  %v14557_v18 = vadd.f32 %v14322_v0, %v14314_v35 }
 0x18a   : > { %v14539_v16 = vadd.f32 %v17282_v43, %v17281_v62  ;;  %v17284_v52 = vld [vmem:[#allocation41_spill] sm:$0xff]  ;;  %v17286_v59 = vld [vmem:[#allocation51_spill] sm:$0xff]  ;;  %v17287_v27 = vld [vmem:[#allocation44_spill] sm:$0xff]  ;;  %v3953_v17 = vrot.slane %v3951_v30, 5 }
 0x18b   : > { %4612 = vmatmul.mubr.bf16.gmra.mrb[136].mxu0 %v10192_v55  ;;  %v17273_v55 = vld [vmem:[#allocation31_spill] sm:$0xff]  ;;  %17278 = vst [vmem:[#allocation26_spill] sm:$0xff] %v14531_v31  ;;  %v14543_v63 = vadd.f32 %v17284_v52, %v17283_v10  ;;  %v14547_v5 = vadd.f32 %v17286_v59, %v17285_v45  ;;  %v17288_v47 = vld [vmem:[#allocation46_spill] sm:$0xff]  ;;  %v17291_v62 = vld [vmem:[#allocation56_spill] sm:$0xff]  ;;  %v14565_v10 = vadd.f32 %v14326_v58, %v14324_v53 }
 0x18c   : > { %4619 = vmatprep.mubr.bf16.mxu0 %v10209_v7  ;;  %v14521_v7 = vadd.f32 %v17273_v55, %v17272_v26  ;;  %v3923_v26 = vrot.slane %v3921_v23, 4  ;;  %v10793_v55 = vpop.f32.mrb[43].mxu1  ;;  %v14551_v31 = vadd.f32 %v17288_v47, %v17287_v27  ;;  %v17290_v23 = vld [vmem:[#allocation55_spill] sm:$0xff]  ;;  %v17292_v52 = vld [vmem:[#allocation57_spill] sm:$0xff]  ;;  %v17294_v35 = vld [vmem:[#allocation54_spill] sm:$0xff]  ;;  %v3906_v27 = vsel %vm12744_vm5, %v3901_v51, %v14473_v49 }
 0x18d   : > { %v14553_v34 = vadd.f32 %v10793_v55, %v10792_v8  ;;  %v14561_v43 = vadd.f32 %v17291_v62, %v17290_v23  ;;  %v17293_v45 = vld [vmem:[#allocation59_spill] sm:$0xff]  ;;  %v3896_v8 = vsel %vm12744_vm5, %v3891_v28, %v14449_v29  ;;  %v3927_v0 = vshll.u32 %v17294_v35, 16 }
 0x18e   : > { %v14569_v59 = vadd.f32 %v17293_v45, %v17292_v52  ;;  %v10659_v55 = vpop.f32.mrb[44].mxu0  ;;  %v3914_v53 = vor.u32 %v3913_v41, %v3910_v4  ;;  %v3924_v58 = vor.u32 %v3923_v26, %v3919_v20  ;;  %v3932_v23 = vshrl.u32 %v14244_v40, 16 }
 0x18f   : > { %17289 = vst [vmem:[#allocation40_spill] sm:$0xff] %v14553_v34  ;;  %v10660_v47 = vpop.f32.mrb[45].mxu0  ;;  %v3935_v52 = vshll.u32 %v14244_v40, 16  ;;  %v3941_v29 = vshll.u32 %v14250_v11, 16  ;;  %v3945_v28 = vshrl.u32 %v14250_v11, 16  ;;  %v10211_v49 = vcombine.low %v3896_v8, %v3906_v27 }
 0x190   : > { %v14579_v62 = vadd.f32 %v10660_v47, %v10659_v55  ;;  %v3915_v51 = vrot.slane %v3914_v53, 4  ;;  %v3925_v4 = vrot.slane %v3924_v58, 4  ;;  %v3929_v41 = vrot.slane %v3927_v0, 5 }
 0x191   : > { %v3934_v26 = vrot.slane %v3932_v23, 4  ;;  %v3937_v55 = vrot.slane %v3935_v52, 5  ;;  %v3943_v47 = vrot.slane %v3941_v29, 5  ;;  %v3947_v34 = vrot.slane %v3945_v28, 4 }
 0x192   : > { %17295 = vst [vmem:[#allocation36_spill] sm:$0xff] %v14579_v62  ;;  %v3920_v62 = vsel %vm12744_vm5, %v3915_v51, %v3919_v20  ;;  %v10195_v58 = vcombine.low %v14162_v54, %v17255_v25 }
 0x193   : > { %4620 = vmatmul.mubr.bf16.gmra.mrb[140].mxu0 %v10193_v50  ;;  %v10662_v50 = vpop.f32.mrb[46].mxu0  ;;  %v3948_v8 = vor.u32 %v3947_v34, %v3943_v47 }
 0x194   : > { %4627 = vmatprep.mubr.bf16.mxu0 %v10210_v48  ;;  %v10663_v45 = vpop.f32.mrb[47].mxu0  ;;  %v10194_v48 = vcombine.low %v14145_v1, %v14134_v15  ;;  %v3930_v15 = vsel %vm12744_vm5, %v3925_v4, %v3929_v41  ;;  %v3938_v1 = vor.u32 %v3937_v55, %v3934_v26  ;;  %v10196_v4 = vcombine.low %v17258_v32, %v17260_v22 }
 0x195   : > { %v14586_v35 = vadd.f32 %v10663_v45, %v10662_v50  ;;  %v10212_v50 = vcombine.low %v3920_v62, %v3930_v15  ;;  %v3949_v29 = vrot.slane %v3948_v8, 4 }
 0x196   : > { %v10795_v33 = vpop.f32.mrb[44].mxu1  ;;  %v3939_v20 = vrot.slane %v3938_v1, 4 }
 0x197   : > { %v10796_v36 = vpop.f32.mrb[45].mxu1  ;;  %v3954_v25 = vsel %vm12744_vm5, %v3949_v29, %v3953_v17 }
 0x198   : > { %v14593_v27 = vadd.f32 %v10796_v36, %v10795_v33  ;;  %v10798_v0 = vpop.f32.mrb[46].mxu1  ;;  %v3944_v54 = vsel %vm12744_vm5, %v3939_v20, %v3943_v47 }
 0x199   : > { %v10799_v53 = vpop.f32.mrb[47].mxu1  ;;  %v10213_v26 = vcombine.low %v3944_v54, %v3954_v25  ;;  %v12163_v54 = vld [vmem:[%s17124_s4 + $0x80] sm:$0xff]  }
 0x19a   : > { %v14597_v23 = vadd.f32 %v10799_v53, %v10798_v0  ;;  %v10197_v0 = vcombine.low %v14244_v40, %v14250_v11  ;;  %v12164_v25 = vld [vmem:[%s17124_s4] sm:$0xff]   ;;  %11537 = vmatprep.subr.bf16.mxu1 %v12163_v54 }
 0x19b   : > { %4628 = vmatmul.mubr.bf16.gmra.mrb[144].mxu0 %v10194_v48  ;;  %11538 = vmatpush3.bf16.msra.mxu1 %v12163_v54  ;;  %v12170_v54 = vld [vmem:[%s17124_s4 + $0x98] sm:$0xff]  }
 0x19c   : > { %4635 = vmatprep.mubr.bf16.mxu0 %v10211_v49  ;;  %v10665_v52 = vpop.f32.mrb[48].mxu0 }
 0x19d   : > { %v10666_v28 = vpop.f32.mrb[49].mxu0 }
 0x19e   : > { %v14599_v45 = vadd.f32 %v10666_v28, %v10665_v52  ;;  %v10668_v48 = vpop.f32.mrb[50].mxu0  ;;  %v10801_v34 = vpop.f32.mrb[48].mxu1 }
 0x19f   : > { %v10669_v33 = vpop.f32.mrb[51].mxu0  ;;  %v10802_v36 = vpop.f32.mrb[49].mxu1 }
 0x1a0   : > { %v14601_v49 = vadd.f32 %v10669_v33, %v10668_v48  ;;  %v14607_v62 = vadd.f32 %v10802_v36, %v10801_v34  ;;  %v10804_v30 = vpop.f32.mrb[50].mxu1  ;;  %v12162_v36 = vld [vmem:[%s17124_s4 + $0x40] sm:$0xff]  }
 0x1a1   : > { %v10805_v51 = vpop.f32.mrb[51].mxu1  ;;  %10985 = vmatprep.subr.bf16.mxu0 %v12162_v36  ;;  %v12169_v36 = vld [vmem:[%s17124_s4 + $0x50] sm:$0xff]  }
 0x1a2   : > { %v14611_v41 = vadd.f32 %v10805_v51, %v10804_v30  ;;  %10986 = vmatpush3.bf16.msra.mxu0 %v12164_v25 }
 0x1a3   : > { %4636 = vmatmul.mubr.bf16.gmra.mrb[148].mxu0 %v10195_v58 }
 0x1a4   : > { %4643 = vmatprep.mubr.bf16.mxu0 %v10212_v50 }
 0x1a5   : > { %v10671_v55 = vpop.f32.mrb[52].mxu0 }
 0x1a6   : > { %v10672_v15 = vpop.f32.mrb[53].mxu0 }
 0x1a7   : > { %v14613_v1 = vadd.f32 %v10672_v15, %v10671_v55  ;;  %v10674_v47 = vpop.f32.mrb[54].mxu0 }
 0x1a8   : > { %v10675_v8 = vpop.f32.mrb[55].mxu0 }
 0x1a9   : > { %v14617_v53 = vadd.f32 %v10675_v8, %v10674_v47 }
 0x1ab   : > { %4644 = vmatmul.mubr.bf16.gmra.mrb[152].mxu0 %v10196_v4  ;;  %v10807_v58 = vpop.f32.mrb[52].mxu1  ;;  %v12165_v4 = vld [vmem:[%s17124_s4 + $0x88] sm:$0xff]  }
 0x1ac   : > { %4651 = vmatprep.mubr.bf16.mxu0 %v10213_v26  ;;  %v10808_v50 = vpop.f32.mrb[53].mxu1  ;;  %11539 = vmatprep.subr.bf16.mxu1 %v12165_v4 }
 0x1ad   : > { %v14619_v52 = vadd.f32 %v10808_v50, %v10807_v58  ;;  %v10810_v32 = vpop.f32.mrb[54].mxu1  ;;  %11540 = vmatpush3.bf16.msra.mxu1 %v12165_v4 }
 0x1ae   : > { %v10811_v22 = vpop.f32.mrb[55].mxu1 }
 0x1af   : > { %v14621_v20 = vadd.f32 %v10811_v22, %v10810_v32 }
 0x1b1   : > { %v10677_v29 = vpop.f32.mrb[56].mxu0 }
 0x1b2   : > { %v10678_v17 = vpop.f32.mrb[57].mxu0 }
 0x1b3   : > { %4652 = vmatmul.mubr.bf16.gmra.mrb[156].mxu0 %v10197_v0  ;;  %v14623_v28 = vadd.f32 %v10678_v17, %v10677_v29  ;;  %v10680_v48 = vpop.f32.mrb[58].mxu0 }
 0x1b4   : > { %v10681_v34 = vpop.f32.mrb[59].mxu0 }
 0x1b5   : > { %v14625_v33 = vadd.f32 %v10681_v34, %v10680_v48  ;;  %v12166_v48 = vld [vmem:[%s17124_s4 + $0x48] sm:$0xff]   ;;  %v12167_v34 = vld [vmem:[%s17124_s4 + $0x90] sm:$0xff]  }
 0x1b6   : > { %10987 = vmatprep.subr.bf16.mxu0 %v12166_v48  ;;  %11541 = vmatprep.subr.bf16.mxu1 %v12167_v34  ;;  %v17296_v48 = vld [vmem:[#allocation61_spill] sm:$0xff] }
 0x1b7   : > { %11542 = vmatpush3.bf16.msra.mxu1 %v12167_v34  ;;  %v12175_v34 = vld [vmem:[%s17124_s4 + $0x60] sm:$0xff]  }
 0x1b8   : > { %11543 = vmatprep.subr.bf16.mxu1 %v12170_v54 }
 0x1bb   : > { %v10813_v40 = vpop.f32.mrb[56].mxu1  ;;  %11544 = vmatpush3.bf16.msra.mxu1 %v12170_v54  ;;  %v17298_v54 = vld [vmem:[#allocation62_spill] sm:$0xff] }
 0x1bc   : > { %v10814_v11 = vpop.f32.mrb[57].mxu1 }
 0x1bd   : > { %v14636_v30 = vadd.f32 %v10814_v11, %v10813_v40  ;;  %v10816_v51 = vpop.f32.mrb[58].mxu1  ;;  %v12168_v40 = vld [vmem:[%s17124_s4 + $0x8] sm:$0xff]  }
 0x1be   : > { %v10817_v26 = vpop.f32.mrb[59].mxu1  ;;  %10988 = vmatpush3.bf16.msra.mxu0 %v12168_v40  ;;  %v12176_v40 = vld [vmem:[%s17124_s4 + $0xa8] sm:$0xff]  }
 0x1bf   : > { %v14641_v55 = vadd.f32 %v10817_v26, %v10816_v51  ;;  %v12171_v51 = vld [vmem:[%s17124_s4 + $0x10] sm:$0xff]   ;;  %10989 = vmatprep.subr.bf16.mxu0 %v12169_v36 }
 0x1c0   : > { %v10683_v15 = vpop.f32.mrb[60].mxu0 }
 0x1c1   : > { %v10684_v47 = vpop.f32.mrb[61].mxu0 }
 0x1c2   : > { %v14643_v8 = vadd.f32 %v10684_v47, %v10683_v15  ;;  %v10686_v0 = vpop.f32.mrb[62].mxu0  ;;  %10990 = vmatpush3.bf16.msra.mxu0 %v12171_v51 }
 0x1c3   : > { %v10819_v58 = vpop.f32.mrb[60].mxu1  ;;  %v10687_v50 = vpop.f32.mrb[63].mxu0 }
 0x1c4   : > { %v10820_v32 = vpop.f32.mrb[61].mxu1  ;;  %v14645_v22 = vadd.f32 %v10687_v50, %v10686_v0 }
 0x1c5   : > { %v14647_v29 = vadd.f32 %v10820_v32, %v10819_v58  ;;  %v10822_v17 = vpop.f32.mrb[62].mxu1 }
 0x1c6   : > { %v10823_v11 = vpop.f32.mrb[63].mxu1 }
 0x1c7   : > { %v14664_v25 = vadd.f32 %v10823_v11, %v10822_v17  ;;  %v12172_v17 = vld [vmem:[%s17124_s4 + $0x58] sm:$0xff]   ;;  %v17297_v11 = vld [vmem:[#allocation9_spill] sm:$0xff] }
 0x1c8   : > { %v11411_v4 = vpop.f32.mrb[64].mxu0  ;;  %10991 = vmatprep.subr.bf16.mxu0 %v12172_v17 }
 0x1c9   : > { %v1979_v26 = vadd.f32 %v11411_v4, %v14505_v61  ;;  %v1970_v15 = vpop.f32.mrb[65].mxu0  ;;  %v12173_v61 = vld [vmem:[%s17124_s4 + $0xa0] sm:$0xff]  }
 0x1ca   : > { %v1971_v47 = vadd.f32 %v14509_v2, %v1970_v15  ;;  %v11412_v0 = vpop.f32.mrb[66].mxu0  ;;  %v12174_v2 = vld [vmem:[%s17124_s4 + $0x18] sm:$0xff]   ;;  %11545 = vmatprep.subr.bf16.mxu1 %v12173_v61 }
 0x1cb   : > { %v14672_v58 = vadd.f32 %v14332_v38, %v1979_v26  ;;  %v1982_v50 = vadd.f32 %v11412_v0, %v14513_v39  ;;  %v1973_v32 = vpop.f32.mrb[67].mxu0  ;;  %10992 = vmatpush3.bf16.msra.mxu0 %v12174_v2  ;;  %11546 = vmatpush3.bf16.msra.mxu1 %v12173_v61  ;;  %v17300_v61 = vld [vmem:[#allocation34_spill] sm:$0xff] }
 0x1cc   : > { %v14685_v38 = vadd.f32 %v17296_v48, %v1971_v47  ;;  %v1974_v39 = vadd.f32 %v14517_v14, %v1973_v32  ;;  %v12177_v14 = vld [vmem:[%s17124_s4 + $0x20] sm:$0xff]   ;;  %10993 = vmatprep.subr.bf16.mxu0 %v12175_v34  ;;  %11547 = vmatprep.subr.bf16.mxu1 %v12176_v40  ;;  %v17301_v34 = vld [vmem:[#allocation15_spill] sm:$0xff] }
 0x1cd   : > { %v14695_v36 = vadd.f32 %v17297_v11, %v1982_v50  ;;  %v17299_v50 = vld [vmem:[#allocation14_spill] sm:$0xff] }
 0x1ce   : > { %v14698_v51 = vadd.f32 %v17298_v54, %v1974_v39  ;;  %v17302_v54 = vld [vmem:[#allocation35_spill] sm:$0xff] }
 0x1cf   : > { %10994 = vmatpush3.bf16.msra.mxu0 %v12177_v14  ;;  %11548 = vmatpush3.bf16.msra.mxu1 %v12176_v40  ;;  %v12181_v40 = vld [vmem:[%s17124_s4 + $0x70] sm:$0xff]  }
 0x1d0   : > { %v11415_v4 = vpop.f32.mrb[68].mxu0 }
 0x1d1   : > { %v1995_v26 = vadd.f32 %v11415_v4, %v14521_v7  ;;  %v1986_v15 = vpop.f32.mrb[69].mxu0  ;;  %v12178_v7 = vld [vmem:[%s17124_s4 + $0x68] sm:$0xff]   ;;  %v12183_v4 = vld [vmem:[%s17124_s4 + $0x30] sm:$0xff]  }
 0x1d2   : > { %v1987_v47 = vadd.f32 %v14525_v46, %v1986_v15  ;;  %v11416_v0 = vpop.f32.mrb[70].mxu0  ;;  %v12179_v46 = vld [vmem:[%s17124_s4 + $0xb0] sm:$0xff]   ;;  %10995 = vmatprep.subr.bf16.mxu0 %v12178_v7 }
 0x1d3   : > { %v14706_v32 = vadd.f32 %v17299_v50, %v1995_v26  ;;  %v1998_v17 = vadd.f32 %v11416_v0, %v14529_v57  ;;  %v1989_v2 = vpop.f32.mrb[71].mxu0  ;;  %v12180_v57 = vld [vmem:[%s17124_s4 + $0x28] sm:$0xff]   ;;  %11549 = vmatprep.subr.bf16.mxu1 %v12179_v46 }
 0x1d4   : > { %v14710_v48 = vadd.f32 %v17300_v61, %v1987_v47  ;;  %v1990_v39 = vadd.f32 %v14535_v9, %v1989_v2  ;;  %v12182_v9 = vld [vmem:[%s17124_s4 + $0xb8] sm:$0xff]   ;;  %10996 = vmatpush3.bf16.msra.mxu0 %v12180_v57  ;;  %11550 = vmatpush3.bf16.msra.mxu1 %v12179_v46 }
 0x1d5   : > { %v14723_v11 = vadd.f32 %v17301_v34, %v1998_v17  ;;  %10997 = vmatprep.subr.bf16.mxu0 %v12181_v40  ;;  %11551 = vmatprep.subr.bf16.mxu1 %v12182_v9 }
 0x1d6   : > { %v14732_v14 = vadd.f32 %v17302_v54, %v1990_v39  ;;  %v12184_v39 = vld [vmem:[%s17124_s4 + $0x78] sm:$0xff]  }
 0x1d8   : > { %v11419_v26 = vpop.f32.mrb[72].mxu0  ;;  %10998 = vmatpush3.bf16.msra.mxu0 %v12183_v4  ;;  %11552 = vmatpush3.bf16.msra.mxu1 %v12182_v9 }
 0x1d9   : > { %v2011_v15 = vadd.f32 %v11419_v26, %v14539_v16  ;;  %v2002_v47 = vpop.f32.mrb[73].mxu0  ;;  %v12185_v16 = vld [vmem:[%s17124_s4 + $0x38] sm:$0xff]   ;;  %10999 = vmatprep.subr.bf16.mxu0 %v12184_v39 }
 0x1da   : > { %v2003_v0 = vadd.f32 %v14543_v63, %v2002_v47  ;;  %v11420_v50 = vpop.f32.mrb[74].mxu0 }
 0x1db   : > { %v14740_v17 = vadd.f32 %v14437_v21, %v2011_v15  ;;  %v2014_v2 = vadd.f32 %v11420_v50, %v14547_v5  ;;  %v2005_v61 = vpop.f32.mrb[75].mxu0  ;;  %v17303_v5 = vld [vmem:[#allocation43_spill] sm:$0xff] }
 0x1dc   : > { %v14750_v7 = vadd.f32 %v14418_v56, %v2003_v0  ;;  %v2006_v63 = vadd.f32 %v14551_v31, %v2005_v61  ;;  %11000 = vmatpush3.bf16.msra.mxu0 %v12185_v16 }
 0x1dd   : > { %v14754_v21 = vadd.f32 %v14441_v6, %v2014_v2 }
 0x1de   : > { %v14757_v46 = vadd.f32 %v17303_v5, %v2006_v63  ;;  %v17307_v63 = vld [vmem:[#allocation22_spill] sm:$0xff] }
 0x1e0   : > { %v11423_v57 = vpop.f32.mrb[76].mxu0 }
 0x1e1   : > { %v2027_v34 = vadd.f32 %v11423_v57, %v14557_v18  ;;  %v2018_v40 = vpop.f32.mrb[77].mxu0  ;;  %v17308_v57 = vld [vmem:[#allocation36_spill] sm:$0xff] }
 0x1e2   : > { %v2019_v9 = vadd.f32 %v14561_v43, %v2018_v40  ;;  %v11424_v54 = vpop.f32.mrb[78].mxu0 }
 0x1e3   : > { %v14762_v56 = vadd.f32 %v14479_v37, %v2027_v34  ;;  %v2030_v31 = vadd.f32 %v11424_v54, %v14565_v10  ;;  %v2021_v4 = vpop.f32.mrb[79].mxu0  ;;  %v17304_v37 = vld [vmem:[#allocation16_spill] sm:$0xff] }
 0x1e4   : > { %v14766_v6 = vadd.f32 %v14458_v3, %v2019_v9  ;;  %v2022_v26 = vadd.f32 %v14569_v59, %v2021_v4  ;;  %v17310_v4 = vld [vmem:[#allocation26_spill] sm:$0xff] }
 0x1e5   : > { %v14770_v15 = vadd.f32 %v14486_v19, %v2030_v31  ;;  %v17305_v19 = vld [vmem:[#allocation18_spill] sm:$0xff] }
 0x1e6   : > { %v14773_v18 = vadd.f32 %v14462_v24, %v2022_v26  ;;  %v17306_v24 = vld [vmem:[#allocation24_spill] sm:$0xff] }
 0x1e8   : > { %v11427_v47 = vpop.f32.mrb[80].mxu0 }
 0x1e9   : > { %v2043_v43 = vadd.f32 %v11427_v47, %v14445_v42  ;;  %v2034_v0 = vpop.f32.mrb[81].mxu0  ;;  %v17311_v47 = vld [vmem:[#allocation23_spill] sm:$0xff] }
 0x1ea   : > { %v2035_v50 = vadd.f32 %v17304_v37, %v2034_v0  ;;  %v11428_v2 = vpop.f32.mrb[82].mxu0  ;;  %v17313_v37 = vld [vmem:[#allocation40_spill] sm:$0xff] }
 0x1eb   : > { %v14778_v10 = vadd.f32 %v14497_v60, %v2043_v43  ;;  %v2046_v3 = vadd.f32 %v11428_v2, %v14447_v44  ;;  %v2037_v61 = vpop.f32.mrb[83].mxu0  ;;  %v17309_v60 = vld [vmem:[#allocation37_spill] sm:$0xff] }
 0x1ec   : > { %v14782_v59 = vadd.f32 %v14491_v13, %v2035_v50  ;;  %v2038_v39 = vadd.f32 %v17305_v19, %v2037_v61 }
 0x1ed   : > { %v14786_v16 = vadd.f32 %v17306_v24, %v2046_v3 }
 0x1ee   : > { %v14789_v42 = vadd.f32 %v17307_v63, %v2038_v39 }
 0x1f0   : > { %v11431_v5 = vpop.f32.mrb[84].mxu0 }
 0x1f1   : > { %v2059_v34 = vadd.f32 %v11431_v5, %v17308_v57  ;;  %v2050_v40 = vpop.f32.mrb[85].mxu0 }
 0x1f2   : > { %v2051_v9 = vadd.f32 %v17309_v60, %v2050_v40  ;;  %v11432_v54 = vpop.f32.mrb[86].mxu0 }
 0x1f3   : > { %v14794_v44 = vadd.f32 %v14593_v27, %v2059_v34  ;;  %v2062_v13 = vadd.f32 %v11432_v54, %v14586_v35  ;;  %v2053_v31 = vpop.f32.mrb[87].mxu0 }
 0x1f4   : > { %v14798_v26 = vadd.f32 %v17310_v4, %v2051_v9  ;;  %v2054_v43 = vadd.f32 %v17311_v47, %v2053_v31 }
 0x1f5   : > { %v14802_v0 = vadd.f32 %v14597_v23, %v2062_v13 }
 0x1f6   : > { %v14805_v50 = vadd.f32 %v17313_v37, %v2054_v43  ;;  %v14849_v37 = vld [vmem:[%s17123_s3] ss:$0 sm:$0xff] }
 0x1f7   : > { %17312 = vst [vmem:[#allocation39_spill] sm:$0xff] %v14802_v0 }
 0x1f8   : > { %v11435_v2 = vpop.f32.mrb[88].mxu0 }
 0x1f9   : > { %v2075_v3 = vadd.f32 %v11435_v2, %v14613_v1  ;;  %v2066_v61 = vpop.f32.mrb[89].mxu0 }
 0x1fa   : > { %v2067_v27 = vadd.f32 %v14599_v45, %v2066_v61  ;;  %v11436_v19 = vpop.f32.mrb[90].mxu0 }
 0x1fb   : > { %v14810_v35 = vadd.f32 %v14619_v52, %v2075_v3  ;;  %v2078_v39 = vadd.f32 %v11436_v19, %v14617_v53  ;;  %v2069_v24 = vpop.f32.mrb[91].mxu0 }
 0x1fc   : > { %v14814_v63 = vadd.f32 %v14607_v62, %v2067_v27  ;;  %v2070_v23 = vadd.f32 %v14601_v49, %v2069_v24  ;;  %v14855_v27 = vld [vmem:[%s17124_s4 + $0x140] sm:$0xff]  }
 0x1fd   : > { %17314 = vst [vmem:[#allocation42_spill] sm:$0xff] %v14810_v35  ;;  %v14818_v5 = vadd.f32 %v14621_v20, %v2078_v39  ;;  %11585 = vmatprep.subr.bf16.mxu1 %v14855_v27 }
 0x1fe   : > { %17315 = vst [vmem:[#allocation45_spill] sm:$0xff] %v14814_v63  ;;  %v14821_v1 = vadd.f32 %v14611_v41, %v2070_v23 }
 0x1ff   : > { %17316 = vst [vmem:[#allocation47_spill] sm:$0xff] %v14818_v5 }
 0x200   : > { %17317 = vst [vmem:[#allocation58_spill] sm:$0xff] %v14821_v1  ;;  %v11439_v57 = vpop.f32.mrb[92].mxu0 }
 0x201   : > { %v2091_v45 = vadd.f32 %v11439_v57, %v14643_v8  ;;  %v2082_v34 = vpop.f32.mrb[93].mxu0 }
 0x202   : > { %v2083_v52 = vadd.f32 %v14623_v28, %v2082_v34  ;;  %v11440_v40 = vpop.f32.mrb[94].mxu0 }
 0x203   : > { %v14826_v53 = vadd.f32 %v14647_v29, %v2091_v45  ;;  %v2094_v62 = vadd.f32 %v11440_v40, %v14645_v22  ;;  %v2085_v60 = vpop.f32.mrb[95].mxu0 }
 0x204   : > { %v14830_v49 = vadd.f32 %v14636_v30, %v2083_v52  ;;  %v2086_v20 = vadd.f32 %v14625_v33, %v2085_v60  ;;  %v14843_v33 = vld [vmem:[%s17122_s2] ss:$0 sm:$0xff] }
 0x205   : > { %17318 = vst [vmem:[#allocation60_spill] sm:$0xff] %v14826_v53  ;;  %v14834_v41 = vadd.f32 %v14664_v25, %v2094_v62 }
 0x206   : > { %17319 = vst [vmem:[#allocation52_spill] sm:$0xff] %v14830_v49  ;;  %v14837_v8 = vadd.f32 %v14641_v55, %v2086_v20 }
 0x207   : > { %17320 = vst [vmem:[#allocation53_spill] sm:$0xff] %v14834_v41 }
 0x208   : > { %17321 = vst [vmem:[#allocation17_spill] sm:$0xff] %v14837_v8 }
 0x20b   : > { %v10865_v9 = vpop.f32.mrb[96].mxu0 }
 0x20c   : > { %v10866_v28 = vpop.f32.mrb[97].mxu0 }
 0x20d   : > { %v10867_v13 = vadd.f32 %v10866_v28, %v10865_v9  ;;  %v10868_v29 = vpop.f32.mrb[98].mxu0 }
 0x20e   : > { %v11507_v54 = vpop.f32.mrb[64].mxu1  ;;  %v10869_v4 = vpop.f32.mrb[99].mxu0 }
 0x20f   : > { %v4694_v31 = vpop.f32.mrb[65].mxu1  ;;  %v11687_v47 = vadd.f32 %v14685_v38, %v10867_v13  ;;  %v10870_v30 = vadd.f32 %v10869_v4, %v10868_v29 }
 0x210   : > { %v11508_v22 = vpop.f32.mrb[66].mxu1 }
 0x211   : > { %v4697_v43 = vpop.f32.mrb[67].mxu1  ;;  %v11688_v25 = vadd.f32 %v11687_v47, %v4694_v31  ;;  %v11695_v55 = vadd.f32 %v14698_v51, %v10870_v30 }
 0x213   : > { %v4956_v2 = vmul.f32 %v11688_v25, %v14843_v33  ;;  %v11696_v3 = vadd.f32 %v11695_v55, %v4697_v43 }
 0x215   : > { %v10871_v61 = vpop.f32.mrb[100].mxu0  ;;  %v4995_v39 = vadd.f32 %v14849_v37, %v4956_v2  ;;  %v4957_v51 = vmul.f32 %v11696_v3, %v14843_v33 }
 0x216   : > { %v10872_v38 = vpop.f32.mrb[101].mxu0 }
 0x217   : > { %v14857_v19 = vpop.f32.mrb[68].mxu1  ;;  %v10873_v24 = vadd.f32 %v10872_v38, %v10871_v61  ;;  %v10874_v23 = vpop.f32.mrb[102].mxu0  ;;  %v4996_v52 = vadd.f32 %v14849_v37, %v4957_v51  ;;  %v5027_v20 = vmax.f32 %v4995_v39, 0.0 }
 0x218   : > { %v4710_v57 = vpop.f32.mrb[69].mxu1  ;;  %v10875_v45 = vpop.f32.mrb[103].mxu0 }
 0x219   : > { %v14862_v34 = vpop.f32.mrb[70].mxu1  ;;  %v11683_v40 = vadd.f32 %v14672_v58, %v10873_v24  ;;  %v10876_v62 = vadd.f32 %v10875_v45, %v10874_v23  ;;  %v5028_v9 = vmax.f32 %v4996_v52, 0.0 }
 0x21a   : > { %v4713_v60 = vpop.f32.mrb[71].mxu1 }
 0x21b   : > { %v11684_v28 = vadd.f32 %v11683_v40, %v11507_v54  ;;  %v11691_v13 = vadd.f32 %v14695_v36, %v10876_v62  ;;  %v5059_v29 = vpack.c.bf16 %v5028_v9, %v5027_v20 }
 0x21d   : > { %v4958_v31 = vmul.f32 %v11684_v28, %v14843_v33  ;;  %v11692_v4 = vadd.f32 %v11691_v13, %v11508_v22  ;;  %v10877_v47 = vpop.f32.mrb[104].mxu0  ;;  %v5076_v43 = vshrl.u32 %v5059_v29, 16  ;;  %v5140_v25 = vshll.u32 %v5059_v29, 16 }
 0x21e   : > { %v10878_v30 = vpop.f32.mrb[105].mxu0 }
 0x21f   : > { %v14868_v55 = vpop.f32.mrb[72].mxu1  ;;  %v4997_v2 = vadd.f32 %v14849_v37, %v4958_v31  ;;  %v4959_v58 = vmul.f32 %v11692_v4, %v14843_v33  ;;  %v10880_v3 = vpop.f32.mrb[106].mxu0  ;;  %v10879_v54 = vadd.f32 %v10878_v30, %v10877_v47  ;;  %v5139_v36 = vrot.slane %v5076_v43, 7 }
 0x220   : > { %v14872_v61 = vpop.f32.mrb[73].mxu1  ;;  %v10881_v38 = vpop.f32.mrb[107].mxu0  ;;  %v5235_v39 = vrot.slane %v5140_v25, 7 }
 0x221   : > { %v14874_v51 = vpop.f32.mrb[74].mxu1  ;;  %v4998_v22 = vadd.f32 %v14849_v37, %v4959_v58  ;;  %v11703_v23 = vadd.f32 %v14710_v48, %v10879_v54  ;;  %v10882_v45 = vadd.f32 %v10881_v38, %v10880_v3  ;;  %v5142_v52 = vor.u32 %v5140_v25, %v5139_v36 }
 0x222   : > { %v14877_v24 = vpop.f32.mrb[75].mxu1  ;;  %v5283_v62 = vsel %vm12644_vm2, %v5139_v36, %v5235_v39  ;;  %v5029_v20 = vmax.f32 %v4997_v2, 0.0 }
 0x223   : > { %v5030_v9 = vmax.f32 %v4998_v22, 0.0  ;;  %v10258_v28 = vcombine.low %v5283_v62, %v5283_v62  ;;  %v11704_v13 = vadd.f32 %v11703_v23, %v4710_v57  ;;  %v11711_v29 = vadd.f32 %v14732_v14, %v10882_v45 }
 0x224   : > { %v5267_v31 = vsel %vm12644_vm2, %v5076_v43, %v5142_v52 }
 0x225   : > { %v5060_v4 = vpack.c.bf16 %v5030_v9, %v5029_v20  ;;  %v10256_v30 = vcombine.low %v5267_v31, %v5267_v31  ;;  %v10257_v58 = vcombine.high %v5267_v31, %v5267_v31  ;;  %5477 = vst [vmem:[#allocation2 + $0x14] sm:$0x1] %v10258_v28  ;;  %v4960_v48 = vmul.f32 %v11704_v13, %v14843_v33 }
 0x226   : > { %v10883_v47 = vpop.f32.mrb[108].mxu0  ;;  %v11712_v25 = vadd.f32 %v11711_v29, %v4713_v60 }
 0x227   : > { %v10884_v3 = vpop.f32.mrb[109].mxu0  ;;  %v5079_v54 = vshrl.u32 %v5060_v4, 16  ;;  %v5144_v38 = vshll.u32 %v5060_v4, 16  ;;  %5475 = vst [vmem:[#allocation2 + $0xc] sm:$0xf] %v10256_v30  ;;  %v4999_v14 = vadd.f32 %v14849_v37, %v4960_v48 }
 0x228   : > { %v14886_v2 = vpop.f32.mrb[76].mxu1  ;;  %v10885_v36 = vadd.f32 %v10884_v3, %v10883_v47  ;;  %v10886_v57 = vpop.f32.mrb[110].mxu0  ;;  %5476 = vst [vmem:[#allocation2 + $0x10] sm:$0xf] %v10257_v58  ;;  %v4961_v39 = vmul.f32 %v11712_v25, %v14843_v33 }
 0x229   : > { %v14889_v43 = vpop.f32.mrb[77].mxu1  ;;  %v10887_v22 = vpop.f32.mrb[111].mxu0  ;;  %v5143_v23 = vrot.slane %v5079_v54, 7  ;;  %v5236_v45 = vrot.slane %v5144_v38, 7  ;;  %v5031_v47 = vmax.f32 %v4999_v14, 0.0 }
 0x22a   : > { %v14892_v52 = vpop.f32.mrb[78].mxu1  ;;  %v11699_v60 = vadd.f32 %v14706_v32, %v10885_v36  ;;  %v10888_v62 = vadd.f32 %v10887_v22, %v10886_v57  ;;  %v5000_v20 = vadd.f32 %v14849_v37, %v4961_v39 }
 0x22b   : > { %v14896_v9 = vpop.f32.mrb[79].mxu1  ;;  %v5146_v28 = vor.u32 %v5144_v38, %v5143_v23  ;;  %v5284_v13 = vsel %vm12644_vm2, %v5143_v23, %v5236_v45 }
 0x22c   : > { %v11700_v29 = vadd.f32 %v11699_v60, %v14857_v19  ;;  %v11707_v31 = vadd.f32 %v14723_v11, %v10888_v62  ;;  %v10261_v4 = vcombine.low %v5284_v13, %v5284_v13  ;;  %v5032_v30 = vmax.f32 %v5000_v20, 0.0  ;;  %v14906_v3 = vld [vmem:[#allocation2 + $0x14] sm:$0x1] }
 0x22d   : > { %v5268_v58 = vsel %vm12644_vm2, %v5079_v54, %v5146_v28  ;;  %v6027_v11 = vrot.slane %v14906_v3, 5 }
 0x22e   : > { %v4962_v32 = vmul.f32 %v11700_v29, %v14843_v33  ;;  %v11708_v48 = vadd.f32 %v11707_v31, %v14862_v34  ;;  %v10889_v25 = vpop.f32.mrb[112].mxu0  ;;  %v10259_v38 = vcombine.low %v5268_v58, %v5268_v58  ;;  %v10260_v36 = vcombine.high %v5268_v58, %v5268_v58  ;;  %5480 = vst [vmem:[#allocation2 + $0x20] sm:$0x1] %v10261_v4  ;;  %v14913_v45 = vld [vmem:[#allocation2 + $0xc] sm:$0xf] }
 0x22f   : > { %v5061_v57 = vpack.c.bf16 %v5032_v30, %v5031_v47  ;;  %v10890_v19 = vpop.f32.mrb[113].mxu0  ;;  %v14915_v34 = vld [vmem:[#allocation2 + $0x10] sm:$0xf]  ;;  %v10305_v13 = vrot.slane %v14913_v45, 9  ;;  %v5608_v53 = vshrl.u32 %v14913_v45, 16 }
 0x230   : > { %v14909_v39 = vpop.f32.mrb[80].mxu1  ;;  %v5001_v14 = vadd.f32 %v14849_v37, %v4962_v32  ;;  %v4963_v54 = vmul.f32 %v11708_v48, %v14843_v33  ;;  %v10891_v22 = vadd.f32 %v10890_v19, %v10889_v25  ;;  %v10892_v23 = vpop.f32.mrb[114].mxu0  ;;  %5478 = vst [vmem:[#allocation2 + $0x18] sm:$0xf] %v10259_v38  ;;  %5479 = vst [vmem:[#allocation2 + $0x1c] sm:$0xf] %v10260_v36 }
 0x231   : > { %v5082_v60 = vshrl.u32 %v5061_v57, 16  ;;  %v5148_v62 = vshll.u32 %v5061_v57, 16  ;;  %v14917_v20 = vpop.f32.mrb[81].mxu1  ;;  %v10893_v28 = vpop.f32.mrb[115].mxu0  ;;  %v6024_v29 = vrot.slane %v14915_v34, 5 }
 0x232   : > { %v5033_v31 = vmax.f32 %v5001_v14, 0.0  ;;  %v14921_v4 = vpop.f32.mrb[82].mxu1  ;;  %v5002_v47 = vadd.f32 %v14849_v37, %v4963_v54  ;;  %v11719_v30 = vadd.f32 %v14750_v7, %v10891_v22  ;;  %v10894_v58 = vadd.f32 %v10893_v28, %v10892_v23 }
 0x233   : > { %v5147_v32 = vrot.slane %v5082_v60, 7  ;;  %v5237_v48 = vrot.slane %v5148_v62, 7  ;;  %v14925_v25 = vpop.f32.mrb[83].mxu1  ;;  %v14929_v36 = vsel %vm13413_vm8, %v10305_v13, %v6024_v29  ;;  %v6026_v57 = vrot.slane %v6024_v29, 4 }
 0x234   : > { %v5034_v19 = vmax.f32 %v5002_v47, 0.0  ;;  %v11720_v41 = vadd.f32 %v11719_v30, %v14872_v61  ;;  %v11727_v14 = vadd.f32 %v14757_v46, %v10894_v58  ;;  %v5611_v23 = vshll.u32 %v14913_v45, 16 }
 0x235   : > { %v5150_v54 = vor.u32 %v5148_v62, %v5147_v32  ;;  %v5285_v7 = vsel %vm12644_vm2, %v5147_v32, %v5237_v48  ;;  %v14938_v22 = vsel %vm13413_vm8, %v6026_v57, %v6027_v11  ;;  %v5525_v46 = vld [vmem:[#allocation2 + $0x20] sm:$0x1]  ;;  %v14950_v48 = vrot.slane %v5608_v53, 4 }
 0x236   : > { %v10264_v28 = vcombine.low %v5285_v7, %v5285_v7  ;;  %v5062_v13 = vpack.c.bf16 %v5034_v19, %v5033_v31  ;;  %v4964_v29 = vmul.f32 %v11720_v41, %v14843_v33  ;;  %v11728_v61 = vadd.f32 %v11727_v14, %v14877_v24  ;;  %v10895_v47 = vpop.f32.mrb[116].mxu0  ;;  %v14943_v30 = vld [vmem:[#allocation2 + $0x20] sm:$0x1]  ;;  %5528 = vst [vmem:[#allocation2 + $0x8] sm:$0x1] %v5525_v46 }
 0x237   : > { %v5269_v62 = vsel %vm12644_vm2, %v5082_v60, %v5150_v54  ;;  %v10896_v58 = vpop.f32.mrb[117].mxu0  ;;  %v6034_v32 = vrot.slane %v14943_v30, 5  ;;  %v5523_v7 = vld [vmem:[#allocation2 + $0x18] sm:$0xff]  }
 0x238   : > { %v10262_v31 = vcombine.low %v5269_v62, %v5269_v62  ;;  %v10263_v41 = vcombine.high %v5269_v62, %v5269_v62  ;;  %5483 = vst [vmem:[#allocation2 + $0x2c] sm:$0x1] %v10264_v28  ;;  %v5085_v24 = vshrl.u32 %v5062_v13, 16  ;;  %v5152_v57 = vshll.u32 %v5062_v13, 16  ;;  %v14952_v19 = vpop.f32.mrb[84].mxu1  ;;  %v10898_v14 = vpop.f32.mrb[118].mxu0 }
 0x239   : > { %v5003_v60 = vadd.f32 %v14849_v37, %v4964_v29  ;;  %v14955_v54 = vpop.f32.mrb[85].mxu1  ;;  %v4965_v46 = vmul.f32 %v11728_v61, %v14843_v33  ;;  %v10897_v11 = vadd.f32 %v10896_v58, %v10895_v47  ;;  %v10899_v8 = vpop.f32.mrb[119].mxu0  ;;  %5526 = vst [vmem:[#allocation2] sm:$0xff] %v5523_v7   ;;  %v14958_v53 = vld [vmem:[#allocation2 + $0x18] sm:$0xf]  ;;  %v14975_v28 = vrot.slane %v5611_v23, 5 }
 0x23a   : > { %v14960_v49 = vld [vmem:[#allocation2 + $0x1c] sm:$0xf]  ;;  %5481 = vst [vmem:[#allocation2 + $0x24] sm:$0xf] %v10262_v31  ;;  %5482 = vst [vmem:[#allocation2 + $0x28] sm:$0xf] %v10263_v41  ;;  %v10900_v29 = vadd.f32 %v10899_v8, %v10898_v14 }
 0x23b   : > { %v5151_v13 = vrot.slane %v5085_v24, 7  ;;  %v5238_v62 = vrot.slane %v5152_v57, 7  ;;  %v14964_v5 = vpop.f32.mrb[86].mxu1  ;;  %v10306_v35 = vrot.slane %v14958_v53, 9  ;;  %v5035_v61 = vmax.f32 %v5003_v60, 0.0 }
 0x23c   : > { %17324 = vst [vmem:[#allocation19_spill] sm:$0xff] %v14964_v5  ;;  %v5004_v47 = vadd.f32 %v14849_v37, %v4965_v46  ;;  %v14968_v58 = vpop.f32.mrb[87].mxu1  ;;  %v11715_v7 = vadd.f32 %v14740_v17, %v10897_v11  ;;  %v6031_v1 = vrot.slane %v14960_v49, 5  ;;  %v11723_v41 = vadd.f32 %v14754_v21, %v10900_v29 }
 0x23d   : > { %v5154_v63 = vor.u32 %v5152_v57, %v5151_v13  ;;  %v5286_v31 = vsel %vm12644_vm2, %v5151_v13, %v5238_v62 }
 0x23e   : > { %v10267_v8 = vcombine.low %v5286_v31, %v5286_v31  ;;  %v5036_v14 = vmax.f32 %v5004_v47, 0.0  ;;  %v11716_v60 = vadd.f32 %v11715_v7, %v14868_v55  ;;  %v14980_v46 = vsel %vm13413_vm8, %v10306_v35, %v6031_v1  ;;  %v10901_v57 = vpop.f32.mrb[120].mxu0  ;;  %v14988_v47 = vld [vmem:[#allocation2 + $0x8] sm:$0x1] }
 0x23f   : > { %v5270_v17 = vsel %vm12644_vm2, %v5085_v24, %v5154_v63  ;;  %v11724_v11 = vadd.f32 %v11723_v41, %v14874_v51  ;;  %v6033_v5 = vrot.slane %v6031_v1, 4  ;;  %v10902_v29 = vpop.f32.mrb[121].mxu0 }
 0x240   : > { %v10265_v23 = vcombine.low %v5270_v17, %v5270_v17  ;;  %v10266_v13 = vcombine.high %v5270_v17, %v5270_v17  ;;  %5486 = vst [vmem:[#allocation2 + $0x38] sm:$0x1] %v10267_v8  ;;  %v5063_v62 = vpack.c.bf16 %v5036_v14, %v5035_v61  ;;  %v4966_v55 = vmul.f32 %v11716_v60, %v14843_v33  ;;  %v14990_v35 = vpop.f32.mrb[88].mxu1  ;;  %v10904_v51 = vpop.f32.mrb[122].mxu0  ;;  %v14993_v7 = vld [vmem:[#allocation2] sm:$0xf] }
 0x241   : > { %17325 = vst [vmem:[#allocation10_spill] sm:$0xff] %v14990_v35  ;;  %v4967_v63 = vmul.f32 %v11724_v11, %v14843_v33  ;;  %v10903_v24 = vadd.f32 %v10902_v29, %v10901_v57  ;;  %v14995_v1 = vld [vmem:[#allocation2 + $0x4] sm:$0xf]  ;;  %v14999_v31 = vsel %vm13413_vm8, %v6033_v5, %v6034_v32  ;;  %v15004_v60 = vpop.f32.mrb[89].mxu1  ;;  %v10905_v17 = vpop.f32.mrb[123].mxu0  ;;  %v10304_v11 = vrot.slane %v14993_v7, 9 }
 0x242   : > { %5484 = vst [vmem:[#allocation2 + $0x30] sm:$0xf] %v10265_v23  ;;  %5485 = vst [vmem:[#allocation2 + $0x34] sm:$0xf] %v10266_v13  ;;  %v5088_v41 = vshrl.u32 %v5063_v62, 16  ;;  %v5156_v8 = vshll.u32 %v5063_v62, 16  ;;  %v5005_v14 = vadd.f32 %v14849_v37, %v4966_v55  ;;  %v10906_v32 = vadd.f32 %v10905_v17, %v10904_v51 }
 0x243   : > { %17326 = vst [vmem:[#allocation11_spill] sm:$0xff] %v15004_v60  ;;  %v15007_v57 = vpop.f32.mrb[90].mxu1  ;;  %v5006_v29 = vadd.f32 %v14849_v37, %v4967_v63  ;;  %v11735_v5 = vadd.f32 %v14766_v6, %v10903_v24  ;;  %v6017_v61 = vrot.slane %v14995_v1, 5  ;;  %v6020_v55 = vrot.slane %v14988_v47, 5 }
 0x244   : > { %17327 = vst [vmem:[#allocation20_spill] sm:$0xff] %v15007_v57  ;;  %v5155_v23 = vrot.slane %v5088_v41, 7  ;;  %v5239_v13 = vrot.slane %v5156_v8, 7  ;;  %v5037_v21 = vmax.f32 %v5005_v14, 0.0  ;;  %v15012_v62 = vpop.f32.mrb[91].mxu1  ;;  %v11743_v0 = vadd.f32 %v14773_v18, %v10906_v32 }
 0x245   : > { %17328 = vst [vmem:[#allocation21_spill] sm:$0xff] %v15012_v62  ;;  %v5038_v35 = vmax.f32 %v5006_v29, 0.0  ;;  %v11736_v60 = vadd.f32 %v11735_v5, %v14889_v43  ;;  %v6018_v63 = vsel %vm13413_vm8, %v10304_v11, %v6017_v61  ;;  %v6019_v24 = vrot.slane %v6017_v61, 4 }
 0x246   : > { %v5158_v57 = vor.u32 %v5156_v8, %v5155_v23  ;;  %v5287_v6 = vsel %vm12644_vm2, %v5155_v23, %v5239_v13  ;;  %v10354_v51 = vcombine.low %v14980_v46, %v14999_v31  ;;  %v11744_v29 = vadd.f32 %v11743_v0, %v14896_v9  ;;  %v10907_v43 = vpop.f32.mrb[124].mxu0 }
 0x247   : > { %v10270_v14 = vcombine.low %v5287_v6, %v5287_v6  ;;  %v5064_v17 = vpack.c.bf16 %v5038_v35, %v5037_v21  ;;  %v4968_v62 = vmul.f32 %v11736_v60, %v14843_v33  ;;  %v10908_v5 = vpop.f32.mrb[125].mxu0  ;;  %v6021_v8 = vsel %vm13413_vm8, %v6019_v24, %v6020_v55 }
 0x248   : > { %v5271_v18 = vsel %vm12644_vm2, %v5088_v41, %v5158_v57  ;;  %v5584_v11 = vshrl.u32 %v14993_v7, 16  ;;  %v5587_v61 = vshll.u32 %v14993_v7, 16  ;;  %v15031_v31 = vpop.f32.mrb[92].mxu1  ;;  %v10910_v0 = vpop.f32.mrb[126].mxu0  ;;  %v4969_v41 = vmul.f32 %v11744_v29, %v14843_v33 }
 0x249   : > { %v10268_v32 = vcombine.low %v5271_v18, %v5271_v18  ;;  %v10269_v46 = vcombine.high %v5271_v18, %v5271_v18  ;;  %5489 = vst [vmem:[#allocation2 + $0x44] sm:$0x1] %v10270_v14  ;;  %v5091_v21 = vshrl.u32 %v5064_v17, 16  ;;  %v5160_v35 = vshll.u32 %v5064_v17, 16  ;;  %17329 = vst [vmem:[#allocation12_spill] sm:$0xff] %v15031_v31  ;;  %v15034_v60 = vpop.f32.mrb[93].mxu1 }
 0x24a   : > { %v5007_v9 = vadd.f32 %v14849_v37, %v4968_v62  ;;  %17330 = vst [vmem:[#allocation13_spill] sm:$0xff] %v15034_v60  ;;  %v10909_v57 = vadd.f32 %v10908_v5, %v10907_v43  ;;  %v10352_v23 = vcombine.low %v6018_v63, %v6021_v8  ;;  %v10911_v13 = vpop.f32.mrb[127].mxu0  ;;  %v15037_v24 = vpop.f32.mrb[94].mxu1  ;;  %v5586_v17 = vrot.slane %v5584_v11, 4  ;;  %v12193_v18 = vld [vmem:[%s17124_s4 + $0x148] sm:$0xff]  }
 0x24b   : > { %5487 = vst [vmem:[#allocation2 + $0x3c] sm:$0xf] %v10268_v32  ;;  %5488 = vst [vmem:[#allocation2 + $0x40] sm:$0xf] %v10269_v46  ;;  %v5159_v55 = vrot.slane %v5091_v21, 7  ;;  %v5240_v6 = vrot.slane %v5160_v35, 7  ;;  %v10912_v14 = vadd.f32 %v10911_v13, %v10910_v0  ;;  %v5008_v31 = vadd.f32 %v14849_v37, %v4969_v41 }
 0x24c   : > { %v5039_v62 = vmax.f32 %v5007_v9, 0.0  ;;  %v15043_v60 = vpop.f32.mrb[95].mxu1  ;;  %v11731_v63 = vadd.f32 %v14762_v56, %v10909_v57  ;;  %11553 = vmatprep.mubr.bf16.mxu1 %v10352_v23  ;;  %v5589_v29 = vrot.slane %v5587_v61, 5  ;;  %v17331_v11 = vcombine.low %v14929_v36, %v14938_v22  ;;  %v12195_v22 = vld [vmem:[%s17124_s4 + $0x150] sm:$0xff]  }
 0x24d   : > { %v5162_v43 = vor.u32 %v5160_v35, %v5159_v55  ;;  %v5288_v5 = vsel %vm12644_vm2, %v5159_v55, %v5240_v6  ;;  %v11739_v8 = vadd.f32 %v14770_v15, %v10912_v14  ;;  %v5593_v32 = vshll.u32 %v14995_v1, 16 }
 0x24e   : > { %11554 = vmatmul.mubr.bf16.vlgmr.msra.gmra.mrb[96].mxu1 %v17331_v11  ;;  %v10273_v46 = vcombine.low %v5288_v5, %v5288_v5  ;;  %v5040_v0 = vmax.f32 %v5008_v31, 0.0  ;;  %v11732_v9 = vadd.f32 %v11731_v63, %v14886_v2  ;;  %v5590_v56 = vor.u32 %v5589_v29, %v5586_v17  ;;  %v10913_v36 = vpop.f32.mrb[128].mxu0 }
 0x24f   : > { %11557 = vmatprep.mubr.bf16.mxu1 %v10354_v51  ;;  %11586 = vmatpush3.bf16.msra.mxu1 %v14855_v27  ;;  %v5272_v61 = vsel %vm12644_vm2, %v5091_v21, %v5162_v43  ;;  %v11740_v35 = vadd.f32 %v11739_v8, %v14892_v52  ;;  %v5595_v15 = vrot.slane %v5593_v32, 5  ;;  %v5597_v41 = vshrl.u32 %v14995_v1, 16  ;;  %v10914_v57 = vpop.f32.mrb[129].mxu0 }
 0x250   : > { %11587 = vmatprep.subr.bf16.mxu1 %v12193_v18  ;;  %v10271_v31 = vcombine.low %v5272_v61, %v5272_v61  ;;  %v10272_v2 = vcombine.high %v5272_v61, %v5272_v61  ;;  %5492 = vst [vmem:[#allocation2 + $0x50] sm:$0x1] %v10273_v46  ;;  %v5065_v51 = vpack.c.bf16 %v5040_v0, %v5039_v62  ;;  %v5591_v23 = vrot.slane %v5590_v56, 4  ;;  %v10916_v55 = vpop.f32.mrb[130].mxu0 }
 0x251   : > { %v4970_v27 = vmul.f32 %v11732_v9, %v14843_v33  ;;  %v4971_v21 = vmul.f32 %v11740_v35, %v14843_v33  ;;  %v5599_v52 = vrot.slane %v5597_v41, 4  ;;  %v5603_v13 = vshll.u32 %v14988_v47, 16  ;;  %v10917_v62 = vpop.f32.mrb[131].mxu0  ;;  %v12197_v47 = vld [vmem:[%s17124_s4 + $0x158] sm:$0xff]  }
 0x252   : > { %5490 = vst [vmem:[#allocation2 + $0x48] sm:$0xf] %v10271_v31  ;;  %5491 = vst [vmem:[#allocation2 + $0x4c] sm:$0xf] %v10272_v2  ;;  %v5094_v6 = vshrl.u32 %v5065_v51, 16  ;;  %v5164_v14 = vshll.u32 %v5065_v51, 16  ;;  %v10320_v63 = vcombine.low %v14993_v7, %v14995_v1  ;;  %v5596_v43 = vsel %vm12744_vm5, %v5591_v23, %v5595_v15 }
 0x253   : > { %v5009_v17 = vadd.f32 %v14849_v37, %v4970_v27  ;;  %11588 = vmatpush3.bf16.msra.mxu1 %v12193_v18  ;;  %v5010_v29 = vadd.f32 %v14849_v37, %v4971_v21  ;;  %v5600_v5 = vor.u32 %v5599_v52, %v5595_v15  ;;  %v5605_v8 = vrot.slane %v5603_v13, 5  ;;  %v15084_v31 = vld [vmem:[#allocation2 + $0x24] sm:$0xf]  ;;  %v15088_v27 = vld [vmem:[#allocation2 + $0x28] sm:$0xf] }
 0x254   : > { %11589 = vmatprep.subr.bf16.mxu1 %v12195_v22  ;;  %v5163_v11 = vrot.slane %v5094_v6, 7  ;;  %v5241_v32 = vrot.slane %v5164_v14, 7  ;;  %v17332_v7 = vor.u32 %v14975_v28, %v14950_v48  ;;  %v5617_v9 = vshll.u32 %v14915_v34, 16  ;;  %v12206_v23 = vld [vmem:[%s17124_s4 + $0x100] sm:$0xff]  }
 0x255   : > { %v5041_v46 = vmax.f32 %v5009_v17, 0.0  ;;  %v5042_v18 = vmax.f32 %v5010_v29, 0.0  ;;  %v5601_v0 = vrot.slane %v5600_v5, 4  ;;  %v5621_v56 = vshrl.u32 %v14915_v34, 16  ;;  %v12199_v13 = vld [vmem:[%s17124_s4 + $0x160] sm:$0xff]   ;;  %11121 = vmatprep.subr.bf16.mxu0 %v12206_v23 }
 0x256   : > { %v15077_v1 = vrot.slane %v17332_v7, 4  ;;  %v5166_v61 = vor.u32 %v5164_v14, %v5163_v11  ;;  %v5289_v35 = vsel %vm12644_vm2, %v5163_v11, %v5241_v32  ;;  %v5627_v15 = vshll.u32 %v14906_v3, 16  ;;  %v15090_v21 = vpop.f32.mrb[132].mxu0  ;;  %v12207_v14 = vld [vmem:[%s17124_s4 + $0xc0] sm:$0xff]   ;;  %v15105_v11 = vld [vmem:[#allocation2 + $0x2c] sm:$0x1] }
 0x257   : > { %v10915_v41 = vadd.f32 %v10914_v57, %v10913_v36  ;;  %11590 = vmatpush3.bf16.msra.mxu1 %v12195_v22  ;;  %v10276_v2 = vcombine.low %v5289_v35, %v5289_v35  ;;  %v5066_v48 = vpack.c.bf16 %v5042_v18, %v5041_v46  ;;  %v5606_v28 = vsel %vm12744_vm5, %v5601_v0, %v5605_v8  ;;  %v15097_v52 = vpop.f32.mrb[133].mxu0  ;;  %v15135_v23 = vld [vmem:[#allocation2 + $0x38] sm:$0x1] }
 0x258   : > { %v5619_v51 = vrot.slane %v5617_v9, 5  ;;  %11591 = vmatprep.subr.bf16.mxu1 %v12197_v47  ;;  %v5273_v3 = vsel %vm12644_vm2, %v5094_v6, %v5166_v61  ;;  %v10336_v36 = vcombine.low %v5596_v43, %v5606_v28  ;;  %v5623_v22 = vrot.slane %v5621_v56, 4  ;;  %v15107_v6 = vpop.f32.mrb[134].mxu0 }
 0x259   : > { %v5629_v57 = vrot.slane %v5627_v15, 5  ;;  %v10274_v17 = vcombine.low %v5273_v3, %v5273_v3  ;;  %v10275_v29 = vcombine.high %v5273_v3, %v5273_v3  ;;  %5495 = vst [vmem:[#allocation2 + $0x5c] sm:$0x1] %v10276_v2  ;;  %v5097_v5 = vshrl.u32 %v5066_v48, 16  ;;  %v15113_v18 = vpop.f32.mrb[135].mxu0 }
 0x25a   : > { %v5168_v8 = vshll.u32 %v5066_v48, 16  ;;  %6543 = vmatprep.mubr.bf16.mxu0 %v10336_v36  ;;  %v5620_v43 = vsel %vm12744_vm5, %v15077_v1, %v5619_v51  ;;  %v5624_v32 = vor.u32 %v5623_v22, %v5619_v51  ;;  %v11751_v46 = vadd.f32 %v14782_v59, %v10915_v41  ;;  %v15133_v51 = vld [vmem:[#allocation2 + $0x34] sm:$0xf] }
 0x25b   : > { %v10918_v7 = vadd.f32 %v10917_v62, %v10916_v55  ;;  %5493 = vst [vmem:[#allocation2 + $0x54] sm:$0xf] %v10274_v17  ;;  %5494 = vst [vmem:[#allocation2 + $0x58] sm:$0xf] %v10275_v29  ;;  %v5167_v0 = vrot.slane %v5097_v5, 7  ;;  %6544 = vmatmul.mubr.bf16.vlgmr.msra.gmra.mrb[160].mxu0 %v10320_v63  ;;  %v10307_v56 = vrot.slane %v15084_v31, 9  ;;  %11592 = vmatpush3.bf16.msra.mxu1 %v12197_v47 }
 0x25c   : > { %v5242_v9 = vrot.slane %v5168_v8, 7  ;;  %v6038_v61 = vrot.slane %v15088_v27, 5  ;;  %v5625_v35 = vrot.slane %v5624_v32, 4  ;;  %v11752_v15 = vadd.f32 %v11751_v46, %v14917_v20  ;;  %v15120_v55 = vld [vmem:[#allocation2 + $0x30] sm:$0xf]  ;;  %11593 = vmatprep.subr.bf16.mxu1 %v12199_v13  ;;  %v12201_v62 = vld [vmem:[%s17124_s4 + $0x168] sm:$0xff]   ;;  %11122 = vmatpush3.bf16.msra.mxu0 %v12207_v14 }
 0x25d   : > { %v11759_v1 = vadd.f32 %v14789_v42, %v10918_v7  ;;  %v6041_v59 = vrot.slane %v15105_v11, 5  ;;  %v5170_v63 = vor.u32 %v5168_v8, %v5167_v0  ;;  %v10308_v14 = vrot.slane %v15120_v55, 9 }
 0x25e   : > { %v5290_v41 = vsel %vm12644_vm2, %v5167_v0, %v5242_v9  ;;  %v6039_v47 = vsel %vm13413_vm8, %v10307_v56, %v6038_v61  ;;  %v6040_v20 = vrot.slane %v6038_v61, 4  ;;  %v5630_v42 = vsel %vm12744_vm5, %v5625_v35, %v5629_v57  ;;  %v15142_v17 = vpop.f32.mrb[136].mxu0 }
 0x25f   : > { %v10279_v2 = vcombine.low %v5290_v41, %v5290_v41  ;;  %v4972_v48 = vmul.f32 %v11752_v15, %v14843_v33  ;;  %v11760_v28 = vadd.f32 %v11759_v1, %v14925_v25  ;;  %v5274_v3 = vsel %vm12644_vm2, %v5097_v5, %v5170_v63  ;;  %11594 = vmatpush3.bf16.msra.mxu1 %v12199_v13  ;;  %v15146_v32 = vpop.f32.mrb[137].mxu0  ;;  %v12203_v13 = vld [vmem:[%s17124_s4 + $0x170] sm:$0xff]  }
 0x260   : > { %v10337_v36 = vcombine.low %v5620_v43, %v5630_v42  ;;  %v6042_v22 = vsel %vm13413_vm8, %v6040_v20, %v6041_v59  ;;  %v10277_v57 = vcombine.low %v5274_v3, %v5274_v3  ;;  %v10278_v29 = vcombine.high %v5274_v3, %v5274_v3  ;;  %11595 = vmatprep.subr.bf16.mxu1 %v12201_v62  ;;  %v15151_v0 = vpop.f32.mrb[138].mxu0  ;;  %v15167_v20 = vld [vmem:[#allocation2 + $0x3c] sm:$0xf] }
 0x261   : > { %5498 = vst [vmem:[#allocation2 + $0x68] sm:$0x1] %v10279_v2  ;;  %v5011_v25 = vadd.f32 %v14849_v37, %v4972_v48  ;;  %v4973_v8 = vmul.f32 %v11760_v28, %v14843_v33  ;;  %v10355_v5 = vcombine.low %v6039_v47, %v6042_v22  ;;  %v6045_v43 = vrot.slane %v15133_v51, 5  ;;  %v15159_v15 = vpop.f32.mrb[139].mxu0  ;;  %v12211_v2 = vld [vmem:[%s17124_s4 + $0x108] sm:$0xff]  }
 0x262   : > { %6551 = vmatprep.mubr.bf16.mxu0 %v10337_v36  ;;  %v6048_v46 = vrot.slane %v15135_v23, 5  ;;  %v5632_v7 = vshrl.u32 %v14958_v53, 16  ;;  %5496 = vst [vmem:[#allocation2 + $0x60] sm:$0xf] %v10277_v57  ;;  %5497 = vst [vmem:[#allocation2 + $0x64] sm:$0xf] %v10278_v29  ;;  %v17333_v63 = vcombine.low %v14913_v45, %v14915_v34  ;;  %v10921_v22 = vadd.f32 %v15097_v52, %v15090_v21 }
 0x263   : > { %v5043_v9 = vmax.f32 %v5011_v25, 0.0  ;;  %v5012_v56 = vadd.f32 %v14849_v37, %v4973_v8  ;;  %v5635_v61 = vshll.u32 %v14958_v53, 16  ;;  %v5641_v35 = vshll.u32 %v14960_v49, 16  ;;  %11558 = vmatmul.mubr.bf16.gmra.mrb[100].mxu1 %v10355_v5  ;;  %v15173_v36 = vld [vmem:[#allocation2 + $0x40] sm:$0xf]  ;;  %v12205_v57 = vld [vmem:[%s17124_s4 + $0x178] sm:$0xff]   ;;  %11123 = vmatprep.subr.bf16.mxu0 %v12211_v2 }
 0x264   : > { %v6046_v1 = vsel %vm13413_vm8, %v10308_v14, %v6045_v43  ;;  %v6047_v59 = vrot.slane %v6045_v43, 4  ;;  %6552 = vmatmul.mubr.bf16.gmra.mrb[164].mxu0 %v17333_v63  ;;  %v5634_v41 = vrot.slane %v5632_v7, 4  ;;  %v5645_v47 = vshrl.u32 %v14960_v49, 16  ;;  %11596 = vmatpush3.bf16.msra.mxu1 %v12201_v62  ;;  %v12214_v62 = vld [vmem:[%s17124_s4 + $0x110] sm:$0xff]   ;;  %v15190_v8 = vld [vmem:[#allocation2 + $0x44] sm:$0x1] }
 0x265   : > { %v5044_v42 = vmax.f32 %v5012_v56, 0.0  ;;  %v5637_v48 = vrot.slane %v5635_v61, 5  ;;  %v5643_v28 = vrot.slane %v5641_v35, 5  ;;  %v5651_v3 = vshll.u32 %v14943_v30, 16  ;;  %11597 = vmatprep.subr.bf16.mxu1 %v12203_v13  ;;  %v12212_v30 = vld [vmem:[%s17124_s4 + $0xc8] sm:$0xff]  }
 0x266   : > { %v6049_v45 = vsel %vm13413_vm8, %v6047_v59, %v6048_v46  ;;  %v5647_v34 = vrot.slane %v5645_v47, 4  ;;  %v10924_v14 = vadd.f32 %v15113_v18, %v15107_v6  ;;  %v11747_v18 = vadd.f32 %v14778_v10, %v10921_v22  ;;  %v15195_v46 = vpop.f32.mrb[140].mxu0  ;;  %11124 = vmatpush3.bf16.msra.mxu0 %v12212_v30  ;;  %v12215_v10 = vld [vmem:[%s17124_s4 + $0xd0] sm:$0xff]   ;;  %v12209_v47 = vld [vmem:[%s17124_s4 + $0x1c0] sm:$0xff]   ;;  %v12218_v22 = vld [vmem:[%s17124_s4 + $0x118] sm:$0xff]  }
 0x267   : > { %v5067_v29 = vpack.c.bf16 %v5044_v42, %v5043_v9  ;;  %v10356_v25 = vcombine.low %v6046_v1, %v6049_v45  ;;  %v5638_v21 = vor.u32 %v5637_v48, %v5634_v41  ;;  %v5653_v52 = vrot.slane %v5651_v3, 5  ;;  %v15198_v35 = vpop.f32.mrb[141].mxu0  ;;  %11125 = vmatprep.subr.bf16.mxu0 %v12214_v62 }
 0x268   : > { %v5648_v6 = vor.u32 %v5647_v34, %v5643_v28  ;;  %v11755_v5 = vadd.f32 %v14786_v16, %v10924_v14  ;;  %v10309_v43 = vrot.slane %v15167_v20, 9  ;;  %v6052_v9 = vrot.slane %v15173_v36, 5  ;;  %11598 = vmatpush3.bf16.msra.mxu1 %v12203_v13  ;;  %v15206_v41 = vpop.f32.mrb[142].mxu0 }
 0x269   : > { %v5100_v7 = vshrl.u32 %v5067_v29, 16  ;;  %v5172_v56 = vshll.u32 %v5067_v29, 16  ;;  %11561 = vmatprep.mubr.bf16.mxu1 %v10356_v25  ;;  %v5639_v61 = vrot.slane %v5638_v21, 4  ;;  %v11748_v16 = vadd.f32 %v11747_v18, %v14909_v39  ;;  %11599 = vmatprep.subr.bf16.mxu1 %v12205_v57  ;;  %v15215_v48 = vpop.f32.mrb[143].mxu0  ;;  %v12219_v29 = vld [vmem:[%s17124_s4 + $0xd8] sm:$0xff]  }
 0x26a   : > { %v5649_v1 = vrot.slane %v5648_v6, 4  ;;  %v11756_v59 = vadd.f32 %v11755_v5, %v14921_v4  ;;  %v6055_v63 = vrot.slane %v15190_v8, 5  ;;  %v6053_v39 = vsel %vm13413_vm8, %v10309_v43, %v6052_v9  ;;  %11126 = vmatpush3.bf16.msra.mxu0 %v12215_v10  ;;  %v12221_v6 = vld [vmem:[%s17124_s4 + $0x120] sm:$0xff]  }
 0x26b   : > { %v5171_v13 = vrot.slane %v5100_v7, 7  ;;  %v5243_v2 = vrot.slane %v5172_v56, 7  ;;  %v5644_v42 = vsel %vm12744_vm5, %v5639_v61, %v5643_v28  ;;  %v4974_v3 = vmul.f32 %v11748_v16, %v14843_v33  ;;  %v15242_v61 = vld [vmem:[#allocation2 + $0x4c] sm:$0xf]  ;;  %11127 = vmatprep.subr.bf16.mxu0 %v12218_v22 }
 0x26c   : > { %v5654_v4 = vsel %vm12744_vm5, %v5649_v1, %v5653_v52  ;;  %v4975_v45 = vmul.f32 %v11756_v59, %v14843_v33  ;;  %v6054_v34 = vrot.slane %v6052_v9, 4  ;;  %v5656_v62 = vshrl.u32 %v15084_v31, 16  ;;  %11600 = vmatpush3.bf16.msra.mxu1 %v12205_v57 }
 0x26d   : > { %v5174_v14 = vor.u32 %v5172_v56, %v5171_v13  ;;  %v5291_v28 = vsel %vm12644_vm2, %v5171_v13, %v5243_v2  ;;  %v10338_v30 = vcombine.low %v5644_v42, %v5654_v4  ;;  %v5013_v33 = vadd.f32 %v14849_v37, %v4974_v3  ;;  %11257 = vmatprep.subr.bf16.mxu1 %v12209_v47  ;;  %v15240_v56 = vld [vmem:[#allocation2 + $0x48] sm:$0xf]  ;;  %v12222_v42 = vld [vmem:[%s17124_s4 + $0xe0] sm:$0xff]  }
 0x26e   : > { %v10282_v25 = vcombine.low %v5291_v28, %v5291_v28  ;;  %v5014_v21 = vadd.f32 %v14849_v37, %v4975_v45  ;;  %v6056_v52 = vsel %vm13413_vm8, %v6054_v34, %v6055_v63  ;;  %v5658_v5 = vrot.slane %v5656_v62, 4  ;;  %11128 = vmatpush3.bf16.msra.mxu0 %v12219_v29 }
 0x26f   : > { %v5275_v57 = vsel %vm12644_vm2, %v5100_v7, %v5174_v14  ;;  %6559 = vmatprep.mubr.bf16.mxu0 %v10338_v30  ;;  %v10357_v18 = vcombine.low %v6053_v39, %v6056_v52  ;;  %v5659_v43 = vshll.u32 %v15084_v31, 16  ;;  %v5045_v10 = vmax.f32 %v5013_v33, 0.0  ;;  %v15247_v7 = vpop.f32.mrb[144].mxu0  ;;  %v15259_v39 = vld [vmem:[#allocation2 + $0x50] sm:$0x1]  ;;  %11129 = vmatprep.subr.bf16.mxu0 %v12221_v6  ;;  %v12226_v6 = vld [vmem:[%s17124_s4 + $0xe8] sm:$0xff]  }
 0x270   : > { %v10280_v37 = vcombine.low %v5275_v57, %v5275_v57  ;;  %v10281_v9 = vcombine.high %v5275_v57, %v5275_v57  ;;  %5501 = vst [vmem:[#allocation2 + $0x74] sm:$0x1] %v10282_v25  ;;  %v5046_v1 = vmax.f32 %v5014_v21, 0.0  ;;  %v17334_v16 = vcombine.low %v14958_v53, %v14960_v49  ;;  %v15252_v2 = vpop.f32.mrb[145].mxu0 }
 0x271   : > { %11562 = vmatmul.mubr.bf16.gmra.mrb[104].mxu1 %v10357_v18  ;;  %v5661_v59 = vrot.slane %v5659_v43, 5  ;;  %v5665_v63 = vshll.u32 %v15088_v27, 16  ;;  %v5669_v47 = vshrl.u32 %v15088_v27, 16  ;;  %v5675_v13 = vshll.u32 %v15105_v11, 16  ;;  %v15263_v11 = vpop.f32.mrb[146].mxu0 }
 0x272   : > { %6560 = vmatmul.mubr.bf16.gmra.mrb[168].mxu0 %v17334_v16  ;;  %5499 = vst [vmem:[#allocation2 + $0x6c] sm:$0xf] %v10280_v37  ;;  %5500 = vst [vmem:[#allocation2 + $0x70] sm:$0xf] %v10281_v9  ;;  %v5068_v49 = vpack.c.bf16 %v5046_v1, %v5045_v10  ;;  %v10927_v53 = vadd.f32 %v15146_v32, %v15142_v17  ;;  %v10310_v4 = vrot.slane %v15240_v56, 9  ;;  %v6059_v3 = vrot.slane %v15242_v61, 5 }
 0x273   : > { %v5662_v45 = vor.u32 %v5661_v59, %v5658_v5  ;;  %v5667_v34 = vrot.slane %v5665_v63, 5  ;;  %v5671_v22 = vrot.slane %v5669_v47, 4  ;;  %v5677_v14 = vrot.slane %v5675_v13, 5  ;;  %v15265_v28 = vpop.f32.mrb[147].mxu0  ;;  %v12225_v32 = vld [vmem:[%s17124_s4 + $0x128] sm:$0xff]   ;;  %11130 = vmatpush3.bf16.msra.mxu0 %v12222_v42  ;;  %v12228_v1 = vld [vmem:[%s17124_s4 + $0x130] sm:$0xff]  }
 0x274   : > { %v5103_v30 = vshrl.u32 %v5068_v49, 16  ;;  %v5176_v62 = vshll.u32 %v5068_v49, 16  ;;  %v11767_v29 = vadd.f32 %v14798_v26, %v10927_v53  ;;  %v6060_v17 = vsel %vm13413_vm8, %v10310_v4, %v6059_v3  ;;  %11131 = vmatprep.subr.bf16.mxu0 %v12225_v32  ;;  %v15310_v4 = vld [vmem:[%s17123_s3] ss:$0 sm:$0xff] }
 0x275   : > { %v5663_v25 = vrot.slane %v5662_v45, 4  ;;  %v5672_v33 = vor.u32 %v5671_v22, %v5667_v34  ;;  %v6061_v21 = vrot.slane %v6059_v3, 4  ;;  %v6062_v52 = vrot.slane %v15259_v39, 5  ;;  %v12229_v22 = vld [vmem:[%s17124_s4 + $0xf0] sm:$0xff]  }
 0x276   : > { %v5175_v57 = vrot.slane %v5103_v30, 7  ;;  %v5244_v18 = vrot.slane %v5176_v62, 7  ;;  %v11768_v26 = vadd.f32 %v11767_v29, %v14955_v54  ;;  %v10930_v5 = vadd.f32 %v15159_v15, %v15151_v0  ;;  %v15294_v0 = vld [vmem:[%s17122_s2] ss:$0 sm:$0xff]  ;;  %v15297_v63 = vpop.f32.mrb[148].mxu0 }
 0x277   : > { %v5668_v43 = vsel %vm12744_vm5, %v5663_v25, %v5667_v34  ;;  %v5673_v37 = vrot.slane %v5672_v33, 4  ;;  %v6063_v9 = vsel %vm13413_vm8, %v6061_v21, %v6062_v52  ;;  %v10323_v10 = vcombine.low %v15084_v31, %v15088_v27  ;;  %v15303_v42 = vpop.f32.mrb[149].mxu0  ;;  %11132 = vmatpush3.bf16.msra.mxu0 %v12226_v6  ;;  %v12232_v25 = vld [vmem:[%s17124_s4 + $0x138] sm:$0xff]  }
 0x278   : > { %v5178_v16 = vor.u32 %v5176_v62, %v5175_v57  ;;  %v5292_v54 = vsel %vm12644_vm2, %v5175_v57, %v5244_v18  ;;  %v4976_v15 = vmul.f32 %v15294_v0, %v11768_v26  ;;  %v10358_v59 = vcombine.low %v6060_v17, %v6063_v9  ;;  %v15316_v34 = vpop.f32.mrb[150].mxu0  ;;  %11133 = vmatprep.subr.bf16.mxu0 %v12228_v1  ;;  %v15322_v17 = vld [vmem:[#allocation2 + $0x58] sm:$0xf]  ;;  %v15331_v57 = vld [vmem:[#allocation2 + $0x5c] sm:$0x1] }
 0x279   : > { %v10285_v47 = vcombine.low %v5292_v54, %v5292_v54  ;;  %v5678_v31 = vsel %vm12744_vm5, %v5673_v37, %v5677_v14  ;;  %v11775_v27 = vadd.f32 %v14805_v50, %v10930_v5  ;;  %v5680_v13 = vshrl.u32 %v15120_v55, 16  ;;  %v15314_v50 = vld [vmem:[#allocation2 + $0x54] sm:$0xf]  ;;  %v15324_v32 = vpop.f32.mrb[151].mxu0 }
 0x27a   : > { %v5276_v49 = vsel %vm12644_vm2, %v5103_v30, %v5178_v16  ;;  %v10339_v53 = vcombine.low %v5668_v43, %v5678_v31  ;;  %v5015_v3 = vadd.f32 %v15310_v4, %v4976_v15  ;;  %11565 = vmatprep.mubr.bf16.mxu1 %v10358_v59  ;;  %v5683_v45 = vshll.u32 %v15120_v55, 16  ;;  %v12234_v16 = vld [vmem:[%s17124_s4 + $0xf8] sm:$0xff]  }
 0x27b   : > { %v10283_v14 = vcombine.low %v5276_v49, %v5276_v49  ;;  %v10284_v30 = vcombine.high %v5276_v49, %v5276_v49  ;;  %5504 = vst [vmem:[#allocation2 + $0x80] sm:$0x1] %v10285_v47  ;;  %v11776_v62 = vadd.f32 %v11775_v27, %v14968_v58  ;;  %v5682_v29 = vrot.slane %v5680_v13, 4  ;;  %11134 = vmatpush3.bf16.msra.mxu0 %v12229_v22 }
 0x27c   : > { %6567 = vmatprep.mubr.bf16.mxu0 %v10339_v53  ;;  %v5047_v33 = vmax.f32 %v5015_v3, 0.0  ;;  %v5685_v21 = vrot.slane %v5683_v45, 5  ;;  %v5689_v52 = vshll.u32 %v15133_v51, 16  ;;  %v5693_v6 = vshrl.u32 %v15133_v51, 16  ;;  %11135 = vmatprep.subr.bf16.mxu0 %v12232_v25 }
 0x27d   : > { %5502 = vst [vmem:[#allocation2 + $0x78] sm:$0xf] %v10283_v14  ;;  %5503 = vst [vmem:[#allocation2 + $0x7c] sm:$0xf] %v10284_v30  ;;  %v4977_v58 = vmul.f32 %v15294_v0, %v11776_v62  ;;  %6568 = vmatmul.mubr.bf16.gmra.mrb[172].mxu0 %v10323_v10  ;;  %v5699_v18 = vshll.u32 %v15135_v23, 16  ;;  %v10933_v26 = vadd.f32 %v15198_v35, %v15195_v46  ;;  %v10311_v5 = vrot.slane %v15314_v50, 9 }
 0x27e   : > { %v5686_v43 = vor.u32 %v5685_v21, %v5682_v29  ;;  %v5691_v37 = vrot.slane %v5689_v52, 5  ;;  %v5695_v9 = vrot.slane %v5693_v6, 4  ;;  %v6066_v1 = vrot.slane %v15322_v17, 5  ;;  %v15347_v31 = vpop.f32.mrb[152].mxu0  ;;  %v17335_v62 = vld [vmem:[#allocation39_spill] sm:$0xff] }
 0x27f   : > { %v5016_v54 = vadd.f32 %v15310_v4, %v4977_v58  ;;  %v5701_v10 = vrot.slane %v5699_v18, 5  ;;  %v11763_v23 = vadd.f32 %v14794_v44, %v10933_v26  ;;  %v6069_v15 = vrot.slane %v15331_v57, 5  ;;  %v15354_v53 = vpop.f32.mrb[153].mxu0  ;;  %11136 = vmatpush3.bf16.msra.mxu0 %v12234_v16  ;;  %v17336_v26 = vld [vmem:[#allocation19_spill] sm:$0xff] }
 0x280   : > { %v5687_v46 = vrot.slane %v5686_v43, 4  ;;  %v5696_v35 = vor.u32 %v5695_v9, %v5691_v37  ;;  %v6067_v59 = vsel %vm13413_vm8, %v10311_v5, %v6066_v1  ;;  %v6068_v47 = vrot.slane %v6066_v1, 4  ;;  %v15361_v30 = vpop.f32.mrb[154].mxu0  ;;  %v15374_v1 = vld [vmem:[#allocation2 + $0x60] sm:$0xf] }
 0x281   : > { %v5048_v27 = vmax.f32 %v5016_v54, 0.0  ;;  %v11764_v13 = vadd.f32 %v11763_v23, %v14952_v19  ;;  %v10936_v49 = vadd.f32 %v15215_v48, %v15206_v41  ;;  %v10324_v44 = vcombine.low %v15120_v55, %v15133_v51  ;;  %v15365_v51 = vpop.f32.mrb[155].mxu0 }
 0x282   : > { %v5692_v3 = vsel %vm12744_vm5, %v5687_v46, %v5691_v37  ;;  %v5697_v45 = vrot.slane %v5696_v35, 4  ;;  %v6070_v22 = vsel %vm13413_vm8, %v6068_v47, %v6069_v15  ;;  %v5704_v14 = vshrl.u32 %v15167_v20, 16  ;;  %v15380_v47 = vld [vmem:[#allocation2 + $0x64] sm:$0xf] }
 0x283   : > { %v5069_v19 = vpack.c.bf16 %v5048_v27, %v5047_v33  ;;  %v4978_v41 = vmul.f32 %v15294_v0, %v11764_v13  ;;  %v10359_v48 = vcombine.low %v6067_v59, %v6070_v22  ;;  %v11771_v55 = vadd.f32 %v17335_v62, %v10936_v49  ;;  %v15382_v27 = vld [vmem:[#allocation2 + $0x68] sm:$0x1] }
 0x284   : > { %v5702_v29 = vsel %vm12744_vm5, %v5697_v45, %v5701_v10  ;;  %v5706_v25 = vrot.slane %v5704_v14, 4  ;;  %v5707_v21 = vshll.u32 %v15167_v20, 16  ;;  %v5713_v52 = vshll.u32 %v15173_v36, 16 }
 0x285   : > { %v5106_v6 = vshrl.u32 %v5069_v19, 16  ;;  %v5180_v58 = vshll.u32 %v5069_v19, 16  ;;  %v10340_v18 = vcombine.low %v5692_v3, %v5702_v29  ;;  %v5017_v33 = vadd.f32 %v15310_v4, %v4978_v41  ;;  %11566 = vmatmul.mubr.bf16.gmra.mrb[108].mxu1 %v10359_v48  ;;  %v17337_v48 = vld [vmem:[#allocation45_spill] sm:$0xff] }
 0x286   : > { %v11772_v5 = vadd.f32 %v11771_v55, %v17336_v26  ;;  %v5709_v43 = vrot.slane %v5707_v21, 5  ;;  %v5715_v37 = vrot.slane %v5713_v52, 5  ;;  %v5717_v9 = vshrl.u32 %v15173_v36, 16  ;;  %v15384_v13 = vpop.f32.mrb[156].mxu0  ;;  %v17338_v26 = vld [vmem:[#allocation11_spill] sm:$0xff] }
 0x287   : > { %v5179_v16 = vrot.slane %v5106_v6, 7  ;;  %v5245_v54 = vrot.slane %v5180_v58, 7  ;;  %6575 = vmatprep.mubr.bf16.mxu0 %v10340_v18  ;;  %v5049_v10 = vmax.f32 %v5017_v33, 0.0  ;;  %v5723_v23 = vshll.u32 %v15190_v8, 16  ;;  %v15389_v22 = vpop.f32.mrb[157].mxu0 }
 0x288   : > { %v4979_v15 = vmul.f32 %v15294_v0, %v11772_v5  ;;  %6576 = vmatmul.mubr.bf16.gmra.mrb[176].mxu0 %v10324_v44  ;;  %v5710_v46 = vor.u32 %v5709_v43, %v5706_v25  ;;  %v5719_v35 = vrot.slane %v5717_v9, 4  ;;  %v10939_v59 = vadd.f32 %v15252_v2, %v15247_v7  ;;  %v15392_v2 = vpop.f32.mrb[158].mxu0 }
 0x289   : > { %v5182_v49 = vor.u32 %v5180_v58, %v5179_v16  ;;  %v5293_v3 = vsel %vm12644_vm2, %v5179_v16, %v5245_v54  ;;  %v5725_v45 = vrot.slane %v5723_v23, 5  ;;  %v10312_v8 = vrot.slane %v15374_v1, 9  ;;  %v15399_v25 = vpop.f32.mrb[159].mxu0 }
 0x28a   : > { %v10288_v44 = vcombine.low %v5293_v3, %v5293_v3  ;;  %v5018_v14 = vadd.f32 %v15310_v4, %v4979_v15  ;;  %v5711_v19 = vrot.slane %v5710_v46, 4  ;;  %v5720_v7 = vor.u32 %v5719_v35, %v5715_v37 }
 0x28b   : > { %v5277_v41 = vsel %vm12644_vm2, %v5106_v6, %v5182_v49  ;;  %v11783_v62 = vadd.f32 %v17337_v48, %v10939_v59  ;;  %v6073_v55 = vrot.slane %v15380_v47, 5  ;;  %v6076_v29 = vrot.slane %v15382_v27, 5 }
 0x28c   : > { %v10286_v21 = vcombine.low %v5277_v41, %v5277_v41  ;;  %v10287_v52 = vcombine.high %v5277_v41, %v5277_v41  ;;  %5507 = vst [vmem:[#allocation2 + $0x8c] sm:$0x1] %v10288_v44  ;;  %v5050_v58 = vmax.f32 %v5018_v14, 0.0  ;;  %v5716_v18 = vsel %vm12744_vm5, %v5711_v19, %v5715_v37  ;;  %v17340_v41 = vld [vmem:[#allocation21_spill] sm:$0xff] }
 0x28d   : > { %v5721_v33 = vrot.slane %v5720_v7, 4  ;;  %v11784_v5 = vadd.f32 %v11783_v62, %v17338_v26  ;;  %v6074_v6 = vsel %vm13413_vm8, %v10312_v8, %v6073_v55  ;;  %v6075_v43 = vrot.slane %v6073_v55, 4 }
 0x28e   : > { %5505 = vst [vmem:[#allocation2 + $0x84] sm:$0xf] %v10286_v21  ;;  %5506 = vst [vmem:[#allocation2 + $0x88] sm:$0xf] %v10287_v52  ;;  %v5070_v9 = vpack.c.bf16 %v5050_v58, %v5049_v10  ;;  %v10942_v16 = vadd.f32 %v15265_v28, %v15263_v11  ;;  %v10325_v54 = vcombine.low %v15167_v20, %v15173_v36  ;;  %v5728_v23 = vshrl.u32 %v15240_v56, 16  ;;  %v17339_v28 = vld [vmem:[#allocation58_spill] sm:$0xff] }
 0x28f   : > { %v5726_v37 = vsel %vm12744_vm5, %v5721_v33, %v5725_v45  ;;  %v4980_v15 = vmul.f32 %v15294_v0, %v11784_v5  ;;  %v6077_v46 = vsel %vm13413_vm8, %v6075_v43, %v6076_v29  ;;  %v5731_v35 = vshll.u32 %v15240_v56, 16  ;;  %v15423_v29 = vld [vmem:[#allocation2 + $0x6c] sm:$0xf]  ;;  %v15428_v43 = vld [vmem:[#allocation2 + $0x70] sm:$0xf] }
 0x290   : > { %v5109_v59 = vshrl.u32 %v5070_v9, 16  ;;  %v5184_v10 = vshll.u32 %v5070_v9, 16  ;;  %v10341_v49 = vcombine.low %v5716_v18, %v5726_v37  ;;  %v10360_v3 = vcombine.low %v6074_v6, %v6077_v46  ;;  %v15430_v9 = vld [vmem:[#allocation2 + $0x74] sm:$0x1] }
 0x291   : > { %v5019_v11 = vadd.f32 %v15310_v4, %v4980_v15  ;;  %v11791_v20 = vadd.f32 %v17339_v28, %v10942_v16  ;;  %v5730_v36 = vrot.slane %v5728_v23, 4  ;;  %v5733_v8 = vrot.slane %v5731_v35, 5 }
 0x292   : > { %v5183_v44 = vrot.slane %v5109_v59, 7  ;;  %v5246_v14 = vrot.slane %v5184_v10, 7  ;;  %6583 = vmatprep.mubr.bf16.mxu0 %v10341_v49  ;;  %11569 = vmatprep.mubr.bf16.mxu1 %v10360_v3  ;;  %v5737_v45 = vshll.u32 %v15242_v61, 16  ;;  %v5741_v19 = vshrl.u32 %v15242_v61, 16  ;;  %v17341_v49 = vld [vmem:[#allocation42_spill] sm:$0xff] }
 0x293   : > { %v5051_v7 = vmax.f32 %v5019_v11, 0.0  ;;  %v11792_v48 = vadd.f32 %v11791_v20, %v17340_v41  ;;  %6584 = vmatmul.mubr.bf16.gmra.mrb[180].mxu0 %v10325_v54  ;;  %v5734_v62 = vor.u32 %v5733_v8, %v5730_v36  ;;  %v5747_v55 = vshll.u32 %v15259_v39, 16  ;;  %v17342_v8 = vld [vmem:[#allocation10_spill] sm:$0xff] }
 0x294   : > { %v5186_v21 = vor.u32 %v5184_v10, %v5183_v44  ;;  %v5294_v52 = vsel %vm12644_vm2, %v5183_v44, %v5246_v14  ;;  %v5739_v58 = vrot.slane %v5737_v45, 5  ;;  %v5743_v18 = vrot.slane %v5741_v19, 4 }
 0x295   : > { %v10291_v33 = vcombine.low %v5294_v52, %v5294_v52  ;;  %v4981_v26 = vmul.f32 %v15294_v0, %v11792_v48  ;;  %v5735_v5 = vrot.slane %v5734_v62, 4  ;;  %v5749_v6 = vrot.slane %v5747_v55, 5  ;;  %v17343_v48 = vld [vmem:[#allocation47_spill] sm:$0xff] }
 0x296   : > { %v5278_v39 = vsel %vm12644_vm2, %v5109_v59, %v5186_v21  ;;  %v5744_v16 = vor.u32 %v5743_v18, %v5739_v58  ;;  %v10945_v54 = vadd.f32 %v15303_v42, %v15297_v63  ;;  %v10313_v23 = vrot.slane %v15423_v29, 9  ;;  %v17344_v18 = vld [vmem:[#allocation20_spill] sm:$0xff] }
 0x297   : > { %v10289_v37 = vcombine.low %v5278_v39, %v5278_v39  ;;  %v10290_v15 = vcombine.high %v5278_v39, %v5278_v39  ;;  %5510 = vst [vmem:[#allocation2 + $0x98] sm:$0x1] %v10291_v33  ;;  %v5020_v46 = vadd.f32 %v15310_v4, %v4981_v26  ;;  %v5740_v35 = vsel %vm12744_vm5, %v5735_v5, %v5739_v58 }
 0x298   : > { %v5745_v10 = vrot.slane %v5744_v16, 4  ;;  %v11779_v3 = vadd.f32 %v17341_v49, %v10945_v54  ;;  %v6080_v11 = vrot.slane %v15428_v43, 5  ;;  %v6083_v59 = vrot.slane %v15430_v9, 5  ;;  %v15468_v49 = vld [vmem:[#allocation2 + $0x7c] sm:$0xf] }
 0x299   : > { %5508 = vst [vmem:[#allocation2 + $0x90] sm:$0xf] %v10289_v37  ;;  %5509 = vst [vmem:[#allocation2 + $0x94] sm:$0xf] %v10290_v15  ;;  %v5052_v63 = vmax.f32 %v5020_v46, 0.0  ;;  %v10948_v42 = vadd.f32 %v15324_v32, %v15316_v34  ;;  %v10326_v28 = vcombine.low %v15240_v56, %v15242_v61  ;;  %v5752_v20 = vshrl.u32 %v15314_v50, 16 }
 0x29a   : > { %v5750_v36 = vsel %vm12744_vm5, %v5745_v10, %v5749_v6  ;;  %v11780_v44 = vadd.f32 %v11779_v3, %v17342_v8  ;;  %v6081_v14 = vsel %vm13413_vm8, %v10313_v23, %v6080_v11  ;;  %v6082_v45 = vrot.slane %v6080_v11, 4  ;;  %v15466_v10 = vld [vmem:[#allocation2 + $0x78] sm:$0xf] }
 0x29b   : > { %v5071_v19 = vpack.c.bf16 %v5052_v63, %v5051_v7  ;;  %v10342_v41 = vcombine.low %v5740_v35, %v5750_v36  ;;  %v11787_v62 = vadd.f32 %v17343_v48, %v10948_v42  ;;  %v5754_v55 = vrot.slane %v5752_v20, 4  ;;  %v17345_v20 = vld [vmem:[#allocation52_spill] sm:$0xff] }
 0x29c   : > { %v4982_v34 = vmul.f32 %v15294_v0, %v11780_v44  ;;  %v6084_v56 = vsel %vm13413_vm8, %v6082_v45, %v6083_v59  ;;  %v5755_v61 = vshll.u32 %v15314_v50, 16  ;;  %v5761_v32 = vshll.u32 %v15322_v17, 16 }
 0x29d   : > { %v5112_v21 = vshrl.u32 %v5071_v19, 16  ;;  %v5188_v52 = vshll.u32 %v5071_v19, 16  ;;  %6591 = vmatprep.mubr.bf16.mxu0 %v10342_v41  ;;  %v10361_v58 = vcombine.low %v6081_v14, %v6084_v56  ;;  %v11788_v33 = vadd.f32 %v11787_v62, %v17344_v18 }
 0x29e   : > { %v5021_v7 = vadd.f32 %v15310_v4, %v4982_v34  ;;  %6592 = vmatmul.mubr.bf16.gmra.mrb[184].mxu0 %v10326_v28  ;;  %v5757_v26 = vrot.slane %v5755_v61, 5  ;;  %v5763_v5 = vrot.slane %v5761_v32, 5  ;;  %v5765_v6 = vshrl.u32 %v15322_v17, 16 }
 0x29f   : > { %v5187_v39 = vrot.slane %v5112_v21, 7  ;;  %v5247_v16 = vrot.slane %v5188_v52, 7  ;;  %11570 = vmatmul.mubr.bf16.gmra.mrb[112].mxu1 %v10361_v58  ;;  %v4983_v54 = vmul.f32 %v15294_v0, %v11788_v33  ;;  %v5771_v23 = vshll.u32 %v15331_v57, 16 }
 0x2a0   : > { %v5053_v37 = vmax.f32 %v5021_v7, 0.0  ;;  %v5758_v15 = vor.u32 %v5757_v26, %v5754_v55  ;;  %v5767_v46 = vrot.slane %v5765_v6, 4  ;;  %v10951_v35 = vadd.f32 %v15354_v53, %v15347_v31  ;;  %v15476_v53 = vld [vmem:[#allocation2 + $0x80] sm:$0x1]  ;;  %v17346_v55 = vld [vmem:[#allocation13_spill] sm:$0xff] }
 0x2a1   : > { %v5190_v3 = vor.u32 %v5188_v52, %v5187_v39  ;;  %v5295_v11 = vsel %vm12644_vm2, %v5187_v39, %v5247_v16  ;;  %v5022_v59 = vadd.f32 %v15310_v4, %v4983_v54  ;;  %v5773_v63 = vrot.slane %v5771_v23, 5  ;;  %v17347_v6 = vld [vmem:[#allocation17_spill] sm:$0xff] }
 0x2a2   : > { %v10294_v42 = vcombine.low %v5295_v11, %v5295_v11  ;;  %v5759_v28 = vrot.slane %v5758_v15, 4  ;;  %v5768_v57 = vor.u32 %v5767_v46, %v5763_v5  ;;  %v11799_v36 = vadd.f32 %v17345_v20, %v10951_v35  ;;  %v15505_v20 = vld [vmem:[#allocation2 + $0x84] sm:$0xf] }
 0x2a3   : > { %v5279_v8 = vsel %vm12644_vm2, %v5112_v21, %v5190_v3  ;;  %v5054_v31 = vmax.f32 %v5022_v59, 0.0  ;;  %v10314_v44 = vrot.slane %v15466_v10, 9  ;;  %v6087_v14 = vrot.slane %v15468_v49, 5 }
 0x2a4   : > { %v10292_v45 = vcombine.low %v5279_v8, %v5279_v8  ;;  %v10293_v19 = vcombine.high %v5279_v8, %v5279_v8  ;;  %5513 = vst [vmem:[#allocation2 + $0xa4] sm:$0x1] %v10294_v42  ;;  %v5764_v41 = vsel %vm12744_vm5, %v5759_v28, %v5763_v5  ;;  %v5769_v48 = vrot.slane %v5768_v57, 4 }
 0x2a5   : > { %v5072_v62 = vpack.c.bf16 %v5054_v31, %v5053_v37  ;;  %v11800_v34 = vadd.f32 %v11799_v36, %v17346_v55  ;;  %v6088_v56 = vsel %vm13413_vm8, %v10314_v44, %v6087_v14  ;;  %v6089_v61 = vrot.slane %v6087_v14, 4  ;;  %v15512_v44 = vld [vmem:[#allocation2 + $0x88] sm:$0xf]  ;;  %v15514_v14 = vld [vmem:[#allocation2 + $0x8c] sm:$0x1] }
 0x2a6   : > { %5511 = vst [vmem:[#allocation2 + $0x9c] sm:$0xf] %v10292_v45  ;;  %5512 = vst [vmem:[#allocation2 + $0xa0] sm:$0xf] %v10293_v19  ;;  %v5774_v32 = vsel %vm12744_vm5, %v5769_v48, %v5773_v63  ;;  %v6090_v21 = vrot.slane %v15476_v53, 5  ;;  %v10954_v52 = vadd.f32 %v15365_v51, %v15361_v30  ;;  %v10327_v58 = vcombine.low %v15314_v50, %v15322_v17 }
 0x2a7   : > { %v5115_v18 = vshrl.u32 %v5072_v62, 16  ;;  %v5192_v33 = vshll.u32 %v5072_v62, 16  ;;  %v10343_v7 = vcombine.low %v5764_v41, %v5774_v32  ;;  %v4984_v26 = vmul.f32 %v15294_v0, %v11800_v34  ;;  %v17348_v34 = vld [vmem:[#allocation60_spill] sm:$0xff] }
 0x2a8   : > { %v6091_v5 = vsel %vm13413_vm8, %v6089_v61, %v6090_v21  ;;  %v11807_v39 = vadd.f32 %v17347_v6, %v10954_v52  ;;  %v5776_v16 = vshrl.u32 %v15374_v1, 16  ;;  %v5779_v54 = vshll.u32 %v15374_v1, 16  ;;  %v17349_v52 = vld [vmem:[#allocation12_spill] sm:$0xff] }
 0x2a9   : > { %v5191_v23 = vrot.slane %v5115_v18, 7  ;;  %v5248_v37 = vrot.slane %v5192_v33, 7  ;;  %6599 = vmatprep.mubr.bf16.mxu0 %v10343_v7  ;;  %v5023_v30 = vadd.f32 %v15310_v4, %v4984_v26  ;;  %v10362_v50 = vcombine.low %v6088_v56, %v6091_v5 }
 0x2aa   : > { %v11808_v17 = vadd.f32 %v11807_v39, %v15043_v60  ;;  %6600 = vmatmul.mubr.bf16.gmra.mrb[188].mxu0 %v10327_v58  ;;  %v5778_v51 = vrot.slane %v5776_v16, 4  ;;  %v5781_v15 = vrot.slane %v5779_v54, 5  ;;  %v5785_v46 = vshll.u32 %v15380_v47, 16  ;;  %v17350_v54 = vld [vmem:[#allocation53_spill] sm:$0xff] }
 0x2ab   : > { %v5194_v35 = vor.u32 %v5192_v33, %v5191_v23  ;;  %v5296_v3 = vsel %vm12644_vm2, %v5191_v23, %v5248_v37  ;;  %v5055_v11 = vmax.f32 %v5023_v30, 0.0  ;;  %11573 = vmatprep.mubr.bf16.mxu1 %v10362_v50  ;;  %v5789_v59 = vshrl.u32 %v15380_v47, 16 }
 0x2ac   : > { %v10297_v63 = vcombine.low %v5296_v3, %v5296_v3  ;;  %v4985_v42 = vmul.f32 %v15294_v0, %v11808_v17  ;;  %v5782_v28 = vor.u32 %v5781_v15, %v5778_v51  ;;  %v5787_v57 = vrot.slane %v5785_v46, 5 }
 0x2ad   : > { %v5280_v60 = vsel %vm12644_vm2, %v5115_v18, %v5194_v35  ;;  %v5791_v36 = vrot.slane %v5789_v59, 4  ;;  %v5795_v8 = vshll.u32 %v15382_v27, 16  ;;  %v10957_v31 = vadd.f32 %v15389_v22, %v15384_v13 }
 0x2ae   : > { %v10295_v45 = vcombine.low %v5280_v60, %v5280_v60  ;;  %v10296_v19 = vcombine.high %v5280_v60, %v5280_v60  ;;  %5516 = vst [vmem:[#allocation2 + $0xb0] sm:$0x1] %v10297_v63  ;;  %v5024_v41 = vadd.f32 %v15310_v4, %v4985_v42  ;;  %v5783_v48 = vrot.slane %v5782_v28, 4 }
 0x2af   : > { %v5792_v62 = vor.u32 %v5791_v36, %v5787_v57  ;;  %v5797_v55 = vrot.slane %v5795_v8, 5  ;;  %v11795_v56 = vadd.f32 %v17348_v34, %v10957_v31  ;;  %v10315_v61 = vrot.slane %v15505_v20, 9 }
 0x2b0   : > { %5514 = vst [vmem:[#allocation2 + $0xa8] sm:$0xf] %v10295_v45  ;;  %5515 = vst [vmem:[#allocation2 + $0xac] sm:$0xf] %v10296_v19  ;;  %v5056_v27 = vmax.f32 %v5024_v41, 0.0  ;;  %v5788_v13 = vsel %vm12744_vm5, %v5783_v48, %v5787_v57  ;;  %v6094_v22 = vrot.slane %v15512_v44, 5  ;;  %v10960_v18 = vadd.f32 %v15399_v25, %v15392_v2 }
 0x2b1   : > { %v6097_v32 = vrot.slane %v15514_v14, 5  ;;  %v5793_v21 = vrot.slane %v5792_v62, 4  ;;  %v11796_v58 = vadd.f32 %v11795_v56, %v17349_v52  ;;  %v10328_v33 = vcombine.low %v15374_v1, %v15380_v47  ;;  %v15546_v57 = vld [vmem:[#allocation2 + $0x94] sm:$0xf]  ;;  %v15551_v48 = vld [vmem:[#allocation2 + $0x98] sm:$0x1] }
 0x2b2   : > { %v5073_v7 = vpack.c.bf16 %v5056_v27, %v5055_v11  ;;  %v6095_v26 = vsel %vm13413_vm8, %v10315_v61, %v6094_v22  ;;  %v6096_v5 = vrot.slane %v6094_v22, 4  ;;  %v5800_v6 = vshrl.u32 %v15423_v29, 16  ;;  %v15541_v11 = vld [vmem:[#allocation2 + $0x90] sm:$0xf] }
 0x2b3   : > { %v5798_v39 = vsel %vm12744_vm5, %v5793_v21, %v5797_v55  ;;  %v4986_v16 = vmul.f32 %v15294_v0, %v11796_v58  ;;  %v11803_v23 = vadd.f32 %v17350_v54, %v10960_v18  ;;  %v5803_v37 = vshll.u32 %v15423_v29, 16 }
 0x2b4   : > { %v5118_v2 = vshrl.u32 %v5073_v7, 16  ;;  %v5196_v25 = vshll.u32 %v5073_v7, 16  ;;  %v10344_v30 = vcombine.low %v5788_v13, %v5798_v39  ;;  %v6098_v1 = vsel %vm13413_vm8, %v6096_v5, %v6097_v32 }
 0x2b5   : > { %v5025_v47 = vadd.f32 %v15310_v4, %v4986_v16  ;;  %v10363_v50 = vcombine.low %v6095_v26, %v6098_v1  ;;  %v11804_v17 = vadd.f32 %v11803_v23, %v15037_v24  ;;  %v5802_v51 = vrot.slane %v5800_v6, 4  ;;  %v15572_v23 = vld [vmem:[#allocation2 + $0x9c] sm:$0xf] }
 0x2b6   : > { %v5195_v15 = vrot.slane %v5118_v2, 7  ;;  %v5249_v46 = vrot.slane %v5196_v25, 7  ;;  %6607 = vmatprep.mubr.bf16.mxu0 %v10344_v30  ;;  %v5805_v35 = vrot.slane %v5803_v37, 5  ;;  %v5809_v3 = vshll.u32 %v15428_v43, 16  ;;  %v15576_v30 = vld [vmem:[#allocation2 + $0xa4] sm:$0x1] }
 0x2b7   : > { %v5057_v59 = vmax.f32 %v5025_v47, 0.0  ;;  %11574 = vmatmul.mubr.bf16.gmra.mrb[116].mxu1 %v10363_v50  ;;  %v4987_v63 = vmul.f32 %v15294_v0, %v11804_v17  ;;  %6608 = vmatmul.mubr.bf16.gmra.mrb[192].mxu0 %v10328_v33  ;;  %v5813_v42 = vshrl.u32 %v15428_v43, 16  ;;  %v5819_v28 = vshll.u32 %v15430_v9, 16 }
 0x2b8   : > { %v5198_v24 = vor.u32 %v5196_v25, %v5195_v15  ;;  %v5297_v60 = vsel %vm12644_vm2, %v5195_v15, %v5249_v46  ;;  %v5806_v36 = vor.u32 %v5805_v35, %v5802_v51  ;;  %v5811_v8 = vrot.slane %v5809_v3, 5 }
 0x2b9   : > { %v10300_v31 = vcombine.low %v5297_v60, %v5297_v60  ;;  %v5026_v45 = vadd.f32 %v15310_v4, %v4987_v63  ;;  %v5815_v19 = vrot.slane %v5813_v42, 4  ;;  %v5821_v41 = vrot.slane %v5819_v28, 5 }
 0x2ba   : > { %v5281_v0 = vsel %vm12644_vm2, %v5118_v2, %v5198_v24  ;;  %v5807_v62 = vrot.slane %v5806_v36, 4  ;;  %v10316_v9 = vrot.slane %v15541_v11, 9  ;;  %v6101_v55 = vrot.slane %v15546_v57, 5 }
 0x2bb   : > { %v10298_v34 = vcombine.low %v5281_v0, %v5281_v0  ;;  %v10299_v56 = vcombine.high %v5281_v0, %v5281_v0  ;;  %5519 = vst [vmem:[#allocation2 + $0xbc] sm:$0x1] %v10300_v31  ;;  %v5058_v61 = vmax.f32 %v5026_v45, 0.0  ;;  %v5816_v27 = vor.u32 %v5815_v19, %v5811_v8 }
 0x2bc   : > { %v5812_v4 = vsel %vm12744_vm5, %v5807_v62, %v5811_v8  ;;  %v6102_v13 = vsel %vm13413_vm8, %v10316_v9, %v6101_v55  ;;  %v6103_v22 = vrot.slane %v6101_v55, 4  ;;  %v6104_v32 = vrot.slane %v15551_v48, 5  ;;  %v15593_v62 = vld [vmem:[#allocation2 + $0xa8] sm:$0xf]  ;;  %v15595_v9 = vld [vmem:[#allocation2 + $0xac] sm:$0xf] }
 0x2bd   : > { %5517 = vst [vmem:[#allocation2 + $0xb4] sm:$0xf] %v10298_v34  ;;  %5518 = vst [vmem:[#allocation2 + $0xb8] sm:$0xf] %v10299_v56  ;;  %v5074_v21 = vpack.c.bf16 %v5058_v61, %v5057_v59  ;;  %v5817_v52 = vrot.slane %v5816_v27, 4  ;;  %v10329_v58 = vcombine.low %v15423_v29, %v15428_v43  ;;  %v5824_v18 = vshrl.u32 %v15466_v10, 16 }
 0x2be   : > { %v6105_v33 = vsel %vm13413_vm8, %v6103_v22, %v6104_v32  ;;  %v5827_v7 = vshll.u32 %v15466_v10, 16  ;;  %v5833_v26 = vshll.u32 %v15468_v49, 16  ;;  %v5837_v5 = vshrl.u32 %v15468_v49, 16  ;;  %v15574_v29 = vld [vmem:[#allocation2 + $0xa0] sm:$0xf] }
 0x2bf   : > { %v5121_v6 = vshrl.u32 %v5074_v21, 16  ;;  %v5200_v39 = vshll.u32 %v5074_v21, 16  ;;  %v5822_v16 = vsel %vm12744_vm5, %v5817_v52, %v5821_v41  ;;  %v10364_v54 = vcombine.low %v6102_v13, %v6105_v33  ;;  %v15600_v61 = vld [vmem:[#allocation2 + $0xb0] sm:$0x1] }
 0x2c0   : > { %v10345_v43 = vcombine.low %v5812_v4, %v5822_v16  ;;  %v5826_v37 = vrot.slane %v5824_v18, 4  ;;  %v5829_v2 = vrot.slane %v5827_v7, 5  ;;  %v5835_v25 = vrot.slane %v5833_v26, 5 }
 0x2c1   : > { %v5199_v1 = vrot.slane %v5121_v6, 7  ;;  %v5250_v47 = vrot.slane %v5200_v39, 7  ;;  %11577 = vmatprep.mubr.bf16.mxu1 %v10364_v54  ;;  %v5839_v50 = vrot.slane %v5837_v5, 4  ;;  %v5843_v17 = vshll.u32 %v15476_v53, 16 }
 0x2c2   : > { %6615 = vmatprep.mubr.bf16.mxu0 %v10345_v43  ;;  %v5830_v51 = vor.u32 %v5829_v2, %v5826_v37  ;;  %v10317_v15 = vrot.slane %v15572_v23, 9  ;;  %v6108_v46 = vrot.slane %v15574_v29, 5  ;;  %v6111_v63 = vrot.slane %v15576_v30, 5  ;;  %v15618_v37 = vld [vmem:[#allocation2 + $0xc] sm:$0xf] }
 0x2c3   : > { %v5202_v35 = vor.u32 %v5200_v39, %v5199_v1  ;;  %v5298_v3 = vsel %vm12644_vm2, %v5199_v1, %v5250_v47  ;;  %6616 = vmatmul.mubr.bf16.gmra.mrb[196].mxu0 %v10329_v58  ;;  %v5840_v59 = vor.u32 %v5839_v50, %v5835_v25  ;;  %v5845_v24 = vrot.slane %v5843_v17, 5 }
 0x2c4   : > { %v10303_v42 = vcombine.low %v5298_v3, %v5298_v3  ;;  %v5831_v28 = vrot.slane %v5830_v51, 4  ;;  %v6110_v60 = vrot.slane %v6108_v46, 4  ;;  %v6109_v8 = vsel %vm13413_vm8, %v10317_v15, %v6108_v46  ;;  %v15616_v43 = vld [vmem:[#allocation2 + $0xb4] sm:$0xf]  ;;  %v15623_v50 = vld [vmem:[#allocation2 + $0xb8] sm:$0xf] }
 0x2c5   : > { %v5282_v53 = vsel %vm12644_vm2, %v5121_v6, %v5202_v35  ;;  %v5841_v36 = vrot.slane %v5840_v59, 4  ;;  %v5848_v31 = vshrl.u32 %v15505_v20, 16  ;;  %v5851_v56 = vshll.u32 %v15505_v20, 16  ;;  %v15625_v35 = vld [vmem:[#allocation2 + $0x10] sm:$0xf] }
 0x2c6   : > { %v10301_v45 = vcombine.low %v5282_v53, %v5282_v53  ;;  %v10302_v19 = vcombine.high %v5282_v53, %v5282_v53  ;;  %5522 = vst [vmem:[#allocation2 + $0xc8] sm:$0x1] %v10303_v42  ;;  %v5836_v41 = vsel %vm12744_vm5, %v5831_v28, %v5835_v25  ;;  %v6112_v0 = vsel %vm13413_vm8, %v6110_v60, %v6111_v63  ;;  %v15631_v42 = vld [vmem:[#allocation2 + $0xbc] sm:$0x1] }
 0x2c7   : > { %v5846_v40 = vsel %vm12744_vm5, %v5841_v36, %v5845_v24  ;;  %v10365_v55 = vcombine.low %v6109_v8, %v6112_v0  ;;  %v5850_v34 = vrot.slane %v5848_v31, 4  ;;  %v5857_v4 = vshll.u32 %v15512_v44, 16  ;;  %v15637_v36 = vld [vmem:[#allocation2 + $0x14] sm:$0x1] }
 0x2c8   : > { %5520 = vst [vmem:[#allocation2 + $0xc0] sm:$0xf] %v10301_v45  ;;  %5521 = vst [vmem:[#allocation2 + $0xc4] sm:$0xf] %v10302_v19  ;;  %v10346_v27 = vcombine.low %v5836_v41, %v5846_v40  ;;  %v5861_v13 = vshrl.u32 %v15512_v44, 16  ;;  %v5867_v22 = vshll.u32 %v15514_v14, 16  ;;  %v10330_v32 = vcombine.low %v15466_v10, %v15468_v49 }
 0x2c9   : > { %11578 = vmatmul.mubr.bf16.gmra.mrb[120].mxu1 %v10365_v55  ;;  %v5853_v21 = vrot.slane %v5851_v56, 5  ;;  %v10318_v52 = vrot.slane %v15593_v62, 9  ;;  %v6115_v58 = vrot.slane %v15595_v9, 5  ;;  %v5859_v18 = vrot.slane %v5857_v4, 5 }
 0x2ca   : > { %6623 = vmatprep.mubr.bf16.mxu0 %v10346_v27  ;;  %v5863_v33 = vrot.slane %v5861_v13, 4  ;;  %v5869_v7 = vrot.slane %v5867_v22, 5  ;;  %v6118_v26 = vrot.slane %v15600_v61, 5  ;;  %v5872_v39 = vshrl.u32 %v15541_v11, 16 }
 0x2cb   : > { %6624 = vmatmul.mubr.bf16.gmra.mrb[200].mxu0 %v10330_v32  ;;  %v5854_v5 = vor.u32 %v5853_v21, %v5850_v34  ;;  %v6116_v14 = vsel %vm13413_vm8, %v10318_v52, %v6115_v58  ;;  %v6117_v6 = vrot.slane %v6115_v58, 4  ;;  %v5875_v49 = vshll.u32 %v15541_v11, 16  ;;  %v15653_v32 = vld [vmem:[#allocation2 + $0x18] sm:$0xf] }
 0x2cc   : > { %v5864_v10 = vor.u32 %v5863_v33, %v5859_v18  ;;  %v5881_v16 = vshll.u32 %v15546_v57, 16  ;;  %v5885_v54 = vshrl.u32 %v15546_v57, 16  ;;  %v5874_v1 = vrot.slane %v5872_v39, 4  ;;  %v15660_v33 = vld [vmem:[#allocation2 + $0x1c] sm:$0xf] }
 0x2cd   : > { %v5855_v2 = vrot.slane %v5854_v5, 4  ;;  %v6119_v25 = vsel %vm13413_vm8, %v6117_v6, %v6118_v26  ;;  %v5891_v47 = vshll.u32 %v15551_v48, 16  ;;  %v5877_v15 = vrot.slane %v5875_v49, 5  ;;  %v15664_v39 = vld [vmem:[#allocation2 + $0x20] sm:$0x1] }
 0x2ce   : > { %v5865_v17 = vrot.slane %v5864_v10, 4  ;;  %v10366_v51 = vcombine.low %v6116_v14, %v6119_v25  ;;  %v5883_v46 = vrot.slane %v5881_v16, 5  ;;  %v10331_v59 = vcombine.low %v15505_v20, %v15512_v44  ;;  %v15666_v10 = vld [vmem:[#allocation2 + $0x28] sm:$0xf]  ;;  %v15671_v25 = vld [vmem:[#allocation2 + $0x2c] sm:$0x1] }
 0x2cf   : > { %v5860_v3 = vsel %vm12744_vm5, %v5855_v2, %v5859_v18  ;;  %v5887_v63 = vrot.slane %v5885_v54, 4  ;;  %v10319_v28 = vrot.slane %v15616_v43, 9  ;;  %v5878_v24 = vor.u32 %v5877_v15, %v5874_v1 }
 0x2d0   : > { %v5870_v48 = vsel %vm12744_vm5, %v5865_v17, %v5869_v7  ;;  %11581 = vmatprep.mubr.bf16.mxu1 %v10366_v51  ;;  %v5893_v60 = vrot.slane %v5891_v47, 5  ;;  %v6122_v53 = vrot.slane %v15623_v50, 5  ;;  %v10392_v45 = vrot.slane %v15618_v37, 9  ;;  %v15662_v7 = vld [vmem:[#allocation2 + $0x24] sm:$0xf] }
 0x2d1   : > { %v10347_v8 = vcombine.low %v5860_v3, %v5870_v48  ;;  %v5888_v31 = vor.u32 %v5887_v63, %v5883_v46  ;;  %v7347_v20 = vrot.slane %v15625_v35, 5  ;;  %v5879_v44 = vrot.slane %v5878_v24, 4 }
 0x2d2   : > { %v6123_v19 = vsel %vm13413_vm8, %v10319_v28, %v6122_v53  ;;  %v6124_v41 = vrot.slane %v6122_v53, 4  ;;  %v6125_v0 = vrot.slane %v15631_v42, 5  ;;  %v7350_v56 = vrot.slane %v15637_v36, 5 }
 0x2d3   : > { %6631 = vmatprep.mubr.bf16.mxu0 %v10347_v8  ;;  %v5889_v40 = vrot.slane %v5888_v31, 4  ;;  %v7348_v55 = vsel %vm13413_vm8, %v10392_v45, %v7347_v20  ;;  %v7349_v34 = vrot.slane %v7347_v20, 4  ;;  %v5884_v27 = vsel %vm12744_vm5, %v5879_v44, %v5883_v46  ;;  %v15694_v44 = vld [vmem:[#allocation2 + $0x30] sm:$0xf] }
 0x2d4   : > { %6632 = vmatmul.mubr.bf16.gmra.mrb[204].mxu0 %v10331_v59  ;;  %v6126_v4 = vsel %vm13413_vm8, %v6124_v41, %v6125_v0  ;;  %v5896_v13 = vshrl.u32 %v15572_v23, 16  ;;  %v5899_v22 = vshll.u32 %v15572_v23, 16  ;;  %v5905_v18 = vshll.u32 %v15574_v29, 16 }
 0x2d5   : > { %v5894_v21 = vsel %vm12744_vm5, %v5889_v40, %v5893_v60  ;;  %v10367_v52 = vcombine.low %v6123_v19, %v6126_v4  ;;  %v7351_v58 = vsel %vm13413_vm8, %v7349_v34, %v7350_v56  ;;  %v5909_v16 = vshrl.u32 %v15574_v29, 16  ;;  %v15696_v19 = vld [vmem:[#allocation2 + $0x34] sm:$0xf]  ;;  %v12216_v34 = vld [vmem:[%s17124_s4 + $0x1c8] sm:$0xff]   ;;  %v15703_v56 = vld [vmem:[#allocation2 + $0x38] sm:$0x1] }
 0x2d6   : > { %v10348_v26 = vcombine.low %v5884_v27, %v5894_v21  ;;  %v10440_v5 = vcombine.low %v7348_v55, %v7351_v58  ;;  %v5898_v14 = vrot.slane %v5896_v13, 4  ;;  %v5901_v6 = vrot.slane %v5899_v22, 5  ;;  %v15706_v21 = vld [vmem:[#allocation2 + $0x3c] sm:$0xf] }
 0x2d7   : > { %11582 = vmatmul.mubr.bf16.gmra.mrb[124].mxu1 %v10367_v52  ;;  %v5907_v49 = vrot.slane %v5905_v18, 5  ;;  %v5915_v54 = vshll.u32 %v15576_v30, 16  ;;  %v10393_v2 = vrot.slane %v15653_v32, 9  ;;  %v10332_v1 = vcombine.low %v15541_v11, %v15546_v57  ;;  %v12210_v11 = vld [vmem:[%s17124_s4 + $0x180] sm:$0xff]  }
 0x2d8   : > { %6639 = vmatprep.mubr.bf16.mxu0 %v10348_v26  ;;  %11601 = vmatprep.mubr.bf16.mxu1 %v10440_v5  ;;  %v5902_v47 = vor.u32 %v5901_v6, %v5898_v14  ;;  %v7354_v17 = vrot.slane %v15660_v33, 5  ;;  %v10394_v51 = vrot.slane %v15662_v7, 9  ;;  %v5911_v15 = vrot.slane %v5909_v16, 4  ;;  %v15713_v5 = vld [vmem:[#allocation2 + $0x40] sm:$0xf] }
 0x2d9   : > { %v5917_v46 = vrot.slane %v5915_v54, 5  ;;  %v7357_v3 = vrot.slane %v15664_v39, 5  ;;  %v7361_v30 = vrot.slane %v15666_v10, 5  ;;  %v7364_v48 = vrot.slane %v15671_v25, 5  ;;  %v12217_v54 = vld [vmem:[%s17124_s4 + $0x188] sm:$0xff]  }
 0x2da   : > { %v5903_v59 = vrot.slane %v5902_v47, 4  ;;  %v7355_v63 = vsel %vm13413_vm8, %v10393_v2, %v7354_v17  ;;  %v7356_v28 = vrot.slane %v7354_v17, 4  ;;  %v5912_v24 = vor.u32 %v5911_v15, %v5907_v49  ;;  %v15720_v2 = vld [vmem:[#allocation2 + $0x44] sm:$0x1] }
 0x2db   : > { %v7362_v57 = vsel %vm13413_vm8, %v10394_v51, %v7361_v30  ;;  %v7363_v60 = vrot.slane %v7361_v30, 4  ;;  %v5920_v53 = vshrl.u32 %v15593_v62, 16  ;;  %v5923_v45 = vshll.u32 %v15593_v62, 16  ;;  %v12223_v51 = vld [vmem:[%s17124_s4 + $0x1d0] sm:$0xff]  }
 0x2dc   : > { %6640 = vmatmul.mubr.bf16.gmra.mrb[208].mxu0 %v10332_v1  ;;  %v5908_v8 = vsel %vm12744_vm5, %v5903_v59, %v5907_v49  ;;  %v7358_v31 = vsel %vm13413_vm8, %v7356_v28, %v7357_v3  ;;  %v5929_v20 = vshll.u32 %v15595_v9, 16  ;;  %v5913_v41 = vrot.slane %v5912_v24, 4  ;;  %v15735_v28 = vld [vmem:[#allocation2 + $0x48] sm:$0xf] }
 0x2dd   : > { %v10441_v0 = vcombine.low %v7355_v63, %v7358_v31  ;;  %v7365_v40 = vsel %vm13413_vm8, %v7363_v60, %v7364_v48  ;;  %v5922_v55 = vrot.slane %v5920_v53, 4  ;;  %v5925_v4 = vrot.slane %v5923_v45, 5  ;;  %v15741_v60 = vld [vmem:[#allocation2 + $0x4c] sm:$0xf]  ;;  %v12224_v53 = vld [vmem:[%s17124_s4 + $0x190] sm:$0xff]  }
 0x2de   : > { %v10442_v27 = vcombine.low %v7362_v57, %v7365_v40  ;;  %v5931_v13 = vrot.slane %v5929_v20, 5  ;;  %v5933_v22 = vshrl.u32 %v15595_v9, 16  ;;  %v5918_v52 = vsel %vm12744_vm5, %v5913_v41, %v5917_v46 }
 0x2df   : > { %11602 = vmatmul.mubr.bf16.vlgmr.msra.gmra.mrb[96].mxu1 %v10441_v0  ;;  %v5939_v58 = vshll.u32 %v15600_v61, 16  ;;  %v10395_v18 = vrot.slane %v15694_v44, 9  ;;  %v7368_v26 = vrot.slane %v15696_v19, 5  ;;  %v10349_v14 = vcombine.low %v5908_v8, %v5918_v52  ;;  %v15746_v8 = vld [vmem:[#allocation2 + $0x54] sm:$0xf]  ;;  %v12230_v0 = vld [vmem:[%s17124_s4 + $0x1d8] sm:$0xff]  }
 0x2e0   : > { %11258 = vmatpush3.bf16.msra.mxu1 %v12210_v11  ;;  %11605 = vmatprep.mubr.bf16.mxu1 %v10442_v27  ;;  %v10333_v6 = vcombine.low %v15572_v23, %v15574_v29  ;;  %v5926_v49 = vor.u32 %v5925_v4, %v5922_v55  ;;  %v5935_v16 = vrot.slane %v5933_v22, 4  ;;  %v7371_v47 = vrot.slane %v15703_v56, 5  ;;  %v15757_v4 = vld [vmem:[#allocation2 + $0x58] sm:$0xf] }
 0x2e1   : > { %v5941_v61 = vrot.slane %v5939_v58, 5  ;;  %11259 = vmatprep.subr.bf16.mxu1 %v12216_v34  ;;  %v7370_v1 = vrot.slane %v7368_v26, 4  ;;  %v10396_v17 = vrot.slane %v15706_v21, 9  ;;  %6647 = vmatprep.mubr.bf16.mxu0 %v10349_v14  ;;  %v7369_v15 = vsel %vm13413_vm8, %v10395_v18, %v7368_v26  ;;  %v15761_v18 = vld [vmem:[#allocation2 + $0x50] sm:$0x1] }
 0x2e2   : > { %v5927_v23 = vrot.slane %v5926_v49, 4  ;;  %v5936_v29 = vor.u32 %v5935_v16, %v5931_v13  ;;  %v7375_v46 = vrot.slane %v15713_v5, 5  ;;  %v7378_v30 = vrot.slane %v15720_v2, 5  ;;  %v15766_v49 = vld [vmem:[#allocation2 + $0x5c] sm:$0x1] }
 0x2e3   : > { %v7372_v3 = vsel %vm13413_vm8, %v7370_v1, %v7371_v47  ;;  %v5944_v59 = vshrl.u32 %v15616_v43, 16  ;;  %v5947_v63 = vshll.u32 %v15616_v43, 16  ;;  %v5953_v41 = vshll.u32 %v15623_v50, 16  ;;  %v12231_v16 = vld [vmem:[%s17124_s4 + $0x198] sm:$0xff]  }
 0x2e4   : > { %6648 = vmatmul.mubr.bf16.gmra.mrb[212].mxu0 %v10333_v6  ;;  %v5932_v48 = vsel %vm12744_vm5, %v5927_v23, %v5931_v13  ;;  %v5937_v24 = vrot.slane %v5936_v29, 4  ;;  %v10443_v11 = vcombine.low %v7369_v15, %v7372_v3  ;;  %11260 = vmatpush3.bf16.msra.mxu1 %v12217_v54  ;;  %v7376_v57 = vsel %vm13413_vm8, %v10396_v17, %v7375_v46 }
 0x2e5   : > { %v7377_v31 = vrot.slane %v7375_v46, 4  ;;  %v5946_v45 = vrot.slane %v5944_v59, 4  ;;  %v5949_v20 = vrot.slane %v5947_v63, 5  ;;  %11261 = vmatprep.subr.bf16.mxu1 %v12223_v51  ;;  %v5957_v55 = vshrl.u32 %v15623_v50, 16 }
 0x2e6   : > { %v5942_v40 = vsel %vm12744_vm5, %v5937_v24, %v5941_v61  ;;  %v5963_v34 = vshll.u32 %v15631_v42, 16  ;;  %v10397_v27 = vrot.slane %v15735_v28, 9  ;;  %v5955_v58 = vrot.slane %v5953_v41, 5  ;;  %v15788_v24 = vld [vmem:[#allocation2 + $0x60] sm:$0xf]  ;;  %v12241_v41 = vld [vmem:[%s17124_s4 + $0x1e8] sm:$0xff]  }
 0x2e7   : > { %v10350_v13 = vcombine.low %v5932_v48, %v5942_v40  ;;  %11606 = vmatmul.mubr.bf16.gmra.mrb[100].mxu1 %v10443_v11  ;;  %v7379_v22 = vsel %vm13413_vm8, %v7377_v31, %v7378_v30  ;;  %v5950_v52 = vor.u32 %v5949_v20, %v5946_v45  ;;  %v10334_v14 = vcombine.low %v15593_v62, %v15595_v9  ;;  %v12236_v62 = vld [vmem:[%s17124_s4 + $0x1e0] sm:$0xff]  }
 0x2e8   : > { %v10444_v26 = vcombine.low %v7376_v57, %v7379_v22  ;;  %v5959_v6 = vrot.slane %v5957_v55, 4  ;;  %v7382_v42 = vrot.slane %v15741_v60, 5  ;;  %11262 = vmatpush3.bf16.msra.mxu1 %v12224_v53  ;;  %v5965_v61 = vrot.slane %v5963_v34, 5  ;;  %v12238_v11 = vld [vmem:[%s17124_s4 + $0x1a0] sm:$0xff]  }
 0x2e9   : > { %6655 = vmatprep.mubr.bf16.mxu0 %v10350_v13  ;;  %v5951_v54 = vrot.slane %v5950_v52, 4  ;;  %v10398_v1 = vrot.slane %v15746_v8, 9  ;;  %v7389_v47 = vrot.slane %v15757_v4, 5  ;;  %11263 = vmatprep.subr.bf16.mxu1 %v12230_v0  ;;  %v7385_v23 = vrot.slane %v15761_v18, 5  ;;  %v15797_v20 = vld [vmem:[#allocation2 + $0x64] sm:$0xf] }
 0x2ea   : > { %11609 = vmatprep.mubr.bf16.mxu1 %v10444_v26  ;;  %v5960_v9 = vor.u32 %v5959_v6, %v5955_v58  ;;  %v7383_v17 = vsel %vm13413_vm8, %v10397_v27, %v7382_v42  ;;  %v7384_v51 = vrot.slane %v7382_v42, 4  ;;  %v7392_v3 = vrot.slane %v15766_v49, 5  ;;  %v15804_v27 = vld [vmem:[#allocation2 + $0x6c] sm:$0xf]  ;;  %v15806_v13 = vld [vmem:[#allocation2 + $0x70] sm:$0xf] }
 0x2eb   : > { %v5956_v29 = vsel %vm12744_vm5, %v5951_v54, %v5955_v58  ;;  %v7390_v15 = vsel %vm13413_vm8, %v10398_v1, %v7389_v47  ;;  %v7391_v46 = vrot.slane %v7389_v47, 4  ;;  %v6914_v63 = vshrl.u32 %v15618_v37, 16  ;;  %v15813_v54 = vld [vmem:[#allocation2 + $0x74] sm:$0x1] }
 0x2ec   : > { %6656 = vmatmul.mubr.bf16.gmra.mrb[216].mxu0 %v10334_v14  ;;  %v5961_v30 = vrot.slane %v5960_v9, 4  ;;  %v7386_v59 = vsel %vm13413_vm8, %v7384_v51, %v7385_v23  ;;  %v6917_v48 = vshll.u32 %v15618_v37, 16  ;;  %11264 = vmatpush3.bf16.msra.mxu1 %v12231_v16  ;;  %v6923_v31 = vshll.u32 %v15625_v35, 16  ;;  %v15809_v14 = vld [vmem:[#allocation2 + $0x68] sm:$0x1]  ;;  %v12246_v9 = vld [vmem:[%s17124_s4 + $0x1f0] sm:$0xff]  }
 0x2ed   : > { %v10445_v57 = vcombine.low %v7383_v17, %v7386_v59  ;;  %v7393_v53 = vsel %vm13413_vm8, %v7391_v46, %v7392_v3  ;;  %v6927_v45 = vshrl.u32 %v15625_v35, 16  ;;  %11265 = vmatprep.subr.bf16.mxu1 %v12236_v62  ;;  %v6916_v55 = vrot.slane %v6914_v63, 4 }
 0x2ee   : > { %v5966_v0 = vsel %vm12744_vm5, %v5961_v30, %v5965_v61  ;;  %v10446_v40 = vcombine.low %v7390_v15, %v7393_v53  ;;  %v6919_v34 = vrot.slane %v6917_v48, 5  ;;  %v6925_v52 = vrot.slane %v6923_v31, 5  ;;  %v12243_v61 = vld [vmem:[%s17124_s4 + $0x1a8] sm:$0xff]   ;;  %v15836_v48 = vld [vmem:[#allocation2 + $0x78] sm:$0xf] }
 0x2ef   : > { %v10351_v22 = vcombine.low %v5956_v29, %v5966_v0  ;;  %11610 = vmatmul.mubr.bf16.gmra.mrb[104].mxu1 %v10445_v57  ;;  %v6929_v58 = vrot.slane %v6927_v45, 4  ;;  %v6933_v26 = vshll.u32 %v15637_v36, 16  ;;  %v10399_v42 = vrot.slane %v15788_v24, 9  ;;  %v15843_v45 = vld [vmem:[#allocation2 + $0x7c] sm:$0xf]  ;;  %v12248_v0 = vld [vmem:[%s17124_s4 + $0x1b0] sm:$0xff]  }
 0x2f0   : > { %11613 = vmatprep.mubr.bf16.mxu1 %v10446_v40  ;;  %v6920_v6 = vor.u32 %v6919_v34, %v6916_v55  ;;  %v7396_v16 = vrot.slane %v15797_v20, 5  ;;  %11266 = vmatpush3.bf16.msra.mxu1 %v12238_v11  ;;  %v10335_v1 = vcombine.low %v15616_v43, %v15623_v50  ;;  %v10400_v47 = vrot.slane %v15804_v27, 9 }
 0x2f1   : > { %6663 = vmatprep.mubr.bf16.mxu0 %v10351_v22  ;;  %v6930_v36 = vor.u32 %v6929_v58, %v6925_v52  ;;  %v7403_v62 = vrot.slane %v15806_v13, 5  ;;  %11267 = vmatprep.subr.bf16.mxu1 %v12241_v41  ;;  %v6935_v51 = vrot.slane %v6933_v26, 5  ;;  %v7399_v29 = vrot.slane %v15809_v14, 5  ;;  %v15845_v41 = vld [vmem:[#allocation2 + $0x80] sm:$0x1]  ;;  %v12251_v58 = vld [vmem:[%s17124_s4 + $0x1f8] sm:$0xff]  }
 0x2f2   : > { %v6921_v17 = vrot.slane %v6920_v6, 4  ;;  %v7398_v23 = vrot.slane %v7396_v16, 4  ;;  %v7397_v46 = vsel %vm13413_vm8, %v10399_v42, %v7396_v16  ;;  %v7406_v50 = vrot.slane %v15813_v54, 5 }
 0x2f3   : > { %v6931_v15 = vrot.slane %v6930_v36, 4  ;;  %v7405_v43 = vrot.slane %v7403_v62, 4  ;;  %v7404_v59 = vsel %vm13413_vm8, %v10400_v47, %v7403_v62  ;;  %v6938_v63 = vshrl.u32 %v15653_v32, 16 }
 0x2f4   : > { %6664 = vmatmul.mubr.bf16.gmra.mrb[220].mxu0 %v10335_v1  ;;  %v6926_v3 = vsel %vm12744_vm5, %v6921_v17, %v6925_v52  ;;  %v7400_v30 = vsel %vm13413_vm8, %v7398_v23, %v7399_v29  ;;  %11268 = vmatpush3.bf16.msra.mxu1 %v12243_v61  ;;  %v6941_v31 = vshll.u32 %v15653_v32, 16  ;;  %v6947_v22 = vshll.u32 %v15660_v33, 16  ;;  %v15851_v52 = vld [vmem:[#allocation2 + $0x84] sm:$0xf]  ;;  %v15859_v61 = vld [vmem:[#allocation2 + $0x88] sm:$0xf] }
 0x2f5   : > { %v6936_v11 = vsel %vm12744_vm5, %v6931_v15, %v6935_v51  ;;  %v10447_v57 = vcombine.low %v7397_v46, %v7400_v30  ;;  %v7407_v53 = vsel %vm13413_vm8, %v7405_v43, %v7406_v50  ;;  %11269 = vmatprep.subr.bf16.mxu1 %v12246_v9  ;;  %v6940_v34 = vrot.slane %v6938_v63, 4  ;;  %v15866_v9 = vld [vmem:[#allocation2 + $0x8c] sm:$0x1]  ;;  %v12253_v29 = vld [vmem:[%s17124_s4 + $0x1b8] sm:$0xff]   ;;  %v15879_v43 = vld [vmem:[%s17124_s4 + $0x200] sm:$0xff]  }
 0x2f6   : > { %v10424_v40 = vcombine.low %v6926_v3, %v6936_v11  ;;  %v10448_v55 = vcombine.low %v7404_v59, %v7407_v53  ;;  %v6943_v26 = vrot.slane %v6941_v31, 5  ;;  %v6951_v6 = vshrl.u32 %v15660_v33, 16 }
 0x2f7   : > { %11614 = vmatmul.mubr.bf16.gmra.mrb[108].mxu1 %v10447_v57  ;;  %v6957_v42 = vshll.u32 %v15664_v39, 16  ;;  %v10401_v16 = vrot.slane %v15836_v48, 9  ;;  %v10416_v1 = vcombine.low %v15804_v27, %v15806_v13  ;;  %v10408_v36 = vcombine.low %v15618_v37, %v15625_v35 }
 0x2f8   : > { %7873 = vmatprep.mubr.bf16.mxu0 %v10424_v40  ;;  %11617 = vmatprep.mubr.bf16.mxu1 %v10448_v55  ;;  %v6949_v47 = vrot.slane %v6947_v22, 5  ;;  %v7410_v62 = vrot.slane %v15843_v45, 5  ;;  %v6944_v17 = vor.u32 %v6943_v26, %v6940_v34  ;;  %v6953_v51 = vrot.slane %v6951_v6, 4  ;;  %v15892_v34 = vld [vmem:[#allocation2 + $0x90] sm:$0xf] }
 0x2f9   : > { %v7413_v39 = vrot.slane %v15845_v41, 5  ;;  %v10402_v23 = vrot.slane %v15851_v52, 9  ;;  %11270 = vmatpush3.bf16.msra.mxu1 %v12248_v0  ;;  %v6959_v15 = vrot.slane %v6957_v42, 5  ;;  %v10417_v37 = vcombine.low %v15836_v48, %v15843_v45  ;;  %v15898_v42 = vld [vmem:[#allocation2 + $0x94] sm:$0xf] }
 0x2fa   : > { %v7412_v46 = vrot.slane %v7410_v62, 4  ;;  %v7417_v35 = vrot.slane %v15859_v61, 5  ;;  %11271 = vmatprep.subr.bf16.mxu1 %v12251_v58  ;;  %v6945_v50 = vrot.slane %v6944_v17, 4  ;;  %v6954_v3 = vor.u32 %v6953_v51, %v6949_v47  ;;  %v15904_v17 = vld [vmem:[#allocation2 + $0x9c] sm:$0xf] }
 0x2fb   : > { %v7411_v30 = vsel %vm13413_vm8, %v10401_v16, %v7410_v62  ;;  %v7420_v59 = vrot.slane %v15866_v9, 5  ;;  %v6962_v53 = vshrl.u32 %v15662_v7, 16  ;;  %v6965_v55 = vshll.u32 %v15662_v7, 16  ;;  %v15906_v51 = vld [vmem:[#allocation2 + $0xa0] sm:$0xf] }
 0x2fc   : > { %7874 = vmatmul.mubr.bf16.vlgmr.msra.gmra.mrb[224].mxu0 %v10408_v36  ;;  %v7414_v63 = vsel %vm13413_vm8, %v7412_v46, %v7413_v39  ;;  %v7418_v11 = vsel %vm13413_vm8, %v10402_v23, %v7417_v35  ;;  %v7419_v57 = vrot.slane %v7417_v35, 4  ;;  %v6950_v31 = vsel %vm12744_vm5, %v6945_v50, %v6949_v47  ;;  %v15908_v46 = vld [vmem:[#allocation2 + $0x98] sm:$0x1] }
 0x2fd   : > { %v6955_v0 = vrot.slane %v6954_v3, 4  ;;  %v10449_v40 = vcombine.low %v7411_v30, %v7414_v63  ;;  %11272 = vmatpush3.bf16.msra.mxu1 %v12253_v29  ;;  %v6964_v58 = vrot.slane %v6962_v53, 4  ;;  %v6971_v26 = vshll.u32 %v15666_v10, 16  ;;  %v15916_v30 = vld [vmem:[#allocation2 + $0xa4] sm:$0x1] }
 0x2fe   : > { %v7421_v22 = vsel %vm13413_vm8, %v7419_v57, %v7420_v59  ;;  %v6975_v6 = vshrl.u32 %v15666_v10, 16  ;;  %11633 = vmatprep.subr.bf16.mxu1 %v15879_v43  ;;  %v6967_v47 = vrot.slane %v6965_v55, 5  ;;  %v6981_v62 = vshll.u32 %v15671_v25, 16 }
 0x2ff   : > { %v6960_v16 = vsel %vm12744_vm5, %v6955_v0, %v6959_v15  ;;  %11618 = vmatmul.mubr.bf16.gmra.mrb[112].mxu1 %v10449_v40  ;;  %v10450_v36 = vcombine.low %v7418_v11, %v7421_v22  ;;  %v6973_v23 = vrot.slane %v6971_v26, 5  ;;  %v10403_v35 = vrot.slane %v15892_v34, 9 }
 0x300   : > { %v10425_v39 = vcombine.low %v6950_v31, %v6960_v16  ;;  %v6977_v29 = vrot.slane %v6975_v6, 4  ;;  %v10409_v15 = vcombine.low %v15653_v32, %v15660_v33  ;;  %v6968_v3 = vor.u32 %v6967_v47, %v6964_v58 }
 0x301   : > { %11621 = vmatprep.mubr.bf16.mxu1 %v10450_v36  ;;  %v7424_v25 = vrot.slane %v15898_v42, 5  ;;  %v6983_v63 = vrot.slane %v6981_v62, 5  ;;  %v10404_v11 = vrot.slane %v15904_v17, 9  ;;  %v7431_v57 = vrot.slane %v15906_v51, 5  ;;  %v15933_v36 = vld [vmem:[#allocation2 + $0xa8] sm:$0xf] }
 0x302   : > { %7881 = vmatprep.mubr.bf16.mxu0 %v10425_v39  ;;  %v6978_v59 = vor.u32 %v6977_v29, %v6973_v23  ;;  %v6969_v53 = vrot.slane %v6968_v3, 4  ;;  %v7427_v0 = vrot.slane %v15908_v46, 5  ;;  %v7434_v22 = vrot.slane %v15916_v30, 5 }
 0x303   : > { %v7426_v31 = vrot.slane %v7424_v25, 4  ;;  %v7425_v33 = vsel %vm13413_vm8, %v10403_v35, %v7424_v25  ;;  %v7433_v55 = vrot.slane %v7431_v57, 4  ;;  %v7432_v6 = vsel %vm13413_vm8, %v10404_v11, %v7431_v57  ;;  %v15945_v11 = vld [vmem:[#allocation2 + $0xb4] sm:$0xf] }
 0x304   : > { %7882 = vmatmul.mubr.bf16.gmra.mrb[228].mxu0 %v10409_v15  ;;  %v6979_v32 = vrot.slane %v6978_v59, 4  ;;  %v6974_v58 = vsel %vm12744_vm5, %v6969_v53, %v6973_v23  ;;  %v6986_v16 = vshrl.u32 %v15694_v44, 16  ;;  %v6989_v29 = vshll.u32 %v15694_v44, 16  ;;  %v15940_v23 = vld [vmem:[#allocation2 + $0xac] sm:$0xf] }
 0x305   : > { %v7428_v26 = vsel %vm13413_vm8, %v7426_v31, %v7427_v0  ;;  %v7435_v39 = vsel %vm13413_vm8, %v7433_v55, %v7434_v22  ;;  %v6995_v25 = vshll.u32 %v15696_v19, 16  ;;  %v15943_v59 = vld [vmem:[#allocation2 + $0xb0] sm:$0x1]  ;;  %v7005_v53 = vshll.u32 %v15703_v56, 16  ;;  %v15950_v0 = vld [vmem:[#allocation2 + $0xb8] sm:$0xf] }
 0x306   : > { %v6984_v47 = vsel %vm12744_vm5, %v6979_v32, %v6983_v63  ;;  %v10451_v62 = vcombine.low %v7425_v33, %v7428_v26  ;;  %v10452_v15 = vcombine.low %v7432_v6, %v7435_v39  ;;  %v6988_v3 = vrot.slane %v6986_v16, 4 }
 0x307   : > { %v10426_v35 = vcombine.low %v6974_v58, %v6984_v47  ;;  %v6991_v57 = vrot.slane %v6989_v29, 5  ;;  %v6999_v63 = vshrl.u32 %v15696_v19, 16  ;;  %v10405_v31 = vrot.slane %v15933_v36, 9  ;;  %v6909_v58 = vld [vmem:[#allocation2 + $0xbc] sm:$0x1] }
 0x308   : > { %11622 = vmatmul.mubr.bf16.gmra.mrb[116].mxu1 %v10451_v62  ;;  %v10410_v33 = vcombine.low %v15662_v7, %v15666_v10  ;;  %v6997_v55 = vrot.slane %v6995_v25, 5  ;;  %v7438_v22 = vrot.slane %v15940_v23, 5  ;;  %v7441_v56 = vrot.slane %v15943_v59, 5  ;;  %v5529_v25 = vld [vmem:[#allocation2 + $0xb4] sm:$0xff]  }
 0x309   : > { %7889 = vmatprep.mubr.bf16.mxu0 %v10426_v35  ;;  %11625 = vmatprep.mubr.bf16.mxu1 %v10452_v15  ;;  %v6992_v26 = vor.u32 %v6991_v57, %v6988_v3  ;;  %v7001_v6 = vrot.slane %v6999_v63, 4  ;;  %v10406_v16 = vrot.slane %v15945_v11, 9  ;;  %v7007_v47 = vrot.slane %v7005_v53, 5  ;;  %v5531_v35 = vld [vmem:[#allocation2 + $0xbc] sm:$0x1]  ;;  %5532 = vst [vmem:[#allocation2 + $0xcc] sm:$0xff] %v5529_v25  }
 0x30a   : > { %v7440_v62 = vrot.slane %v7438_v22, 4  ;;  %v7445_v29 = vrot.slane %v15950_v0, 5  ;;  %v7439_v15 = vsel %vm13413_vm8, %v10405_v31, %v7438_v22  ;;  %v7448_v3 = vrot.slane %v6909_v58, 5  ;;  %5534 = vst [vmem:[#allocation2 + $0xd4] sm:$0x1] %v5531_v35 }
 0x30b   : > { %v6993_v7 = vrot.slane %v6992_v26, 4  ;;  %v7002_v10 = vor.u32 %v7001_v6, %v6997_v55  ;;  %v7010_v39 = vshrl.u32 %v15706_v21, 16  ;;  %v7013_v31 = vshll.u32 %v15706_v21, 16  ;;  %v6910_v22 = vld [vmem:[#allocation2 + $0xc0] sm:$0xf] }
 0x30c   : > { %7890 = vmatmul.mubr.bf16.gmra.mrb[232].mxu0 %v10410_v33  ;;  %v7442_v57 = vsel %vm13413_vm8, %v7440_v62, %v7441_v56  ;;  %v7446_v63 = vsel %vm13413_vm8, %v10406_v16, %v7445_v29  ;;  %v7447_v53 = vrot.slane %v7445_v29, 4  ;;  %v7019_v56 = vshll.u32 %v15713_v5, 16  ;;  %v6911_v62 = vld [vmem:[#allocation2 + $0xc4] sm:$0xf] }
 0x30d   : > { %v6998_v33 = vsel %vm12744_vm5, %v6993_v7, %v6997_v55  ;;  %v7003_v26 = vrot.slane %v7002_v10, 4  ;;  %v10453_v6 = vcombine.low %v7439_v15, %v7442_v57  ;;  %v7012_v35 = vrot.slane %v7010_v39, 4  ;;  %v6912_v10 = vld [vmem:[#allocation2 + $0xc8] sm:$0x1]  ;;  %v15979_v15 = vld [vmem:[#allocation2 + $0x18] sm:$0xf] }
 0x30e   : > { %v7449_v58 = vsel %vm13413_vm8, %v7447_v53, %v7448_v3  ;;  %v7023_v16 = vshrl.u32 %v15713_v5, 16  ;;  %v7015_v55 = vrot.slane %v7013_v31, 5  ;;  %v7029_v7 = vshll.u32 %v15720_v2, 16  ;;  %v15981_v53 = vld [vmem:[#allocation2 + $0x1c] sm:$0xf] }
 0x30f   : > { %v7008_v29 = vsel %vm12744_vm5, %v7003_v26, %v7007_v47  ;;  %v10454_v25 = vcombine.low %v7446_v63, %v7449_v58  ;;  %v7021_v32 = vrot.slane %v7019_v56, 5  ;;  %v10407_v39 = vrot.slane %v6910_v22, 9  ;;  %v8261_v2 = vld [vmem:[#allocation2 + $0x20] sm:$0x1] }
 0x310   : > { %11626 = vmatmul.mubr.bf16.gmra.mrb[120].mxu1 %v10453_v6  ;;  %v10427_v57 = vcombine.low %v6998_v33, %v7008_v29  ;;  %v7025_v3 = vrot.slane %v7023_v16, 4  ;;  %v10411_v40 = vcombine.low %v15694_v44, %v15696_v19  ;;  %v7016_v50 = vor.u32 %v7015_v55, %v7012_v35 }
 0x311   : > { %11629 = vmatprep.mubr.bf16.mxu1 %v10454_v25  ;;  %v7031_v47 = vrot.slane %v7029_v7, 5  ;;  %v7452_v26 = vrot.slane %v6911_v62, 5  ;;  %v7455_v6 = vrot.slane %v6912_v10, 5  ;;  %v8308_v31 = vshrl.u32 %v15979_v15, 16 }
 0x312   : > { %7897 = vmatprep.mubr.bf16.mxu0 %v10427_v57  ;;  %v7026_v63 = vor.u32 %v7025_v3, %v7021_v32  ;;  %v8311_v33 = vshll.u32 %v15979_v15, 16  ;;  %v7017_v58 = vrot.slane %v7016_v50, 4  ;;  %v8317_v16 = vshll.u32 %v15981_v53, 16 }
 0x313   : > { %v7453_v22 = vsel %vm13413_vm8, %v10407_v39, %v7452_v26  ;;  %v7454_v56 = vrot.slane %v7452_v26, 4  ;;  %v8310_v19 = vrot.slane %v8308_v31, 4  ;;  %v8321_v62 = vshrl.u32 %v15981_v53, 16 }
 0x314   : > { %7898 = vmatmul.mubr.bf16.gmra.mrb[236].mxu0 %v10411_v40  ;;  %v7027_v44 = vrot.slane %v7026_v63, 4  ;;  %v8313_v35 = vrot.slane %v8311_v33, 5  ;;  %v7022_v29 = vsel %vm12744_vm5, %v7017_v58, %v7021_v32  ;;  %v8319_v55 = vrot.slane %v8317_v16, 5  ;;  %v16002_v33 = vld [vmem:[#allocation2 + $0x24] sm:$0xf] }
 0x315   : > { %v7456_v25 = vsel %vm13413_vm8, %v7454_v56, %v7455_v6  ;;  %v8327_v40 = vshll.u32 %v8261_v2, 16  ;;  %v8323_v57 = vrot.slane %v8321_v62, 4  ;;  %v10422_v3 = vcombine.low %v15945_v11, %v15950_v0  ;;  %v16008_v16 = vld [vmem:[#allocation2 + $0x28] sm:$0xf] }
 0x316   : > { %v7032_v50 = vsel %vm12744_vm5, %v7027_v44, %v7031_v47  ;;  %v10455_v7 = vcombine.low %v7453_v22, %v7456_v25  ;;  %v8314_v10 = vor.u32 %v8313_v35, %v8310_v19  ;;  %v7034_v63 = vshrl.u32 %v15735_v28, 16 }
 0x317   : > { %v10428_v39 = vcombine.low %v7022_v29, %v7032_v50  ;;  %v8329_v26 = vrot.slane %v8327_v40, 5  ;;  %v8324_v31 = vor.u32 %v8323_v57, %v8319_v55  ;;  %v7037_v6 = vshll.u32 %v15735_v28, 16  ;;  %v8264_v40 = vld [vmem:[#allocation2 + $0x2c] sm:$0x1] }
 0x318   : > { %11630 = vmatmul.mubr.bf16.gmra.mrb[124].mxu1 %v10455_v7  ;;  %v8315_v32 = vrot.slane %v8314_v10, 4  ;;  %v7043_v2 = vshll.u32 %v15741_v60, 16  ;;  %v10412_v47 = vcombine.low %v15706_v21, %v15713_v5  ;;  %v7036_v58 = vrot.slane %v7034_v63, 4 }
 0x319   : > { %7905 = vmatprep.mubr.bf16.mxu0 %v10428_v39  ;;  %v7047_v22 = vshrl.u32 %v15741_v60, 16  ;;  %v7053_v56 = vshll.u32 %v15761_v18, 16  ;;  %v8325_v19 = vrot.slane %v8324_v31, 4  ;;  %v7039_v35 = vrot.slane %v7037_v6, 5  ;;  %v12260_v6 = vld [vmem:[%s17124_s4 + $0x208] sm:$0xff]  }
 0x31a   : > { %v8320_v44 = vsel %vm12744_vm5, %v8315_v32, %v8319_v55  ;;  %v7045_v62 = vrot.slane %v7043_v2, 5  ;;  %v10496_v25 = vcombine.low %v15979_v15, %v15981_v53  ;;  %v8332_v21 = vshrl.u32 %v16002_v33, 16 }
 0x31b   : > { %v7049_v29 = vrot.slane %v7047_v22, 4  ;;  %v8335_v5 = vshll.u32 %v16002_v33, 16  ;;  %v8330_v18 = vsel %vm12744_vm5, %v8325_v19, %v8329_v26  ;;  %v7040_v50 = vor.u32 %v7039_v35, %v7036_v58 }
 0x31c   : > { %7906 = vmatmul.mubr.bf16.gmra.mrb[240].mxu0 %v10412_v47  ;;  %v8341_v7 = vshll.u32 %v16008_v16, 16  ;;  %v8345_v55 = vshrl.u32 %v16008_v16, 16  ;;  %v10512_v10 = vcombine.low %v8320_v44, %v8330_v18  ;;  %v8334_v39 = vrot.slane %v8332_v21, 4  ;;  %v12264_v18 = vld [vmem:[%s17124_s4 + $0x210] sm:$0xff]  }
 0x31d   : > { %v7050_v57 = vor.u32 %v7049_v29, %v7045_v62  ;;  %v8337_v63 = vrot.slane %v8335_v5, 5  ;;  %v7041_v32 = vrot.slane %v7040_v50, 4  ;;  %v8351_v53 = vshll.u32 %v8264_v40, 16  ;;  %v16033_v5 = vld [vmem:[#allocation2 + $0x30] sm:$0xf] }
 0x31e   : > { %v8343_v31 = vrot.slane %v8341_v7, 5  ;;  %v8347_v15 = vrot.slane %v8345_v55, 4  ;;  %9267 = vmatprep.mubr.bf16.mxu1 %v10512_v10  ;;  %v7055_v26 = vrot.slane %v7053_v56, 5  ;;  %v10413_v58 = vcombine.low %v15735_v28, %v15741_v60  ;;  %v16042_v10 = vld [vmem:[#allocation2 + $0x34] sm:$0xf] }
 0x31f   : > { %v7051_v2 = vrot.slane %v7050_v57, 4  ;;  %v8338_v47 = vor.u32 %v8337_v63, %v8334_v39  ;;  %v7046_v22 = vsel %vm12744_vm5, %v7041_v32, %v7045_v62  ;;  %v8353_v19 = vrot.slane %v8351_v53, 5  ;;  %v8267_v32 = vld [vmem:[#allocation2 + $0x38] sm:$0x1] }
 0x320   : > { %9268 = vmatmul.mubr.bf16.vlgmr.msra.gmra.mrb[128].mxu1 %v10496_v25  ;;  %v8348_v44 = vor.u32 %v8347_v15, %v8343_v31  ;;  %v7058_v35 = vshrl.u32 %v15746_v8, 16  ;;  %v7061_v56 = vshll.u32 %v15746_v8, 16  ;;  %v7067_v21 = vshll.u32 %v15757_v4, 16 }
 0x321   : > { %v7056_v29 = vsel %vm12744_vm5, %v7051_v2, %v7055_v26  ;;  %11634 = vmatpush3.bf16.msra.mxu1 %v15879_v43  ;;  %v8339_v40 = vrot.slane %v8338_v47, 4  ;;  %v7071_v25 = vshrl.u32 %v15757_v4, 16  ;;  %v7077_v55 = vshll.u32 %v15766_v49, 16 }
 0x322   : > { %v10429_v28 = vcombine.low %v7046_v22, %v7056_v29  ;;  %v8349_v60 = vrot.slane %v8348_v44, 4  ;;  %v7060_v62 = vrot.slane %v7058_v35, 4  ;;  %11635 = vmatprep.subr.bf16.mxu1 %v12260_v6  ;;  %v7063_v50 = vrot.slane %v7061_v56, 5 }
 0x323   : > { %v8344_v43 = vsel %vm12744_vm5, %v8339_v40, %v8343_v31  ;;  %v7069_v7 = vrot.slane %v7067_v21, 5  ;;  %v7073_v39 = vrot.slane %v7071_v25, 4  ;;  %v10497_v63 = vcombine.low %v16002_v33, %v16008_v16  ;;  %v12267_v33 = vld [vmem:[%s17124_s4 + $0x218] sm:$0xff]  }
 0x324   : > { %7913 = vmatprep.mubr.bf16.mxu0 %v10429_v28  ;;  %v8354_v57 = vsel %vm12744_vm5, %v8349_v60, %v8353_v19  ;;  %v8356_v15 = vshrl.u32 %v16033_v5, 16  ;;  %v7064_v31 = vor.u32 %v7063_v50, %v7060_v62  ;;  %v7079_v2 = vrot.slane %v7077_v55, 5  ;;  %v12270_v55 = vld [vmem:[%s17124_s4 + $0x220] sm:$0xff]  }
 0x325   : > { %v10513_v53 = vcombine.low %v8344_v43, %v8354_v57  ;;  %7914 = vmatmul.mubr.bf16.gmra.mrb[244].mxu0 %v10413_v58  ;;  %v8359_v26 = vshll.u32 %v16033_v5, 16  ;;  %11636 = vmatpush3.bf16.msra.mxu1 %v12260_v6  ;;  %v7074_v49 = vor.u32 %v7073_v39, %v7069_v7  ;;  %v8365_v22 = vshll.u32 %v16042_v10, 16 }
 0x326   : > { %v8358_v47 = vrot.slane %v8356_v15, 4  ;;  %v8369_v44 = vshrl.u32 %v16042_v10, 16  ;;  %11637 = vmatprep.subr.bf16.mxu1 %v12264_v18  ;;  %v7065_v16 = vrot.slane %v7064_v31, 4  ;;  %v8375_v58 = vshll.u32 %v8267_v32, 16 }
 0x327   : > { %9275 = vmatprep.mubr.bf16.mxu1 %v10513_v53  ;;  %v8361_v19 = vrot.slane %v8359_v26, 5  ;;  %v10414_v35 = vcombine.low %v15746_v8, %v15757_v4  ;;  %v7075_v29 = vrot.slane %v7074_v49, 4  ;;  %v8367_v6 = vrot.slane %v8365_v22, 5  ;;  %v16064_v4 = vld [vmem:[#allocation2 + $0x3c] sm:$0xf] }
 0x328   : > { %9276 = vmatmul.mubr.bf16.gmra.mrb[132].mxu1 %v10497_v63  ;;  %v8371_v40 = vrot.slane %v8369_v44, 4  ;;  %v7082_v56 = vshrl.u32 %v15788_v24, 16  ;;  %v7070_v21 = vsel %vm12744_vm5, %v7065_v16, %v7069_v7  ;;  %v8377_v60 = vrot.slane %v8375_v58, 5 }
 0x329   : > { %v8362_v28 = vor.u32 %v8361_v19, %v8358_v47  ;;  %v7085_v62 = vshll.u32 %v15788_v24, 16  ;;  %11638 = vmatpush3.bf16.msra.mxu1 %v12264_v18  ;;  %v7080_v25 = vsel %vm12744_vm5, %v7075_v29, %v7079_v2  ;;  %v7091_v8 = vshll.u32 %v15797_v20, 16  ;;  %v16070_v18 = vld [vmem:[#allocation2 + $0x40] sm:$0xf]  ;;  %v8270_v47 = vld [vmem:[#allocation2 + $0x44] sm:$0x1] }
 0x32a   : > { %v8372_v43 = vor.u32 %v8371_v40, %v8367_v6  ;;  %v7084_v50 = vrot.slane %v7082_v56, 4  ;;  %11639 = vmatprep.subr.bf16.mxu1 %v12267_v33  ;;  %v10430_v7 = vcombine.low %v7070_v21, %v7080_v25  ;;  %v7095_v63 = vshrl.u32 %v15797_v20, 16 }
 0x32b   : > { %v8363_v57 = vrot.slane %v8362_v28, 4  ;;  %v7087_v39 = vrot.slane %v7085_v62, 5  ;;  %v7093_v15 = vrot.slane %v7091_v8, 5  ;;  %v7101_v53 = vshll.u32 %v15809_v14, 16 }
 0x32c   : > { %v8373_v32 = vrot.slane %v8372_v43, 4  ;;  %v10498_v31 = vcombine.low %v16033_v5, %v16042_v10  ;;  %7921 = vmatprep.mubr.bf16.mxu0 %v10430_v7  ;;  %v7097_v49 = vrot.slane %v7095_v63, 4  ;;  %v8380_v22 = vshrl.u32 %v16064_v4, 16  ;;  %v12273_v10 = vld [vmem:[%s17124_s4 + $0x228] sm:$0xff]  }
 0x32d   : > { %v8368_v2 = vsel %vm12744_vm5, %v8363_v57, %v8367_v6  ;;  %v7088_v26 = vor.u32 %v7087_v39, %v7084_v50  ;;  %11640 = vmatpush3.bf16.msra.mxu1 %v12267_v33  ;;  %7922 = vmatmul.mubr.bf16.gmra.mrb[248].mxu0 %v10414_v35  ;;  %v7103_v16 = vrot.slane %v7101_v53, 5  ;;  %v8383_v14 = vshll.u32 %v16064_v4, 16 }
 0x32e   : > { %v8378_v44 = vsel %vm12744_vm5, %v8373_v32, %v8377_v60  ;;  %v8389_v19 = vshll.u32 %v16070_v18, 16  ;;  %v16082_v5 = vpop.f32.mrb[160].mxu0  ;;  %11641 = vmatprep.subr.bf16.mxu1 %v12270_v55  ;;  %v7098_v6 = vor.u32 %v7097_v49, %v7093_v15  ;;  %v8382_v33 = vrot.slane %v8380_v22, 4  ;;  %v12276_v32 = vld [vmem:[%s17124_s4 + $0x230] sm:$0xff]  }
 0x32f   : > { %v10514_v58 = vcombine.low %v8368_v2, %v8378_v44  ;;  %v7089_v29 = vrot.slane %v7088_v26, 4  ;;  %v16087_v40 = vpop.f32.mrb[161].mxu0  ;;  %v8385_v56 = vrot.slane %v8383_v14, 5  ;;  %v8393_v21 = vshrl.u32 %v16070_v18, 16 }
 0x330   : > { %v8391_v35 = vrot.slane %v8389_v19, 5  ;;  %v8399_v28 = vshll.u32 %v8270_v47, 16  ;;  %v16090_v60 = vpop.f32.mrb[162].mxu0  ;;  %v7099_v25 = vrot.slane %v7098_v6, 4  ;;  %v10415_v43 = vcombine.low %v15788_v24, %v15797_v20  ;;  %v16109_v47 = vld [vmem:[#allocation2 + $0x4c] sm:$0xf] }
 0x331   : > { %9283 = vmatprep.mubr.bf16.mxu1 %v10514_v58  ;;  %v7094_v62 = vsel %vm12744_vm5, %v7089_v29, %v7093_v15  ;;  %v7106_v50 = vshrl.u32 %v15804_v27, 16  ;;  %v16097_v8 = vpop.f32.mrb[163].mxu0  ;;  %11642 = vmatpush3.bf16.msra.mxu1 %v12270_v55  ;;  %v8386_v7 = vor.u32 %v8385_v56, %v8382_v33  ;;  %v8395_v57 = vrot.slane %v8393_v21, 4  ;;  %v16107_v55 = vld [vmem:[#allocation2 + $0x48] sm:$0xf]  ;;  %v12279_v56 = vld [vmem:[%s17124_s4 + $0x238] sm:$0xff]  }
 0x332   : > { %9284 = vmatmul.mubr.bf16.gmra.mrb[136].mxu1 %v10498_v31  ;;  %v8401_v39 = vrot.slane %v8399_v28, 5  ;;  %v7109_v63 = vshll.u32 %v15804_v27, 16  ;;  %11643 = vmatprep.subr.bf16.mxu1 %v12273_v10  ;;  %v7104_v15 = vsel %vm12744_vm5, %v7099_v25, %v7103_v16  ;;  %v7115_v20 = vshll.u32 %v15806_v13, 16 }
 0x333   : > { %v7108_v24 = vrot.slane %v7106_v50, 4  ;;  %v7119_v53 = vshrl.u32 %v15806_v13, 16  ;;  %v10431_v31 = vcombine.low %v7094_v62, %v7104_v15  ;;  %v8387_v2 = vrot.slane %v8386_v7, 4 }
 0x334   : > { %v8396_v26 = vor.u32 %v8395_v57, %v8391_v35  ;;  %v7111_v49 = vrot.slane %v7109_v63, 5  ;;  %v7117_v22 = vrot.slane %v7115_v20, 5  ;;  %v7125_v14 = vshll.u32 %v15813_v54, 16 }
 0x335   : > { %v7121_v44 = vrot.slane %v7119_v53, 4  ;;  %v10499_v16 = vcombine.low %v16064_v4, %v16070_v18  ;;  %11644 = vmatpush3.bf16.msra.mxu1 %v12273_v10  ;;  %7929 = vmatprep.mubr.bf16.mxu0 %v10431_v31  ;;  %v8392_v19 = vsel %vm12744_vm5, %v8387_v2, %v8391_v35  ;;  %v8404_v6 = vshrl.u32 %v16107_v55, 16  ;;  %v8273_v4 = vld [vmem:[#allocation2 + $0x50] sm:$0x1] }
 0x336   : > { %v8397_v58 = vrot.slane %v8396_v26, 4  ;;  %v7112_v29 = vor.u32 %v7111_v49, %v7108_v24  ;;  %11645 = vmatprep.subr.bf16.mxu1 %v12276_v32  ;;  %7930 = vmatmul.mubr.bf16.gmra.mrb[252].mxu0 %v10415_v43  ;;  %v7127_v21 = vrot.slane %v7125_v14, 5  ;;  %v8407_v18 = vshll.u32 %v16107_v55, 16  ;;  %v16140_v14 = vld [vmem:[#allocation2 + $0x54] sm:$0xf] }
 0x337   : > { %v16117_v33 = vpop.f32.mrb[164].mxu0  ;;  %v7122_v54 = vor.u32 %v7121_v44, %v7117_v22  ;;  %v8413_v10 = vshll.u32 %v16109_v47, 16  ;;  %v8406_v25 = vrot.slane %v8404_v6, 4  ;;  %v8417_v50 = vshrl.u32 %v16109_v47, 16 }
 0x338   : > { %v16124_v35 = vpop.f32.mrb[165].mxu0  ;;  %v8402_v28 = vsel %vm12744_vm5, %v8397_v58, %v8401_v39  ;;  %v7113_v62 = vrot.slane %v7112_v29, 4  ;;  %v8409_v63 = vrot.slane %v8407_v18, 5  ;;  %v8423_v31 = vshll.u32 %v8273_v4, 16  ;;  %v16143_v18 = vld [vmem:[#allocation2 + $0x58] sm:$0xf] }
 0x339   : > { %v16129_v7 = vpop.f32.mrb[166].mxu0  ;;  %v10515_v57 = vcombine.low %v8392_v19, %v8402_v28  ;;  %v7123_v43 = vrot.slane %v7122_v54, 4  ;;  %v8415_v15 = vrot.slane %v8413_v10, 5  ;;  %11646 = vmatpush3.bf16.msra.mxu1 %v12276_v32  ;;  %v8419_v53 = vrot.slane %v8417_v50, 4 }
 0x33a   : > { %v16131_v24 = vpop.f32.mrb[167].mxu0  ;;  %v7118_v20 = vsel %vm12744_vm5, %v7113_v62, %v7117_v22  ;;  %v7130_v39 = vshrl.u32 %v15836_v48, 16  ;;  %11647 = vmatprep.subr.bf16.mxu1 %v12279_v56  ;;  %v8410_v26 = vor.u32 %v8409_v63, %v8406_v25  ;;  %v7133_v49 = vshll.u32 %v15836_v48, 16 }
 0x33b   : > { %9291 = vmatprep.mubr.bf16.mxu1 %v10515_v57  ;;  %v7128_v2 = vsel %vm12744_vm5, %v7123_v43, %v7127_v21  ;;  %v7139_v44 = vshll.u32 %v15843_v45, 16  ;;  %v8420_v19 = vor.u32 %v8419_v53, %v8415_v15  ;;  %v8425_v22 = vrot.slane %v8423_v31, 5  ;;  %v8276_v57 = vld [vmem:[#allocation2 + $0x5c] sm:$0x1] }
 0x33c   : > { %v10432_v32 = vcombine.low %v7118_v20, %v7128_v2  ;;  %9292 = vmatmul.mubr.bf16.gmra.mrb[140].mxu1 %v10499_v16  ;;  %v7132_v58 = vrot.slane %v7130_v39, 4  ;;  %v8411_v29 = vrot.slane %v8410_v26, 4  ;;  %v7135_v6 = vrot.slane %v7133_v49, 5 }
 0x33d   : > { %v7141_v54 = vrot.slane %v7139_v44, 5  ;;  %v7143_v4 = vshrl.u32 %v15843_v45, 16  ;;  %11648 = vmatpush3.bf16.msra.mxu1 %v12279_v56  ;;  %v8421_v21 = vrot.slane %v8420_v19, 4  ;;  %v7149_v10 = vshll.u32 %v15845_v41, 16 }
 0x33e   : > { %7937 = vmatprep.mubr.bf16.mxu0 %v10432_v32  ;;  %v10500_v28 = vcombine.low %v16107_v55, %v16109_v47  ;;  %v8428_v16 = vshrl.u32 %v16140_v14, 16  ;;  %v8416_v62 = vsel %vm12744_vm5, %v8411_v29, %v8415_v15  ;;  %v7136_v25 = vor.u32 %v7135_v6, %v7132_v58 }
 0x33f   : > { %7938 = vmatmul.mubr.bf16.gmra.mrb[0].mxu0 %v10416_v1  ;;  %v7145_v50 = vrot.slane %v7143_v4, 4  ;;  %v8431_v56 = vshll.u32 %v16140_v14, 16  ;;  %v8426_v41 = vsel %vm12744_vm5, %v8421_v21, %v8425_v22  ;;  %v7151_v43 = vrot.slane %v7149_v10, 5 }
 0x340   : > { %v8430_v63 = vrot.slane %v8428_v16, 4  ;;  %v8437_v55 = vshll.u32 %v16143_v18, 16  ;;  %v10516_v20 = vcombine.low %v8416_v62, %v8426_v41  ;;  %v7137_v53 = vrot.slane %v7136_v25, 4  ;;  %v16173_v62 = vld [vmem:[#allocation2 + $0x60] sm:$0xf] }
 0x341   : > { %v7146_v31 = vor.u32 %v7145_v50, %v7141_v54  ;;  %v8433_v15 = vrot.slane %v8431_v56, 5  ;;  %v8441_v27 = vshrl.u32 %v16143_v18, 16  ;;  %v8447_v13 = vshll.u32 %v8276_v57, 16  ;;  %v16178_v41 = vld [vmem:[#allocation2 + $0x64] sm:$0xf] }
 0x342   : > { %v8439_v39 = vrot.slane %v8437_v55, 5  ;;  %v7154_v1 = vshrl.u32 %v15851_v52, 16  ;;  %9299 = vmatprep.mubr.bf16.mxu1 %v10516_v20  ;;  %v7142_v26 = vsel %vm12744_vm5, %v7137_v53, %v7141_v54  ;;  %v7157_v32 = vshll.u32 %v15851_v52, 16  ;;  %v16184_v53 = vld [vmem:[#allocation2 + $0x68] sm:$0x1] }
 0x343   : > { %v7147_v49 = vrot.slane %v7146_v31, 4  ;;  %v8434_v44 = vor.u32 %v8433_v15, %v8430_v63  ;;  %v8443_v22 = vrot.slane %v8441_v27, 4  ;;  %v8449_v58 = vrot.slane %v8447_v13, 5 }
 0x344   : > { %9300 = vmatmul.mubr.bf16.gmra.mrb[144].mxu1 %v10500_v28  ;;  %v7156_v29 = vrot.slane %v7154_v1, 4  ;;  %v7163_v6 = vshll.u32 %v15859_v61, 16  ;;  %v7159_v16 = vrot.slane %v7157_v32, 5  ;;  %v7167_v54 = vshrl.u32 %v15859_v61, 16 }
 0x345   : > { %v16160_v2 = vpop.f32.mrb[168].mxu0  ;;  %v7152_v21 = vsel %vm12744_vm5, %v7147_v49, %v7151_v43  ;;  %v8435_v10 = vrot.slane %v8434_v44, 4  ;;  %v8444_v28 = vor.u32 %v8443_v22, %v8439_v39  ;;  %v7173_v56 = vshll.u32 %v15866_v9, 16 }
 0x346   : > { %v16165_v19 = vpop.f32.mrb[169].mxu0  ;;  %v10433_v50 = vcombine.low %v7142_v26, %v7152_v21  ;;  %v7165_v57 = vrot.slane %v7163_v6, 5  ;;  %v7160_v55 = vor.u32 %v7159_v16, %v7156_v29  ;;  %v7169_v43 = vrot.slane %v7167_v54, 4 }
 0x347   : > { %v16168_v4 = vpop.f32.mrb[170].mxu0  ;;  %v8440_v63 = vsel %vm12744_vm5, %v8435_v10, %v8439_v39  ;;  %v10501_v20 = vcombine.low %v16140_v14, %v16143_v18  ;;  %v8445_v31 = vrot.slane %v8444_v28, 4  ;;  %v7175_v15 = vrot.slane %v7173_v56, 5 }
 0x348   : > { %v16175_v25 = vpop.f32.mrb[171].mxu0  ;;  %7945 = vmatprep.mubr.bf16.mxu0 %v10433_v50  ;;  %v8452_v27 = vshrl.u32 %v16173_v62, 16  ;;  %v8455_v13 = vshll.u32 %v16173_v62, 16  ;;  %v7161_v9 = vrot.slane %v7160_v55, 4  ;;  %v7170_v39 = vor.u32 %v7169_v43, %v7165_v57  ;;  %v16206_v55 = vld [vmem:[#allocation2 + $0x70] sm:$0xf] }
 0x349   : > { %7946 = vmatmul.mubr.bf16.gmra.mrb[4].mxu0 %v10417_v37  ;;  %v8461_v1 = vshll.u32 %v16178_v41, 16  ;;  %v8465_v26 = vshrl.u32 %v16178_v41, 16  ;;  %v8450_v14 = vsel %vm12744_vm5, %v8445_v31, %v8449_v58  ;;  %v8471_v44 = vshll.u32 %v16184_v53, 16 }
 0x34a   : > { %v8454_v18 = vrot.slane %v8452_v27, 4  ;;  %v8457_v49 = vrot.slane %v8455_v13, 5  ;;  %v10517_v32 = vcombine.low %v8440_v63, %v8450_v14  ;;  %v7166_v22 = vsel %vm12744_vm5, %v7161_v9, %v7165_v57  ;;  %v16204_v63 = vld [vmem:[#allocation2 + $0x6c] sm:$0xf] }
 0x34b   : > { %v7171_v29 = vrot.slane %v7170_v39, 4  ;;  %v8463_v48 = vrot.slane %v8461_v1, 5  ;;  %v8467_v37 = vrot.slane %v8465_v26, 4  ;;  %v8473_v6 = vrot.slane %v8471_v44, 5  ;;  %v16224_v44 = vld [vmem:[#allocation2 + $0x74] sm:$0x1] }
 0x34c   : > { %v8458_v45 = vor.u32 %v8457_v49, %v8454_v18  ;;  %v7178_v21 = vshrl.u32 %v15892_v34, 16  ;;  %9307 = vmatprep.mubr.bf16.mxu1 %v10517_v32  ;;  %v7181_v58 = vshll.u32 %v15892_v34, 16  ;;  %v7187_v16 = vshll.u32 %v15898_v42, 16 }
 0x34d   : > { %v7176_v10 = vsel %vm12744_vm5, %v7171_v29, %v7175_v15  ;;  %v7191_v54 = vshrl.u32 %v15898_v42, 16  ;;  %9308 = vmatmul.mubr.bf16.gmra.mrb[148].mxu1 %v10501_v20  ;;  %v8468_v57 = vor.u32 %v8467_v37, %v8463_v48  ;;  %v7197_v15 = vshll.u32 %v15908_v46, 16 }
 0x34e   : > { %v10434_v50 = vcombine.low %v7166_v22, %v7176_v10  ;;  %v8459_v28 = vrot.slane %v8458_v45, 4  ;;  %v7180_v56 = vrot.slane %v7178_v21, 4  ;;  %v7183_v43 = vrot.slane %v7181_v58, 5 }
 0x34f   : > { %v7189_v31 = vrot.slane %v7187_v16, 5  ;;  %v7193_v27 = vrot.slane %v7191_v54, 4  ;;  %v8469_v39 = vrot.slane %v8468_v57, 4  ;;  %v10502_v20 = vcombine.low %v16173_v62, %v16178_v41 }
 0x350   : > { %v16209_v13 = vpop.f32.mrb[172].mxu0  ;;  %7953 = vmatprep.mubr.bf16.mxu0 %v10434_v50  ;;  %v8464_v9 = vsel %vm12744_vm5, %v8459_v28, %v8463_v48  ;;  %v16217_v1 = vadd.f32 %v16087_v40, %v16082_v5  ;;  %v17351_v14 = vcombine.low %v15851_v52, %v15859_v61  ;;  %v7184_v46 = vor.u32 %v7183_v43, %v7180_v56 }
 0x351   : > { %v16219_v26 = vpop.f32.mrb[173].mxu0  ;;  %v7194_v18 = vor.u32 %v7193_v27, %v7189_v31  ;;  %v7199_v49 = vrot.slane %v7197_v15, 5  ;;  %v8476_v32 = vshrl.u32 %v16204_v63, 16  ;;  %v8474_v62 = vsel %vm12744_vm5, %v8469_v39, %v8473_v6 }
 0x352   : > { %7954 = vmatmul.mubr.bf16.gmra.mrb[8].mxu0 %v17351_v14  ;;  %v16227_v22 = vpop.f32.mrb[174].mxu0  ;;  %v8479_v5 = vshll.u32 %v16204_v63, 16  ;;  %v8485_v40 = vshll.u32 %v16206_v55, 16  ;;  %v8489_v29 = vshrl.u32 %v16206_v55, 16  ;;  %v10518_v61 = vcombine.low %v8464_v9, %v8474_v62  ;;  %v16249_v14 = vld [vmem:[#allocation2 + $0x78] sm:$0xf] }
 0x353   : > { %v16234_v52 = vpop.f32.mrb[175].mxu0  ;;  %v7185_v48 = vrot.slane %v7184_v46, 4  ;;  %v7195_v45 = vrot.slane %v7194_v18, 4  ;;  %v8478_v37 = vrot.slane %v8476_v32, 4  ;;  %v8495_v16 = vshll.u32 %v16224_v44, 16 }
 0x354   : > { %v8481_v21 = vrot.slane %v8479_v5, 5  ;;  %v8487_v10 = vrot.slane %v8485_v40, 5  ;;  %v8491_v58 = vrot.slane %v8489_v29, 4  ;;  %9315 = vmatprep.mubr.bf16.mxu1 %v10518_v61  ;;  %v16243_v50 = vadd.f32 %v16097_v8, %v16090_v60  ;;  %v16254_v18 = vld [vmem:[#allocation2 + $0x80] sm:$0x1] }
 0x355   : > { %v7190_v6 = vsel %vm12744_vm5, %v7185_v48, %v7189_v31  ;;  %v7200_v54 = vsel %vm12744_vm5, %v7195_v45, %v7199_v49  ;;  %v7202_v28 = vshrl.u32 %v15904_v17, 16  ;;  %9316 = vmatmul.mubr.bf16.gmra.mrb[152].mxu1 %v10502_v20  ;;  %v8497_v27 = vrot.slane %v8495_v16, 5  ;;  %v16263_v29 = vld [vmem:[#allocation2 + $0x7c] sm:$0xf] }
 0x356   : > { %v10435_v57 = vcombine.low %v7190_v6, %v7200_v54  ;;  %v8482_v56 = vor.u32 %v8481_v21, %v8478_v37  ;;  %v8492_v43 = vor.u32 %v8491_v58, %v8487_v10  ;;  %v7205_v9 = vshll.u32 %v15904_v17, 16 }
 0x357   : > { %v7204_v15 = vrot.slane %v7202_v28, 4  ;;  %v7211_v39 = vshll.u32 %v15906_v51, 16  ;;  %v7215_v31 = vshrl.u32 %v15906_v51, 16  ;;  %v7221_v8 = vshll.u32 %v15916_v30, 16 }
 0x358   : > { %7961 = vmatprep.mubr.bf16.mxu0 %v10435_v57  ;;  %v8483_v46 = vrot.slane %v8482_v56, 4  ;;  %v8493_v60 = vrot.slane %v8492_v43, 4  ;;  %v10503_v20 = vcombine.low %v16204_v63, %v16206_v55  ;;  %v17352_v49 = vcombine.low %v15892_v34, %v15898_v42 }
 0x359   : > { %v7207_v32 = vrot.slane %v7205_v9, 5  ;;  %v7213_v62 = vrot.slane %v7211_v39, 5  ;;  %v7217_v5 = vrot.slane %v7215_v31, 4  ;;  %v16261_v40 = vadd.f32 %v16124_v35, %v16117_v33 }
 0x35a   : > { %7962 = vmatmul.mubr.bf16.gmra.mrb[12].mxu0 %v17352_v49  ;;  %v8488_v30 = vsel %vm12744_vm5, %v8483_v46, %v8487_v10  ;;  %v8498_v61 = vsel %vm12744_vm5, %v8493_v60, %v8497_v27  ;;  %v7223_v48 = vrot.slane %v7221_v8, 5  ;;  %v8500_v45 = vshrl.u32 %v16249_v14, 16 }
 0x35b   : > { %v16270_v34 = vpop.f32.mrb[176].mxu0  ;;  %v10519_v42 = vcombine.low %v8488_v30, %v8498_v61  ;;  %v7208_v37 = vor.u32 %v7207_v32, %v7204_v15  ;;  %v7218_v21 = vor.u32 %v7217_v5, %v7213_v62  ;;  %v8503_v58 = vshll.u32 %v16249_v14, 16 }
 0x35c   : > { %v16273_v33 = vpop.f32.mrb[177].mxu0  ;;  %v8502_v35 = vrot.slane %v8500_v45, 4  ;;  %v8509_v16 = vshll.u32 %v16263_v29, 16  ;;  %v8513_v10 = vshrl.u32 %v16263_v29, 16  ;;  %v8519_v6 = vshll.u32 %v16254_v18, 16 }
 0x35d   : > { %v16278_v54 = vpop.f32.mrb[178].mxu0  ;;  %9323 = vmatprep.mubr.bf16.mxu1 %v10519_v42  ;;  %v7209_v28 = vrot.slane %v7208_v37, 4  ;;  %v7219_v57 = vrot.slane %v7218_v21, 4  ;;  %v8505_v56 = vrot.slane %v8503_v58, 5  ;;  %v16282_v43 = vadd.f32 %v16131_v24, %v16129_v7 }
 0x35e   : > { %v16284_v27 = vpop.f32.mrb[179].mxu0  ;;  %9324 = vmatmul.mubr.bf16.gmra.mrb[156].mxu1 %v10503_v20  ;;  %v8511_v15 = vrot.slane %v8509_v16, 5  ;;  %v8515_v9 = vrot.slane %v8513_v10, 4  ;;  %v8521_v39 = vrot.slane %v8519_v6, 5  ;;  %v7226_v31 = vshrl.u32 %v15933_v36, 16 }
 0x35f   : > { %v7214_v46 = vsel %vm12744_vm5, %v7209_v28, %v7213_v62  ;;  %v7224_v60 = vsel %vm12744_vm5, %v7219_v57, %v7223_v48  ;;  %v8506_v8 = vor.u32 %v8505_v56, %v8502_v35  ;;  %v7229_v49 = vshll.u32 %v15933_v36, 16  ;;  %v16293_v20 = vld [vmem:[#allocation2 + $0x84] sm:$0xf]  ;;  %v16297_v62 = vld [vmem:[#allocation2 + $0x88] sm:$0xf] }
 0x360   : > { %v10436_v32 = vcombine.low %v7214_v46, %v7224_v60  ;;  %v8516_v7 = vor.u32 %v8515_v9, %v8511_v15  ;;  %v7228_v24 = vrot.slane %v7226_v31, 4  ;;  %v7235_v5 = vshll.u32 %v15940_v23, 16  ;;  %v16310_v28 = vld [vmem:[#allocation2 + $0x8c] sm:$0x1] }
 0x361   : > { %v8507_v30 = vrot.slane %v8506_v8, 4  ;;  %v7231_v61 = vrot.slane %v7229_v49, 5  ;;  %v7239_v45 = vshrl.u32 %v15940_v23, 16  ;;  %v7245_v42 = vshll.u32 %v15943_v59, 16 }
 0x362   : > { %7969 = vmatprep.mubr.bf16.mxu0 %v10436_v32  ;;  %v8517_v48 = vrot.slane %v8516_v7, 4  ;;  %v7237_v37 = vrot.slane %v7235_v5, 5  ;;  %v10504_v21 = vcombine.low %v16249_v14, %v16263_v29  ;;  %v16303_v58 = vadd.f32 %v16165_v19, %v16160_v2 }
 0x363   : > { %v8512_v35 = vsel %vm12744_vm5, %v8507_v30, %v8511_v15  ;;  %v17353_v16 = vcombine.low %v15904_v17, %v15906_v51  ;;  %v7232_v59 = vor.u32 %v7231_v61, %v7228_v24  ;;  %v7241_v10 = vrot.slane %v7239_v45, 4 }
 0x364   : > { %v7247_v6 = vrot.slane %v7245_v42, 5  ;;  %v8522_v57 = vsel %vm12744_vm5, %v8517_v48, %v8521_v39  ;;  %v8524_v56 = vshrl.u32 %v16293_v20, 16  ;;  %v8527_v2 = vshll.u32 %v16293_v20, 16  ;;  %v12369_v42 = vld [vmem:[#allocation2 + $0xb4] sm:$0xf] }
 0x365   : > { %7970 = vmatmul.mubr.bf16.gmra.mrb[16].mxu0 %v17353_v16  ;;  %v8533_v19 = vshll.u32 %v16297_v62, 16  ;;  %v10520_v9 = vcombine.low %v8512_v35, %v8522_v57  ;;  %v7233_v15 = vrot.slane %v7232_v59, 4  ;;  %v7242_v31 = vor.u32 %v7241_v10, %v7237_v37  ;;  %v12370_v10 = vld [vmem:[#allocation2 + $0xb8] sm:$0xf] }
 0x366   : > { %v8537_v17 = vshrl.u32 %v16297_v62, 16  ;;  %v16318_v51 = vpop.f32.mrb[180].mxu0  ;;  %v8526_v46 = vrot.slane %v8524_v56, 4  ;;  %v8529_v60 = vrot.slane %v8527_v2, 5  ;;  %v8543_v49 = vshll.u32 %v16310_v28, 16 }
 0x367   : > { %v8535_v8 = vrot.slane %v8533_v19, 5  ;;  %v16321_v32 = vpop.f32.mrb[181].mxu0  ;;  %9331 = vmatprep.mubr.bf16.mxu1 %v10520_v9  ;;  %v7238_v39 = vsel %vm12744_vm5, %v7233_v15, %v7237_v37  ;;  %v7243_v7 = vrot.slane %v7242_v31, 4  ;;  %v16327_v5 = vadd.f32 %v16175_v25, %v16168_v4  ;;  %v16335_v9 = vld [vmem:[#allocation2 + $0x90] sm:$0xf] }
 0x368   : > { %v8539_v24 = vrot.slane %v8537_v17, 4  ;;  %v16329_v30 = vpop.f32.mrb[182].mxu0  ;;  %9332 = vmatmul.mubr.bf16.gmra.mrb[160].mxu1 %v10504_v21  ;;  %v8530_v61 = vor.u32 %v8529_v60, %v8526_v46  ;;  %v8545_v45 = vrot.slane %v8543_v49, 5  ;;  %v7250_v48 = vshrl.u32 %v12369_v42, 16  ;;  %v12371_v17 = vld [vmem:[#allocation2 + $0xbc] sm:$0x1] }
 0x369   : > { %v7253_v35 = vshll.u32 %v12369_v42, 16  ;;  %v16331_v16 = vpop.f32.mrb[183].mxu0  ;;  %v7248_v59 = vsel %vm12744_vm5, %v7243_v7, %v7247_v6  ;;  %v7259_v57 = vshll.u32 %v12370_v10, 16  ;;  %v7263_v56 = vshrl.u32 %v12370_v10, 16  ;;  %v16337_v60 = vld [vmem:[#allocation2 + $0x94] sm:$0xf] }
 0x36a   : > { %v8540_v37 = vor.u32 %v8539_v24, %v8535_v8  ;;  %v10437_v2 = vcombine.low %v7238_v39, %v7248_v59  ;;  %v8531_v4 = vrot.slane %v8530_v61, 4  ;;  %v7252_v25 = vrot.slane %v7250_v48, 4  ;;  %v16347_v24 = vld [vmem:[#allocation2 + $0x98] sm:$0x1] }
 0x36b   : > { %v7255_v19 = vrot.slane %v7253_v35, 5  ;;  %v7261_v15 = vrot.slane %v7259_v57, 5  ;;  %v7265_v31 = vrot.slane %v7263_v56, 4  ;;  %v7269_v46 = vshll.u32 %v12371_v17, 16  ;;  %v16369_v17 = vld [vmem:[#allocation2 + $0xc0] sm:$0xf] }
 0x36c   : > { %v8541_v21 = vrot.slane %v8540_v37, 4  ;;  %7977 = vmatprep.mubr.bf16.mxu0 %v10437_v2  ;;  %v8536_v6 = vsel %vm12744_vm5, %v8531_v4, %v8535_v8  ;;  %v10505_v39 = vcombine.low %v16293_v20, %v16297_v62  ;;  %v16345_v7 = vadd.f32 %v16219_v26, %v16209_v13 }
 0x36d   : > { %v7256_v49 = vor.u32 %v7255_v19, %v7252_v25  ;;  %v17354_v42 = vcombine.low %v15933_v36, %v15940_v23  ;;  %v7266_v48 = vor.u32 %v7265_v31, %v7261_v15  ;;  %v7271_v35 = vrot.slane %v7269_v46, 5 }
 0x36e   : > { %v8546_v61 = vsel %vm12744_vm5, %v8541_v21, %v8545_v45  ;;  %v8548_v8 = vshrl.u32 %v16335_v9, 16  ;;  %v8551_v10 = vshll.u32 %v16335_v9, 16  ;;  %v8557_v13 = vshll.u32 %v16337_v60, 16 }
 0x36f   : > { %7978 = vmatmul.mubr.bf16.gmra.mrb[20].mxu0 %v17354_v42  ;;  %v10521_v59 = vcombine.low %v8536_v6, %v8546_v61  ;;  %v7257_v37 = vrot.slane %v7256_v49, 4  ;;  %v7267_v26 = vrot.slane %v7266_v48, 4  ;;  %v8561_v56 = vshrl.u32 %v16337_v60, 16 }
 0x370   : > { %v8550_v57 = vrot.slane %v8548_v8, 4  ;;  %v8567_v45 = vshll.u32 %v16347_v24, 16  ;;  %v8553_v23 = vrot.slane %v8551_v10, 5  ;;  %v8559_v2 = vrot.slane %v8557_v13, 5  ;;  %v12374_v8 = vld [vmem:[#allocation2 + $0xc8] sm:$0x1] }
 0x371   : > { %9339 = vmatprep.mubr.bf16.mxu1 %v10521_v59  ;;  %v7262_v36 = vsel %vm12744_vm5, %v7257_v37, %v7261_v15  ;;  %v16363_v4 = vadd.f32 %v16234_v52, %v16227_v22  ;;  %v16365_v25 = vpop.f32.mrb[184].mxu0  ;;  %v7272_v19 = vsel %vm12744_vm5, %v7267_v26, %v7271_v35  ;;  %v8563_v21 = vrot.slane %v8561_v56, 4  ;;  %v16375_v22 = vld [vmem:[#allocation2 + $0xc4] sm:$0xf]  ;;  %v16381_v37 = vld [vmem:[#allocation2 + $0x9c] sm:$0xf] }
 0x372   : > { %9340 = vmatmul.mubr.bf16.gmra.mrb[164].mxu1 %v10505_v39  ;;  %v8569_v31 = vrot.slane %v8567_v45, 5  ;;  %v7274_v46 = vshrl.u32 %v16369_v17, 16  ;;  %v16372_v6 = vpop.f32.mrb[185].mxu0  ;;  %v10438_v15 = vcombine.low %v7262_v36, %v7272_v19  ;;  %v8554_v49 = vor.u32 %v8553_v23, %v8550_v57  ;;  %v16387_v45 = vld [vmem:[#allocation2 + $0xa0] sm:$0xf] }
 0x373   : > { %v7277_v61 = vshll.u32 %v16369_v17, 16  ;;  %v7283_v52 = vshll.u32 %v16375_v22, 16  ;;  %v16378_v42 = vpop.f32.mrb[186].mxu0  ;;  %v8564_v48 = vor.u32 %v8563_v21, %v8559_v2  ;;  %v7287_v35 = vshrl.u32 %v16375_v22, 16 }
 0x374   : > { %v7276_v39 = vrot.slane %v7274_v46, 4  ;;  %v7293_v59 = vshll.u32 %v12374_v8, 16  ;;  %v16383_v10 = vpop.f32.mrb[187].mxu0  ;;  %7985 = vmatprep.mubr.bf16.mxu0 %v10438_v15  ;;  %v8555_v13 = vrot.slane %v8554_v49, 4  ;;  %v10506_v56 = vcombine.low %v16335_v9, %v16337_v60  ;;  %v16398_v49 = vld [vmem:[#allocation2 + $0xa4] sm:$0x1] }
 0x375   : > { %v7279_v26 = vrot.slane %v7277_v61, 5  ;;  %v7285_v57 = vrot.slane %v7283_v52, 5  ;;  %v8565_v36 = vrot.slane %v8564_v48, 4  ;;  %v7289_v23 = vrot.slane %v7287_v35, 4 }
 0x376   : > { %v7295_v19 = vrot.slane %v7293_v59, 5  ;;  %v16394_v21 = vadd.f32 %v16273_v33, %v16270_v34  ;;  %v8560_v46 = vsel %vm12744_vm5, %v8555_v13, %v8559_v2  ;;  %v8572_v61 = vshrl.u32 %v16381_v37, 16 }
 0x377   : > { %7986 = vmatmul.mubr.bf16.gmra.mrb[24].mxu0 %v10422_v3  ;;  %v7280_v15 = vor.u32 %v7279_v26, %v7276_v39  ;;  %v8575_v52 = vshll.u32 %v16381_v37, 16  ;;  %v8570_v11 = vsel %vm12744_vm5, %v8565_v36, %v8569_v31  ;;  %v7290_v0 = vor.u32 %v7289_v23, %v7285_v57  ;;  %v16407_v26 = vld [vmem:[#allocation2 + $0xa8] sm:$0xf] }
 0x378   : > { %17355 = vst [vmem:[#allocation30_spill] sm:$0xff] %v16394_v21  ;;  %v8581_v3 = vshll.u32 %v16387_v45, 16  ;;  %v8585_v48 = vshrl.u32 %v16387_v45, 16  ;;  %v10522_v34 = vcombine.low %v8560_v46, %v8570_v11  ;;  %v8574_v35 = vrot.slane %v8572_v61, 4  ;;  %v16417_v46 = vld [vmem:[#allocation2 + $0xac] sm:$0xf] }
 0x379   : > { %v7281_v33 = vrot.slane %v7280_v15, 4  ;;  %v8577_v8 = vrot.slane %v8575_v52, 5  ;;  %v7291_v2 = vrot.slane %v7290_v0, 4  ;;  %v8591_v13 = vshll.u32 %v16398_v49, 16  ;;  %v16419_v15 = vld [vmem:[#allocation2 + $0xb0] sm:$0x1] }
 0x37a   : > { %v8583_v39 = vrot.slane %v8581_v3, 5  ;;  %v8587_v59 = vrot.slane %v8585_v48, 4  ;;  %v10423_v21 = vcombine.low %v16369_v17, %v16375_v22  ;;  %9347 = vmatprep.mubr.bf16.mxu1 %v10522_v34  ;;  %v16415_v23 = vadd.f32 %v16284_v27, %v16278_v54  ;;  %v16429_v27 = vld [vmem:[#allocation2 + $0xb4] sm:$0xf] }
 0x37b   : > { %v7286_v31 = vsel %vm12744_vm5, %v7281_v33, %v7285_v57  ;;  %v8578_v36 = vor.u32 %v8577_v8, %v8574_v35  ;;  %v7296_v61 = vsel %vm12744_vm5, %v7291_v2, %v7295_v19  ;;  %9348 = vmatmul.mubr.bf16.gmra.mrb[168].mxu1 %v10506_v56  ;;  %v8593_v11 = vrot.slane %v8591_v13, 5  ;;  %v16440_v2 = vld [vmem:[#allocation2 + $0xb8] sm:$0xf] }
 0x37c   : > { %17356 = vst [vmem:[#allocation31_spill] sm:$0xff] %v16415_v23  ;;  %v8588_v52 = vor.u32 %v8587_v59, %v8583_v39  ;;  %v16425_v17 = vadd.f32 %v16321_v32, %v16318_v51  ;;  %v10439_v22 = vcombine.low %v7286_v31, %v7296_v61  ;;  %v8596_v0 = vshrl.u32 %v16407_v26, 16 }
 0x37d   : > { %v8579_v57 = vrot.slane %v8578_v36, 4  ;;  %v8599_v54 = vshll.u32 %v16407_v26, 16  ;;  %v11043_v3 = vpop.f32.mrb[188].mxu0  ;;  %v8605_v34 = vshll.u32 %v16417_v46, 16  ;;  %v8609_v56 = vshrl.u32 %v16417_v46, 16 }
 0x37e   : > { %17357 = vst [vmem:[#allocation25_spill] sm:$0xff] %v16425_v17  ;;  %v8589_v48 = vrot.slane %v8588_v52, 4  ;;  %v8615_v19 = vshll.u32 %v16419_v15, 16  ;;  %v11044_v33 = vpop.f32.mrb[189].mxu0  ;;  %7993 = vmatprep.mubr.bf16.mxu0 %v10439_v22  ;;  %v8598_v32 = vrot.slane %v8596_v0, 4  ;;  %v16438_v8 = vadd.f32 %v16331_v16, %v16329_v30 }
 0x37f   : > { %v8584_v51 = vsel %vm12744_vm5, %v8579_v57, %v8583_v39  ;;  %v8601_v35 = vrot.slane %v8599_v54, 5  ;;  %v11046_v59 = vpop.f32.mrb[190].mxu0  ;;  %7994 = vmatmul.mubr.bf16.gmra.mrb[28].mxu0 %v10423_v21  ;;  %v10507_v31 = vcombine.low %v16381_v37, %v16387_v45  ;;  %v8607_v36 = vrot.slane %v8605_v34, 5  ;;  %v16446_v52 = vld [vmem:[#allocation2 + $0xbc] sm:$0x1] }
 0x380   : > { %17358 = vst [vmem:[#allocation27_spill] sm:$0xff] %v16438_v8  ;;  %v8594_v13 = vsel %vm12744_vm5, %v8589_v48, %v8593_v11  ;;  %v8611_v61 = vrot.slane %v8609_v56, 4  ;;  %v11047_v39 = vpop.f32.mrb[191].mxu0  ;;  %v8617_v0 = vrot.slane %v8615_v19, 5  ;;  %v16450_v30 = vadd.f32 %v16372_v6, %v16365_v25 }
 0x381   : > { %v10523_v22 = vcombine.low %v8584_v51, %v8594_v13  ;;  %v8602_v57 = vor.u32 %v8601_v35, %v8598_v32  ;;  %v8620_v54 = vshrl.u32 %v16429_v27, 16  ;;  %v8623_v21 = vshll.u32 %v16429_v27, 16  ;;  %v16461_v51 = vld [vmem:[#allocation2 + $0xc0] sm:$0xf]  ;;  %v16463_v13 = vld [vmem:[#allocation2 + $0xc4] sm:$0xf] }
 0x382   : > { %17359 = vst [vmem:[#allocation32_spill] sm:$0xff] %v16450_v30  ;;  %v8612_v16 = vor.u32 %v8611_v61, %v8607_v36  ;;  %v8629_v11 = vshll.u32 %v16440_v2, 16  ;;  %v8633_v34 = vshrl.u32 %v16440_v2, 16  ;;  %v8639_v56 = vshll.u32 %v16446_v52, 16 }
 0x383   : > { %9355 = vmatprep.mubr.bf16.mxu1 %v10523_v22  ;;  %v8603_v48 = vrot.slane %v8602_v57, 4  ;;  %v16459_v19 = vadd.f32 %v16383_v10, %v16378_v42  ;;  %v8622_v6 = vrot.slane %v8620_v54, 4  ;;  %v8625_v32 = vrot.slane %v8623_v21, 5 }
 0x384   : > { %9356 = vmatmul.mubr.bf16.gmra.mrb[172].mxu1 %v10507_v31  ;;  %v8613_v25 = vrot.slane %v8612_v16, 4  ;;  %v8631_v35 = vrot.slane %v8629_v11, 5  ;;  %v8635_v22 = vrot.slane %v8633_v34, 4  ;;  %v16469_v8 = vadd.f32 %v11044_v33, %v11043_v3  ;;  %v16472_v16 = vld [vmem:[#allocation2 + $0xc8] sm:$0x1] }
 0x385   : > { %17360 = vst [vmem:[#allocation33_spill] sm:$0xff] %v16459_v19  ;;  %v8608_v61 = vsel %vm12744_vm5, %v8603_v48, %v8607_v36  ;;  %v8626_v30 = vor.u32 %v8625_v32, %v8622_v6  ;;  %v8644_v42 = vshrl.u32 %v16461_v51, 16  ;;  %v8647_v54 = vshll.u32 %v16461_v51, 16  ;;  %v16477_v34 = vld [vmem:[#allocation2 + $0xcc] sm:$0xf] }
 0x386   : > { %v8618_v57 = vsel %vm12744_vm5, %v8613_v25, %v8617_v0  ;;  %17361 = vst [vmem:[#allocation28_spill] sm:$0xff] %v16469_v8  ;;  %v8636_v31 = vor.u32 %v8635_v22, %v8631_v35  ;;  %v8653_v21 = vshll.u32 %v16463_v13, 16  ;;  %v8641_v19 = vrot.slane %v8639_v56, 5  ;;  %v16481_v6 = vld [vmem:[#allocation2 + $0xd0] sm:$0xf] }
 0x387   : > { %v10524_v10 = vcombine.low %v8608_v61, %v8618_v57  ;;  %v8627_v11 = vrot.slane %v8626_v30, 4  ;;  %v8646_v36 = vrot.slane %v8644_v42, 4  ;;  %v8657_v48 = vshrl.u32 %v16463_v13, 16 }
 0x388   : > { %v8637_v3 = vrot.slane %v8636_v31, 4  ;;  %v8649_v33 = vrot.slane %v8647_v54, 5  ;;  %v8655_v0 = vrot.slane %v8653_v21, 5  ;;  %v16479_v25 = vadd.f32 %v11047_v39, %v11046_v59 }
 0x389   : > { %9363 = vmatprep.mubr.bf16.mxu1 %v10524_v10  ;;  %v10508_v32 = vcombine.low %v16407_v26, %v16417_v46  ;;  %v8632_v30 = vsel %vm12744_vm5, %v8627_v11, %v8631_v35  ;;  %v8659_v56 = vrot.slane %v8657_v48, 4  ;;  %v8663_v61 = vshll.u32 %v16472_v16, 16 }
 0x38a   : > { %17362 = vst [vmem:[#allocation29_spill] sm:$0xff] %v16479_v25  ;;  %v11049_v22 = vpop.f32.mrb[192].mxu0  ;;  %v8642_v57 = vsel %vm12744_vm5, %v8637_v3, %v8641_v19  ;;  %v8650_v42 = vor.u32 %v8649_v33, %v8646_v36  ;;  %v8668_v59 = vshrl.u32 %v16477_v34, 16  ;;  %v8671_v39 = vshll.u32 %v16477_v34, 16 }
 0x38b   : > { %v11050_v10 = vpop.f32.mrb[193].mxu0  ;;  %v10525_v31 = vcombine.low %v8632_v30, %v8642_v57  ;;  %v8660_v54 = vor.u32 %v8659_v56, %v8655_v0  ;;  %v8677_v35 = vshll.u32 %v16481_v6, 16  ;;  %v8681_v17 = vshrl.u32 %v16481_v6, 16 }
 0x38c   : > { %9364 = vmatmul.mubr.bf16.gmra.mrb[176].mxu1 %v10508_v32  ;;  %v16492_v21 = vadd.f32 %v11050_v10, %v11049_v22  ;;  %v11052_v11 = vpop.f32.mrb[194].mxu0  ;;  %v8651_v48 = vrot.slane %v8650_v42, 4  ;;  %v8670_v25 = vrot.slane %v8668_v59, 4  ;;  %v8673_v8 = vrot.slane %v8671_v39, 5  ;;  %v16498_v32 = vld [vmem:[#allocation2 + $0xd4] sm:$0x1] }
 0x38d   : > { %v11053_v19 = vpop.f32.mrb[195].mxu0  ;;  %9371 = vmatprep.mubr.bf16.mxu1 %v10525_v31  ;;  %v8661_v36 = vrot.slane %v8660_v54, 4  ;;  %v8665_v3 = vrot.slane %v8663_v61, 5  ;;  %v8679_v33 = vrot.slane %v8677_v35, 5  ;;  %v8683_v30 = vrot.slane %v8681_v17, 4 }
 0x38e   : > { %v16496_v23 = vadd.f32 %v11053_v19, %v11052_v11  ;;  %v8656_v56 = vsel %vm12744_vm5, %v8651_v48, %v8655_v0  ;;  %v8674_v57 = vor.u32 %v8673_v8, %v8670_v25  ;;  %v10509_v10 = vcombine.low %v16429_v27, %v16440_v2  ;;  %v12375_v54 = vld [vmem:[#allocation2 + $0x1c] sm:$0xf]  ;;  %v12376_v0 = vld [vmem:[#allocation2 + $0x28] sm:$0xf] }
 0x38f   : > { %v8666_v22 = vsel %vm12744_vm5, %v8661_v36, %v8665_v3  ;;  %v8684_v42 = vor.u32 %v8683_v30, %v8679_v33  ;;  %v8687_v59 = vshll.u32 %v16498_v32, 16  ;;  %v8741_v17 = vrot.slane %v12375_v54, 5  ;;  %v12377_v36 = vld [vmem:[#allocation2 + $0x34] sm:$0xf]  ;;  %v12378_v54 = vld [vmem:[#allocation2 + $0x18] sm:$0xf] }
 0x390   : > { %17363 = vst [vmem:[#allocation48_spill] sm:$0xff] %v16496_v23  ;;  %v10526_v61 = vcombine.low %v8656_v56, %v8666_v22  ;;  %v8675_v39 = vrot.slane %v8674_v57, 4  ;;  %v8748_v48 = vrot.slane %v12376_v0, 5  ;;  %v8755_v8 = vrot.slane %v12377_v36, 5  ;;  %v12379_v36 = vld [vmem:[#allocation2 + $0x20] sm:$0x1] }
 0x391   : > { %v8685_v31 = vrot.slane %v8684_v42, 4  ;;  %v8689_v35 = vrot.slane %v8687_v59, 5  ;;  %v8743_v22 = vrot.slane %v8741_v17, 4  ;;  %v10510_v42 = vcombine.low %v16461_v51, %v16463_v13 }
 0x392   : > { %v8680_v25 = vsel %vm12744_vm5, %v8675_v39, %v8679_v33  ;;  %v8750_v59 = vrot.slane %v8748_v48, 4  ;;  %v10480_v0 = vrot.slane %v12378_v54, 9  ;;  %v8744_v23 = vrot.slane %v12379_v36, 5  ;;  %v12380_v39 = vld [vmem:[#allocation2 + $0x2c] sm:$0x1] }
 0x393   : > { %v8690_v3 = vsel %vm12744_vm5, %v8685_v31, %v8689_v35  ;;  %v8757_v33 = vrot.slane %v8755_v8, 4  ;;  %v8751_v12 = vrot.slane %v12380_v39, 5  ;;  %v12381_v31 = vld [vmem:[#allocation2 + $0x24] sm:$0xf]  ;;  %v8769_v36 = vrot.slane %v16109_v47, 5 }
 0x394   : > { %9372 = vmatmul.mubr.bf16.gmra.mrb[180].mxu1 %v10509_v10  ;;  %v10481_v35 = vrot.slane %v12381_v31, 9  ;;  %v16543_v54 = vld [vmem:[#allocation2 + $0x3c] sm:$0xf] }
 0x395   : > { %9379 = vmatprep.mubr.bf16.mxu1 %v10526_v61  ;;  %v10527_v61 = vcombine.low %v8680_v25, %v8690_v3  ;;  %v16521_v25 = vsel %vm13413_vm8, %v8750_v59, %v8751_v12  ;;  %v16523_v3 = vld [vmem:[#allocation2 + $0x40] sm:$0xf] }
 0x396   : > { %v11055_v11 = vpop.f32.mrb[196].mxu0  ;;  %v8749_v59 = vsel %vm13413_vm8, %v10481_v35, %v8748_v48 }
 0x397   : > { %v11056_v19 = vpop.f32.mrb[197].mxu0 }
 0x398   : > { %v16511_v30 = vadd.f32 %v11056_v19, %v11055_v11  ;;  %v11058_v56 = vpop.f32.mrb[198].mxu0  ;;  %v8745_v11 = vsel %vm13413_vm8, %v8743_v22, %v8744_v23  ;;  %v12382_v19 = vld [vmem:[#allocation2 + $0x30] sm:$0xf] }
 0x399   : > { %v11059_v57 = vpop.f32.mrb[199].mxu0 }
 0x39a   : > { %17364 = vst [vmem:[#allocation49_spill] sm:$0xff] %v16511_v30  ;;  %v16515_v10 = vadd.f32 %v11059_v57, %v11058_v56  ;;  %v10482_v30 = vrot.slane %v12382_v19, 9  ;;  %v12383_v56 = vld [vmem:[#allocation2 + $0x38] sm:$0x1]  ;;  %v10489_v19 = vrot.slane %v16293_v20, 9  ;;  %v8804_v20 = vrot.slane %v16297_v62, 5 }
 0x39b   : > { %v8758_v57 = vrot.slane %v12383_v56, 5  ;;  %v10529_v56 = vcombine.low %v8749_v59, %v16521_v25  ;;  %v16554_v25 = vrot.slane %v8769_v36, 4  ;;  %v10491_v62 = vrot.slane %v16381_v37, 9 }
 0x39c   : > { %17365 = vst [vmem:[#allocation38_spill] sm:$0xff] %v16515_v10  ;;  %9380 = vmatmul.mubr.bf16.gmra.mrb[184].mxu1 %v10510_v42  ;;  %v10511_v42 = vcombine.low %v16477_v34, %v16481_v6  ;;  %v8806_v59 = vrot.slane %v8804_v20, 4  ;;  %v8828_v37 = vrot.slane %v16419_v15, 5 }
 0x39d   : > { %9387 = vmatprep.mubr.bf16.mxu1 %v10527_v61  ;;  %v8742_v61 = vsel %vm13413_vm8, %v10480_v0, %v8741_v17  ;;  %v16532_v22 = vsel %vm13413_vm8, %v8757_v33, %v8758_v57  ;;  %v8756_v17 = vsel %vm13413_vm8, %v10482_v30, %v8755_v8  ;;  %v10483_v33 = vrot.slane %v16543_v54, 9  ;;  %v12386_v57 = vld [vmem:[#allocation2 + $0x44] sm:$0x1] }
 0x39e   : > { %v11061_v10 = vpop.f32.mrb[200].mxu0  ;;  %v10528_v39 = vcombine.low %v8742_v61, %v8745_v11  ;;  %v8765_v11 = vrot.slane %v12386_v57, 5  ;;  %v10530_v61 = vcombine.low %v8756_v17, %v16532_v22  ;;  %v8807_v8 = vrot.slane %v16310_v28, 5 }
 0x39f   : > { %v11062_v23 = vpop.f32.mrb[201].mxu0  ;;  %v10490_v30 = vrot.slane %v16335_v9, 9  ;;  %v16561_v22 = vsel %vm13413_vm8, %v10489_v19, %v8804_v20  ;;  %v8818_v9 = vrot.slane %v16387_v45, 5  ;;  %v10492_v19 = vrot.slane %v16407_v26, 9 }
 0x3a0   : > { %v16537_v12 = vadd.f32 %v11062_v23, %v11061_v10  ;;  %v11064_v31 = vpop.f32.mrb[202].mxu0  ;;  %v17366_v10 = vrot.slane %v16523_v3, 5  ;;  %v8811_v23 = vrot.slane %v16337_v60, 5  ;;  %v8821_v60 = vrot.slane %v16398_v49, 5 }
 0x3a1   : > { %v11065_v0 = vpop.f32.mrb[203].mxu0  ;;  %v16586_v45 = vsel %vm13413_vm8, %v10491_v62, %v8818_v9  ;;  %v8820_v49 = vrot.slane %v8818_v9, 4  ;;  %v10493_v20 = vrot.slane %v16429_v27, 9  ;;  %v10494_v27 = vrot.slane %v16461_v51, 9 }
 0x3a2   : > { %v16547_v48 = vadd.f32 %v11065_v0, %v11064_v31  ;;  %v8764_v35 = vrot.slane %v17366_v10, 4  ;;  %v8814_v31 = vrot.slane %v16347_v24, 5  ;;  %v16567_v17 = vsel %vm13413_vm8, %v10490_v30, %v8811_v23 }
 0x3a3   : > { %v8813_v28 = vrot.slane %v8811_v23, 4  ;;  %v8825_v24 = vrot.slane %v16417_v46, 5  ;;  %v16599_v23 = vsel %vm13413_vm8, %v8820_v49, %v8821_v60  ;;  %v8842_v51 = vrot.slane %v16472_v16, 5  ;;  %v12387_v49 = vld [vmem:[#allocation2 + $0x48] sm:$0xf] }
 0x3a4   : > { %9388 = vmatmul.mubr.bf16.gmra.mrb[188].mxu1 %v10511_v42  ;;  %v16573_v42 = vsel %vm13413_vm8, %v8806_v59, %v8807_v8  ;;  %v8832_v59 = vrot.slane %v16440_v2, 5 }
 0x3a5   : > { %11649 = vmatprep.mubr.bf16.mxu1 %v10528_v39  ;;  %v10537_v0 = vcombine.low %v16561_v22, %v16573_v42  ;;  %v16582_v57 = vsel %vm13413_vm8, %v8813_v28, %v8814_v31  ;;  %v16592_v46 = vsel %vm13413_vm8, %v10492_v19, %v8825_v24  ;;  %v8827_v15 = vrot.slane %v8825_v24, 4 }
 0x3a6   : > { %v10538_v26 = vcombine.low %v16567_v17, %v16582_v57  ;;  %v8835_v31 = vrot.slane %v16446_v52, 5  ;;  %v10539_v28 = vcombine.low %v16586_v45, %v16599_v23  ;;  %v8839_v19 = vrot.slane %v16463_v13, 5 }
 0x3a7   : > { %v11067_v39 = vpop.f32.mrb[204].mxu0  ;;  %v16607_v9 = vsel %vm13413_vm8, %v8827_v15, %v8828_v37  ;;  %v16617_v2 = vsel %vm13413_vm8, %v10493_v20, %v8832_v59  ;;  %v8834_v52 = vrot.slane %v8832_v59, 4  ;;  %v10495_v13 = vrot.slane %v16477_v34, 9  ;;  %v12388_v15 = vld [vmem:[#allocation2 + $0x50] sm:$0x1] }
 0x3a8   : > { %v11068_v10 = vpop.f32.mrb[205].mxu0  ;;  %v10540_v60 = vcombine.low %v16592_v46, %v16607_v9  ;;  %v8841_v37 = vrot.slane %v8839_v19, 4  ;;  %v8766_v59 = vsel %vm13413_vm8, %v8764_v35, %v8765_v11  ;;  %v8849_v11 = vrot.slane %v16498_v32, 5 }
 0x3a9   : > { %v16595_v8 = vadd.f32 %v11068_v10, %v11067_v39  ;;  %v11070_v30 = vpop.f32.mrb[206].mxu0  ;;  %v16621_v39 = vsel %vm13413_vm8, %v10494_v27, %v8839_v19  ;;  %v10484_v10 = vrot.slane %v12387_v49, 9  ;;  %v16627_v20 = vsel %vm13413_vm8, %v8834_v52, %v8835_v31 }
 0x3aa   : > { %v11071_v62 = vpop.f32.mrb[207].mxu0  ;;  %v10541_v16 = vcombine.low %v16617_v2, %v16627_v20  ;;  %v16636_v34 = vsel %vm13413_vm8, %v8841_v37, %v8842_v51  ;;  %v8783_v49 = vrot.slane %v16178_v41, 5  ;;  %v17367_v37 = vrot.slane %v16523_v3, 5 }
 0x3ab   : > { %v16611_v24 = vadd.f32 %v11071_v62, %v11070_v30  ;;  %v8772_v30 = vrot.slane %v12388_v15, 5  ;;  %v12389_v62 = vld [vmem:[#allocation2 + $0x58] sm:$0xf]  ;;  %v10542_v19 = vcombine.low %v16621_v39, %v16636_v34  ;;  %v8770_v41 = vsel %vm13413_vm8, %v10484_v10, %v8769_v36 }
 0x3ac   : > { %11650 = vmatmul.mubr.bf16.vlgmr.msra.gmra.mrb[96].mxu1 %v10529_v56  ;;  %v8846_v56 = vrot.slane %v16481_v6, 5  ;;  %v8776_v27 = vrot.slane %v12389_v62, 5  ;;  %v8763_v51 = vsel %vm13413_vm8, %v10483_v33, %v17367_v37  ;;  %v8785_v62 = vrot.slane %v8783_v49, 4 }
 0x3ad   : > { %11653 = vmatprep.mubr.bf16.mxu1 %v10530_v61  ;;  %v8773_v35 = vsel %vm13413_vm8, %v16554_v25, %v8772_v30  ;;  %v8786_v37 = vrot.slane %v16184_v53, 5 }
 0x3ae   : > { %v16642_v31 = vsel %vm13413_vm8, %v10495_v13, %v8846_v56  ;;  %v8848_v6 = vrot.slane %v8846_v56, 4  ;;  %v10531_v56 = vcombine.low %v8763_v51, %v8766_v59  ;;  %v10532_v54 = vcombine.low %v8770_v41, %v8773_v35 }
 0x3af   : > { %v11073_v61 = vpop.f32.mrb[208].mxu0  ;;  %v8778_v30 = vrot.slane %v8776_v27, 4  ;;  %v8790_v35 = vrot.slane %v16206_v55, 5  ;;  %v8787_v51 = vsel %vm13413_vm8, %v8785_v62, %v8786_v37 }
 0x3b0   : > { %v11074_v52 = vpop.f32.mrb[209].mxu0  ;;  %v16659_v32 = vsel %vm13413_vm8, %v8848_v6, %v8849_v11  ;;  %v12391_v11 = vld [vmem:[#allocation2 + $0x5c] sm:$0x1] }
 0x3b1   : > { %v16655_v15 = vadd.f32 %v11074_v52, %v11073_v61  ;;  %v11076_v13 = vpop.f32.mrb[210].mxu0  ;;  %v10543_v3 = vcombine.low %v16642_v31, %v16659_v32  ;;  %v12390_v61 = vld [vmem:[#allocation2 + $0x54] sm:$0xf]  ;;  %v8779_v59 = vrot.slane %v12391_v11, 5  ;;  %v12392_v52 = vld [vmem:[#allocation2 + $0x60] sm:$0xf] }
 0x3b2   : > { %v11077_v25 = vpop.f32.mrb[211].mxu0  ;;  %v10485_v6 = vrot.slane %v12390_v61, 9  ;;  %v10486_v47 = vrot.slane %v12392_v52, 9  ;;  %v8793_v52 = vrot.slane %v16224_v44, 5 }
 0x3b3   : > { %v16667_v33 = vadd.f32 %v11077_v25, %v11076_v13  ;;  %v8780_v36 = vsel %vm13413_vm8, %v8778_v30, %v8779_v59  ;;  %v8792_v59 = vrot.slane %v8790_v35, 4 }
 0x3b4   : > { %11654 = vmatmul.mubr.bf16.gmra.mrb[100].mxu1 %v10531_v56  ;;  %v8797_v56 = vrot.slane %v16263_v29, 5  ;;  %v8777_v41 = vsel %vm13413_vm8, %v10485_v6, %v8776_v27  ;;  %v8784_v53 = vsel %vm13413_vm8, %v10486_v47, %v8783_v49  ;;  %v10487_v29 = vrot.slane %v16204_v63, 9 }
 0x3b5   : > { %11657 = vmatprep.mubr.bf16.mxu1 %v10532_v54  ;;  %v10533_v61 = vcombine.low %v8777_v41, %v8780_v36  ;;  %v10534_v11 = vcombine.low %v8784_v53, %v8787_v51  ;;  %v10488_v27 = vrot.slane %v16249_v14, 9  ;;  %v8800_v6 = vrot.slane %v16254_v18, 5 }
 0x3b6   : > { %v8799_v62 = vrot.slane %v8797_v56, 4  ;;  %v8794_v37 = vsel %vm13413_vm8, %v8792_v59, %v8793_v52 }
 0x3b7   : > { %v11079_v10 = vpop.f32.mrb[212].mxu0  ;;  %v8798_v44 = vsel %vm13413_vm8, %v10488_v27, %v8797_v56 }
 0x3b8   : > { %v11080_v13 = vpop.f32.mrb[213].mxu0  ;;  %v8801_v47 = vsel %vm13413_vm8, %v8799_v62, %v8800_v6 }
 0x3b9   : > { %v16678_v25 = vadd.f32 %v11080_v13, %v11079_v10  ;;  %v11082_v54 = vpop.f32.mrb[214].mxu0  ;;  %v8791_v10 = vsel %vm13413_vm8, %v10487_v29, %v8790_v35  ;;  %v10536_v18 = vcombine.low %v8798_v44, %v8801_v47 }
 0x3ba   : > { %v11083_v30 = vpop.f32.mrb[215].mxu0  ;;  %v10535_v13 = vcombine.low %v8791_v10, %v8794_v37 }
 0x3bb   : > { %v16682_v55 = vadd.f32 %v11083_v30, %v11082_v54 }
 0x3bc   : > { %11658 = vmatmul.mubr.bf16.gmra.mrb[104].mxu1 %v10533_v61 }
 0x3bd   : > { %11661 = vmatprep.mubr.bf16.mxu1 %v10534_v11 }
 0x3bf   : > { %v11085_v49 = vpop.f32.mrb[216].mxu0 }
 0x3c0   : > { %v11086_v36 = vpop.f32.mrb[217].mxu0 }
 0x3c1   : > { %v16694_v51 = vadd.f32 %v11086_v36, %v11085_v49  ;;  %v11088_v63 = vpop.f32.mrb[218].mxu0 }
 0x3c2   : > { %v11089_v14 = vpop.f32.mrb[219].mxu0 }
 0x3c3   : > { %v16698_v41 = vadd.f32 %v11089_v14, %v11088_v63 }
 0x3c4   : > { %11662 = vmatmul.mubr.bf16.gmra.mrb[108].mxu1 %v10535_v13  ;;  %v17369_v13 = vld [vmem:[#allocation31_spill] sm:$0xff] }
 0x3c5   : > { %11665 = vmatprep.mubr.bf16.mxu1 %v10536_v18 }
 0x3c7   : > { %v11091_v54 = vpop.f32.mrb[220].mxu0 }
 0x3c8   : > { %v11092_v61 = vpop.f32.mrb[221].mxu0 }
 0x3c9   : > { %v16700_v53 = vadd.f32 %v11092_v61, %v11091_v54  ;;  %v11094_v30 = vpop.f32.mrb[222].mxu0 }
 0x3ca   : > { %v11095_v11 = vpop.f32.mrb[223].mxu0 }
 0x3cb   : > { %v16702_v35 = vadd.f32 %v11095_v11, %v11094_v30 }
 0x3cc   : > { %11666 = vmatmul.mubr.bf16.gmra.mrb[112].mxu1 %v10537_v0 }
 0x3cd   : > { %11669 = vmatprep.mubr.bf16.mxu1 %v10538_v26 }
 0x3cf   : > { %v11137_v38 = vpop.f32.mrb[224].mxu0 }
 0x3d0   : > { %v11138_v56 = vpop.f32.mrb[225].mxu0 }
 0x3d1   : > { %v11139_v59 = vadd.f32 %v11138_v56, %v11137_v38  ;;  %v11140_v62 = vpop.f32.mrb[226].mxu0 }
 0x3d2   : > { %v11141_v29 = vpop.f32.mrb[227].mxu0 }
 0x3d3   : > { %v16711_v52 = vadd.f32 %v11139_v59, %v16217_v1  ;;  %v11142_v27 = vadd.f32 %v11141_v29, %v11140_v62  ;;  %v17370_v62 = vld [vmem:[#allocation25_spill] sm:$0xff] }
 0x3d4   : > { %11670 = vmatmul.mubr.bf16.gmra.mrb[116].mxu1 %v10539_v28 }
 0x3d5   : > { %11673 = vmatprep.mubr.bf16.mxu1 %v10540_v60  ;;  %v16720_v22 = vadd.f32 %v11142_v27, %v16243_v50 }
 0x3d7   : > { %v11143_v17 = vpop.f32.mrb[228].mxu0 }
 0x3d8   : > { %v11144_v42 = vpop.f32.mrb[229].mxu0 }
 0x3d9   : > { %v11145_v0 = vadd.f32 %v11144_v42, %v11143_v17  ;;  %v11146_v57 = vpop.f32.mrb[230].mxu0 }
 0x3da   : > { %v11147_v26 = vpop.f32.mrb[231].mxu0 }
 0x3db   : > { %v11809_v1 = vadd.f32 %v11145_v0, %v16261_v40  ;;  %v11148_v6 = vadd.f32 %v11147_v26, %v11146_v57  ;;  %v17371_v57 = vld [vmem:[#allocation27_spill] sm:$0xff] }
 0x3dc   : > { %11674 = vmatmul.mubr.bf16.gmra.mrb[120].mxu1 %v10541_v16 }
 0x3dd   : > { %11677 = vmatprep.mubr.bf16.mxu1 %v10542_v19  ;;  %v11815_v45 = vadd.f32 %v11148_v6, %v16282_v43 }
 0x3df   : > { %v11149_v50 = vpop.f32.mrb[232].mxu0 }
 0x3e0   : > { %v11150_v46 = vpop.f32.mrb[233].mxu0 }
 0x3e1   : > { %v11151_v23 = vadd.f32 %v11150_v46, %v11149_v50  ;;  %v11152_v28 = vpop.f32.mrb[234].mxu0 }
 0x3e2   : > { %v11153_v9 = vpop.f32.mrb[235].mxu0 }
 0x3e3   : > { %v16731_v60 = vadd.f32 %v11151_v23, %v16303_v58  ;;  %v11154_v40 = vadd.f32 %v11153_v9, %v11152_v28 }
 0x3e4   : > { %11678 = vmatmul.mubr.bf16.gmra.mrb[124].mxu1 %v10543_v3  ;;  %v17368_v3 = vld [vmem:[#allocation30_spill] sm:$0xff] }
 0x3e5   : > { %v16737_v2 = vadd.f32 %v11154_v40, %v16327_v5 }
 0x3e7   : > { %v11155_v39 = vpop.f32.mrb[236].mxu0 }
 0x3e8   : > { %v11156_v20 = vpop.f32.mrb[237].mxu0 }
 0x3e9   : > { %v11157_v16 = vadd.f32 %v11156_v20, %v11155_v39  ;;  %v11158_v43 = vpop.f32.mrb[238].mxu0  ;;  %v17372_v20 = vld [vmem:[#allocation32_spill] sm:$0xff] }
 0x3ea   : > { %v11159_v34 = vpop.f32.mrb[239].mxu0 }
 0x3eb   : > { %v16740_v19 = vadd.f32 %v11157_v16, %v16345_v7  ;;  %v11160_v37 = vadd.f32 %v11159_v34, %v11158_v43 }
 0x3ed   : > { %v16743_v58 = vadd.f32 %v11160_v37, %v16363_v4 }
 0x3ef   : > { %v11161_v49 = vpop.f32.mrb[240].mxu0 }
 0x3f0   : > { %v11162_v47 = vpop.f32.mrb[241].mxu0 }
 0x3f1   : > { %v11163_v36 = vadd.f32 %v11162_v47, %v11161_v49  ;;  %v11164_v31 = vpop.f32.mrb[242].mxu0  ;;  %v17373_v49 = vld [vmem:[#allocation33_spill] sm:$0xff] }
 0x3f2   : > { %v11165_v32 = vpop.f32.mrb[243].mxu0 }
 0x3f3   : > { %v16746_v5 = vadd.f32 %v11163_v36, %v17368_v3  ;;  %v11166_v10 = vadd.f32 %v11165_v32, %v11164_v31  ;;  %v11273_v63 = vpop.f32.mrb[128].mxu1 }
 0x3f4   : > { %v11274_v14 = vpop.f32.mrb[129].mxu1 }
 0x3f5   : > { %v16749_v44 = vadd.f32 %v11166_v10, %v17369_v13  ;;  %v11275_v7 = vadd.f32 %v11274_v14, %v11273_v63  ;;  %v11276_v18 = vpop.f32.mrb[130].mxu1 }
 0x3f6   : > { %v11277_v54 = vpop.f32.mrb[131].mxu1 }
 0x3f7   : > { %v11278_v61 = vadd.f32 %v11277_v54, %v11276_v18  ;;  %v16766_v32 = vadd.f32 %v16711_v52, %v11275_v7  ;;  %v17375_v7 = vld [vmem:[#allocation29_spill] sm:$0xff] }
 0x3f8   : > { %v11167_v4 = vpop.f32.mrb[244].mxu0 }
 0x3f9   : > { %v11168_v30 = vpop.f32.mrb[245].mxu0  ;;  %v16771_v63 = vadd.f32 %v16720_v22, %v11278_v61 }
 0x3fa   : > { %v11169_v11 = vadd.f32 %v11168_v30, %v11167_v4  ;;  %v11170_v38 = vpop.f32.mrb[246].mxu0  ;;  %v17374_v30 = vld [vmem:[#allocation28_spill] sm:$0xff] }
 0x3fb   : > { %v11171_v56 = vpop.f32.mrb[247].mxu0  ;;  %v11279_v59 = vpop.f32.mrb[132].mxu1 }
 0x3fc   : > { %v16752_v29 = vadd.f32 %v11169_v11, %v17370_v62  ;;  %v11172_v27 = vadd.f32 %v11171_v56, %v11170_v38  ;;  %v11280_v17 = vpop.f32.mrb[133].mxu1 }
 0x3fd   : > { %v11281_v42 = vadd.f32 %v11280_v17, %v11279_v59  ;;  %v11282_v0 = vpop.f32.mrb[134].mxu1 }
 0x3fe   : > { %v16755_v26 = vadd.f32 %v11172_v27, %v17371_v57  ;;  %v11283_v6 = vpop.f32.mrb[135].mxu1 }
 0x3ff   : > { %v11284_v50 = vadd.f32 %v11283_v6, %v11282_v0  ;;  %v16757_v46 = vadd.f32 %v11809_v1, %v11281_v42 }
 0x400   : > { %v11173_v23 = vpop.f32.mrb[248].mxu0 }
 0x401   : > { %v11174_v28 = vpop.f32.mrb[249].mxu0  ;;  %v16768_v3 = vadd.f32 %v11815_v45, %v11284_v50 }
 0x402   : > { %v11175_v9 = vadd.f32 %v11174_v28, %v11173_v23  ;;  %v11176_v40 = vpop.f32.mrb[250].mxu0 }
 0x403   : > { %v11177_v39 = vpop.f32.mrb[251].mxu0 }
 0x404   : > { %v16760_v16 = vadd.f32 %v11175_v9, %v17372_v20  ;;  %v11178_v43 = vadd.f32 %v11177_v39, %v11176_v40 }
 0x405   : > { %v11285_v34 = vpop.f32.mrb[136].mxu1 }
 0x406   : > { %v11286_v37 = vpop.f32.mrb[137].mxu1  ;;  %v16763_v47 = vadd.f32 %v11178_v43, %v17373_v49 }
 0x407   : > { %v11287_v36 = vadd.f32 %v11286_v37, %v11285_v34  ;;  %v11288_v31 = vpop.f32.mrb[138].mxu1 }
 0x408   : > { %v11289_v1 = vpop.f32.mrb[139].mxu1 }
 0x409   : > { %v11290_v10 = vadd.f32 %v11289_v1, %v11288_v31  ;;  %v11179_v13 = vpop.f32.mrb[252].mxu0  ;;  %v16777_v52 = vadd.f32 %v16731_v60, %v11287_v36 }
 0x40a   : > { %v11180_v14 = vpop.f32.mrb[253].mxu0 }
 0x40b   : > { %v11181_v18 = vadd.f32 %v11180_v14, %v11179_v13  ;;  %v11182_v54 = vpop.f32.mrb[254].mxu0  ;;  %v16783_v61 = vadd.f32 %v16737_v2, %v11290_v10  ;;  %v17376_v2 = vld [vmem:[#allocation48_spill] sm:$0xff]  ;;  %v17377_v13 = vld [vmem:[#allocation49_spill] sm:$0xff] }
 0x40c   : > { %v11183_v4 = vpop.f32.mrb[255].mxu0 }
 0x40d   : > { %v16774_v11 = vadd.f32 %v11181_v18, %v17374_v30  ;;  %v11184_v38 = vadd.f32 %v11183_v4, %v11182_v54  ;;  %v17378_v4 = vld [vmem:[#allocation38_spill] sm:$0xff] }
 0x40f   : > { %v11291_v56 = vpop.f32.mrb[140].mxu1  ;;  %v16780_v45 = vadd.f32 %v11184_v38, %v17375_v7 }
 0x410   : > { %v11292_v59 = vpop.f32.mrb[141].mxu1 }
 0x411   : > { %v11293_v62 = vadd.f32 %v11292_v59, %v11291_v56  ;;  %v11294_v22 = vpop.f32.mrb[142].mxu1 }
 0x412   : > { %v11295_v27 = vpop.f32.mrb[143].mxu1  ;;  %v11185_v17 = vpop.f32.mrb[0].mxu0 }
 0x413   : > { %v11296_v42 = vadd.f32 %v11295_v27, %v11294_v22  ;;  %v11186_v0 = vpop.f32.mrb[1].mxu0  ;;  %v16786_v57 = vadd.f32 %v16740_v19, %v11293_v62 }
 0x414   : > { %v11187_v6 = vadd.f32 %v11186_v0, %v11185_v17  ;;  %v11188_v50 = vpop.f32.mrb[2].mxu0 }
 0x415   : > { %v11189_v60 = vpop.f32.mrb[3].mxu0  ;;  %v16789_v23 = vadd.f32 %v16743_v58, %v11296_v42 }
 0x416   : > { %v16792_v28 = vadd.f32 %v11187_v6, %v16492_v21  ;;  %v11190_v9 = vadd.f32 %v11189_v60, %v11188_v50 }
 0x417   : > { %v11297_v40 = vpop.f32.mrb[144].mxu1 }
 0x418   : > { %v16795_v39 = vadd.f32 %v11190_v9, %v17376_v2  ;;  %v11298_v20 = vpop.f32.mrb[145].mxu1 }
 0x419   : > { %v11299_v43 = vadd.f32 %v11298_v20, %v11297_v40  ;;  %v11300_v34 = vpop.f32.mrb[146].mxu1 }
 0x41a   : > { %v11301_v37 = vpop.f32.mrb[147].mxu1 }
 0x41b   : > { %v11302_v19 = vadd.f32 %v11301_v37, %v11300_v34  ;;  %v16798_v49 = vadd.f32 %v16746_v5, %v11299_v43 }
 0x41c   : > { %v11191_v36 = vpop.f32.mrb[4].mxu0 }
 0x41d   : > { %v11192_v31 = vpop.f32.mrb[5].mxu0  ;;  %v16801_v58 = vadd.f32 %v16749_v44, %v11302_v19 }
 0x41e   : > { %v11193_v21 = vadd.f32 %v11192_v31, %v11191_v36  ;;  %v11194_v1 = vpop.f32.mrb[6].mxu0 }
 0x41f   : > { %v11195_v10 = vpop.f32.mrb[7].mxu0 }
 0x420   : > { %v16804_v14 = vadd.f32 %v11193_v21, %v17377_v13  ;;  %v11196_v18 = vadd.f32 %v11195_v10, %v11194_v1  ;;  %v11303_v54 = vpop.f32.mrb[148].mxu1 }
 0x421   : > { %v11304_v38 = vpop.f32.mrb[149].mxu1 }
 0x422   : > { %v16807_v30 = vadd.f32 %v11196_v18, %v17378_v4  ;;  %v11305_v56 = vadd.f32 %v11304_v38, %v11303_v54  ;;  %v11306_v5 = vpop.f32.mrb[150].mxu1 }
 0x423   : > { %v11307_v7 = vpop.f32.mrb[151].mxu1 }
 0x424   : > { %v11308_v62 = vadd.f32 %v11307_v7, %v11306_v5  ;;  %v16810_v44 = vadd.f32 %v16752_v29, %v11305_v56 }
 0x425   : > { %v11197_v59 = vpop.f32.mrb[8].mxu0 }
 0x426   : > { %v11198_v22 = vpop.f32.mrb[9].mxu0  ;;  %v16813_v0 = vadd.f32 %v16755_v26, %v11308_v62 }
 0x427   : > { %v11199_v27 = vadd.f32 %v11198_v22, %v11197_v59  ;;  %v11200_v17 = vpop.f32.mrb[10].mxu0 }
 0x428   : > { %v11201_v42 = vpop.f32.mrb[11].mxu0  ;;  %v11309_v60 = vpop.f32.mrb[152].mxu1 }
 0x429   : > { %v16816_v6 = vadd.f32 %v11199_v27, %v16537_v12  ;;  %v11202_v50 = vadd.f32 %v11201_v42, %v11200_v17  ;;  %v11310_v40 = vpop.f32.mrb[153].mxu1 }
 0x42a   : > { %v11311_v2 = vadd.f32 %v11310_v40, %v11309_v60  ;;  %v11312_v20 = vpop.f32.mrb[154].mxu1 }
 0x42b   : > { %v16819_v9 = vadd.f32 %v11202_v50, %v16547_v48  ;;  %v11313_v43 = vpop.f32.mrb[155].mxu1 }
 0x42c   : > { %v11314_v34 = vadd.f32 %v11313_v43, %v11312_v20  ;;  %v16822_v19 = vadd.f32 %v16760_v16, %v11311_v2 }
 0x42d   : > { %v11203_v29 = vpop.f32.mrb[12].mxu0 }
 0x42e   : > { %v11204_v37 = vpop.f32.mrb[13].mxu0  ;;  %v16825_v12 = vadd.f32 %v16763_v47, %v11314_v34 }
 0x42f   : > { %v11205_v26 = vadd.f32 %v11204_v37, %v11203_v29  ;;  %v11206_v36 = vpop.f32.mrb[14].mxu0 }
 0x430   : > { %v11207_v31 = vpop.f32.mrb[15].mxu0 }
 0x431   : > { %v16828_v21 = vadd.f32 %v11205_v26, %v16595_v8  ;;  %v11208_v48 = vadd.f32 %v11207_v31, %v11206_v36  ;;  %v11315_v1 = vpop.f32.mrb[156].mxu1 }
 0x432   : > { %v11316_v13 = vpop.f32.mrb[157].mxu1 }
 0x433   : > { %v16831_v10 = vadd.f32 %v11208_v48, %v16611_v24  ;;  %v11317_v18 = vadd.f32 %v11316_v13, %v11315_v1  ;;  %v11318_v54 = vpop.f32.mrb[158].mxu1 }
 0x434   : > { %v11319_v4 = vpop.f32.mrb[159].mxu1 }
 0x435   : > { %v11320_v16 = vadd.f32 %v11319_v4, %v11318_v54  ;;  %v16834_v38 = vadd.f32 %v16774_v11, %v11317_v18 }
 0x437   : > { %v16837_v47 = vadd.f32 %v16780_v45, %v11320_v16 }
 0x438   : > { %v11209_v56 = vpop.f32.mrb[16].mxu0 }
 0x439   : > { %v11210_v5 = vpop.f32.mrb[17].mxu0 }
 0x43a   : > { %v11211_v8 = vadd.f32 %v11210_v5, %v11209_v56  ;;  %v11212_v7 = vpop.f32.mrb[18].mxu0 }
 0x43b   : > { %v11213_v59 = vpop.f32.mrb[19].mxu0  ;;  %v11321_v22 = vpop.f32.mrb[160].mxu1 }
 0x43c   : > { %v16840_v62 = vadd.f32 %v11211_v8, %v16655_v15  ;;  %v11214_v24 = vadd.f32 %v11213_v59, %v11212_v7  ;;  %v11322_v17 = vpop.f32.mrb[161].mxu1 }
 0x43d   : > { %v11323_v42 = vadd.f32 %v11322_v17, %v11321_v22  ;;  %v11324_v11 = vpop.f32.mrb[162].mxu1 }
 0x43e   : > { %v16843_v27 = vadd.f32 %v11214_v24, %v16667_v33  ;;  %v11325_v50 = vpop.f32.mrb[163].mxu1 }
 0x43f   : > { %v11326_v60 = vadd.f32 %v11325_v50, %v11324_v11  ;;  %v16846_v40 = vadd.f32 %v16792_v28, %v11323_v42 }
 0x441   : > { %v16849_v20 = vadd.f32 %v16795_v39, %v11326_v60 }
 0x442   : > { %v11215_v45 = vpop.f32.mrb[20].mxu0 }
 0x443   : > { %v11216_v2 = vpop.f32.mrb[21].mxu0 }
 0x444   : > { %v11217_v15 = vadd.f32 %v11216_v2, %v11215_v45  ;;  %v11218_v43 = vpop.f32.mrb[22].mxu0 }
 0x445   : > { %v11219_v29 = vpop.f32.mrb[23].mxu0  ;;  %v11327_v37 = vpop.f32.mrb[164].mxu1 }
 0x446   : > { %v11881_v34 = vadd.f32 %v11217_v15, %v16678_v25  ;;  %v11220_v33 = vadd.f32 %v11219_v29, %v11218_v43  ;;  %v11328_v26 = vpop.f32.mrb[165].mxu1 }
 0x447   : > { %v11329_v31 = vadd.f32 %v11328_v26, %v11327_v37  ;;  %v11330_v48 = vpop.f32.mrb[166].mxu1 }
 0x448   : > { %v11887_v36 = vadd.f32 %v11220_v33, %v16682_v55  ;;  %v11331_v1 = vpop.f32.mrb[167].mxu1 }
 0x449   : > { %v11332_v28 = vadd.f32 %v11331_v1, %v11330_v48  ;;  %v16854_v18 = vadd.f32 %v16804_v14, %v11329_v31 }
 0x44a   : > { %v11221_v13 = vpop.f32.mrb[24].mxu0 }
 0x44b   : > { %v11222_v39 = vpop.f32.mrb[25].mxu0  ;;  %v16857_v16 = vadd.f32 %v16807_v30, %v11332_v28 }
 0x44c   : > { %v11223_v54 = vadd.f32 %v11222_v39, %v11221_v13  ;;  %v11224_v4 = vpop.f32.mrb[26].mxu0 }
 0x44d   : > { %v11225_v25 = vpop.f32.mrb[27].mxu0 }
 0x44e   : > { %v11896_v56 = vadd.f32 %v11223_v54, %v16694_v51  ;;  %v11226_v5 = vadd.f32 %v11225_v25, %v11224_v4  ;;  %v11333_v8 = vpop.f32.mrb[168].mxu1 }
 0x44f   : > { %v11334_v7 = vpop.f32.mrb[169].mxu1 }
 0x450   : > { %v11902_v55 = vadd.f32 %v11226_v5, %v16698_v41  ;;  %v11335_v59 = vadd.f32 %v11334_v7, %v11333_v8  ;;  %v11336_v24 = vpop.f32.mrb[170].mxu1 }
 0x451   : > { %v11337_v22 = vpop.f32.mrb[171].mxu1 }
 0x452   : > { %v11338_v17 = vadd.f32 %v11337_v22, %v11336_v24  ;;  %v11227_v14 = vpop.f32.mrb[28].mxu0  ;;  %v16862_v42 = vadd.f32 %v16816_v6, %v11335_v59 }
 0x453   : > { %v11228_v11 = vpop.f32.mrb[29].mxu0 }
 0x454   : > { %v11229_v50 = vadd.f32 %v11228_v11, %v11227_v14  ;;  %v11230_v30 = vpop.f32.mrb[30].mxu0  ;;  %v16865_v60 = vadd.f32 %v16819_v9, %v11338_v17 }
 0x455   : > { %v11231_v51 = vpop.f32.mrb[31].mxu0 }
 0x456   : > { %v11893_v45 = vadd.f32 %v11229_v50, %v16700_v53  ;;  %v11232_v41 = vadd.f32 %v11231_v51, %v11230_v30 }
 0x457   : > { %v11339_v2 = vpop.f32.mrb[172].mxu1 }
 0x458   : > { %v11340_v15 = vpop.f32.mrb[173].mxu1  ;;  %v11899_v43 = vadd.f32 %v11232_v41, %v16702_v35 }
 0x459   : > { %v11341_v29 = vadd.f32 %v11340_v15, %v11339_v2  ;;  %v11342_v33 = vpop.f32.mrb[174].mxu1 }
 0x45a   : > { %v11343_v37 = vpop.f32.mrb[175].mxu1 }
 0x45b   : > { %v11344_v26 = vadd.f32 %v11343_v37, %v11342_v33  ;;  %v16870_v6 = vadd.f32 %v16828_v21, %v11341_v29  ;;  %v16903_v37 = vld [vmem:[%s17126_s6] ss:$0 sm:$0xff] }
 0x45d   : > { %v16873_v31 = vadd.f32 %v16831_v10, %v11344_v26 }
 0x45f   : > { %v11345_v9 = vpop.f32.mrb[176].mxu1 }
 0x460   : > { %v11346_v48 = vpop.f32.mrb[177].mxu1 }
 0x461   : > { %v11347_v1 = vadd.f32 %v11346_v48, %v11345_v9  ;;  %v11348_v28 = vpop.f32.mrb[178].mxu1 }
 0x462   : > { %v11349_v53 = vpop.f32.mrb[179].mxu1 }
 0x463   : > { %v11350_v13 = vadd.f32 %v11349_v53, %v11348_v28  ;;  %v16876_v39 = vadd.f32 %v16840_v62, %v11347_v1  ;;  %v9765_v1 = vld [vmem:[%s12634_s16 + $0x10] sm:$0xff] }
 0x465   : > { %v16879_v35 = vadd.f32 %v16843_v27, %v11350_v13  ;;  %v9763_v13 = vld [vmem:[%s12634_s16] sm:$0xff] }
 0x467   : > { %v11351_v54 = vpop.f32.mrb[180].mxu1 }
 0x468   : > { %v11352_v4 = vpop.f32.mrb[181].mxu1 }
 0x469   : > { %v11353_v25 = vadd.f32 %v11352_v4, %v11351_v54  ;;  %v11354_v21 = vpop.f32.mrb[182].mxu1  ;;  %v9766_v4 = vld [vmem:[%s12634_s16 + $0x18] sm:$0xff] }
 0x46a   : > { %v11355_v5 = vpop.f32.mrb[183].mxu1 }
 0x46b   : > { %v11356_v8 = vadd.f32 %v11355_v5, %v11354_v21  ;;  %v16881_v10 = vadd.f32 %v11881_v34, %v11353_v25 }
 0x46d   : > { %v16883_v7 = vadd.f32 %v11887_v36, %v11356_v8 }
 0x46f   : > { %v11357_v59 = vpop.f32.mrb[184].mxu1 }
 0x470   : > { %v11358_v24 = vpop.f32.mrb[185].mxu1 }
 0x471   : > { %v11359_v22 = vadd.f32 %v11358_v24, %v11357_v59  ;;  %v11360_v17 = vpop.f32.mrb[186].mxu1 }
 0x472   : > { %v11361_v62 = vpop.f32.mrb[187].mxu1 }
 0x473   : > { %v11362_v14 = vadd.f32 %v11361_v62, %v11360_v17  ;;  %v16885_v11 = vadd.f32 %v11896_v56, %v11359_v22  ;;  %v16897_v56 = vld [vmem:[%s17125_s5] ss:$0 sm:$0xff] }
 0x475   : > { %v16887_v27 = vadd.f32 %v11902_v55, %v11362_v14 }
 0x477   : > { %v11363_v50 = vpop.f32.mrb[188].mxu1 }
 0x478   : > { %v11364_v30 = vpop.f32.mrb[189].mxu1 }
 0x479   : > { %v11365_v51 = vadd.f32 %v11364_v30, %v11363_v50  ;;  %v11366_v41 = vpop.f32.mrb[190].mxu1 }
 0x47a   : > { %v11367_v34 = vpop.f32.mrb[191].mxu1 }
 0x47b   : > { %v11368_v36 = vadd.f32 %v11367_v34, %v11366_v41  ;;  %v16889_v2 = vadd.f32 %v11893_v45, %v11365_v51  ;;  %v9769_v34 = vld [vmem:[%s12634_s16 + $0x30] sm:$0xff] }
 0x47d   : > { %v16891_v15 = vadd.f32 %v11899_v43, %v11368_v36 }
 0x47f   : > { %v11651_v29 = vpop.f32.mrb[96].mxu1 }
 0x480   : > { %v11811_v55 = vadd.f32 %v16757_v46, %v11651_v29  ;;  %v9430_v33 = vpop.f32.mrb[97].mxu1 }
 0x481   : > { %v11814_v45 = vadd.f32 %v16766_v32, %v9430_v33  ;;  %v11652_v43 = vpop.f32.mrb[98].mxu1 }
 0x482   : > { %v9694_v26 = vmul.f32 %v11811_v55, %v16897_v56  ;;  %v11817_v9 = vadd.f32 %v16768_v3, %v11652_v43  ;;  %v9433_v48 = vpop.f32.mrb[99].mxu1  ;;  %v9764_v3 = vld [vmem:[%s12634_s16 + $0x8] sm:$0xff]  ;;  %v9767_v55 = vld [vmem:[%s12634_s16 + $0x20] sm:$0xff] }
 0x483   : > { %v9692_v46 = vmul.f32 %v11814_v45, %v16897_v56  ;;  %v11820_v28 = vadd.f32 %v16771_v63, %v9433_v48  ;;  %v9770_v45 = vld [vmem:[%s12634_s16 + $0x38] sm:$0xff] }
 0x484   : > { %v9733_v53 = vadd.f32 %v16903_v37, %v9694_v26  ;;  %v9695_v54 = vmul.f32 %v11817_v9, %v16897_v56  ;;  %v9768_v9 = vld [vmem:[%s12634_s16 + $0x28] sm:$0xff] }
 0x485   : > { %v9731_v32 = vadd.f32 %v16903_v37, %v9692_v46  ;;  %v9693_v25 = vmul.f32 %v11820_v28, %v16897_v56 }
 0x486   : > { %v9797_v21 = vadd.f32 %v9765_v1, %v9733_v53  ;;  %v9734_v5 = vadd.f32 %v16903_v37, %v9695_v54 }
 0x487   : > { %v9795_v8 = vadd.f32 %v9763_v13, %v9731_v32  ;;  %v9732_v59 = vadd.f32 %v16903_v37, %v9693_v25  ;;  %v11655_v24 = vpop.f32.mrb[100].mxu1 }
 0x488   : > { %9829 = vst [vmem:[%s16922_s19 + $0x10] sm:$0xff] %v9797_v21  ;;  %v9798_v63 = vadd.f32 %v9766_v4, %v9734_v5  ;;  %v11823_v22 = vadd.f32 %v16786_v57, %v11655_v24  ;;  %v9446_v17 = vpop.f32.mrb[101].mxu1  ;;  %v9773_v5 = vld [vmem:[%s12634_s16 + $0x50] sm:$0xff] }
 0x489   : > { %9827 = vst [vmem:[%s16922_s19] sm:$0xff] %v9795_v8  ;;  %v9796_v62 = vadd.f32 %v9764_v3, %v9732_v59  ;;  %v11826_v14 = vadd.f32 %v16777_v52, %v9446_v17  ;;  %v11656_v50 = vpop.f32.mrb[102].mxu1  ;;  %v9771_v59 = vld [vmem:[%s12634_s16 + $0x40] sm:$0xff] }
 0x48a   : > { %9830 = vst [vmem:[%s16922_s19 + $0x18] sm:$0xff] %v9798_v63  ;;  %v9698_v30 = vmul.f32 %v11823_v22, %v16897_v56  ;;  %v11829_v51 = vadd.f32 %v16789_v23, %v11656_v50  ;;  %v9449_v41 = vpop.f32.mrb[103].mxu1  ;;  %v9774_v63 = vld [vmem:[%s12634_s16 + $0x58] sm:$0xff] }
 0x48b   : > { %9828 = vst [vmem:[%s16922_s19 + $0x8] sm:$0xff] %v9796_v62  ;;  %v9696_v36 = vmul.f32 %v11826_v14, %v16897_v56  ;;  %v11832_v57 = vadd.f32 %v16783_v61, %v9449_v41  ;;  %v9772_v62 = vld [vmem:[%s12634_s16 + $0x48] sm:$0xff] }
 0x48c   : > { %v9737_v29 = vadd.f32 %v16903_v37, %v9698_v30  ;;  %v9699_v52 = vmul.f32 %v11829_v51, %v16897_v56 }
 0x48d   : > { %v9735_v33 = vadd.f32 %v16903_v37, %v9696_v36  ;;  %v9697_v23 = vmul.f32 %v11832_v57, %v16897_v56 }
 0x48e   : > { %v9801_v43 = vadd.f32 %v9769_v34, %v9737_v29  ;;  %v9738_v26 = vadd.f32 %v16903_v37, %v9699_v52 }
 0x48f   : > { %v9799_v48 = vadd.f32 %v9767_v55, %v9735_v33  ;;  %v9736_v61 = vadd.f32 %v16903_v37, %v9697_v23  ;;  %v11659_v1 = vpop.f32.mrb[104].mxu1  ;;  %v9777_v33 = vld [vmem:[%s12634_s16 + $0x70] sm:$0xff] }
 0x490   : > { %9833 = vst [vmem:[%s16922_s19 + $0x30] sm:$0xff] %v9801_v43  ;;  %v9802_v46 = vadd.f32 %v9770_v45, %v9738_v26  ;;  %v11835_v28 = vadd.f32 %v16810_v44, %v11659_v1  ;;  %v9462_v53 = vpop.f32.mrb[105].mxu1  ;;  %v9775_v43 = vld [vmem:[%s12634_s16 + $0x60] sm:$0xff]  ;;  %v9776_v1 = vld [vmem:[%s12634_s16 + $0x68] sm:$0xff] }
 0x491   : > { %9831 = vst [vmem:[%s16922_s19 + $0x20] sm:$0xff] %v9799_v48  ;;  %v9800_v13 = vadd.f32 %v9768_v9, %v9736_v61  ;;  %v11838_v54 = vadd.f32 %v16798_v49, %v9462_v53  ;;  %v11660_v32 = vpop.f32.mrb[106].mxu1  ;;  %v9778_v9 = vld [vmem:[%s12634_s16 + $0x78] sm:$0xff] }
 0x492   : > { %9834 = vst [vmem:[%s16922_s19 + $0x38] sm:$0xff] %v9802_v46  ;;  %v9702_v4 = vmul.f32 %v11835_v28, %v16897_v56  ;;  %v11841_v25 = vadd.f32 %v16813_v0, %v11660_v32  ;;  %v9465_v21 = vpop.f32.mrb[107].mxu1 }
 0x493   : > { %9832 = vst [vmem:[%s16922_s19 + $0x28] sm:$0xff] %v9800_v13  ;;  %v9700_v3 = vmul.f32 %v11838_v54, %v16897_v56  ;;  %v11844_v44 = vadd.f32 %v16801_v58, %v9465_v21 }
 0x494   : > { %v9741_v8 = vadd.f32 %v16903_v37, %v9702_v4  ;;  %v9703_v49 = vmul.f32 %v11841_v25, %v16897_v56 }
 0x495   : > { %v9739_v24 = vadd.f32 %v16903_v37, %v9700_v3  ;;  %v9701_v0 = vmul.f32 %v11844_v44, %v16897_v56  ;;  %v9781_v44 = vld [vmem:[%s12634_s16 + $0x90] sm:$0xff] }
 0x496   : > { %v9805_v22 = vadd.f32 %v9773_v5, %v9741_v8  ;;  %v9742_v17 = vadd.f32 %v16903_v37, %v9703_v49  ;;  %v9779_v49 = vld [vmem:[%s12634_s16 + $0x80] sm:$0xff] }
 0x497   : > { %v9803_v14 = vadd.f32 %v9771_v59, %v9739_v24  ;;  %v9740_v58 = vadd.f32 %v16903_v37, %v9701_v0  ;;  %v11663_v50 = vpop.f32.mrb[108].mxu1 }
 0x498   : > { %9837 = vst [vmem:[%s16922_s19 + $0x50] sm:$0xff] %v9805_v22  ;;  %v9806_v30 = vadd.f32 %v9774_v63, %v9742_v17  ;;  %v11847_v51 = vadd.f32 %v16834_v38, %v11663_v50  ;;  %v9478_v41 = vpop.f32.mrb[109].mxu1  ;;  %v9782_v63 = vld [vmem:[%s12634_s16 + $0x98] sm:$0xff]  ;;  %v9780_v17 = vld [vmem:[%s12634_s16 + $0x88] sm:$0xff] }
 0x499   : > { %9835 = vst [vmem:[%s16922_s19 + $0x40] sm:$0xff] %v9803_v14  ;;  %v9804_v34 = vadd.f32 %v9772_v62, %v9740_v58  ;;  %v11850_v36 = vadd.f32 %v16822_v19, %v9478_v41  ;;  %v11664_v57 = vpop.f32.mrb[110].mxu1 }
 0x49a   : > { %9838 = vst [vmem:[%s16922_s19 + $0x58] sm:$0xff] %v9806_v30  ;;  %v9706_v29 = vmul.f32 %v11847_v51, %v16897_v56  ;;  %v11853_v55 = vadd.f32 %v16837_v47, %v11664_v57  ;;  %v9481_v52 = vpop.f32.mrb[111].mxu1 }
 0x49b   : > { %9836 = vst [vmem:[%s16922_s19 + $0x48] sm:$0xff] %v9804_v34  ;;  %v9704_v45 = vmul.f32 %v11850_v36, %v16897_v56  ;;  %v11856_v38 = vadd.f32 %v16825_v12, %v9481_v52 }
 0x49c   : > { %v9745_v23 = vadd.f32 %v16903_v37, %v9706_v29  ;;  %v9707_v19 = vmul.f32 %v11853_v55, %v16897_v56  ;;  %v9785_v55 = vld [vmem:[%s12634_s16 + $0xb0] sm:$0xff] }
 0x49d   : > { %v9743_v26 = vadd.f32 %v16903_v37, %v9704_v45  ;;  %v9705_v47 = vmul.f32 %v11856_v38, %v16897_v56  ;;  %v9783_v45 = vld [vmem:[%s12634_s16 + $0xa0] sm:$0xff] }
 0x49e   : > { %v9809_v48 = vadd.f32 %v9777_v33, %v9745_v23  ;;  %v9746_v61 = vadd.f32 %v16903_v37, %v9707_v19  ;;  %v9786_v23 = vld [vmem:[%s12634_s16 + $0xb8] sm:$0xff] }
 0x49f   : > { %v9807_v46 = vadd.f32 %v9775_v43, %v9743_v26  ;;  %v9744_v12 = vadd.f32 %v16903_v37, %v9705_v47  ;;  %v11667_v28 = vpop.f32.mrb[112].mxu1  ;;  %v9784_v26 = vld [vmem:[%s12634_s16 + $0xa8] sm:$0xff] }
 0x4a0   : > { %9841 = vst [vmem:[%s16922_s19 + $0x70] sm:$0xff] %v9809_v48  ;;  %v9810_v53 = vadd.f32 %v9778_v9, %v9746_v61  ;;  %v11859_v13 = vadd.f32 %v16854_v18, %v11667_v28  ;;  %v9494_v54 = vpop.f32.mrb[113].mxu1 }
 0x4a1   : > { %9839 = vst [vmem:[%s16922_s19 + $0x60] sm:$0xff] %v9807_v46  ;;  %v9808_v32 = vadd.f32 %v9776_v1, %v9744_v12  ;;  %v11862_v4 = vadd.f32 %v16846_v40, %v9494_v54  ;;  %v11668_v25 = vpop.f32.mrb[114].mxu1 }
 0x4a2   : > { %9842 = vst [vmem:[%s16922_s19 + $0x78] sm:$0xff] %v9810_v53  ;;  %v9710_v21 = vmul.f32 %v11859_v13, %v16897_v56  ;;  %v11865_v5 = vadd.f32 %v16857_v16, %v11668_v25  ;;  %v9497_v3 = vpop.f32.mrb[115].mxu1 }
 0x4a3   : > { %9840 = vst [vmem:[%s16922_s19 + $0x68] sm:$0xff] %v9808_v32  ;;  %v9708_v8 = vmul.f32 %v11862_v4, %v16897_v56  ;;  %v11868_v18 = vadd.f32 %v16849_v20, %v9497_v3  ;;  %v9789_v32 = vld [vmem:[%s12634_s16 + $0xd0] sm:$0xff]  ;;  %v9790_v3 = vld [vmem:[%s12634_s16 + $0xd8] sm:$0xff] }
 0x4a4   : > { %v9749_v59 = vadd.f32 %v16903_v37, %v9710_v21  ;;  %v9711_v40 = vmul.f32 %v11865_v5, %v16897_v56  ;;  %v9787_v21 = vld [vmem:[%s12634_s16 + $0xc0] sm:$0xff] }
 0x4a5   : > { %v9747_v24 = vadd.f32 %v16903_v37, %v9708_v8  ;;  %v9709_v16 = vmul.f32 %v11868_v18, %v16897_v56  ;;  %v9788_v18 = vld [vmem:[%s12634_s16 + $0xc8] sm:$0xff] }
 0x4a6   : > { %v9813_v0 = vadd.f32 %v9781_v44, %v9749_v59  ;;  %v9750_v22 = vadd.f32 %v16903_v37, %v9711_v40 }
 0x4a7   : > { %v9811_v62 = vadd.f32 %v9779_v49, %v9747_v24  ;;  %v9748_v20 = vadd.f32 %v16903_v37, %v9709_v16  ;;  %v11671_v14 = vpop.f32.mrb[116].mxu1 }
 0x4a8   : > { %9845 = vst [vmem:[%s16922_s19 + $0x90] sm:$0xff] %v9813_v0  ;;  %v9814_v58 = vadd.f32 %v9782_v63, %v9750_v22  ;;  %v11871_v50 = vadd.f32 %v16870_v6, %v11671_v14  ;;  %v9510_v30 = vpop.f32.mrb[117].mxu1  ;;  %v9793_v14 = vld [vmem:[%s12634_s16 + $0xf0] sm:$0xff] }
 0x4a9   : > { %9843 = vst [vmem:[%s16922_s19 + $0x80] sm:$0xff] %v9811_v62  ;;  %v9812_v51 = vadd.f32 %v9780_v17, %v9748_v20  ;;  %v11874_v41 = vadd.f32 %v16862_v42, %v9510_v30  ;;  %v11672_v34 = vpop.f32.mrb[118].mxu1 }
 0x4aa   : > { %9846 = vst [vmem:[%s16922_s19 + $0x98] sm:$0xff] %v9814_v58  ;;  %v9714_v36 = vmul.f32 %v11871_v50, %v16897_v56  ;;  %v11877_v57 = vadd.f32 %v16873_v31, %v11672_v34  ;;  %v9513_v29 = vpop.f32.mrb[119].mxu1 }
 0x4ab   : > { %9844 = vst [vmem:[%s16922_s19 + $0x88] sm:$0xff] %v9812_v51  ;;  %v9712_v52 = vmul.f32 %v11874_v41, %v16897_v56  ;;  %v11880_v6 = vadd.f32 %v16865_v60, %v9513_v29  ;;  %v9794_v41 = vld [vmem:[%s12634_s16 + $0xf8] sm:$0xff] }
 0x4ac   : > { %v9753_v33 = vadd.f32 %v16903_v37, %v9714_v36  ;;  %v9715_v42 = vmul.f32 %v11877_v57, %v16897_v56  ;;  %v9792_v36 = vld [vmem:[%s12634_s16 + $0xe8] sm:$0xff] }
 0x4ad   : > { %v9751_v38 = vadd.f32 %v16903_v37, %v9712_v52  ;;  %v9713_v31 = vmul.f32 %v11880_v6, %v16897_v56 }
 0x4ae   : > { %v9817_v43 = vadd.f32 %v9785_v55, %v9753_v33  ;;  %v9754_v19 = vadd.f32 %v16903_v37, %v9715_v42 }
 0x4af   : > { %v9815_v9 = vadd.f32 %v9783_v45, %v9751_v38  ;;  %v9752_v60 = vadd.f32 %v16903_v37, %v9713_v31  ;;  %v11675_v47 = vpop.f32.mrb[120].mxu1 }
 0x4b0   : > { %9849 = vst [vmem:[%s16922_s19 + $0xb0] sm:$0xff] %v9817_v43  ;;  %v9818_v48 = vadd.f32 %v9786_v23, %v9754_v19  ;;  %v11883_v61 = vadd.f32 %v16881_v10, %v11675_v47  ;;  %v9526_v1 = vpop.f32.mrb[121].mxu1 }
 0x4b1   : > { %9847 = vst [vmem:[%s16922_s19 + $0xa0] sm:$0xff] %v9815_v9  ;;  %v9816_v46 = vadd.f32 %v9784_v26, %v9752_v60  ;;  %v11886_v12 = vadd.f32 %v16876_v39, %v9526_v1  ;;  %v11676_v28 = vpop.f32.mrb[122].mxu1 }
 0x4b2   : > { %9850 = vst [vmem:[%s16922_s19 + $0xb8] sm:$0xff] %v9818_v48  ;;  %v9718_v53 = vmul.f32 %v11883_v61, %v16897_v56  ;;  %v11889_v13 = vadd.f32 %v16883_v7, %v11676_v28  ;;  %v9529_v54 = vpop.f32.mrb[123].mxu1 }
 0x4b3   : > { %9848 = vst [vmem:[%s16922_s19 + $0xa8] sm:$0xff] %v9816_v46  ;;  %v9716_v4 = vmul.f32 %v11886_v12, %v16897_v56  ;;  %v11892_v10 = vadd.f32 %v16879_v35, %v9529_v54 }
 0x4b4   : > { %v9757_v25 = vadd.f32 %v16903_v37, %v9718_v53  ;;  %v9719_v39 = vmul.f32 %v11889_v13, %v16897_v56 }
 0x4b5   : > { %v9755_v5 = vadd.f32 %v16903_v37, %v9716_v4  ;;  %v9717_v7 = vmul.f32 %v11892_v10, %v16897_v56 }
 0x4b6   : > { %v9821_v44 = vadd.f32 %v9789_v32, %v9757_v25  ;;  %v9758_v8 = vadd.f32 %v16903_v37, %v9719_v39 }
 0x4b7   : > { %v9819_v59 = vadd.f32 %v9787_v21, %v9755_v5  ;;  %v9756_v35 = vadd.f32 %v16903_v37, %v9717_v7  ;;  %v11679_v49 = vpop.f32.mrb[124].mxu1 }
 0x4b8   : > { %9853 = vst [vmem:[%s16922_s19 + $0xd0] sm:$0xff] %v9821_v44  ;;  %v9822_v40 = vadd.f32 %v9790_v3, %v9758_v8  ;;  %v11895_v24 = vadd.f32 %v16889_v2, %v11679_v49  ;;  %v9542_v63 = vpop.f32.mrb[125].mxu1 }
 0x4b9   : > { %9851 = vst [vmem:[%s16922_s19 + $0xc0] sm:$0xff] %v9819_v59  ;;  %v9820_v16 = vadd.f32 %v9788_v18, %v9756_v35  ;;  %v11898_v0 = vadd.f32 %v16885_v11, %v9542_v63  ;;  %v11680_v22 = vpop.f32.mrb[126].mxu1  ;;  %v9791_v11 = vld [vmem:[%s12634_s16 + $0xe0] sm:$0xff]  ;;  %s12393_s16 = scalar_lea.vmem %s17072_s21, 4096 }
 0x4ba   : > { %9854 = vst [vmem:[%s16922_s19 + $0xd8] sm:$0xff] %v9822_v40  ;;  %v9722_v17 = vmul.f32 %v11895_v24, %v16897_v56  ;;  %v11901_v62 = vadd.f32 %v16891_v15, %v11680_v22  ;;  %v9545_v20 = vpop.f32.mrb[127].mxu1  ;;  %p12394_p11 = scmp.ne.s32.totalorder %s17072_s21, %s12393_s16  ;;  %p12401_p1 = scmp.lt.s32.totalorder %s12399_s15, %s12393_s16 }
 0x4bb   : > { %9852 = vst [vmem:[%s16922_s19 + $0xc8] sm:$0xff] %v9820_v16  ;;  %v9720_v2 = vmul.f32 %v11898_v0, %v16897_v56  ;;  %v11904_v58 = vadd.f32 %v16887_v27, %v9545_v20 }
 0x4bc   : > { %v9761_v50 = vadd.f32 %v16903_v37, %v9722_v17  ;;  %v9723_v30 = vmul.f32 %v11901_v62, %v16897_v56  ;;  %p12395_p12 = pnand %p12394_p11, %p12538_p5  ;;  %p12402_p2 = por %p12401_p1, %p12400_p0 }
 0x4bd   : > { %v9759_v51 = vadd.f32 %v16903_v37, %v9720_v2  ;;  %v9721_v15 = vmul.f32 %v11904_v58, %v16897_v56 }
 0x4be   : > { %v9825_v34 = vadd.f32 %v9793_v14, %v9761_v50  ;;  %v9762_v27 = vadd.f32 %v16903_v37, %v9723_v30  ;;  %p12396_p13 = pneg %p12395_p12 }
 0x4bf   : > { %v9823_v57 = vadd.f32 %v9791_v11, %v9759_v51  ;;  %v9760_v29 = vadd.f32 %v16903_v37, %v9721_v15 }
 0x4c0   : > { %9857 = vst [vmem:[%s16922_s19 + $0xf0] sm:$0xff] %v9825_v34  ;;  %v9826_v55 = vadd.f32 %v9794_v41, %v9762_v27  ;;  %p12403_p3 = pnand %p12402_p2, %p12396_p13 }
 0x4c1   : > { %9855 = vst [vmem:[%s16922_s19 + $0xe0] sm:$0xff] %v9823_v57  ;;  %v9824_v56 = vadd.f32 %v9792_v36, %v9760_v29 }
 0x4c2   : > { %9858 = vst [vmem:[%s16922_s19 + $0xf8] sm:$0xff] %v9826_v55 }
 0x4c3   : > { %9856 = vst [vmem:[%s16922_s19 + $0xe8] sm:$0xff] %v9824_v56 }
 0x4c4   : > { %12406 = shalt.err (!%p12403_p3)
}
 0x4c5   : > { %s12407_s13 = scalar_lea.hbm %s17070_s29, 4096  ;;  %s12411_s18 = scalar_lea.hbm %s17127_s7, 8192 }
 0x4c6   : > { %p12408_p4 = scmp.ne.s32.totalorder %s17070_s29, %s12407_s13  ;;  %p12412_p9 = scmp.lt.u32.totalorder %s17070_s29, %s17127_s7 }
 0x4c7   : > { %p12413_p10 = scmp.lt.u32.totalorder %s12411_s18, %s12407_s13  ;;  %p12415_p12 = scmp.lt.u32.totalorder %s12407_s13, %s17070_s29 }
 0x4c8   : > { %p12409_p7 = pnand %p12408_p4, %p12538_p5 }
 0x4c9   : > { %p12414_p11 = por %p12413_p10, %p12412_p9 }
 0x4ca   : > { %p12410_p8 = pneg %p12409_p7 }
 0x4cb   : > { %p12416_p13 = por %p12415_p12, %p12414_p11 }
 0x4cd   : > { %p12417_p0 = pnand %p12416_p13, %p12410_p8 }
 0x4cf   : > { %12420 = shalt.err (!%p12417_p0)
}
 0x4d0   : > { %s12458_s22 = smov 128   ;;  %s12459_s23 = smov 8  }
 0x4d1   : > { %12001 = dma.vmem_to_hbm [thread:$0]  (%p12538_p5), %s17072_s21, 4096, %s17070_s29, %s17079_s28, %s12458_s22, %s12458_s22, %s12459_s23  }
 0x4d2 PF: > { %p12007_p1 = scmp.ge.s32.totalorder %s12455_s27, 2  ;;  %s9888_s16 = sand.u32 1, %s12443_s24  }
 0x4d3   : > { %s9889_s9 = scalar_lea.sflag [#allocation5], %s9888_s16 }
 0x4d4   : > { %p12004_p2 = pnand %p12007_p1, %p12542_p6 }
 0x4d6   : > { %12438 = dma.done.wait (!%p12004_p2), %s9889_s9, 4096  }
 0x4d7   : > { %12440 = vsyncadd (!%p12004_p2), %s9889_s9, 4294963200  ;;  %p17_p3 = scmp.ge.s32.totalorder %s12525_s30, 4   ;;  %s17379_s24 = smov %s12447_s25 }
 0x4d8   : > { %s17380_s25 = smov %s12451_s26  ;;  %s17381_s26 = smov %s12536_s10 }
 0x4d9   : > { %s17382_s27 = smov %s12525_s30  ;;  %19 = sbr.rel (!%p17_p3) target bundleno = 3 (0x3), region = 87 }
 0x4e0   :  { %9894 = vsyncpa [#allocation5], 1 }
 0x4e1   :  { %9896 = vsyncpa [#allocation5 + $0x1], 1 }

</bundles_post_ra>
